<compile_context>
chip_gen: v6e
topology: v6e:2x2x1
jax: 0.10.0
libtpu: 0.0.40
codegen_flags: <defaults>
</compile_context>

<pallas_src>
import functools

import numpy as np

import jax
import jax.numpy as jnp
from jax import lax
from jax.experimental import pallas as pl
from jax.experimental.pallas import tpu as pltpu

# Model geometry implied by the PyTorch module (fc1 in-features 320 = 20*4*4).
K1 = 5                # conv kernel size (both convs)
H0, W0 = 28, 28       # input spatial size
H1, W1 = 24, 24       # conv1 output spatial
HP1, WP1 = 12, 12     # after 2x2 max-pool
H2, W2 = 8, 8         # conv2 output spatial
HP2, WP2 = 4, 4       # after 2x2 max-pool
C1, C2 = 10, 20       # conv channel counts
FC1 = 50              # fc1 width
LANE = 128            # TPU lane width; also the per-half feature width below


# ------------------------------ fused kernel -------------------------------

def _fused_kernel(x_ref, w1_ref, b1_ref, w2_ref, b2_ref,
                  wf1_ref, bf1_ref, wf2_ref, bf2_ref, out_ref):
    """x_ref: (28, bt, 28) bf16 -- H leading, batch in sublanes, W in lanes."""
    bt = x_ref.shape[1]

    # ---- conv1: 5 banded MXU matmuls over the kernel's H taps -------------
    # lhs rows are (h1, b); the W-direction taps are folded into the banded
    # (28, 256) rhs built in prep_params.  Even/odd output columns land in
    # separate 128-lane halves of the 256-wide output.
    def conv1_tap(ki):
        lhs = x_ref[ki:ki + H1, :, :].reshape(H1 * bt, W0)            # bf16
        return jnp.dot(lhs, w1_ref[ki], preferred_element_type=jnp.float32)

    acc1 = conv1_tap(0)
    for ki in range(1, K1):
        acc1 = acc1 + conv1_tap(ki)                                   # (24*bt, 256)

    # ---- maxpool 2x2 + bias + relu (bias/relu commute with the max) -------
    a1 = acc1.reshape(HP1, 2, bt, 2 * LANE)
    hmax1 = jnp.maximum(a1[:, 0], a1[:, 1])                           # (12, bt, 256)
    pool1 = jnp.maximum(hmax1[:, :, :LANE], hmax1[:, :, LANE:])       # (12, bt, 128)
    p1 = jnp.maximum(pool1 + b1_ref[...], 0.0).astype(jnp.bfloat16)

    # ---- conv2 (Dropout2d = identity in eval): 5 banded matmuls, K=128 ----
    def conv2_tap(ki):
        lhs = p1[ki:ki + H2].reshape(H2 * bt, LANE)
        return jnp.dot(lhs, w2_ref[ki], preferred_element_type=jnp.float32)

    acc2 = conv2_tap(0)
    for ki in range(1, K1):
        acc2 = acc2 + conv2_tap(ki)                                   # (8*bt, 256)

    a2 = acc2.reshape(HP2, 2, bt, 2 * LANE)
    hmax2 = jnp.maximum(a2[:, 0], a2[:, 1])                           # (4, bt, 256)
    pool2 = jnp.maximum(hmax2[:, :, :LANE], hmax2[:, :, LANE:])       # (4, bt, 128)
    p2 = jnp.maximum(pool2 + b2_ref[...], 0.0).astype(jnp.bfloat16)

    # ---- fc1: 4 accumulated K=128 dots (one per pooled row) ---------------
    accf = jnp.broadcast_to(bf1_ref[...], (bt, FC1)).astype(jnp.float32)
    for h in range(HP2):
        accf = accf + jnp.dot(p2[h], wf1_ref[h],
                              preferred_element_type=jnp.float32)

    # ---- relu -> (dropout = identity) -> fc2 -> log_softmax ---------------
    feat = jnp.maximum(accf, 0.0).astype(jnp.bfloat16)                # (bt, 50)
    logits = jnp.dot(feat, wf2_ref[...],
                     preferred_element_type=jnp.float32) + bf2_ref[...]
    z = logits - jnp.max(logits, axis=-1, keepdims=True)
    lse = jnp.log(jnp.sum(jnp.exp(z), axis=-1, keepdims=True))
    out_ref[...] = (z - lse).astype(out_ref.dtype)


# ------------------------------ host wrappers -------------------------------

def prep_params(params):
    """One-time weight prep: build block-Toeplitz ("banded") conv weights so
    both convolutions become plain MXU matmuls, reorder fc1 to the kernel's
    (h2p, w2p, c2) lane layout (folding PyTorch's NCHW flatten order), tile the
    conv biases over lanes, and cast all matmul operands to bf16."""
    nc = params["fc2_w"].shape[0]
    c1w = np.asarray(params["conv1_w"], np.float32)     # (10, 1, 5, 5)
    c2w = np.asarray(params["conv2_w"], np.float32)     # (20, 10, 5, 5)
    f1w = np.asarray(params["fc1_w"], np.float32)       # (50, 320)

    # conv1: per H-tap ki a (28, 256) banded matrix.  Output lane layout:
    #   lane 10*w1p + c        -> conv column w1 = 2*w1p    (even half)
    #   lane 128 + 10*w1p + c  -> conv column w1 = 2*w1p+1  (odd half)
    w1b = np.zeros((K1, W0, 2 * LANE), np.float32)
    for ki in range(K1):
        tap = c1w[:, 0, ki, :].T                        # (kj=5, c=10)
        for wp in range(WP1):
            w1b[ki, 2 * wp:2 * wp + K1, C1 * wp:C1 * wp + C1] = tap
            w1b[ki, 2 * wp + 1:2 * wp + 1 + K1,
                LANE + C1 * wp:LANE + C1 * wp + C1] = tap

    # conv2: per H-tap ki a (128, 256) banded matrix over the pooled conv1
    # feature lanes (10*w1p + c1); rows 120..127 stay zero.
    w2b = np.zeros((K1, LANE, 2 * LANE), np.float32)
    for ki in range(K1):
        for w2o in range(W2):
            base = (w2o % 2) * LANE + C2 * (w2o // 2)
            for kj in range(K1):
                wp = w2o + kj                           # pooled conv1 column
                w2b[ki, C1 * wp:C1 * wp + C1, base:base + C2] = c2w[:, :, ki, kj].T

    # fc1: one (128, 50) slab per pooled row h2p, rows indexed 20*w2p + c2
    # (matches PyTorch's flatten order c2*16 + h2p*4 + w2p); rows 80..127 zero.
    wf1 = np.zeros((HP2, LANE, FC1), np.float32)
    for hp in range(HP2):
        for wp in range(WP2):
            cols = np.arange(C2) * (HP2 * WP2) + hp * WP2 + wp
            wf1[hp, C2 * wp:C2 * wp + C2, :] = f1w[:, cols].T

    b1t = np.zeros((1, LANE), np.float32)
    b1t[0, :C1 * WP1] = np.tile(np.asarray(params["conv1_b"], np.float32), WP1)
    b2t = np.zeros((1, LANE), np.float32)
    b2t[0, :C2 * WP2] = np.tile(np.asarray(params["conv2_b"], np.float32), WP2)

    return {
        "w1": jnp.asarray(w1b, jnp.bfloat16),
        "b1": jnp.asarray(b1t),
        "w2": jnp.asarray(w2b, jnp.bfloat16),
        "b2": jnp.asarray(b2t),
        "wf1": jnp.asarray(wf1, jnp.bfloat16),
        "bf1": jnp.asarray(np.asarray(params["fc1_b"], np.float32).reshape(1, FC1)),
        "wf2": jnp.asarray(np.asarray(params["fc2_w"], np.float32).T, jnp.bfloat16),
        "bf2": jnp.asarray(np.asarray(params["fc2_b"], np.float32).reshape(1, nc)),
    }


def _round_up(n, m):
    return (n + m - 1) // m * m


@functools.partial(jax.jit, static_argnames=("batch_tile",))
def cnn_mnist_forward(x_nchw, prepped, batch_tile=128):
    """Equivalent of CNNMnist.forward(x) (is_feat=False), inference mode."""
    assert batch_tile % 32 == 0 and batch_tile > 0
    B = x_nchw.shape[0]
    nc = prepped["wf2"].shape[1]
    # Shrink the tile for tiny batches; pad ragged batches instead of asserting.
    bt = min(batch_tile, _round_up(B, 32))
    b_pad = _round_up(B, bt)

    # (B,1,28,28) -> (28, B_pad, 28): H leading, batch in sublanes, W in lanes.
    x = x_nchw.reshape(B, H0, W0).astype(jnp.bfloat16)
    x = jnp.transpose(x, (1, 0, 2))
    if b_pad != B:
        x = jnp.pad(x, ((0, 0), (0, b_pad - B), (0, 0)))

    in_specs = [
        pl.BlockSpec((H0, bt, W0), lambda i: (0, i, 0)),             # x tile
        pl.BlockSpec((K1, W0, 2 * LANE), lambda i: (0, 0, 0)),       # conv1 banded w
        pl.BlockSpec((1, LANE), lambda i: (0, 0)),                   # conv1 bias
        pl.BlockSpec((K1, LANE, 2 * LANE), lambda i: (0, 0, 0)),     # conv2 banded w
        pl.BlockSpec((1, LANE), lambda i: (0, 0)),                   # conv2 bias
        pl.BlockSpec((HP2, LANE, FC1), lambda i: (0, 0, 0)),         # fc1 w
        pl.BlockSpec((1, FC1), lambda i: (0, 0)),                    # fc1 bias
        pl.BlockSpec((FC1, nc), lambda i: (0, 0)),                   # fc2 w
        pl.BlockSpec((1, nc), lambda i: (0, 0)),                     # fc2 bias
    ]
    out = pl.pallas_call(
        _fused_kernel,
        out_shape=jax.ShapeDtypeStruct((b_pad, nc), jnp.float32),
        grid=(b_pad // bt,),
        in_specs=in_specs,
        out_specs=pl.BlockSpec((bt, nc), lambda i: (i, 0)),
        compiler_params=pltpu.CompilerParams(
            dimension_semantics=("parallel",),
            vmem_limit_bytes=32 * 1024 * 1024,   # safe on v5e/v6e and <= v7x/2
        ),
    )(x, prepped["w1"], prepped["b1"], prepped["w2"], prepped["b2"],
      prepped["wf1"], prepped["bf1"], prepped["wf2"], prepped["bf2"])
    return out[:B]


# --------------------------- params & reference ----------------------------

def init_params(key, num_classes=10):
    ks = jax.random.split(key, 8)

    def u(k, shape, scale):
        return jax.random.uniform(k, shape, jnp.float32, -1.0, 1.0) * scale

    return {
        "conv1_w": u(ks[0], (10, 1, 5, 5), 0.2),
        "conv1_b": u(ks[1], (10,), 0.1),
        "conv2_w": u(ks[2], (20, 10, 5, 5), 0.1),
        "conv2_b": u(ks[3], (20,), 0.1),
        "fc1_w":   u(ks[4], (50, 320), 0.05),
        "fc1_b":   u(ks[5], (50,), 0.05),
        "fc2_w":   u(ks[6], (num_classes, 50), 0.1),
        "fc2_b":   u(ks[7], (num_classes,), 0.1),
    }


@jax.jit
def reference_forward(x_nchw, params):
    dn = ("NCHW", "OIHW", "NCHW")
    y = lax.conv_general_dilated(x_nchw, params["conv1_w"], (1, 1), "VALID",
                                 dimension_numbers=dn)
    y = y + params["conv1_b"].reshape(1, -1, 1, 1)
    y = lax.reduce_window(y, -jnp.inf, lax.max, (1, 1, 2, 2), (1, 1, 2, 2), "VALID")
    y = jnp.maximum(y, 0.0)
    y = lax.conv_general_dilated(y, params["conv2_w"], (1, 1), "VALID",
                                 dimension_numbers=dn)
    y = y + params["conv2_b"].reshape(1, -1, 1, 1)
    y = lax.reduce_window(y, -jnp.inf, lax.max, (1, 1, 2, 2), (1, 1, 2, 2), "VALID")
    y = jnp.maximum(y, 0.0)
    y = y.reshape(y.shape[0], -1)
    y = jnp.maximum(y @ params["fc1_w"].T + params["fc1_b"], 0.0)
    y = y @ params["fc2_w"].T + params["fc2_b"]
    return jax.nn.log_softmax(y, axis=1)


if __name__ == "__main__":
    key = jax.random.PRNGKey(0)
    kx, kp = jax.random.split(key)
    # Spatial size 28 is implied by the module (20*4*4 == 320 == fc1 in-features).
    x = jax.random.normal(kx, (2, 1, 28, 28), jnp.float32)
    params = init_params(kp, num_classes=10)
    prepped = prep_params(params)

    out = jax.block_until_ready(cnn_mnist_forward(x, prepped))
    assert out.shape == (2, 10), out.shape

    ref = jax.block_until_ready(reference_forward(x, params))
    # bf16 MXU operands with f32 accumulation -> slightly looser tolerance.
    if not jnp.allclose(out, ref, rtol=5e-2, atol=5e-2):
        max_err = float(jnp.max(jnp.abs(out - ref)))
        raise AssertionError(f"mismatch vs reference, max abs err = {max_err}")
    print("KERNEL_OK")
</pallas_src>

<mosaic_0001>
module attributes {stable_mosaic.version = 11 : i64} {
  func.func @_fused_kernel(%arg0: i32, %arg1: memref<28x32x28xbf16, #tpu.memory_space<vmem>>, %arg2: memref<5x28x256xbf16, #tpu.memory_space<vmem>>, %arg3: memref<1x128xf32, #tpu.memory_space<vmem>>, %arg4: memref<5x128x256xbf16, #tpu.memory_space<vmem>>, %arg5: memref<1x128xf32, #tpu.memory_space<vmem>>, %arg6: memref<4x128x50xbf16, #tpu.memory_space<vmem>>, %arg7: memref<1x50xf32, #tpu.memory_space<vmem>>, %arg8: memref<50x10xbf16, #tpu.memory_space<vmem>>, %arg9: memref<1x10xf32, #tpu.memory_space<vmem>>, %arg10: memref<32x10xf32, #tpu.memory_space<vmem>>) attributes {dimension_semantics = [#tpu.dimension_semantics<parallel>], iteration_bounds = array<i64: 1>, scalar_prefetch = 0 : i64, scratch_operands = 0 : i64, tpu.core_type = #tpu.core_type<tc>, window_params = [{transform_indices = @transform_0, window_bounds = array<i64: 28, 32, 28>}, {pipeline_mode = #tpu.pipeline_mode<synchronous>, transform_indices = @transform_1, window_bounds = array<i64: 5, 28, 256>}, {pipeline_mode = #tpu.pipeline_mode<synchronous>, transform_indices = @transform_2, window_bounds = array<i64: 1, 128>}, {pipeline_mode = #tpu.pipeline_mode<synchronous>, transform_indices = @transform_3, window_bounds = array<i64: 5, 128, 256>}, {pipeline_mode = #tpu.pipeline_mode<synchronous>, transform_indices = @transform_4, window_bounds = array<i64: 1, 128>}, {pipeline_mode = #tpu.pipeline_mode<synchronous>, transform_indices = @transform_5, window_bounds = array<i64: 4, 128, 50>}, {pipeline_mode = #tpu.pipeline_mode<synchronous>, transform_indices = @transform_6, window_bounds = array<i64: 1, 50>}, {pipeline_mode = #tpu.pipeline_mode<synchronous>, transform_indices = @transform_7, window_bounds = array<i64: 50, 10>}, {pipeline_mode = #tpu.pipeline_mode<synchronous>, transform_indices = @transform_8, window_bounds = array<i64: 1, 10>}, {transform_indices = @transform_9, window_bounds = array<i64: 32, 10>}]} {
    %c0 = arith.constant 0 : index
    %c0_0 = arith.constant 0 : index
    %c0_1 = arith.constant 0 : index
    %0 = vector.load %arg1[%c0, %c0_0, %c0_1] : memref<28x32x28xbf16, #tpu.memory_space<vmem>>, vector<24x32x28xbf16>
    %1 = vector.shape_cast %0 : vector<24x32x28xbf16> to vector<768x28xbf16>
    %c0_2 = arith.constant 0 : index
    %c0_3 = arith.constant 0 : index
    %c0_4 = arith.constant 0 : index
    %2 = vector.load %arg2[%c0_2, %c0_3, %c0_4] : memref<5x28x256xbf16, #tpu.memory_space<vmem>>, vector<1x28x256xbf16>
    %3 = vector.shape_cast %2 : vector<1x28x256xbf16> to vector<28x256xbf16>
    %cst = arith.constant dense<0.000000e+00> : vector<768x256xf32>
    %4 = tpu.matmul %1, %3, %cst {dimension_numbers = #tpu.dot_dimension_numbers<[1], [0], [0], [1], [0, 0, 1, 1], [], []>} : vector<768x28xbf16>, vector<28x256xbf16>, vector<768x256xf32> -> vector<768x256xf32>
    %c1 = arith.constant 1 : index
    %c0_5 = arith.constant 0 : index
    %c0_6 = arith.constant 0 : index
    %5 = vector.load %arg1[%c1, %c0_5, %c0_6] : memref<28x32x28xbf16, #tpu.memory_space<vmem>>, vector<24x32x28xbf16>
    %6 = vector.shape_cast %5 : vector<24x32x28xbf16> to vector<768x28xbf16>
    %c1_7 = arith.constant 1 : index
    %c0_8 = arith.constant 0 : index
    %c0_9 = arith.constant 0 : index
    %7 = vector.load %arg2[%c1_7, %c0_8, %c0_9] : memref<5x28x256xbf16, #tpu.memory_space<vmem>>, vector<1x28x256xbf16>
    %8 = vector.shape_cast %7 : vector<1x28x256xbf16> to vector<28x256xbf16>
    %cst_10 = arith.constant dense<0.000000e+00> : vector<768x256xf32>
    %9 = tpu.matmul %6, %8, %cst_10 {dimension_numbers = #tpu.dot_dimension_numbers<[1], [0], [0], [1], [0, 0, 1, 1], [], []>} : vector<768x28xbf16>, vector<28x256xbf16>, vector<768x256xf32> -> vector<768x256xf32>
    %10 = arith.addf %4, %9 : vector<768x256xf32>
    %c2 = arith.constant 2 : index
    %c0_11 = arith.constant 0 : index
    %c0_12 = arith.constant 0 : index
    %11 = vector.load %arg1[%c2, %c0_11, %c0_12] : memref<28x32x28xbf16, #tpu.memory_space<vmem>>, vector<24x32x28xbf16>
    %12 = vector.shape_cast %11 : vector<24x32x28xbf16> to vector<768x28xbf16>
    %c2_13 = arith.constant 2 : index
    %c0_14 = arith.constant 0 : index
    %c0_15 = arith.constant 0 : index
    %13 = vector.load %arg2[%c2_13, %c0_14, %c0_15] : memref<5x28x256xbf16, #tpu.memory_space<vmem>>, vector<1x28x256xbf16>
    %14 = vector.shape_cast %13 : vector<1x28x256xbf16> to vector<28x256xbf16>
    %cst_16 = arith.constant dense<0.000000e+00> : vector<768x256xf32>
    %15 = tpu.matmul %12, %14, %cst_16 {dimension_numbers = #tpu.dot_dimension_numbers<[1], [0], [0], [1], [0, 0, 1, 1], [], []>} : vector<768x28xbf16>, vector<28x256xbf16>, vector<768x256xf32> -> vector<768x256xf32>
    %16 = arith.addf %10, %15 : vector<768x256xf32>
    %c3 = arith.constant 3 : index
    %c0_17 = arith.constant 0 : index
    %c0_18 = arith.constant 0 : index
    %17 = vector.load %arg1[%c3, %c0_17, %c0_18] : memref<28x32x28xbf16, #tpu.memory_space<vmem>>, vector<24x32x28xbf16>
    %18 = vector.shape_cast %17 : vector<24x32x28xbf16> to vector<768x28xbf16>
    %c3_19 = arith.constant 3 : index
    %c0_20 = arith.constant 0 : index
    %c0_21 = arith.constant 0 : index
    %19 = vector.load %arg2[%c3_19, %c0_20, %c0_21] : memref<5x28x256xbf16, #tpu.memory_space<vmem>>, vector<1x28x256xbf16>
    %20 = vector.shape_cast %19 : vector<1x28x256xbf16> to vector<28x256xbf16>
    %cst_22 = arith.constant dense<0.000000e+00> : vector<768x256xf32>
    %21 = tpu.matmul %18, %20, %cst_22 {dimension_numbers = #tpu.dot_dimension_numbers<[1], [0], [0], [1], [0, 0, 1, 1], [], []>} : vector<768x28xbf16>, vector<28x256xbf16>, vector<768x256xf32> -> vector<768x256xf32>
    %22 = arith.addf %16, %21 : vector<768x256xf32>
    %c4 = arith.constant 4 : index
    %c0_23 = arith.constant 0 : index
    %c0_24 = arith.constant 0 : index
    %23 = vector.load %arg1[%c4, %c0_23, %c0_24] : memref<28x32x28xbf16, #tpu.memory_space<vmem>>, vector<24x32x28xbf16>
    %24 = vector.shape_cast %23 : vector<24x32x28xbf16> to vector<768x28xbf16>
    %c4_25 = arith.constant 4 : index
    %c0_26 = arith.constant 0 : index
    %c0_27 = arith.constant 0 : index
    %25 = vector.load %arg2[%c4_25, %c0_26, %c0_27] : memref<5x28x256xbf16, #tpu.memory_space<vmem>>, vector<1x28x256xbf16>
    %26 = vector.shape_cast %25 : vector<1x28x256xbf16> to vector<28x256xbf16>
    %cst_28 = arith.constant dense<0.000000e+00> : vector<768x256xf32>
    %27 = tpu.matmul %24, %26, %cst_28 {dimension_numbers = #tpu.dot_dimension_numbers<[1], [0], [0], [1], [0, 0, 1, 1], [], []>} : vector<768x28xbf16>, vector<28x256xbf16>, vector<768x256xf32> -> vector<768x256xf32>
    %28 = arith.addf %22, %27 : vector<768x256xf32>
    %29 = vector.shape_cast %28 : vector<768x256xf32> to vector<12x2x32x256xf32>
    %30 = vector.extract_strided_slice %29 {offsets = [0, 0, 0, 0], sizes = [12, 1, 32, 256], strides = [1, 1, 1, 1]} : vector<12x2x32x256xf32> to vector<12x1x32x256xf32>
    %31 = vector.shape_cast %30 : vector<12x1x32x256xf32> to vector<12x32x256xf32>
    %32 = vector.extract_strided_slice %29 {offsets = [0, 1, 0, 0], sizes = [12, 1, 32, 256], strides = [1, 1, 1, 1]} : vector<12x2x32x256xf32> to vector<12x1x32x256xf32>
    %33 = vector.shape_cast %32 : vector<12x1x32x256xf32> to vector<12x32x256xf32>
    %34 = arith.maximumf %31, %33 : vector<12x32x256xf32>
    %35 = vector.extract_strided_slice %34 {offsets = [0, 0, 0], sizes = [12, 32, 128], strides = [1, 1, 1]} : vector<12x32x256xf32> to vector<12x32x128xf32>
    %36 = vector.extract_strided_slice %34 {offsets = [0, 0, 128], sizes = [12, 32, 128], strides = [1, 1, 1]} : vector<12x32x256xf32> to vector<12x32x128xf32>
    %37 = arith.maximumf %35, %36 : vector<12x32x128xf32>
    %c0_29 = arith.constant 0 : index
    %c0_30 = arith.constant 0 : index
    %38 = vector.load %arg3[%c0_29, %c0_30] : memref<1x128xf32, #tpu.memory_space<vmem>>, vector<1x128xf32>
    %39 = vector.shape_cast %38 : vector<1x128xf32> to vector<1x1x128xf32>
    %40 = vector.broadcast %39 : vector<1x1x128xf32> to vector<12x32x128xf32>
    %41 = arith.addf %37, %40 : vector<12x32x128xf32>
    %cst_31 = arith.constant 0.000000e+00 : f32
    %42 = vector.broadcast %cst_31 : f32 to vector<12x32x128xf32>
    %43 = arith.maximumf %41, %42 : vector<12x32x128xf32>
    %44 = arith.truncf %43 : vector<12x32x128xf32> to vector<12x32x128xbf16>
    %45 = vector.extract_strided_slice %44 {offsets = [0, 0, 0], sizes = [8, 32, 128], strides = [1, 1, 1]} : vector<12x32x128xbf16> to vector<8x32x128xbf16>
    %46 = vector.shape_cast %45 : vector<8x32x128xbf16> to vector<256x128xbf16>
    %c0_32 = arith.constant 0 : index
    %c0_33 = arith.constant 0 : index
    %c0_34 = arith.constant 0 : index
    %47 = vector.load %arg4[%c0_32, %c0_33, %c0_34] : memref<5x128x256xbf16, #tpu.memory_space<vmem>>, vector<1x128x256xbf16>
    %48 = vector.shape_cast %47 : vector<1x128x256xbf16> to vector<128x256xbf16>
    %cst_35 = arith.constant dense<0.000000e+00> : vector<256x256xf32>
    %49 = tpu.matmul %46, %48, %cst_35 {dimension_numbers = #tpu.dot_dimension_numbers<[1], [0], [0], [1], [0, 0, 1, 1], [], []>} : vector<256x128xbf16>, vector<128x256xbf16>, vector<256x256xf32> -> vector<256x256xf32>
    %50 = vector.extract_strided_slice %44 {offsets = [1, 0, 0], sizes = [8, 32, 128], strides = [1, 1, 1]} : vector<12x32x128xbf16> to vector<8x32x128xbf16>
    %51 = vector.shape_cast %50 : vector<8x32x128xbf16> to vector<256x128xbf16>
    %c1_36 = arith.constant 1 : index
    %c0_37 = arith.constant 0 : index
    %c0_38 = arith.constant 0 : index
    %52 = vector.load %arg4[%c1_36, %c0_37, %c0_38] : memref<5x128x256xbf16, #tpu.memory_space<vmem>>, vector<1x128x256xbf16>
    %53 = vector.shape_cast %52 : vector<1x128x256xbf16> to vector<128x256xbf16>
    %cst_39 = arith.constant dense<0.000000e+00> : vector<256x256xf32>
    %54 = tpu.matmul %51, %53, %cst_39 {dimension_numbers = #tpu.dot_dimension_numbers<[1], [0], [0], [1], [0, 0, 1, 1], [], []>} : vector<256x128xbf16>, vector<128x256xbf16>, vector<256x256xf32> -> vector<256x256xf32>
    %55 = arith.addf %49, %54 : vector<256x256xf32>
    %56 = vector.extract_strided_slice %44 {offsets = [2, 0, 0], sizes = [8, 32, 128], strides = [1, 1, 1]} : vector<12x32x128xbf16> to vector<8x32x128xbf16>
    %57 = vector.shape_cast %56 : vector<8x32x128xbf16> to vector<256x128xbf16>
    %c2_40 = arith.constant 2 : index
    %c0_41 = arith.constant 0 : index
    %c0_42 = arith.constant 0 : index
    %58 = vector.load %arg4[%c2_40, %c0_41, %c0_42] : memref<5x128x256xbf16, #tpu.memory_space<vmem>>, vector<1x128x256xbf16>
    %59 = vector.shape_cast %58 : vector<1x128x256xbf16> to vector<128x256xbf16>
    %cst_43 = arith.constant dense<0.000000e+00> : vector<256x256xf32>
    %60 = tpu.matmul %57, %59, %cst_43 {dimension_numbers = #tpu.dot_dimension_numbers<[1], [0], [0], [1], [0, 0, 1, 1], [], []>} : vector<256x128xbf16>, vector<128x256xbf16>, vector<256x256xf32> -> vector<256x256xf32>
    %61 = arith.addf %55, %60 : vector<256x256xf32>
    %62 = vector.extract_strided_slice %44 {offsets = [3, 0, 0], sizes = [8, 32, 128], strides = [1, 1, 1]} : vector<12x32x128xbf16> to vector<8x32x128xbf16>
    %63 = vector.shape_cast %62 : vector<8x32x128xbf16> to vector<256x128xbf16>
    %c3_44 = arith.constant 3 : index
    %c0_45 = arith.constant 0 : index
    %c0_46 = arith.constant 0 : index
    %64 = vector.load %arg4[%c3_44, %c0_45, %c0_46] : memref<5x128x256xbf16, #tpu.memory_space<vmem>>, vector<1x128x256xbf16>
    %65 = vector.shape_cast %64 : vector<1x128x256xbf16> to vector<128x256xbf16>
    %cst_47 = arith.constant dense<0.000000e+00> : vector<256x256xf32>
    %66 = tpu.matmul %63, %65, %cst_47 {dimension_numbers = #tpu.dot_dimension_numbers<[1], [0], [0], [1], [0, 0, 1, 1], [], []>} : vector<256x128xbf16>, vector<128x256xbf16>, vector<256x256xf32> -> vector<256x256xf32>
    %67 = arith.addf %61, %66 : vector<256x256xf32>
    %68 = vector.extract_strided_slice %44 {offsets = [4, 0, 0], sizes = [8, 32, 128], strides = [1, 1, 1]} : vector<12x32x128xbf16> to vector<8x32x128xbf16>
    %69 = vector.shape_cast %68 : vector<8x32x128xbf16> to vector<256x128xbf16>
    %c4_48 = arith.constant 4 : index
    %c0_49 = arith.constant 0 : index
    %c0_50 = arith.constant 0 : index
    %70 = vector.load %arg4[%c4_48, %c0_49, %c0_50] : memref<5x128x256xbf16, #tpu.memory_space<vmem>>, vector<1x128x256xbf16>
    %71 = vector.shape_cast %70 : vector<1x128x256xbf16> to vector<128x256xbf16>
    %cst_51 = arith.constant dense<0.000000e+00> : vector<256x256xf32>
    %72 = tpu.matmul %69, %71, %cst_51 {dimension_numbers = #tpu.dot_dimension_numbers<[1], [0], [0], [1], [0, 0, 1, 1], [], []>} : vector<256x128xbf16>, vector<128x256xbf16>, vector<256x256xf32> -> vector<256x256xf32>
    %73 = arith.addf %67, %72 : vector<256x256xf32>
    %74 = vector.shape_cast %73 : vector<256x256xf32> to vector<4x2x32x256xf32>
    %75 = vector.extract_strided_slice %74 {offsets = [0, 0, 0, 0], sizes = [4, 1, 32, 256], strides = [1, 1, 1, 1]} : vector<4x2x32x256xf32> to vector<4x1x32x256xf32>
    %76 = vector.shape_cast %75 : vector<4x1x32x256xf32> to vector<4x32x256xf32>
    %77 = vector.extract_strided_slice %74 {offsets = [0, 1, 0, 0], sizes = [4, 1, 32, 256], strides = [1, 1, 1, 1]} : vector<4x2x32x256xf32> to vector<4x1x32x256xf32>
    %78 = vector.shape_cast %77 : vector<4x1x32x256xf32> to vector<4x32x256xf32>
    %79 = arith.maximumf %76, %78 : vector<4x32x256xf32>
    %80 = vector.extract_strided_slice %79 {offsets = [0, 0, 0], sizes = [4, 32, 128], strides = [1, 1, 1]} : vector<4x32x256xf32> to vector<4x32x128xf32>
    %81 = vector.extract_strided_slice %79 {offsets = [0, 0, 128], sizes = [4, 32, 128], strides = [1, 1, 1]} : vector<4x32x256xf32> to vector<4x32x128xf32>
    %82 = arith.maximumf %80, %81 : vector<4x32x128xf32>
    %c0_52 = arith.constant 0 : index
    %c0_53 = arith.constant 0 : index
    %83 = vector.load %arg5[%c0_52, %c0_53] : memref<1x128xf32, #tpu.memory_space<vmem>>, vector<1x128xf32>
    %84 = vector.shape_cast %83 : vector<1x128xf32> to vector<1x1x128xf32>
    %85 = vector.broadcast %84 : vector<1x1x128xf32> to vector<4x32x128xf32>
    %86 = arith.addf %82, %85 : vector<4x32x128xf32>
    %cst_54 = arith.constant 0.000000e+00 : f32
    %87 = vector.broadcast %cst_54 : f32 to vector<4x32x128xf32>
    %88 = arith.maximumf %86, %87 : vector<4x32x128xf32>
    %89 = arith.truncf %88 : vector<4x32x128xf32> to vector<4x32x128xbf16>
    %c0_55 = arith.constant 0 : index
    %c0_56 = arith.constant 0 : index
    %90 = vector.load %arg7[%c0_55, %c0_56] : memref<1x50xf32, #tpu.memory_space<vmem>>, vector<1x50xf32>
    %91 = vector.shape_cast %90 : vector<1x50xf32> to vector<1x50xf32>
    %92 = vector.broadcast %91 : vector<1x50xf32> to vector<32x50xf32>
    %93 = vector.extract_strided_slice %89 {offsets = [0, 0, 0], sizes = [1, 32, 128], strides = [1, 1, 1]} : vector<4x32x128xbf16> to vector<1x32x128xbf16>
    %94 = vector.shape_cast %93 : vector<1x32x128xbf16> to vector<32x128xbf16>
    %c0_57 = arith.constant 0 : index
    %c0_58 = arith.constant 0 : index
    %c0_59 = arith.constant 0 : index
    %95 = vector.load %arg6[%c0_57, %c0_58, %c0_59] : memref<4x128x50xbf16, #tpu.memory_space<vmem>>, vector<1x128x50xbf16>
    %96 = vector.shape_cast %95 : vector<1x128x50xbf16> to vector<128x50xbf16>
    %cst_60 = arith.constant dense<0.000000e+00> : vector<32x50xf32>
    %97 = tpu.matmul %94, %96, %cst_60 {dimension_numbers = #tpu.dot_dimension_numbers<[1], [0], [0], [1], [0, 0, 1, 1], [], []>} : vector<32x128xbf16>, vector<128x50xbf16>, vector<32x50xf32> -> vector<32x50xf32>
    %98 = arith.addf %92, %97 : vector<32x50xf32>
    %99 = vector.extract_strided_slice %89 {offsets = [1, 0, 0], sizes = [1, 32, 128], strides = [1, 1, 1]} : vector<4x32x128xbf16> to vector<1x32x128xbf16>
    %100 = vector.shape_cast %99 : vector<1x32x128xbf16> to vector<32x128xbf16>
    %c1_61 = arith.constant 1 : index
    %c0_62 = arith.constant 0 : index
    %c0_63 = arith.constant 0 : index
    %101 = vector.load %arg6[%c1_61, %c0_62, %c0_63] : memref<4x128x50xbf16, #tpu.memory_space<vmem>>, vector<1x128x50xbf16>
    %102 = vector.shape_cast %101 : vector<1x128x50xbf16> to vector<128x50xbf16>
    %cst_64 = arith.constant dense<0.000000e+00> : vector<32x50xf32>
    %103 = tpu.matmul %100, %102, %cst_64 {dimension_numbers = #tpu.dot_dimension_numbers<[1], [0], [0], [1], [0, 0, 1, 1], [], []>} : vector<32x128xbf16>, vector<128x50xbf16>, vector<32x50xf32> -> vector<32x50xf32>
    %104 = arith.addf %98, %103 : vector<32x50xf32>
    %105 = vector.extract_strided_slice %89 {offsets = [2, 0, 0], sizes = [1, 32, 128], strides = [1, 1, 1]} : vector<4x32x128xbf16> to vector<1x32x128xbf16>
    %106 = vector.shape_cast %105 : vector<1x32x128xbf16> to vector<32x128xbf16>
    %c2_65 = arith.constant 2 : index
    %c0_66 = arith.constant 0 : index
    %c0_67 = arith.constant 0 : index
    %107 = vector.load %arg6[%c2_65, %c0_66, %c0_67] : memref<4x128x50xbf16, #tpu.memory_space<vmem>>, vector<1x128x50xbf16>
    %108 = vector.shape_cast %107 : vector<1x128x50xbf16> to vector<128x50xbf16>
    %cst_68 = arith.constant dense<0.000000e+00> : vector<32x50xf32>
    %109 = tpu.matmul %106, %108, %cst_68 {dimension_numbers = #tpu.dot_dimension_numbers<[1], [0], [0], [1], [0, 0, 1, 1], [], []>} : vector<32x128xbf16>, vector<128x50xbf16>, vector<32x50xf32> -> vector<32x50xf32>
    %110 = arith.addf %104, %109 : vector<32x50xf32>
    %111 = vector.extract_strided_slice %89 {offsets = [3, 0, 0], sizes = [1, 32, 128], strides = [1, 1, 1]} : vector<4x32x128xbf16> to vector<1x32x128xbf16>
    %112 = vector.shape_cast %111 : vector<1x32x128xbf16> to vector<32x128xbf16>
    %c3_69 = arith.constant 3 : index
    %c0_70 = arith.constant 0 : index
    %c0_71 = arith.constant 0 : index
    %113 = vector.load %arg6[%c3_69, %c0_70, %c0_71] : memref<4x128x50xbf16, #tpu.memory_space<vmem>>, vector<1x128x50xbf16>
    %114 = vector.shape_cast %113 : vector<1x128x50xbf16> to vector<128x50xbf16>
    %cst_72 = arith.constant dense<0.000000e+00> : vector<32x50xf32>
    %115 = tpu.matmul %112, %114, %cst_72 {dimension_numbers = #tpu.dot_dimension_numbers<[1], [0], [0], [1], [0, 0, 1, 1], [], []>} : vector<32x128xbf16>, vector<128x50xbf16>, vector<32x50xf32> -> vector<32x50xf32>
    %116 = arith.addf %110, %115 : vector<32x50xf32>
    %cst_73 = arith.constant 0.000000e+00 : f32
    %117 = vector.broadcast %cst_73 : f32 to vector<32x50xf32>
    %118 = arith.maximumf %116, %117 : vector<32x50xf32>
    %119 = arith.truncf %118 : vector<32x50xf32> to vector<32x50xbf16>
    %c0_74 = arith.constant 0 : index
    %c0_75 = arith.constant 0 : index
    %120 = vector.load %arg8[%c0_74, %c0_75] : memref<50x10xbf16, #tpu.memory_space<vmem>>, vector<50x10xbf16>
    %cst_76 = arith.constant dense<0.000000e+00> : vector<32x10xf32>
    %121 = tpu.matmul %119, %120, %cst_76 {dimension_numbers = #tpu.dot_dimension_numbers<[1], [0], [0], [1], [0, 0, 1, 1], [], []>} : vector<32x50xbf16>, vector<50x10xbf16>, vector<32x10xf32> -> vector<32x10xf32>
    %c0_77 = arith.constant 0 : index
    %c0_78 = arith.constant 0 : index
    %122 = vector.load %arg9[%c0_77, %c0_78] : memref<1x10xf32, #tpu.memory_space<vmem>>, vector<1x10xf32>
    %123 = vector.broadcast %122 : vector<1x10xf32> to vector<32x10xf32>
    %124 = arith.addf %121, %123 : vector<32x10xf32>
    %cst_79 = arith.constant dense<0xFF800000> : vector<32xf32>
    %125 = vector.multi_reduction <maximumf>, %124, %cst_79 [1] : vector<32x10xf32> to vector<32xf32>
    %126 = vector.shape_cast %125 : vector<32xf32> to vector<32x1xf32>
    %127 = vector.broadcast %126 : vector<32x1xf32> to vector<32x10xf32>
    %128 = arith.subf %124, %127 : vector<32x10xf32>
    %129 = math.exp %128 : vector<32x10xf32>
    %cst_80 = arith.constant dense<0.000000e+00> : vector<32xf32>
    %130 = vector.multi_reduction <add>, %129, %cst_80 [1] : vector<32x10xf32> to vector<32xf32>
    %131 = vector.shape_cast %130 : vector<32xf32> to vector<32x1xf32>
    %132 = math.log %131 : vector<32x1xf32>
    %133 = vector.broadcast %132 : vector<32x1xf32> to vector<32x10xf32>
    %134 = arith.subf %128, %133 : vector<32x10xf32>
    %c0_81 = arith.constant 0 : index
    %c0_82 = arith.constant 0 : index
    %135 = vector.load %arg10[%c0_81, %c0_82] : memref<32x10xf32, #tpu.memory_space<vmem>>, vector<32x10xf32>
    tpu.vector_store %arg10[%c0_81, %c0_82], %134 {strides = array<i32>} : memref<32x10xf32, #tpu.memory_space<vmem>>, vector<32x10xf32>,
    return
  }
  func.func @transform_0(%arg0: i32) -> (i32, i32, i32) {
    %c0_i32 = arith.constant 0 : i32
    %c0_i32_0 = arith.constant 0 : i32
    %c0_i32_1 = arith.constant 0 : i32
    return %c0_i32, %arg0, %c0_i32_0 : i32, i32, i32
  }
  func.func @transform_1(%arg0: i32) -> (i32, i32, i32) {
    %c0_i32 = arith.constant 0 : i32
    %c0_i32_0 = arith.constant 0 : i32
    %c0_i32_1 = arith.constant 0 : i32
    %c0_i32_2 = arith.constant 0 : i32
    return %c0_i32, %c0_i32_0, %c0_i32_1 : i32, i32, i32
  }
  func.func @transform_2(%arg0: i32) -> (i32, i32) {
    %c0_i32 = arith.constant 0 : i32
    %c0_i32_0 = arith.constant 0 : i32
    %c0_i32_1 = arith.constant 0 : i32
    return %c0_i32, %c0_i32_0 : i32, i32
  }
  func.func @transform_3(%arg0: i32) -> (i32, i32, i32) {
    %c0_i32 = arith.constant 0 : i32
    %c0_i32_0 = arith.constant 0 : i32
    %c0_i32_1 = arith.constant 0 : i32
    %c0_i32_2 = arith.constant 0 : i32
    return %c0_i32, %c0_i32_0, %c0_i32_1 : i32, i32, i32
  }
  func.func @transform_4(%arg0: i32) -> (i32, i32) {
    %c0_i32 = arith.constant 0 : i32
    %c0_i32_0 = arith.constant 0 : i32
    %c0_i32_1 = arith.constant 0 : i32
    return %c0_i32, %c0_i32_0 : i32, i32
  }
  func.func @transform_5(%arg0: i32) -> (i32, i32, i32) {
    %c0_i32 = arith.constant 0 : i32
    %c0_i32_0 = arith.constant 0 : i32
    %c0_i32_1 = arith.constant 0 : i32
    %c0_i32_2 = arith.constant 0 : i32
    return %c0_i32, %c0_i32_0, %c0_i32_1 : i32, i32, i32
  }
  func.func @transform_6(%arg0: i32) -> (i32, i32) {
    %c0_i32 = arith.constant 0 : i32
    %c0_i32_0 = arith.constant 0 : i32
    %c0_i32_1 = arith.constant 0 : i32
    return %c0_i32, %c0_i32_0 : i32, i32
  }
  func.func @transform_7(%arg0: i32) -> (i32, i32) {
    %c0_i32 = arith.constant 0 : i32
    %c0_i32_0 = arith.constant 0 : i32
    %c0_i32_1 = arith.constant 0 : i32
    return %c0_i32, %c0_i32_0 : i32, i32
  }
  func.func @transform_8(%arg0: i32) -> (i32, i32) {
    %c0_i32 = arith.constant 0 : i32
    %c0_i32_0 = arith.constant 0 : i32
    %c0_i32_1 = arith.constant 0 : i32
    return %c0_i32, %c0_i32_0 : i32, i32
  }
  func.func @transform_9(%arg0: i32) -> (i32, i32) {
    %c0_i32 = arith.constant 0 : i32
    %c0_i32_0 = arith.constant 0 : i32
    return %arg0, %c0_i32 : i32, i32
  }
}

</mosaic_0001>

<bundles_post_ra>
// kernel: cnn_mnist_forward.1
= control target key start
LH: loop header
LB: loop body
LE: loop exit
PB: predicated region body
PF: predicated region fallthrough
CT: control target
= control target key end

     0   :  { %vm638_vm0 = vcmask 1045504   ;;  %v14270_v1 = vmov 0   ;;  %vm493_vm1 = vcmask 228352   ;;  %vm8257_vm2 = vcmask 1040384   ;;  %s14260_s1 = inlined_call_operand.vmem [shape: bf16[5,28,256], index: 1, kind: input, shape index: {}]   ;;  %s14261_s0 = inlined_call_operand.vmem [shape: bf16[28,32,28], index: 0, kind: input, shape index: {}]   ;;  %s14262_s3 = inlined_call_operand.vmem [shape: bf16[5,128,256], index: 3, kind: input, shape index: {}]   ;;  %s14263_s2 = inlined_call_operand.vmem [shape: f32[1,128], index: 2, kind: input, shape index: {}]   ;;  %s14264_s5 = inlined_call_operand.vmem [shape: bf16[4,128,50], index: 5, kind: input, shape index: {}]   ;;  %s14265_s4 = inlined_call_operand.vmem [shape: f32[1,128], index: 4, kind: input, shape index: {}]   ;;  %s14266_s7 = inlined_call_operand.vmem [shape: bf16[50,10], index: 7, kind: input, shape index: {}]   ;;  %s14267_s6 = inlined_call_operand.vmem [shape: f32[1,50], index: 6, kind: input, shape index: {}]   ;;  %s14268_s8 = inlined_call_operand.vmem [shape: f32[1,10], index: 8, kind: input, shape index: {}]   ;;  %s14269_s9 = inlined_call_operand.vmem [shape: f32[32,10], index: 9, kind: output, shape index: {}]  }
   0x1   :  { %v9650_v0 = vld [vmem:[%s14260_s1 + $0x34] ss:$8 sps:$4 sm:$0x3f]   ;;  %677 = vmatprep.mubr.bf16.mxu0 %v14270_v1  ;;  %1147 = vmatprep.mubr.bf16.mxu1 %v14270_v1  ;;  %v9652_v2 = vld [vmem:[%s14260_s1 + $0x30] ss:$8 sps:$4 sm:$0x3f]  }
   0x2   :  { %8519 = vmatprep.subr.msk.bf16.mxu0 %vm638_vm0, %v9650_v0  ;;  %9644 = vmatprep.subr.msk.bf16.mxu1 %vm638_vm0, %v9650_v0  ;;  %v9653_v3 = vld [vmem:[%s14260_s1 + $0x24] ss:$8 sps:$4 sm:$0xff]   ;;  %v640_v4 = vsel %vm638_vm0, %v9652_v2, 0  ;;  %v9655_v5 = vld [vmem:[%s14260_s1 + $0x20] ss:$8 sps:$4 sm:$0xff]   ;;  %v9656_v6 = vld [vmem:[%s14261_s0 + $0x10] sm:$0xff]  }
   0x3   :  { %658 = vmatpush1.bf16.msra.mxu0 %v640_v4  ;;  %9646 = vmatpush1.bf16.msra.mxu1 %v640_v4  ;;  %v9657_v7 = vld [vmem:[%s14261_s0 + $0x188] sm:$0xff]   ;;  %v9658_v8 = vld [vmem:[%s14260_s1 + $0x14] ss:$8 sps:$4 sm:$0x3f]   ;;  %v9668_v17 = vld [vmem:[%s14261_s0] sm:$0xff]   ;;  %vm8250_vm3 = vcmask 408576  }
   0x4   :  { %659 = vmatprep.subr.bf16.mxu0 %v9653_v3  ;;  %9645 = vmatprep.subr.bf16.mxu1 %v9653_v3  ;;  %v9660_v9 = vld [vmem:[%s14260_s1 + $0x54] ss:$8 sps:$4 sm:$0x3f]   ;;  %v9662_v10 = vld [vmem:[%s14260_s1 + $0x10] ss:$8 sps:$4 sm:$0x3f]  }
   0x5   :  { %v9663_v11 = vld [vmem:[%s14260_s1 + $0x50] ss:$8 sps:$4 sm:$0x3f]   ;;  %v9666_v12 = vld [vmem:[%s14260_s1 + $0x4] ss:$8 sps:$4 sm:$0xff]   ;;  %v1561_v13 = vsel %vm638_vm0, %v9662_v10, 0 }
   0x6   :  { %v2584_v14 = vsel %vm638_vm0, %v9663_v11, 0  ;;  %v9664_v15 = vld [vmem:[%s14260_s1] ss:$8 sps:$4 sm:$0xff]   ;;  %v9667_v16 = vld [vmem:[%s14261_s0 + $0x18] sm:$0xff]   ;;  %v9672_v21 = vld [vmem:[%s14261_s0 + $0x10] sm:$0xff]   ;;  %vm8310_vm4 = vcmask 80896  }
   0x7   :  { %660 = vmatpush1.bf16.msra.mxu0 %v9655_v5  ;;  %9647 = vmatpush1.bf16.msra.mxu1 %v9655_v5  ;;  %v9669_v18 = vld [vmem:[%s14261_s0 + $0x20] sm:$0xff]   ;;  %v9670_v19 = vld [vmem:[%s14261_s0 + $0x8] sm:$0xff]   ;;  %v9673_v22 = vld [vmem:[%s14261_s0 + $0x30] sm:$0xff]  }
   0x8   :  { %8620 = vmatprep.subr.msk.bf16.mxu1 %vm638_vm0, %v9658_v8  ;;  %8821 = vmatprep.subr.msk.bf16.mxu0 %vm638_vm0, %v9660_v9  ;;  %v9671_v20 = vld [vmem:[%s14261_s0 + $0x28] sm:$0xff]   ;;  %v9674_v23 = vld [vmem:[%s14261_s0 + $0x18] sm:$0xff]   ;;  %v9676_v25 = vld [vmem:[%s14261_s0 + $0x20] sm:$0xff]  }
   0x9   :  { %v9675_v24 = vld [vmem:[%s14261_s0 + $0x38] sm:$0xff]   ;;  %v9677_v26 = vld [vmem:[%s14261_s0 + $0x40] sm:$0xff]   ;;  %v9678_v27 = vld [vmem:[%s14261_s0 + $0x28] sm:$0xff]  }
   0xa   :  { %8520 = vmatmul.mubr.msk.bf16.vlgmr.msra.gmra.mxu0 %vm493_vm1, %v9656_v6  ;;  %8567 = vmatmul.mubr.msk.bf16.vlgmr.msra.gmra.mxu1 %vm493_vm1, %v9657_v7  ;;  %v9679_v28 = vld [vmem:[%s14261_s0 + $0x48] sm:$0xff]   ;;  %v9680_v29 = vld [vmem:[%s14261_s0 + $0x30] sm:$0xff]   ;;  %v9682_v33 = vld [vmem:[%s14261_s0 + $0x38] sm:$0xff]  }
   0xb   :  { %1579 = vmatpush1.bf16.msra.mxu1 %v1561_v13  ;;  %2602 = vmatpush1.bf16.msra.mxu0 %v2584_v14  ;;  %v9713_v30 = vld [vmem:[%s14260_s1 + $0x40] ss:$8 sps:$4 sm:$0xff]   ;;  %v9715_v31 = vld [vmem:[%s14260_s1 + $0x44] ss:$8 sps:$4 sm:$0xff]   ;;  %v9681_v32 = vld [vmem:[%s14261_s0 + $0x50] sm:$0xff]  }
   0xc   :  { %1580 = vmatprep.subr.bf16.mxu1 %v9666_v12  ;;  %687 = vmatprep.mubr.bf16.mxu0 %v14270_v1  ;;  %v9683_v34 = vld [vmem:[%s14261_s0 + $0x58] sm:$0xff]   ;;  %v9684_v35 = vld [vmem:[%s14261_s0 + $0x40] sm:$0xff]   ;;  %v9686_v37 = vld [vmem:[%s14261_s0 + $0x48] sm:$0xff]  }
   0xd   :  { %1598 = vmatprep.mubr.bf16.mxu1 %v14270_v1  ;;  %2603 = vmatprep.subr.bf16.mxu0 %v9715_v31  ;;  %v9685_v36 = vld [vmem:[%s14261_s0 + $0x60] sm:$0xff]   ;;  %v9687_v38 = vld [vmem:[%s14261_s0 + $0x68] sm:$0xff]   ;;  %v9688_v39 = vld [vmem:[%s14261_s0 + $0x50] sm:$0xff]  }
   0xe   :  { %v9689_v40 = vld [vmem:[%s14261_s0 + $0x70] sm:$0xff]   ;;  %v9690_v41 = vld [vmem:[%s14261_s0 + $0x58] sm:$0xff]   ;;  %v9692_v43 = vld [vmem:[%s14261_s0 + $0x60] sm:$0xff]  }
   0xf   :  { %1581 = vmatpush1.bf16.msra.mxu1 %v9664_v15  ;;  %2604 = vmatpush1.bf16.msra.mxu0 %v9713_v30  ;;  %v9691_v42 = vld [vmem:[%s14261_s0 + $0x78] sm:$0xff]   ;;  %v9693_v44 = vld [vmem:[%s14261_s0 + $0x80] sm:$0xff]   ;;  %v9694_v45 = vld [vmem:[%s14261_s0 + $0x68] sm:$0xff]  }
  0x10   :  { %v9695_v46 = vld [vmem:[%s14261_s0 + $0x88] sm:$0xff]   ;;  %v9696_v47 = vld [vmem:[%s14261_s0 + $0x70] sm:$0xff]   ;;  %v9698_v49 = vld [vmem:[%s14261_s0 + $0x78] sm:$0xff]  }
  0x11   :  { %v9697_v48 = vld [vmem:[%s14261_s0 + $0x90] sm:$0xff]   ;;  %v9699_v50 = vld [vmem:[%s14261_s0 + $0x98] sm:$0xff]   ;;  %v9700_v51 = vld [vmem:[%s14261_s0 + $0x80] sm:$0xff]  }
  0x12   :  { %8521 = vmatmul.mubr.msk.bf16.gmra.mxu0 %vm493_vm1, %v9667_v16  ;;  %8621 = vmatmul.mubr.msk.bf16.vlgmr.msra.gmra.mxu1 %vm493_vm1, %v9668_v17  ;;  %v9701_v52 = vld [vmem:[%s14261_s0 + $0xa0] sm:$0xff]   ;;  %v9702_v53 = vld [vmem:[%s14261_s0 + $0x88] sm:$0xff]   ;;  %v9704_v55 = vld [vmem:[%s14261_s0 + $0x90] sm:$0xff]  }
  0x13   :  { %697 = vmatprep.mubr.bf16.mxu0 %v14270_v1  ;;  %1608 = vmatprep.mubr.bf16.mxu1 %v14270_v1  ;;  %v9703_v54 = vld [vmem:[%s14261_s0 + $0xa8] sm:$0xff]   ;;  %v9705_v56 = vld [vmem:[%s14261_s0 + $0xb0] sm:$0xff]   ;;  %v9706_v57 = vld [vmem:[%s14261_s0 + $0x98] sm:$0xff]  }
  0x14   :  { %v9707_v58 = vld [vmem:[%s14261_s0 + $0xb8] sm:$0xff]   ;;  %v9708_v59 = vld [vmem:[%s14261_s0 + $0xa0] sm:$0xff]   ;;  %v9710_v61 = vld [vmem:[%s14261_s0 + $0xa8] sm:$0xff]  }
  0x15   :  { %v9709_v60 = vld [vmem:[%s14261_s0 + $0xc0] sm:$0xff]   ;;  %v9711_v62 = vld [vmem:[%s14261_s0 + $0xc8] sm:$0xff]   ;;  %v9712_v63 = vld [vmem:[%s14261_s0 + $0xb0] sm:$0xff]  }
  0x16   :  { %v9716_v0 = vld [vmem:[%s14261_s0 + $0xd0] sm:$0xff]   ;;  %v9717_v2 = vld [vmem:[%s14261_s0 + $0xb8] sm:$0xff]   ;;  %v9719_v10 = vld [vmem:[%s14261_s0 + $0xc0] sm:$0xff]  }
  0x17   :  { %v9718_v9 = vld [vmem:[%s14261_s0 + $0xd8] sm:$0xff]  }
  0x1a   :  { %8522 = vmatmul.mubr.msk.bf16.gmra.mxu0 %vm493_vm1, %v9669_v18  ;;  %8622 = vmatmul.mubr.msk.bf16.gmra.mxu1 %vm493_vm1, %v9670_v19 }
  0x1b   :  { %707 = vmatprep.mubr.bf16.mxu0 %v14270_v1  ;;  %1618 = vmatprep.mubr.bf16.mxu1 %v14270_v1 }
  0x22   :  { %8523 = vmatmul.mubr.msk.bf16.gmra.mxu0 %vm493_vm1, %v9671_v20  ;;  %8623 = vmatmul.mubr.msk.bf16.gmra.mxu1 %vm493_vm1, %v9672_v21  ;;  %v9720_v21 = vld [vmem:[%s14261_s0 + $0xe0] sm:$0xff]  }
  0x23   :  { %717 = vmatprep.mubr.bf16.mxu0 %v14270_v1  ;;  %1628 = vmatprep.mubr.bf16.mxu1 %v14270_v1 }
  0x2a   :  { %8524 = vmatmul.mubr.msk.bf16.gmra.mxu0 %vm493_vm1, %v9673_v22  ;;  %8624 = vmatmul.mubr.msk.bf16.gmra.mxu1 %vm493_vm1, %v9674_v23  ;;  %v9721_v22 = vld [vmem:[%s14261_s0 + $0xc8] sm:$0xff]  }
  0x2b   :  { %727 = vmatprep.mubr.bf16.mxu0 %v14270_v1  ;;  %1638 = vmatprep.mubr.bf16.mxu1 %v14270_v1 }
  0x32   :  { %8525 = vmatmul.mubr.msk.bf16.gmra.mxu0 %vm493_vm1, %v9675_v24  ;;  %8625 = vmatmul.mubr.msk.bf16.gmra.mxu1 %vm493_vm1, %v9676_v25 }
  0x33   :  { %737 = vmatprep.mubr.bf16.mxu0 %v14270_v1  ;;  %1648 = vmatprep.mubr.bf16.mxu1 %v14270_v1 }
  0x3a   :  { %8526 = vmatmul.mubr.msk.bf16.gmra.mxu0 %vm493_vm1, %v9677_v26  ;;  %8626 = vmatmul.mubr.msk.bf16.gmra.mxu1 %vm493_vm1, %v9678_v27 }
  0x3b   :  { %747 = vmatprep.mubr.bf16.mxu0 %v14270_v1  ;;  %1658 = vmatprep.mubr.bf16.mxu1 %v14270_v1 }
  0x42   :  { %8527 = vmatmul.mubr.msk.bf16.gmra.mxu0 %vm493_vm1, %v9679_v28  ;;  %8627 = vmatmul.mubr.msk.bf16.gmra.mxu1 %vm493_vm1, %v9680_v29 }
  0x43   :  { %757 = vmatprep.mubr.bf16.mxu0 %v14270_v1  ;;  %1668 = vmatprep.mubr.bf16.mxu1 %v14270_v1 }
  0x4a   :  { %8528 = vmatmul.mubr.msk.bf16.gmra.mxu0 %vm493_vm1, %v9681_v32  ;;  %8628 = vmatmul.mubr.msk.bf16.gmra.mxu1 %vm493_vm1, %v9682_v33 }
  0x4b   :  { %767 = vmatprep.mubr.bf16.mxu0 %v14270_v1  ;;  %1678 = vmatprep.mubr.bf16.mxu1 %v14270_v1 }
  0x52   :  { %8529 = vmatmul.mubr.msk.bf16.gmra.mxu0 %vm493_vm1, %v9683_v34  ;;  %8629 = vmatmul.mubr.msk.bf16.gmra.mxu1 %vm493_vm1, %v9684_v35  ;;  %v9722_v35 = vld [vmem:[%s14261_s0 + $0xe8] sm:$0xff]  }
  0x53   :  { %777 = vmatprep.mubr.bf16.mxu0 %v14270_v1  ;;  %1688 = vmatprep.mubr.bf16.mxu1 %v14270_v1 }
  0x5a   :  { %8530 = vmatmul.mubr.msk.bf16.gmra.mxu0 %vm493_vm1, %v9685_v36  ;;  %8630 = vmatmul.mubr.msk.bf16.gmra.mxu1 %vm493_vm1, %v9686_v37  ;;  %v9723_v36 = vld [vmem:[%s14261_s0 + $0xd0] sm:$0xff]  }
  0x5b   :  { %787 = vmatprep.mubr.bf16.mxu0 %v14270_v1  ;;  %1698 = vmatprep.mubr.bf16.mxu1 %v14270_v1 }
  0x62   :  { %8531 = vmatmul.mubr.msk.bf16.gmra.mxu0 %vm493_vm1, %v9687_v38  ;;  %8631 = vmatmul.mubr.msk.bf16.gmra.mxu1 %vm493_vm1, %v9688_v39 }
  0x63   :  { %797 = vmatprep.mubr.bf16.mxu0 %v14270_v1  ;;  %1708 = vmatprep.mubr.bf16.mxu1 %v14270_v1 }
  0x6a   :  { %8532 = vmatmul.mubr.msk.bf16.gmra.mxu0 %vm493_vm1, %v9689_v40  ;;  %8632 = vmatmul.mubr.msk.bf16.gmra.mxu1 %vm493_vm1, %v9690_v41 }
  0x6b   :  { %807 = vmatprep.mubr.bf16.mxu0 %v14270_v1  ;;  %1718 = vmatprep.mubr.bf16.mxu1 %v14270_v1 }
  0x72   :  { %8533 = vmatmul.mubr.msk.bf16.gmra.mxu0 %vm493_vm1, %v9691_v42  ;;  %8633 = vmatmul.mubr.msk.bf16.gmra.mxu1 %vm493_vm1, %v9692_v43 }
  0x73   :  { %817 = vmatprep.mubr.bf16.mxu0 %v14270_v1  ;;  %1728 = vmatprep.mubr.bf16.mxu1 %v14270_v1 }
  0x7a   :  { %8534 = vmatmul.mubr.msk.bf16.gmra.mxu0 %vm493_vm1, %v9693_v44  ;;  %8634 = vmatmul.mubr.msk.bf16.gmra.mxu1 %vm493_vm1, %v9694_v45 }
  0x7b   :  { %827 = vmatprep.mubr.bf16.mxu0 %v14270_v1  ;;  %1738 = vmatprep.mubr.bf16.mxu1 %v14270_v1 }
  0x82   :  { %8535 = vmatmul.mubr.msk.bf16.gmra.mxu0 %vm493_vm1, %v9695_v46  ;;  %8635 = vmatmul.mubr.msk.bf16.gmra.mxu1 %vm493_vm1, %v9696_v47 }
  0x83   :  { %837 = vmatprep.mubr.bf16.mxu0 %v14270_v1  ;;  %1748 = vmatprep.mubr.bf16.mxu1 %v14270_v1 }
  0x8a   :  { %8536 = vmatmul.mubr.msk.bf16.gmra.mxu0 %vm493_vm1, %v9697_v48  ;;  %8636 = vmatmul.mubr.msk.bf16.gmra.mxu1 %vm493_vm1, %v9698_v49  ;;  %v9724_v49 = vld [vmem:[%s14261_s0 + $0xf0] sm:$0xff]  }
  0x8b   :  { %847 = vmatprep.mubr.bf16.mxu0 %v14270_v1  ;;  %1758 = vmatprep.mubr.bf16.mxu1 %v14270_v1 }
  0x92   :  { %8537 = vmatmul.mubr.msk.bf16.gmra.mxu0 %vm493_vm1, %v9699_v50  ;;  %8637 = vmatmul.mubr.msk.bf16.gmra.mxu1 %vm493_vm1, %v9700_v51  ;;  %v9725_v50 = vld [vmem:[%s14261_s0 + $0xd8] sm:$0xff]  }
  0x93   :  { %857 = vmatprep.mubr.bf16.mxu0 %v14270_v1  ;;  %1768 = vmatprep.mubr.bf16.mxu1 %v14270_v1 }
  0x9a   :  { %8538 = vmatmul.mubr.msk.bf16.gmra.mxu0 %vm493_vm1, %v9701_v52  ;;  %8638 = vmatmul.mubr.msk.bf16.gmra.mxu1 %vm493_vm1, %v9702_v53 }
  0x9b   :  { %867 = vmatprep.mubr.bf16.mxu0 %v14270_v1  ;;  %1778 = vmatprep.mubr.bf16.mxu1 %v14270_v1 }
  0xa2   :  { %8539 = vmatmul.mubr.msk.bf16.gmra.mxu0 %vm493_vm1, %v9703_v54  ;;  %8639 = vmatmul.mubr.msk.bf16.gmra.mxu1 %vm493_vm1, %v9704_v55 }
  0xa3   :  { %877 = vmatprep.mubr.bf16.mxu0 %v14270_v1  ;;  %1788 = vmatprep.mubr.bf16.mxu1 %v14270_v1 }
  0xaa   :  { %8540 = vmatmul.mubr.msk.bf16.gmra.mxu0 %vm493_vm1, %v9705_v56  ;;  %8640 = vmatmul.mubr.msk.bf16.gmra.mxu1 %vm493_vm1, %v9706_v57 }
  0xab   :  { %887 = vmatprep.mubr.bf16.mxu0 %v14270_v1  ;;  %1798 = vmatprep.mubr.bf16.mxu1 %v14270_v1 }
  0xb2   :  { %8541 = vmatmul.mubr.msk.bf16.gmra.mxu0 %vm493_vm1, %v9707_v58  ;;  %8641 = vmatmul.mubr.msk.bf16.gmra.mxu1 %vm493_vm1, %v9708_v59 }
  0xb3   :  { %897 = vmatprep.mubr.bf16.mxu0 %v14270_v1  ;;  %1808 = vmatprep.mubr.bf16.mxu1 %v14270_v1 }
  0xba   :  { %8542 = vmatmul.mubr.msk.bf16.gmra.mxu0 %vm493_vm1, %v9709_v60  ;;  %8642 = vmatmul.mubr.msk.bf16.gmra.mxu1 %vm493_vm1, %v9710_v61 }
  0xbb   :  { %907 = vmatprep.mubr.bf16.mxu0 %v14270_v1  ;;  %1818 = vmatprep.mubr.bf16.mxu1 %v14270_v1 }
  0xc2   :  { %8543 = vmatmul.mubr.msk.bf16.gmra.mxu0 %vm493_vm1, %v9711_v62  ;;  %8643 = vmatmul.mubr.msk.bf16.gmra.mxu1 %vm493_vm1, %v9712_v63  ;;  %v9726_v63 = vld [vmem:[%s14261_s0 + $0xf8] sm:$0xff]  }
  0xc3   :  { %917 = vmatprep.mubr.bf16.mxu0 %v14270_v1  ;;  %1828 = vmatprep.mubr.bf16.mxu1 %v14270_v1 }
  0xca   :  { %v679_v3 = vpop.f32.mrf.mxu0  ;;  %8544 = vmatmul.mubr.msk.bf16.gmra.mxu0 %vm493_vm1, %v9716_v0  ;;  %v10436_v4 = vpop.f32.mrf.mxu1  ;;  %8644 = vmatmul.mubr.msk.bf16.gmra.mxu1 %vm493_vm1, %v9717_v2  ;;  %v9727_v0 = vld [vmem:[%s14261_s0 + $0xe0] sm:$0xff]  }
  0xcb   :  { %14273 = vst [vmem:[#allocation2_spill] sm:$0xff] %v10436_v4  ;;  %927 = vmatprep.mubr.bf16.mxu0 %v14270_v1  ;;  %1838 = vmatprep.mubr.bf16.mxu1 %v14270_v1 }
  0xcc   :  { %v681_v5 = vpop.f32.mrf.mxu0  ;;  %v10441_v6 = vpop.f32.mrf.mxu1 }
  0xcd   :  { %14274 = vst [vmem:[#allocation3_spill] sm:$0xff] %v10441_v6 }
  0xce   :  { %v683_v7 = vpop.f32.mrf.mxu0  ;;  %v10443_v8 = vpop.f32.mrf.mxu1 }
  0xcf   :  { %14275 = vst [vmem:[#allocation4_spill] sm:$0xff] %v10443_v8  ;;  %v14281_v8 = vmov 0  }
  0xd0   :  { %v685_v11 = vpop.f32.mrf.mxu0  ;;  %v10451_v12 = vpop.f32.mrf.mxu1 }
  0xd1   :  { %14276 = vst [vmem:[#allocation5_spill] sm:$0xff] %v10451_v12 }
  0xd2   :  { %v689_v13 = vpop.f32.mrf.mxu0  ;;  %8545 = vmatmul.mubr.msk.bf16.gmra.mxu0 %vm493_vm1, %v9718_v9  ;;  %v1600_v14 = vpop.f32.mrf.mxu1  ;;  %8645 = vmatmul.mubr.msk.bf16.gmra.mxu1 %vm493_vm1, %v9719_v10 }
  0xd3   :  { %v10455_v15 = vadd.f32 %v1600_v14, %v679_v3  ;;  %937 = vmatprep.mubr.bf16.mxu0 %v14270_v1  ;;  %1848 = vmatprep.mubr.bf16.mxu1 %v14270_v1 }
  0xd4   :  { %v691_v16 = vpop.f32.mrf.mxu0  ;;  %v1602_v17 = vpop.f32.mrf.mxu1 }
  0xd5   :  { %v10459_v18 = vadd.f32 %v1602_v17, %v681_v5  ;;  %v9760_v17 = vld [vmem:[%s14260_s1 + $0x74] ss:$8 sps:$4 sm:$0x3f]  }
  0xd6   :  { %v693_v19 = vpop.f32.mrf.mxu0  ;;  %v1604_v20 = vpop.f32.mrf.mxu1  ;;  %9022 = vmatprep.subr.msk.bf16.mxu1 %vm638_vm0, %v9760_v17 }
  0xd7   :  { %v10467_v23 = vadd.f32 %v1604_v20, %v683_v7 }
  0xd8   :  { %v695_v24 = vpop.f32.mrf.mxu0  ;;  %v1606_v25 = vpop.f32.mrf.mxu1 }
  0xd9   :  { %v10469_v26 = vadd.f32 %v1606_v25, %v685_v11  ;;  %v9762_v25 = vld [vmem:[%s14260_s1 + $0x70] ss:$8 sps:$4 sm:$0x3f]  }
  0xda   :  { %v699_v27 = vpop.f32.mrf.mxu0  ;;  %8546 = vmatmul.mubr.msk.bf16.gmra.mxu0 %vm493_vm1, %v9720_v21  ;;  %v1610_v28 = vpop.f32.mrf.mxu1  ;;  %8646 = vmatmul.mubr.msk.bf16.gmra.mxu1 %vm493_vm1, %v9721_v22  ;;  %v9728_v21 = vld [vmem:[%s14261_s0 + $0x100] sm:$0xff]   ;;  %v9729_v22 = vld [vmem:[%s14261_s0 + $0xe8] sm:$0xff]  }
  0xdb   :  { %v10473_v29 = vadd.f32 %v1610_v28, %v689_v13  ;;  %947 = vmatprep.mubr.bf16.mxu0 %v14270_v1  ;;  %1858 = vmatprep.mubr.bf16.mxu1 %v14270_v1 }
  0xdc   :  { %v701_v30 = vpop.f32.mrf.mxu0  ;;  %v1612_v31 = vpop.f32.mrf.mxu1 }
  0xdd   :  { %v10477_v32 = vadd.f32 %v1612_v31, %v691_v16  ;;  %v3799_v31 = vsel %vm638_vm0, %v9762_v25, 0 }
  0xde   :  { %v703_v33 = vpop.f32.mrf.mxu0  ;;  %v1614_v34 = vpop.f32.mrf.mxu1  ;;  %3817 = vmatpush1.bf16.msra.mxu1 %v3799_v31 }
  0xdf   :  { %v10485_v37 = vadd.f32 %v1614_v34, %v693_v19 }
  0xe0   :  { %v705_v38 = vpop.f32.mrf.mxu0  ;;  %v1616_v39 = vpop.f32.mrf.mxu1 }
  0xe1   :  { %v10487_v40 = vadd.f32 %v1616_v39, %v695_v24 }
  0xe2   :  { %v709_v41 = vpop.f32.mrf.mxu0  ;;  %8547 = vmatmul.mubr.msk.bf16.gmra.mxu0 %vm493_vm1, %v9722_v35  ;;  %v1620_v42 = vpop.f32.mrf.mxu1  ;;  %8647 = vmatmul.mubr.msk.bf16.gmra.mxu1 %vm493_vm1, %v9723_v36 }
  0xe3   :  { %v10491_v43 = vadd.f32 %v1620_v42, %v699_v27  ;;  %957 = vmatprep.mubr.bf16.mxu0 %v14270_v1  ;;  %1868 = vmatprep.mubr.bf16.mxu1 %v14270_v1 }
  0xe4   :  { %v711_v44 = vpop.f32.mrf.mxu0  ;;  %v1622_v45 = vpop.f32.mrf.mxu1 }
  0xe5   :  { %v10495_v46 = vadd.f32 %v1622_v45, %v701_v30  ;;  %v9731_v45 = vld [vmem:[%s14261_s0 + $0xf0] sm:$0xff]  }
  0xe6   :  { %v713_v47 = vpop.f32.mrf.mxu0  ;;  %v1624_v48 = vpop.f32.mrf.mxu1 }
  0xe7   :  { %v10503_v51 = vadd.f32 %v1624_v48, %v703_v33 }
  0xe8   :  { %v715_v52 = vpop.f32.mrf.mxu0  ;;  %v1626_v53 = vpop.f32.mrf.mxu1 }
  0xe9   :  { %v10505_v54 = vadd.f32 %v1626_v53, %v705_v38 }
  0xea   :  { %v719_v55 = vpop.f32.mrf.mxu0  ;;  %8548 = vmatmul.mubr.msk.bf16.gmra.mxu0 %vm493_vm1, %v9724_v49  ;;  %v1630_v56 = vpop.f32.mrf.mxu1  ;;  %8648 = vmatmul.mubr.msk.bf16.gmra.mxu1 %vm493_vm1, %v9725_v50 }
  0xeb   :  { %v10509_v57 = vadd.f32 %v1630_v56, %v709_v41  ;;  %967 = vmatprep.mubr.bf16.mxu0 %v14270_v1  ;;  %1878 = vmatprep.mubr.bf16.mxu1 %v14270_v1  ;;  %v9767_v56 = vld [vmem:[%s14260_s1 + $0x94] ss:$8 sps:$4 sm:$0x3f]  }
  0xec   :  { %v721_v58 = vpop.f32.mrf.mxu0  ;;  %v1632_v59 = vpop.f32.mrf.mxu1  ;;  %9223 = vmatprep.subr.msk.bf16.mxu0 %vm638_vm0, %v9767_v56 }
  0xed   :  { %v10513_v60 = vadd.f32 %v1632_v59, %v711_v44  ;;  %v9730_v44 = vld [vmem:[%s14261_s0 + $0x108] sm:$0xff]  }
  0xee   :  { %v723_v61 = vpop.f32.mrf.mxu0  ;;  %v1634_v62 = vpop.f32.mrf.mxu1 }
  0xef   :  { %v10521_v2 = vadd.f32 %v1634_v62, %v713_v47 }
  0xf0   :  { %v725_v3 = vpop.f32.mrf.mxu0  ;;  %v1636_v5 = vpop.f32.mrf.mxu1 }
  0xf1   :  { %v10523_v7 = vadd.f32 %v1636_v5, %v715_v52 }
  0xf2   :  { %v729_v9 = vpop.f32.mrf.mxu0  ;;  %8549 = vmatmul.mubr.msk.bf16.gmra.mxu0 %vm493_vm1, %v9726_v63  ;;  %v1640_v10 = vpop.f32.mrf.mxu1  ;;  %8649 = vmatmul.mubr.msk.bf16.gmra.mxu1 %vm493_vm1, %v9727_v0  ;;  %v9732_v0 = vld [vmem:[%s14261_s0 + $0x110] sm:$0xff]  }
  0xf3   :  { %v10527_v11 = vadd.f32 %v1640_v10, %v719_v55  ;;  %977 = vmatprep.mubr.bf16.mxu0 %v14270_v1  ;;  %1888 = vmatprep.mubr.bf16.mxu1 %v14270_v1 }
  0xf4   :  { %v731_v13 = vpop.f32.mrf.mxu0  ;;  %v1642_v14 = vpop.f32.mrf.mxu1 }
  0xf5   :  { %v10531_v16 = vadd.f32 %v1642_v14, %v721_v58 }
  0xf6   :  { %v733_v19 = vpop.f32.mrf.mxu0  ;;  %v1644_v20 = vpop.f32.mrf.mxu1 }
  0xf7   :  { %v10542_v24 = vadd.f32 %v1644_v20, %v723_v61 }
  0xf8   :  { %v735_v27 = vpop.f32.mrf.mxu0  ;;  %v1646_v28 = vpop.f32.mrf.mxu1 }
  0xf9   :  { %v10548_v30 = vadd.f32 %v1646_v28, %v725_v3  ;;  %v9733_v3 = vld [vmem:[%s14261_s0 + $0xf8] sm:$0xff]  }
  0xfa   :  { %v739_v33 = vpop.f32.mrf.mxu0  ;;  %8550 = vmatmul.mubr.msk.bf16.gmra.mxu0 %vm493_vm1, %v9728_v21  ;;  %v1650_v34 = vpop.f32.mrf.mxu1  ;;  %8650 = vmatmul.mubr.msk.bf16.gmra.mxu1 %vm493_vm1, %v9729_v22  ;;  %v9774_v22 = vld [vmem:[%s14260_s1 + $0x64] ss:$8 sps:$4 sm:$0xff]  }
  0xfb   :  { %v10553_v35 = vadd.f32 %v1650_v34, %v729_v9  ;;  %987 = vmatprep.mubr.bf16.mxu0 %v14270_v1  ;;  %1898 = vmatprep.mubr.bf16.mxu1 %v14270_v1  ;;  %v9735_v34 = vld [vmem:[%s14261_s0 + $0x100] sm:$0xff]  }
  0xfc   :  { %v741_v36 = vpop.f32.mrf.mxu0  ;;  %v1652_v38 = vpop.f32.mrf.mxu1  ;;  %3818 = vmatprep.subr.bf16.mxu1 %v9774_v22 }
  0xfd   :  { %v10557_v39 = vadd.f32 %v1652_v38, %v731_v13 }
  0xfe   :  { %v743_v41 = vpop.f32.mrf.mxu0  ;;  %v1654_v42 = vpop.f32.mrf.mxu1 }
  0xff   :  { %v10565_v47 = vadd.f32 %v1654_v42, %v733_v19 }
 0x100   :  { %v745_v48 = vpop.f32.mrf.mxu0  ;;  %v1656_v49 = vpop.f32.mrf.mxu1 }
 0x101   :  { %v10567_v50 = vadd.f32 %v1656_v49, %v735_v27  ;;  %v9772_v27 = vld [vmem:[%s14260_s1 + $0x60] ss:$8 sps:$4 sm:$0xff]  }
 0x102   :  { %v749_v52 = vpop.f32.mrf.mxu0  ;;  %8551 = vmatmul.mubr.msk.bf16.gmra.mxu0 %vm493_vm1, %v9730_v44  ;;  %v1660_v53 = vpop.f32.mrf.mxu1  ;;  %8651 = vmatmul.mubr.msk.bf16.gmra.mxu1 %vm493_vm1, %v9731_v45 }
 0x103   :  { %v10571_v55 = vadd.f32 %v1660_v53, %v739_v33  ;;  %997 = vmatprep.mubr.bf16.mxu0 %v14270_v1  ;;  %1908 = vmatprep.mubr.bf16.mxu1 %v14270_v1  ;;  %v9734_v33 = vld [vmem:[%s14261_s0 + $0x118] sm:$0xff]  }
 0x104   :  { %v751_v58 = vpop.f32.mrf.mxu0  ;;  %v1662_v59 = vpop.f32.mrf.mxu1  ;;  %3819 = vmatpush1.bf16.msra.mxu1 %v9772_v27 }
 0x105   :  { %v10578_v61 = vadd.f32 %v1662_v59, %v741_v36  ;;  %v9736_v59 = vld [vmem:[%s14261_s0 + $0x120] sm:$0xff]  }
 0x106   :  { %v753_v62 = vpop.f32.mrf.mxu0  ;;  %v1664_v63 = vpop.f32.mrf.mxu1 }
 0x107   :  { %v10587_v5 = vadd.f32 %v1664_v63, %v743_v41 }
 0x108   :  { %v755_v9 = vpop.f32.mrf.mxu0  ;;  %v1666_v10 = vpop.f32.mrf.mxu1 }
 0x109   :  { %v10589_v13 = vadd.f32 %v1666_v10, %v745_v48 }
 0x10a   :  { %v759_v14 = vpop.f32.mrf.mxu0  ;;  %8552 = vmatmul.mubr.msk.bf16.gmra.mxu0 %vm493_vm1, %v9732_v0  ;;  %v1670_v17 = vpop.f32.mrf.mxu1  ;;  %8652 = vmatmul.mubr.msk.bf16.gmra.mxu1 %vm493_vm1, %v9733_v3 }
 0x10b   :  { %v10593_v19 = vadd.f32 %v1670_v17, %v749_v52  ;;  %1007 = vmatprep.mubr.bf16.mxu0 %v14270_v1  ;;  %1918 = vmatprep.mubr.bf16.mxu1 %v14270_v1 }
 0x10c   :  { %v761_v20 = vpop.f32.mrf.mxu0  ;;  %v1672_v21 = vpop.f32.mrf.mxu1 }
 0x10d   :  { %v10600_v25 = vadd.f32 %v1672_v21, %v751_v58 }
 0x10e   :  { %v763_v28 = vpop.f32.mrf.mxu0  ;;  %v1674_v31 = vpop.f32.mrf.mxu1 }
 0x10f   :  { %v10611_v36 = vadd.f32 %v1674_v31, %v753_v62  ;;  %v9737_v62 = vld [vmem:[%s14261_s0 + $0x108] sm:$0xff]  }
 0x110   :  { %v765_v38 = vpop.f32.mrf.mxu0  ;;  %v1676_v41 = vpop.f32.mrf.mxu1  ;;  %v9738_v31 = vld [vmem:[%s14261_s0 + $0x128] sm:$0xff]  }
 0x111   :  { %v10613_v42 = vadd.f32 %v1676_v41, %v755_v9 }
 0x112   :  { %v769_v44 = vpop.f32.mrf.mxu0  ;;  %8553 = vmatmul.mubr.msk.bf16.gmra.mxu0 %vm493_vm1, %v9734_v33  ;;  %v1680_v45 = vpop.f32.mrf.mxu1  ;;  %8653 = vmatmul.mubr.msk.bf16.gmra.mxu1 %vm493_vm1, %v9735_v34  ;;  %v9739_v33 = vld [vmem:[%s14261_s0 + $0x110] sm:$0xff]  }
 0x113   :  { %v10617_v48 = vadd.f32 %v1680_v45, %v759_v14  ;;  %1017 = vmatprep.mubr.bf16.mxu0 %v14270_v1  ;;  %1928 = vmatprep.mubr.bf16.mxu1 %v14270_v1 }
 0x114   :  { %v771_v49 = vpop.f32.mrf.mxu0  ;;  %v1682_v52 = vpop.f32.mrf.mxu1 }
 0x115   :  { %v10621_v53 = vadd.f32 %v1682_v52, %v761_v20 }
 0x116   :  { %v773_v56 = vpop.f32.mrf.mxu0  ;;  %v1684_v58 = vpop.f32.mrf.mxu1 }
 0x117   :  { %v10629_v63 = vadd.f32 %v1684_v58, %v763_v28 }
 0x118   :  { %v775_v0 = vpop.f32.mrf.mxu0  ;;  %v1686_v3 = vpop.f32.mrf.mxu1 }
 0x119   :  { %v10631_v9 = vadd.f32 %v1686_v3, %v765_v38 }
 0x11a   :  { %v779_v10 = vpop.f32.mrf.mxu0  ;;  %8554 = vmatmul.mubr.msk.bf16.gmra.mxu0 %vm493_vm1, %v9736_v59  ;;  %v1690_v14 = vpop.f32.mrf.mxu1  ;;  %8654 = vmatmul.mubr.msk.bf16.gmra.mxu1 %vm493_vm1, %v9737_v62 }
 0x11b   :  { %v10635_v17 = vadd.f32 %v1690_v14, %v769_v44  ;;  %1027 = vmatprep.mubr.bf16.mxu0 %v14270_v1  ;;  %1938 = vmatprep.mubr.bf16.mxu1 %v14270_v1  ;;  %v9741_v14 = vld [vmem:[%s14261_s0 + $0x118] sm:$0xff]  }
 0x11c   :  { %v781_v20 = vpop.f32.mrf.mxu0  ;;  %v1692_v21 = vpop.f32.mrf.mxu1 }
 0x11d   :  { %v10639_v22 = vadd.f32 %v1692_v21, %v771_v49 }
 0x11e   :  { %v783_v27 = vpop.f32.mrf.mxu0  ;;  %v1694_v28 = vpop.f32.mrf.mxu1 }
 0x11f   :  { %v10647_v34 = vadd.f32 %v1694_v28, %v773_v56 }
 0x120   :  { %v785_v38 = vpop.f32.mrf.mxu0  ;;  %v1696_v41 = vpop.f32.mrf.mxu1 }
 0x121   :  { %v10649_v44 = vadd.f32 %v1696_v41, %v775_v0  ;;  %v9740_v0 = vld [vmem:[%s14261_s0 + $0x130] sm:$0xff]  }
 0x122   :  { %v789_v45 = vpop.f32.mrf.mxu0  ;;  %8555 = vmatmul.mubr.msk.bf16.gmra.mxu0 %vm493_vm1, %v9738_v31  ;;  %v1700_v49 = vpop.f32.mrf.mxu1  ;;  %8655 = vmatmul.mubr.msk.bf16.gmra.mxu1 %vm493_vm1, %v9739_v33 }
 0x123   :  { %v10653_v52 = vadd.f32 %v1700_v49, %v779_v10  ;;  %1037 = vmatprep.mubr.bf16.mxu0 %v14270_v1  ;;  %1948 = vmatprep.mubr.bf16.mxu1 %v14270_v1 }
 0x124   :  { %v791_v58 = vpop.f32.mrf.mxu0  ;;  %v1702_v59 = vpop.f32.mrf.mxu1 }
 0x125   :  { %v10657_v56 = vadd.f32 %v1702_v59, %v781_v20 }
 0x126   :  { %v793_v62 = vpop.f32.mrf.mxu0  ;;  %v1704_v3 = vpop.f32.mrf.mxu1 }
 0x127   :  { %v10665_v10 = vadd.f32 %v1704_v3, %v783_v27 }
 0x128   :  { %v795_v21 = vpop.f32.mrf.mxu0  ;;  %v1706_v28 = vpop.f32.mrf.mxu1 }
 0x129   :  { %v10667_v31 = vadd.f32 %v1706_v28, %v785_v38  ;;  %v9742_v38 = vld [vmem:[%s14261_s0 + $0x138] sm:$0xff]  }
 0x12a   :  { %v799_v33 = vpop.f32.mrf.mxu0  ;;  %8556 = vmatmul.mubr.msk.bf16.gmra.mxu0 %vm493_vm1, %v9740_v0  ;;  %v1710_v20 = vpop.f32.mrf.mxu1  ;;  %8656 = vmatmul.mubr.msk.bf16.gmra.mxu1 %vm493_vm1, %v9741_v14  ;;  %v9743_v0 = vld [vmem:[%s14261_s0 + $0x120] sm:$0xff]  }
 0x12b   :  { %v10671_v41 = vadd.f32 %v1710_v20, %v789_v45  ;;  %1047 = vmatprep.mubr.bf16.mxu0 %v14270_v1  ;;  %1958 = vmatprep.mubr.bf16.mxu1 %v14270_v1 }
 0x12c   :  { %v801_v49 = vpop.f32.mrf.mxu0  ;;  %v1712_v59 = vpop.f32.mrf.mxu1 }
 0x12d   :  { %v10675_v27 = vadd.f32 %v1712_v59, %v791_v58 }
 0x12e   :  { %v803_v3 = vpop.f32.mrf.mxu0  ;;  %v1714_v12 = vpop.f32.mrf.mxu1 }
 0x12f   :  { %14277 = vst [vmem:[#allocation6_spill] sm:$0xff] %v10675_v27  ;;  %v10683_v45 = vadd.f32 %v1714_v12, %v793_v62 }
 0x130   :  { %v805_v14 = vpop.f32.mrf.mxu0  ;;  %v1716_v28 = vpop.f32.mrf.mxu1 }
 0x131   :  { %14278 = vst [vmem:[#allocation7_spill] sm:$0xff] %v10683_v45  ;;  %v10685_v20 = vadd.f32 %v1716_v28, %v795_v21  ;;  %v9744_v21 = vld [vmem:[%s14261_s0 + $0x140] sm:$0xff]  }
 0x132   :  { %v809_v1 = vpop.f32.mrf.mxu0  ;;  %8557 = vmatmul.mubr.msk.bf16.gmra.mxu0 %vm493_vm1, %v9742_v38  ;;  %v1720_v58 = vpop.f32.mrf.mxu1  ;;  %8657 = vmatmul.mubr.msk.bf16.gmra.mxu1 %vm493_vm1, %v9743_v0  ;;  %v9745_v38 = vld [vmem:[%s14261_s0 + $0x128] sm:$0xff]  }
 0x133   :  { %14279 = vst [vmem:[#allocation8_spill] sm:$0xff] %v10685_v20  ;;  %v10689_v59 = vadd.f32 %v1720_v58, %v799_v33  ;;  %1057 = vmatprep.mubr.bf16.mxu0 %v14281_v8  ;;  %1968 = vmatprep.mubr.bf16.mxu1 %v14281_v8 }
 0x134   :  { %v811_v6 = vpop.f32.mrf.mxu0  ;;  %v1722_v4 = vpop.f32.mrf.mxu1 }
 0x135   :  { %14280 = vst [vmem:[#allocation9_spill] sm:$0xff] %v10689_v59  ;;  %v10693_v12 = vadd.f32 %v1722_v4, %v801_v49 }
 0x136   :  { %v813_v62 = vpop.f32.mrf.mxu0  ;;  %v1724_v45 = vpop.f32.mrf.mxu1 }
 0x137   :  { %14282 = vst [vmem:[#allocation10_spill] sm:$0xff] %v10693_v12  ;;  %v10701_v33 = vadd.f32 %v1724_v45, %v803_v3 }
 0x138   :  { %v815_v0 = vpop.f32.mrf.mxu0  ;;  %v1726_v28 = vpop.f32.mrf.mxu1 }
 0x139   :  { %14283 = vst [vmem:[#allocation11_spill] sm:$0xff] %v10701_v33  ;;  %v10703_v58 = vadd.f32 %v1726_v28, %v805_v14  ;;  %v9746_v14 = vld [vmem:[%s14261_s0 + $0x148] sm:$0xff]  }
 0x13a   :  { %v819_v59 = vpop.f32.mrf.mxu0  ;;  %8558 = vmatmul.mubr.msk.bf16.gmra.mxu0 %vm493_vm1, %v9744_v21  ;;  %v1730_v4 = vpop.f32.mrf.mxu1  ;;  %8658 = vmatmul.mubr.msk.bf16.gmra.mxu1 %vm493_vm1, %v9745_v38  ;;  %v9747_v21 = vld [vmem:[%s14261_s0 + $0x130] sm:$0xff]  }
 0x13b   :  { %14284 = vst [vmem:[#allocation12_spill] sm:$0xff] %v10703_v58  ;;  %v10707_v49 = vadd.f32 %v1730_v4, %v809_v1  ;;  %1067 = vmatprep.mubr.bf16.mxu0 %v14281_v8  ;;  %1978 = vmatprep.mubr.bf16.mxu1 %v14281_v8 }
 0x13c   :  { %v821_v12 = vpop.f32.mrf.mxu0  ;;  %v1732_v20 = vpop.f32.mrf.mxu1 }
 0x13d   :  { %14285 = vst [vmem:[#allocation13_spill] sm:$0xff] %v10707_v49  ;;  %v10711_v3 = vadd.f32 %v1732_v20, %v811_v6 }
 0x13e   :  { %v823_v45 = vpop.f32.mrf.mxu0  ;;  %v1734_v33 = vpop.f32.mrf.mxu1 }
 0x13f   :  { %14286 = vst [vmem:[#allocation14_spill] sm:$0xff] %v10711_v3  ;;  %v10719_v1 = vadd.f32 %v1734_v33, %v813_v62 }
 0x140   :  { %v825_v38 = vpop.f32.mrf.mxu0  ;;  %v1736_v28 = vpop.f32.mrf.mxu1 }
 0x141   :  { %14287 = vst [vmem:[#allocation15_spill] sm:$0xff] %v10719_v1  ;;  %v10721_v4 = vadd.f32 %v1736_v28, %v815_v0  ;;  %v9748_v0 = vld [vmem:[%s14261_s0 + $0x150] sm:$0xff]  }
 0x142   :  { %v829_v49 = vpop.f32.mrf.mxu0  ;;  %8559 = vmatmul.mubr.msk.bf16.gmra.mxu0 %vm493_vm1, %v9746_v14  ;;  %v1740_v6 = vpop.f32.mrf.mxu1  ;;  %8659 = vmatmul.mubr.msk.bf16.gmra.mxu1 %vm493_vm1, %v9747_v21  ;;  %v9749_v14 = vld [vmem:[%s14261_s0 + $0x138] sm:$0xff]  }
 0x143   :  { %14288 = vst [vmem:[#allocation16_spill] sm:$0xff] %v10721_v4  ;;  %v10725_v20 = vadd.f32 %v1740_v6, %v819_v59  ;;  %1077 = vmatprep.mubr.bf16.mxu0 %v14281_v8  ;;  %1988 = vmatprep.mubr.bf16.mxu1 %v14281_v8 }
 0x144   :  { %v831_v3 = vpop.f32.mrf.mxu0  ;;  %v1742_v58 = vpop.f32.mrf.mxu1 }
 0x145   :  { %14289 = vst [vmem:[#allocation17_spill] sm:$0xff] %v10725_v20  ;;  %v10729_v62 = vadd.f32 %v1742_v58, %v821_v12 }
 0x146   :  { %v833_v33 = vpop.f32.mrf.mxu0  ;;  %v1744_v1 = vpop.f32.mrf.mxu1 }
 0x147   :  { %14290 = vst [vmem:[#allocation18_spill] sm:$0xff] %v10729_v62  ;;  %v10737_v59 = vadd.f32 %v1744_v1, %v823_v45 }
 0x148   :  { %v835_v21 = vpop.f32.mrf.mxu0  ;;  %v1746_v28 = vpop.f32.mrf.mxu1 }
 0x149   :  { %14291 = vst [vmem:[#allocation19_spill] sm:$0xff] %v10737_v59  ;;  %v10739_v6 = vadd.f32 %v1746_v28, %v825_v38  ;;  %v9750_v38 = vld [vmem:[%s14261_s0 + $0x158] sm:$0xff]  }
 0x14a   :  { %v839_v20 = vpop.f32.mrf.mxu0  ;;  %8560 = vmatmul.mubr.msk.bf16.gmra.mxu0 %vm493_vm1, %v9748_v0  ;;  %v1750_v12 = vpop.f32.mrf.mxu1  ;;  %8660 = vmatmul.mubr.msk.bf16.gmra.mxu1 %vm493_vm1, %v9749_v14  ;;  %v9751_v0 = vld [vmem:[%s14261_s0 + $0x140] sm:$0xff]  }
 0x14b   :  { %14292 = vst [vmem:[#allocation20_spill] sm:$0xff] %v10739_v6  ;;  %v10743_v58 = vadd.f32 %v1750_v12, %v829_v49  ;;  %1087 = vmatprep.mubr.bf16.mxu0 %v14281_v8  ;;  %1998 = vmatprep.mubr.bf16.mxu1 %v14281_v8 }
 0x14c   :  { %v841_v62 = vpop.f32.mrf.mxu0  ;;  %v1752_v4 = vpop.f32.mrf.mxu1 }
 0x14d   :  { %14293 = vst [vmem:[#allocation21_spill] sm:$0xff] %v10743_v58  ;;  %v10747_v45 = vadd.f32 %v1752_v4, %v831_v3 }
 0x14e   :  { %v843_v1 = vpop.f32.mrf.mxu0  ;;  %v1754_v59 = vpop.f32.mrf.mxu1 }
 0x14f   :  { %14294 = vst [vmem:[#allocation22_spill] sm:$0xff] %v10747_v45  ;;  %v10755_v49 = vadd.f32 %v1754_v59, %v833_v33 }
 0x150   :  { %v845_v14 = vpop.f32.mrf.mxu0  ;;  %v1756_v28 = vpop.f32.mrf.mxu1 }
 0x151   :  { %14295 = vst [vmem:[#allocation23_spill] sm:$0xff] %v10755_v49  ;;  %v10757_v12 = vadd.f32 %v1756_v28, %v835_v21  ;;  %v9752_v21 = vld [vmem:[%s14261_s0 + $0x160] sm:$0xff]  }
 0x152   :  { %v849_v58 = vpop.f32.mrf.mxu0  ;;  %8561 = vmatmul.mubr.msk.bf16.gmra.mxu0 %vm493_vm1, %v9750_v38  ;;  %v1760_v3 = vpop.f32.mrf.mxu1  ;;  %8661 = vmatmul.mubr.msk.bf16.gmra.mxu1 %vm493_vm1, %v9751_v0  ;;  %v9753_v38 = vld [vmem:[%s14261_s0 + $0x148] sm:$0xff]  }
 0x153   :  { %14296 = vst [vmem:[#allocation24_spill] sm:$0xff] %v10757_v12  ;;  %v10761_v4 = vadd.f32 %v1760_v3, %v839_v20  ;;  %1097 = vmatprep.mubr.bf16.mxu0 %v14281_v8  ;;  %2008 = vmatprep.mubr.bf16.mxu1 %v14281_v8 }
 0x154   :  { %v851_v45 = vpop.f32.mrf.mxu0  ;;  %v1762_v6 = vpop.f32.mrf.mxu1 }
 0x155   :  { %14297 = vst [vmem:[#allocation25_spill] sm:$0xff] %v10761_v4  ;;  %v10765_v33 = vadd.f32 %v1762_v6, %v841_v62 }
 0x156   :  { %v853_v59 = vpop.f32.mrf.mxu0  ;;  %v1764_v49 = vpop.f32.mrf.mxu1 }
 0x157   :  { %14298 = vst [vmem:[#allocation26_spill] sm:$0xff] %v10765_v33  ;;  %v10773_v20 = vadd.f32 %v1764_v49, %v843_v1 }
 0x158   :  { %v855_v0 = vpop.f32.mrf.mxu0  ;;  %v1766_v28 = vpop.f32.mrf.mxu1 }
 0x159   :  { %14299 = vst [vmem:[#allocation27_spill] sm:$0xff] %v10773_v20  ;;  %v10775_v3 = vadd.f32 %v1766_v28, %v845_v14  ;;  %v9754_v14 = vld [vmem:[%s14261_s0 + $0x168] sm:$0xff]  }
 0x15a   :  { %v859_v4 = vpop.f32.mrf.mxu0  ;;  %8562 = vmatmul.mubr.msk.bf16.gmra.mxu0 %vm493_vm1, %v9752_v21  ;;  %v1770_v62 = vpop.f32.mrf.mxu1  ;;  %8662 = vmatmul.mubr.msk.bf16.gmra.mxu1 %vm493_vm1, %v9753_v38  ;;  %v9755_v21 = vld [vmem:[%s14261_s0 + $0x150] sm:$0xff]  }
 0x15b   :  { %14300 = vst [vmem:[#allocation28_spill] sm:$0xff] %v10775_v3  ;;  %v10779_v6 = vadd.f32 %v1770_v62, %v849_v58  ;;  %1107 = vmatprep.mubr.bf16.mxu0 %v14281_v8  ;;  %2018 = vmatprep.mubr.bf16.mxu1 %v14281_v8 }
 0x15c   :  { %v861_v33 = vpop.f32.mrf.mxu0  ;;  %v1772_v12 = vpop.f32.mrf.mxu1 }
 0x15d   :  { %14301 = vst [vmem:[#allocation29_spill] sm:$0xff] %v10779_v6  ;;  %v10783_v1 = vadd.f32 %v1772_v12, %v851_v45 }
 0x15e   :  { %v863_v49 = vpop.f32.mrf.mxu0  ;;  %v1774_v20 = vpop.f32.mrf.mxu1 }
 0x15f   :  { %14302 = vst [vmem:[#allocation30_spill] sm:$0xff] %v10783_v1  ;;  %v10791_v58 = vadd.f32 %v1774_v20, %v853_v59 }
 0x160   :  { %v865_v38 = vpop.f32.mrf.mxu0  ;;  %v1776_v28 = vpop.f32.mrf.mxu1 }
 0x161   :  { %14303 = vst [vmem:[#allocation31_spill] sm:$0xff] %v10791_v58  ;;  %v10793_v62 = vadd.f32 %v1776_v28, %v855_v0  ;;  %v9756_v0 = vld [vmem:[%s14261_s0 + $0x170] sm:$0xff]  }
 0x162   :  { %v869_v6 = vpop.f32.mrf.mxu0  ;;  %8563 = vmatmul.mubr.msk.bf16.gmra.mxu0 %vm493_vm1, %v9754_v14  ;;  %v1780_v45 = vpop.f32.mrf.mxu1  ;;  %8663 = vmatmul.mubr.msk.bf16.gmra.mxu1 %vm493_vm1, %v9755_v21  ;;  %v9757_v14 = vld [vmem:[%s14261_s0 + $0x158] sm:$0xff]  }
 0x163   :  { %14304 = vst [vmem:[#allocation32_spill] sm:$0xff] %v10793_v62  ;;  %v10797_v12 = vadd.f32 %v1780_v45, %v859_v4  ;;  %1117 = vmatprep.mubr.bf16.mxu0 %v14281_v8  ;;  %2028 = vmatprep.mubr.bf16.mxu1 %v14281_v8 }
 0x164   :  { %v871_v1 = vpop.f32.mrf.mxu0  ;;  %v1782_v3 = vpop.f32.mrf.mxu1 }
 0x165   :  { %14305 = vst [vmem:[#allocation33_spill] sm:$0xff] %v10797_v12  ;;  %v10801_v59 = vadd.f32 %v1782_v3, %v861_v33 }
 0x166   :  { %v873_v20 = vpop.f32.mrf.mxu0  ;;  %v1784_v58 = vpop.f32.mrf.mxu1 }
 0x167   :  { %14306 = vst [vmem:[#allocation34_spill] sm:$0xff] %v10801_v59  ;;  %v10809_v4 = vadd.f32 %v1784_v58, %v863_v49 }
 0x168   :  { %v875_v21 = vpop.f32.mrf.mxu0  ;;  %v1786_v28 = vpop.f32.mrf.mxu1 }
 0x169   :  { %14307 = vst [vmem:[#allocation35_spill] sm:$0xff] %v10809_v4  ;;  %v10811_v45 = vadd.f32 %v1786_v28, %v865_v38  ;;  %v9758_v38 = vld [vmem:[%s14261_s0 + $0x178] sm:$0xff]  }
 0x16a   :  { %v879_v12 = vpop.f32.mrf.mxu0  ;;  %8564 = vmatmul.mubr.msk.bf16.gmra.mxu0 %vm493_vm1, %v9756_v0  ;;  %v1790_v33 = vpop.f32.mrf.mxu1  ;;  %8664 = vmatmul.mubr.msk.bf16.gmra.mxu1 %vm493_vm1, %v9757_v14  ;;  %v9759_v0 = vld [vmem:[%s14261_s0 + $0x160] sm:$0xff]  }
 0x16b   :  { %14308 = vst [vmem:[#allocation36_spill] sm:$0xff] %v10811_v45  ;;  %v10815_v3 = vadd.f32 %v1790_v33, %v869_v6  ;;  %1127 = vmatprep.mubr.bf16.mxu0 %v14281_v8  ;;  %2038 = vmatprep.mubr.bf16.mxu1 %v14281_v8 }
 0x16c   :  { %v881_v59 = vpop.f32.mrf.mxu0  ;;  %v1792_v62 = vpop.f32.mrf.mxu1 }
 0x16d   :  { %14309 = vst [vmem:[#allocation37_spill] sm:$0xff] %v10815_v3  ;;  %v10819_v49 = vadd.f32 %v1792_v62, %v871_v1 }
 0x16e   :  { %v883_v58 = vpop.f32.mrf.mxu0  ;;  %v1794_v4 = vpop.f32.mrf.mxu1 }
 0x16f   :  { %14310 = vst [vmem:[#allocation38_spill] sm:$0xff] %v10819_v49  ;;  %v10827_v6 = vadd.f32 %v1794_v4, %v873_v20 }
 0x170   :  { %v885_v14 = vpop.f32.mrf.mxu0  ;;  %v1796_v28 = vpop.f32.mrf.mxu1 }
 0x171   :  { %14311 = vst [vmem:[#allocation39_spill] sm:$0xff] %v10827_v6  ;;  %v10829_v33 = vadd.f32 %v1796_v28, %v875_v21  ;;  %v9763_v21 = vld [vmem:[%s14261_s0 + $0x180] sm:$0xff]  }
 0x172   :  { %v889_v3 = vpop.f32.mrf.mxu0  ;;  %8565 = vmatmul.mubr.msk.bf16.gmra.mxu0 %vm493_vm1, %v9758_v38  ;;  %v1800_v1 = vpop.f32.mrf.mxu1  ;;  %8665 = vmatmul.mubr.msk.bf16.gmra.mxu1 %vm493_vm1, %v9759_v0  ;;  %v9764_v38 = vld [vmem:[%s14261_s0 + $0x168] sm:$0xff]  }
 0x173   :  { %14312 = vst [vmem:[#allocation40_spill] sm:$0xff] %v10829_v33  ;;  %v10833_v62 = vadd.f32 %v1800_v1, %v879_v12  ;;  %1137 = vmatprep.mubr.bf16.mxu0 %v14281_v8  ;;  %2048 = vmatprep.mubr.bf16.mxu1 %v14281_v8 }
 0x174   :  { %v891_v49 = vpop.f32.mrf.mxu0  ;;  %v1802_v45 = vpop.f32.mrf.mxu1 }
 0x175   :  { %14313 = vst [vmem:[#allocation41_spill] sm:$0xff] %v10833_v62  ;;  %v10837_v20 = vadd.f32 %v1802_v45, %v881_v59 }
 0x176   :  { %v893_v4 = vpop.f32.mrf.mxu0  ;;  %v1804_v6 = vpop.f32.mrf.mxu1 }
 0x177   :  { %14314 = vst [vmem:[#allocation42_spill] sm:$0xff] %v10837_v20  ;;  %v10845_v12 = vadd.f32 %v1804_v6, %v883_v58  ;;  %v9769_v58 = vld [vmem:[%s14260_s1 + $0x90] ss:$8 sps:$4 sm:$0x3f]  }
 0x178   :  { %v895_v0 = vpop.f32.mrf.mxu0  ;;  %v1806_v28 = vpop.f32.mrf.mxu1 }
 0x179   :  { %14315 = vst [vmem:[#allocation43_spill] sm:$0xff] %v10845_v12  ;;  %v10847_v1 = vadd.f32 %v1806_v28, %v885_v14 }
 0x17a   :  { %v899_v62 = vpop.f32.mrf.mxu0  ;;  %8566 = vmatmul.mubr.msk.bf16.gmra.mxu0 %vm493_vm1, %v9763_v21  ;;  %v1810_v59 = vpop.f32.mrf.mxu1  ;;  %8666 = vmatmul.mubr.msk.bf16.gmra.mxu1 %vm493_vm1, %v9764_v38  ;;  %v9765_v21 = vld [vmem:[%s14261_s0 + $0x170] sm:$0xff]  }
 0x17b   :  { %14316 = vst [vmem:[#allocation44_spill] sm:$0xff] %v10847_v1  ;;  %v10851_v45 = vadd.f32 %v1810_v59, %v889_v3  ;;  %2058 = vmatprep.mubr.bf16.mxu1 %v14281_v8  ;;  %2621 = vmatprep.mubr.bf16.mxu0 %v14281_v8  ;;  %v9766_v3 = vld [vmem:[%s14261_s0 + $0x20] sm:$0xff]   ;;  %v5014_v1 = vsel %vm638_vm0, %v9769_v58, 0 }
 0x17c   :  { %v901_v20 = vpop.f32.mrf.mxu0  ;;  %v1812_v33 = vpop.f32.mrf.mxu1 }
 0x17d   :  { %14317 = vst [vmem:[#allocation45_spill] sm:$0xff] %v10851_v45  ;;  %v10858_v6 = vadd.f32 %v1812_v33, %v891_v49 }
 0x17e   :  { %v903_v14 = vpop.f32.mrf.mxu0  ;;  %v1814_v28 = vpop.f32.mrf.mxu1 }
 0x17f   :  { %14318 = vst [vmem:[#allocation46_spill] sm:$0xff] %v10858_v6  ;;  %v10866_v38 = vadd.f32 %v1814_v28, %v893_v4 }
 0x180   :  { %v905_v59 = vpop.f32.mrf.mxu0  ;;  %v1816_v45 = vpop.f32.mrf.mxu1 }
 0x181   :  { %v10869_v12 = vadd.f32 %v1816_v45, %v895_v0  ;;  %v9770_v45 = vld [vmem:[%s14261_s0 + $0x178] sm:$0xff]  }
 0x182   :  { %v909_v49 = vpop.f32.mrf.mxu0  ;;  %v1820_v33 = vpop.f32.mrf.mxu1  ;;  %8667 = vmatmul.mubr.msk.bf16.gmra.mxu1 %vm493_vm1, %v9765_v21  ;;  %8822 = vmatmul.mubr.msk.bf16.vlgmr.msra.gmra.mxu0 %vm493_vm1, %v9766_v3 }
 0x183   :  { %14319 = vst [vmem:[#allocation47_spill] sm:$0xff] %v10869_v12  ;;  %v10873_v6 = vadd.f32 %v1820_v33, %v899_v62  ;;  %5032 = vmatpush1.bf16.msra.mxu0 %v5014_v1  ;;  %2068 = vmatprep.mubr.bf16.mxu1 %v14281_v8  ;;  %v9771_v62 = vld [vmem:[%s14261_s0 + $0x28] sm:$0xff]  }
 0x184   :  { %v911_v27 = vpop.f32.mrf.mxu0  ;;  %v1822_v4 = vpop.f32.mrf.mxu1  ;;  %2631 = vmatprep.mubr.bf16.mxu0 %v14281_v8 }
 0x185   :  { %14320 = vst [vmem:[#allocation48_spill] sm:$0xff] %v10873_v6  ;;  %v10877_v28 = vadd.f32 %v1822_v4, %v901_v20 }
 0x186   :  { %v913_v58 = vpop.f32.mrf.mxu0  ;;  %v1824_v0 = vpop.f32.mrf.mxu1 }
 0x187   :  { %14321 = vst [vmem:[#allocation49_spill] sm:$0xff] %v10877_v28  ;;  %v10885_v21 = vadd.f32 %v1824_v0, %v903_v14 }
 0x188   :  { %v915_v1 = vpop.f32.mrf.mxu0  ;;  %v1826_v3 = vpop.f32.mrf.mxu1 }
 0x189   :  { %14322 = vst [vmem:[#allocation50_spill] sm:$0xff] %v10885_v21  ;;  %v10887_v33 = vadd.f32 %v1826_v3, %v905_v59  ;;  %v9775_v59 = vld [vmem:[%s14261_s0 + $0x30] sm:$0xff]  }
 0x18a   :  { %v919_v6 = vpop.f32.mrf.mxu0  ;;  %v1830_v12 = vpop.f32.mrf.mxu1  ;;  %8668 = vmatmul.mubr.msk.bf16.gmra.mxu1 %vm493_vm1, %v9770_v45  ;;  %8823 = vmatmul.mubr.msk.bf16.gmra.mxu0 %vm493_vm1, %v9771_v62  ;;  %v9776_v45 = vld [vmem:[%s14261_s0 + $0x30] sm:$0xff]  }
 0x18b   :  { %14323 = vst [vmem:[#allocation51_spill] sm:$0xff] %v10887_v33  ;;  %v10891_v20 = vadd.f32 %v1830_v12, %v909_v49  ;;  %2641 = vmatprep.mubr.bf16.mxu0 %v14281_v8  ;;  %3836 = vmatprep.mubr.bf16.mxu1 %v14281_v8 }
 0x18c   :  { %v921_v4 = vpop.f32.mrf.mxu0  ;;  %v1832_v28 = vpop.f32.mrf.mxu1 }
 0x18d   :  { %14324 = vst [vmem:[#allocation52_spill] sm:$0xff] %v10891_v20  ;;  %v10895_v14 = vadd.f32 %v1832_v28, %v911_v27 }
 0x18e   :  { %v923_v0 = vpop.f32.mrf.mxu0  ;;  %v1834_v21 = vpop.f32.mrf.mxu1 }
 0x18f   :  { %14325 = vst [vmem:[#allocation53_spill] sm:$0xff] %v10895_v14  ;;  %v10903_v12 = vadd.f32 %v1834_v21, %v913_v58 }
 0x190   :  { %v925_v49 = vpop.f32.mrf.mxu0  ;;  %v1836_v62 = vpop.f32.mrf.mxu1 }
 0x191   :  { %14326 = vst [vmem:[#allocation54_spill] sm:$0xff] %v10903_v12  ;;  %v10905_v3 = vadd.f32 %v1836_v62, %v915_v1  ;;  %v9777_v1 = vld [vmem:[%s14261_s0 + $0x38] sm:$0xff]  }
 0x192   :  { %v929_v20 = vpop.f32.mrf.mxu0  ;;  %v1840_v33 = vpop.f32.mrf.mxu1  ;;  %8824 = vmatmul.mubr.msk.bf16.gmra.mxu0 %vm493_vm1, %v9775_v59  ;;  %9023 = vmatmul.mubr.msk.bf16.vlgmr.msra.gmra.mxu1 %vm493_vm1, %v9776_v45  ;;  %v9778_v59 = vld [vmem:[%s14261_s0 + $0x38] sm:$0xff]  }
 0x193   :  { %14327 = vst [vmem:[#allocation55_spill] sm:$0xff] %v10905_v3  ;;  %v10909_v27 = vadd.f32 %v1840_v33, %v919_v6  ;;  %2651 = vmatprep.mubr.bf16.mxu0 %v14281_v8  ;;  %3846 = vmatprep.mubr.bf16.mxu1 %v14281_v8 }
 0x194   :  { %v931_v28 = vpop.f32.mrf.mxu0  ;;  %v1842_v14 = vpop.f32.mrf.mxu1 }
 0x195   :  { %14328 = vst [vmem:[#allocation56_spill] sm:$0xff] %v10909_v27  ;;  %v10913_v58 = vadd.f32 %v1842_v14, %v921_v4 }
 0x196   :  { %v933_v21 = vpop.f32.mrf.mxu0  ;;  %v1844_v12 = vpop.f32.mrf.mxu1 }
 0x197   :  { %14329 = vst [vmem:[#allocation57_spill] sm:$0xff] %v10913_v58  ;;  %v10921_v6 = vadd.f32 %v1844_v12, %v923_v0 }
 0x198   :  { %v935_v33 = vpop.f32.mrf.mxu0  ;;  %v1846_v45 = vpop.f32.mrf.mxu1 }
 0x199   :  { %14330 = vst [vmem:[#allocation58_spill] sm:$0xff] %v10921_v6  ;;  %v10923_v62 = vadd.f32 %v1846_v45, %v925_v49  ;;  %v9779_v49 = vld [vmem:[%s14261_s0 + $0x40] sm:$0xff]  }
 0x19a   :  { %v939_v27 = vpop.f32.mrf.mxu0  ;;  %v1850_v3 = vpop.f32.mrf.mxu1  ;;  %8825 = vmatmul.mubr.msk.bf16.gmra.mxu0 %vm493_vm1, %v9777_v1  ;;  %9024 = vmatmul.mubr.msk.bf16.gmra.mxu1 %vm493_vm1, %v9778_v59  ;;  %v9780_v1 = vld [vmem:[%s14261_s0 + $0x40] sm:$0xff]  }
 0x19b   :  { %14331 = vst [vmem:[#allocation59_spill] sm:$0xff] %v10923_v62  ;;  %v10927_v4 = vadd.f32 %v1850_v3, %v929_v20  ;;  %2661 = vmatprep.mubr.bf16.mxu0 %v14281_v8  ;;  %3856 = vmatprep.mubr.bf16.mxu1 %v14281_v8 }
 0x19c   :  { %v941_v14 = vpop.f32.mrf.mxu0  ;;  %v1852_v58 = vpop.f32.mrf.mxu1 }
 0x19d   :  { %14332 = vst [vmem:[#allocation60_spill] sm:$0xff] %v10927_v4  ;;  %v10931_v0 = vadd.f32 %v1852_v58, %v931_v28 }
 0x19e   :  { %v943_v12 = vpop.f32.mrf.mxu0  ;;  %v1854_v6 = vpop.f32.mrf.mxu1 }
 0x19f   :  { %14333 = vst [vmem:[#allocation61_spill] sm:$0xff] %v10931_v0  ;;  %v10939_v20 = vadd.f32 %v1854_v6, %v933_v21 }
 0x1a0   :  { %v945_v3 = vpop.f32.mrf.mxu0  ;;  %v1856_v59 = vpop.f32.mrf.mxu1 }
 0x1a1   :  { %14334 = vst [vmem:[#allocation62_spill] sm:$0xff] %v10939_v20  ;;  %v10941_v45 = vadd.f32 %v1856_v59, %v935_v33  ;;  %v9781_v33 = vld [vmem:[%s14261_s0 + $0x48] sm:$0xff]  }
 0x1a2   :  { %v949_v4 = vpop.f32.mrf.mxu0  ;;  %v1860_v62 = vpop.f32.mrf.mxu1  ;;  %8826 = vmatmul.mubr.msk.bf16.gmra.mxu0 %vm493_vm1, %v9779_v49  ;;  %9025 = vmatmul.mubr.msk.bf16.gmra.mxu1 %vm493_vm1, %v9780_v1  ;;  %v9782_v49 = vld [vmem:[%s14261_s0 + $0x48] sm:$0xff]  }
 0x1a3   :  { %14335 = vst [vmem:[#allocation63_spill] sm:$0xff] %v10941_v45  ;;  %v10945_v28 = vadd.f32 %v1860_v62, %v939_v27  ;;  %2671 = vmatprep.mubr.bf16.mxu0 %v14281_v8  ;;  %3866 = vmatprep.mubr.bf16.mxu1 %v14281_v8 }
 0x1a4   :  { %v951_v58 = vpop.f32.mrf.mxu0  ;;  %v1862_v0 = vpop.f32.mrf.mxu1 }
 0x1a5   :  { %14336 = vst [vmem:[#allocation64_spill] sm:$0xff] %v10945_v28  ;;  %v10949_v21 = vadd.f32 %v1862_v0, %v941_v14 }
 0x1a6   :  { %v953_v6 = vpop.f32.mrf.mxu0  ;;  %v1864_v20 = vpop.f32.mrf.mxu1 }
 0x1a7   :  { %14337 = vst [vmem:[#allocation65_spill] sm:$0xff] %v10949_v21  ;;  %v10957_v27 = vadd.f32 %v1864_v20, %v943_v12 }
 0x1a8   :  { %v955_v62 = vpop.f32.mrf.mxu0  ;;  %v1866_v1 = vpop.f32.mrf.mxu1 }
 0x1a9   :  { %14338 = vst [vmem:[#allocation66_spill] sm:$0xff] %v10957_v27  ;;  %v10959_v59 = vadd.f32 %v1866_v1, %v945_v3  ;;  %v9783_v3 = vld [vmem:[%s14261_s0 + $0x50] sm:$0xff]  }
 0x1aa   :  { %v959_v28 = vpop.f32.mrf.mxu0  ;;  %v1870_v45 = vpop.f32.mrf.mxu1  ;;  %8827 = vmatmul.mubr.msk.bf16.gmra.mxu0 %vm493_vm1, %v9781_v33  ;;  %9026 = vmatmul.mubr.msk.bf16.gmra.mxu1 %vm493_vm1, %v9782_v49  ;;  %v9784_v33 = vld [vmem:[%s14261_s0 + $0x50] sm:$0xff]  }
 0x1ab   :  { %14339 = vst [vmem:[#allocation67_spill] sm:$0xff] %v10959_v59  ;;  %v10963_v14 = vadd.f32 %v1870_v45, %v949_v4  ;;  %2681 = vmatprep.mubr.bf16.mxu0 %v14281_v8  ;;  %3876 = vmatprep.mubr.bf16.mxu1 %v14281_v8 }
 0x1ac   :  { %v961_v0 = vpop.f32.mrf.mxu0  ;;  %v1872_v21 = vpop.f32.mrf.mxu1 }
 0x1ad   :  { %14340 = vst [vmem:[#allocation68_spill] sm:$0xff] %v10963_v14  ;;  %v10967_v12 = vadd.f32 %v1872_v21, %v951_v58 }
 0x1ae   :  { %v963_v20 = vpop.f32.mrf.mxu0  ;;  %v1874_v27 = vpop.f32.mrf.mxu1 }
 0x1af   :  { %14341 = vst [vmem:[#allocation69_spill] sm:$0xff] %v10967_v12  ;;  %v10975_v4 = vadd.f32 %v1874_v27, %v953_v6 }
 0x1b0   :  { %v965_v45 = vpop.f32.mrf.mxu0  ;;  %v1876_v49 = vpop.f32.mrf.mxu1 }
 0x1b1   :  { %14342 = vst [vmem:[#allocation70_spill] sm:$0xff] %v10975_v4  ;;  %v10977_v1 = vadd.f32 %v1876_v49, %v955_v62  ;;  %v9785_v62 = vld [vmem:[%s14261_s0 + $0x58] sm:$0xff]  }
 0x1b2   :  { %v969_v14 = vpop.f32.mrf.mxu0  ;;  %v1880_v59 = vpop.f32.mrf.mxu1  ;;  %8828 = vmatmul.mubr.msk.bf16.gmra.mxu0 %vm493_vm1, %v9783_v3  ;;  %9027 = vmatmul.mubr.msk.bf16.gmra.mxu1 %vm493_vm1, %v9784_v33  ;;  %v9786_v3 = vld [vmem:[%s14261_s0 + $0x58] sm:$0xff]  }
 0x1b3   :  { %14343 = vst [vmem:[#allocation71_spill] sm:$0xff] %v10977_v1  ;;  %v10981_v58 = vadd.f32 %v1880_v59, %v959_v28  ;;  %2691 = vmatprep.mubr.bf16.mxu0 %v14281_v8  ;;  %3886 = vmatprep.mubr.bf16.mxu1 %v14281_v8 }
 0x1b4   :  { %v971_v21 = vpop.f32.mrf.mxu0  ;;  %v1882_v12 = vpop.f32.mrf.mxu1 }
 0x1b5   :  { %14344 = vst [vmem:[#allocation72_spill] sm:$0xff] %v10981_v58  ;;  %v10985_v6 = vadd.f32 %v1882_v12, %v961_v0 }
 0x1b6   :  { %v973_v27 = vpop.f32.mrf.mxu0  ;;  %v1884_v4 = vpop.f32.mrf.mxu1 }
 0x1b7   :  { %14345 = vst [vmem:[#allocation73_spill] sm:$0xff] %v10985_v6  ;;  %v10993_v28 = vadd.f32 %v1884_v4, %v963_v20 }
 0x1b8   :  { %v975_v59 = vpop.f32.mrf.mxu0  ;;  %v1886_v33 = vpop.f32.mrf.mxu1 }
 0x1b9   :  { %14346 = vst [vmem:[#allocation74_spill] sm:$0xff] %v10993_v28  ;;  %v10995_v49 = vadd.f32 %v1886_v33, %v965_v45  ;;  %v9787_v45 = vld [vmem:[%s14261_s0 + $0x60] sm:$0xff]  }
 0x1ba   :  { %v979_v58 = vpop.f32.mrf.mxu0  ;;  %v1890_v1 = vpop.f32.mrf.mxu1  ;;  %8829 = vmatmul.mubr.msk.bf16.gmra.mxu0 %vm493_vm1, %v9785_v62  ;;  %9028 = vmatmul.mubr.msk.bf16.gmra.mxu1 %vm493_vm1, %v9786_v3  ;;  %v9788_v62 = vld [vmem:[%s14261_s0 + $0x60] sm:$0xff]  }
 0x1bb   :  { %14347 = vst [vmem:[#allocation75_spill] sm:$0xff] %v10995_v49  ;;  %v10999_v0 = vadd.f32 %v1890_v1, %v969_v14  ;;  %2701 = vmatprep.mubr.bf16.mxu0 %v14281_v8  ;;  %3896 = vmatprep.mubr.bf16.mxu1 %v14281_v8 }
 0x1bc   :  { %v981_v12 = vpop.f32.mrf.mxu0  ;;  %v1892_v6 = vpop.f32.mrf.mxu1 }
 0x1bd   :  { %14348 = vst [vmem:[#allocation76_spill] sm:$0xff] %v10999_v0  ;;  %v11003_v20 = vadd.f32 %v1892_v6, %v971_v21  ;;  %v9821_v6 = vld [vmem:[%s14260_s1 + $0x80] ss:$8 sps:$4 sm:$0xff]  }
 0x1be   :  { %v983_v4 = vpop.f32.mrf.mxu0  ;;  %v1894_v28 = vpop.f32.mrf.mxu1 }
 0x1bf   :  { %14349 = vst [vmem:[#allocation77_spill] sm:$0xff] %v11003_v20  ;;  %v11011_v14 = vadd.f32 %v1894_v28, %v973_v27  ;;  %v9823_v27 = vld [vmem:[%s14260_s1 + $0x84] ss:$8 sps:$4 sm:$0xff]  }
 0x1c0   :  { %v985_v1 = vpop.f32.mrf.mxu0  ;;  %v1896_v3 = vpop.f32.mrf.mxu1  ;;  %5033 = vmatprep.subr.bf16.mxu0 %v9823_v27 }
 0x1c1   :  { %14350 = vst [vmem:[#allocation78_spill] sm:$0xff] %v11011_v14  ;;  %v11013_v33 = vadd.f32 %v1896_v3, %v975_v59  ;;  %5034 = vmatpush1.bf16.msra.mxu0 %v9821_v6 }
 0x1c2   :  { %v989_v0 = vpop.f32.mrf.mxu0  ;;  %v1900_v49 = vpop.f32.mrf.mxu1  ;;  %8830 = vmatmul.mubr.msk.bf16.gmra.mxu0 %vm493_vm1, %v9787_v45  ;;  %9029 = vmatmul.mubr.msk.bf16.gmra.mxu1 %vm493_vm1, %v9788_v62  ;;  %v9790_v62 = vld [vmem:[%s14261_s0 + $0x68] sm:$0xff]  }
 0x1c3   :  { %14351 = vst [vmem:[#allocation79_spill] sm:$0xff] %v11013_v33  ;;  %v11017_v21 = vadd.f32 %v1900_v49, %v979_v58  ;;  %2711 = vmatprep.mubr.bf16.mxu0 %v14281_v8  ;;  %3906 = vmatprep.mubr.bf16.mxu1 %v14281_v8  ;;  %v9789_v49 = vld [vmem:[%s14261_s0 + $0x68] sm:$0xff]  }
 0x1c4   :  { %v991_v28 = vpop.f32.mrf.mxu0  ;;  %v1902_v59 = vpop.f32.mrf.mxu1 }
 0x1c5   :  { %14352 = vst [vmem:[#allocation80_spill] sm:$0xff] %v11017_v21  ;;  %v11027_v3 = vadd.f32 %v1902_v59, %v981_v12 }
 0x1c6   :  { %v993_v45 = vpop.f32.mrf.mxu0  ;;  %v1904_v58 = vpop.f32.mrf.mxu1 }
 0x1c7   :  { %14353 = vst [vmem:[#allocation81_spill] sm:$0xff] %v11027_v3  ;;  %v11035_v21 = vadd.f32 %v1904_v58, %v983_v4 }
 0x1c8   :  { %v995_v33 = vpop.f32.mrf.mxu0  ;;  %v1906_v14 = vpop.f32.mrf.mxu1 }
 0x1c9   :  { %14354 = vst [vmem:[#allocation82_spill] sm:$0xff] %v11035_v21  ;;  %v11037_v20 = vadd.f32 %v1906_v14, %v985_v1  ;;  %v9791_v14 = vld [vmem:[%s14261_s0 + $0x70] sm:$0xff]  }
 0x1ca   :  { %v999_v12 = vpop.f32.mrf.mxu0  ;;  %v1910_v59 = vpop.f32.mrf.mxu1  ;;  %8831 = vmatmul.mubr.msk.bf16.gmra.mxu0 %vm493_vm1, %v9789_v49  ;;  %9030 = vmatmul.mubr.msk.bf16.gmra.mxu1 %vm493_vm1, %v9790_v62  ;;  %v9792_v1 = vld [vmem:[%s14261_s0 + $0x70] sm:$0xff]  }
 0x1cb   :  { %14355 = vst [vmem:[#allocation83_spill] sm:$0xff] %v11037_v20  ;;  %v11041_v27 = vadd.f32 %v1910_v59, %v989_v0  ;;  %2721 = vmatprep.mubr.bf16.mxu0 %v14281_v8  ;;  %3916 = vmatprep.mubr.bf16.mxu1 %v14281_v8 }
 0x1cc   :  { %v1001_v3 = vpop.f32.mrf.mxu0  ;;  %v1912_v6 = vpop.f32.mrf.mxu1 }
 0x1cd   :  { %14356 = vst [vmem:[#allocation84_spill] sm:$0xff] %v11041_v27  ;;  %v11045_v4 = vadd.f32 %v1912_v6, %v991_v28 }
 0x1ce   :  { %v1003_v58 = vpop.f32.mrf.mxu0  ;;  %v1914_v21 = vpop.f32.mrf.mxu1 }
 0x1cf   :  { %14357 = vst [vmem:[#allocation85_spill] sm:$0xff] %v11045_v4  ;;  %v11053_v0 = vadd.f32 %v1914_v21, %v993_v45 }
 0x1d0   :  { %v1005_v49 = vpop.f32.mrf.mxu0  ;;  %v1916_v62 = vpop.f32.mrf.mxu1 }
 0x1d1   :  { %14358 = vst [vmem:[#allocation86_spill] sm:$0xff] %v11053_v0  ;;  %v11055_v59 = vadd.f32 %v1916_v62, %v995_v33  ;;  %v9793_v33 = vld [vmem:[%s14261_s0 + $0x78] sm:$0xff]  }
 0x1d2   :  { %v1009_v27 = vpop.f32.mrf.mxu0  ;;  %v1920_v20 = vpop.f32.mrf.mxu1  ;;  %8832 = vmatmul.mubr.msk.bf16.gmra.mxu0 %vm493_vm1, %v9791_v14  ;;  %9031 = vmatmul.mubr.msk.bf16.gmra.mxu1 %vm493_vm1, %v9792_v1  ;;  %v9794_v14 = vld [vmem:[%s14261_s0 + $0x78] sm:$0xff]  }
 0x1d3   :  { %14359 = vst [vmem:[#allocation87_spill] sm:$0xff] %v11055_v59  ;;  %v11059_v28 = vadd.f32 %v1920_v20, %v999_v12  ;;  %2731 = vmatprep.mubr.bf16.mxu0 %v14281_v8  ;;  %3926 = vmatprep.mubr.bf16.mxu1 %v14281_v8 }
 0x1d4   :  { %v1011_v6 = vpop.f32.mrf.mxu0  ;;  %v1922_v4 = vpop.f32.mrf.mxu1 }
 0x1d5   :  { %14360 = vst [vmem:[#allocation88_spill] sm:$0xff] %v11059_v28  ;;  %v11063_v21 = vadd.f32 %v1922_v4, %v1001_v3 }
 0x1d6   :  { %v1013_v45 = vpop.f32.mrf.mxu0  ;;  %v1924_v0 = vpop.f32.mrf.mxu1 }
 0x1d7   :  { %14361 = vst [vmem:[#allocation89_spill] sm:$0xff] %v11063_v21  ;;  %v11071_v20 = vadd.f32 %v1924_v0, %v1003_v58 }
 0x1d8   :  { %v1015_v12 = vpop.f32.mrf.mxu0  ;;  %v1926_v1 = vpop.f32.mrf.mxu1 }
 0x1d9   :  { %14362 = vst [vmem:[#allocation90_spill] sm:$0xff] %v11071_v20  ;;  %v11073_v62 = vadd.f32 %v1926_v1, %v1005_v49  ;;  %v9795_v49 = vld [vmem:[%s14261_s0 + $0x80] sm:$0xff]  }
 0x1da   :  { %v1019_v28 = vpop.f32.mrf.mxu0  ;;  %v1930_v59 = vpop.f32.mrf.mxu1  ;;  %8833 = vmatmul.mubr.msk.bf16.gmra.mxu0 %vm493_vm1, %v9793_v33  ;;  %9032 = vmatmul.mubr.msk.bf16.gmra.mxu1 %vm493_vm1, %v9794_v14  ;;  %v9796_v33 = vld [vmem:[%s14261_s0 + $0x80] sm:$0xff]  }
 0x1db   :  { %14363 = vst [vmem:[#allocation91_spill] sm:$0xff] %v11073_v62  ;;  %v11077_v3 = vadd.f32 %v1930_v59, %v1009_v27  ;;  %2741 = vmatprep.mubr.bf16.mxu0 %v14281_v8  ;;  %3936 = vmatprep.mubr.bf16.mxu1 %v14281_v8 }
 0x1dc   :  { %v1021_v4 = vpop.f32.mrf.mxu0  ;;  %v1932_v21 = vpop.f32.mrf.mxu1 }
 0x1dd   :  { %14364 = vst [vmem:[#allocation92_spill] sm:$0xff] %v11077_v3  ;;  %v11081_v58 = vadd.f32 %v1932_v21, %v1011_v6 }
 0x1de   :  { %v1023_v0 = vpop.f32.mrf.mxu0  ;;  %v1934_v20 = vpop.f32.mrf.mxu1 }
 0x1df   :  { %14365 = vst [vmem:[#allocation93_spill] sm:$0xff] %v11081_v58  ;;  %v11089_v27 = vadd.f32 %v1934_v20, %v1013_v45 }
 0x1e0   :  { %v1025_v59 = vpop.f32.mrf.mxu0  ;;  %v1936_v14 = vpop.f32.mrf.mxu1 }
 0x1e1   :  { %14366 = vst [vmem:[#allocation94_spill] sm:$0xff] %v11089_v27  ;;  %v11091_v1 = vadd.f32 %v1936_v14, %v1015_v12  ;;  %v9797_v12 = vld [vmem:[%s14261_s0 + $0x88] sm:$0xff]  }
 0x1e2   :  { %v1029_v3 = vpop.f32.mrf.mxu0  ;;  %v1940_v62 = vpop.f32.mrf.mxu1  ;;  %8834 = vmatmul.mubr.msk.bf16.gmra.mxu0 %vm493_vm1, %v9795_v49  ;;  %9033 = vmatmul.mubr.msk.bf16.gmra.mxu1 %vm493_vm1, %v9796_v33  ;;  %v9798_v49 = vld [vmem:[%s14261_s0 + $0x88] sm:$0xff]  }
 0x1e3   :  { %14367 = vst [vmem:[#allocation95_spill] sm:$0xff] %v11091_v1  ;;  %v11095_v6 = vadd.f32 %v1940_v62, %v1019_v28  ;;  %2751 = vmatprep.mubr.bf16.mxu0 %v14281_v8  ;;  %3946 = vmatprep.mubr.bf16.mxu1 %v14281_v8 }
 0x1e4   :  { %v1031_v21 = vpop.f32.mrf.mxu0  ;;  %v1942_v58 = vpop.f32.mrf.mxu1 }
 0x1e5   :  { %14368 = vst [vmem:[#allocation96_spill] sm:$0xff] %v11095_v6  ;;  %v11099_v45 = vadd.f32 %v1942_v58, %v1021_v4 }
 0x1e6   :  { %v1033_v20 = vpop.f32.mrf.mxu0  ;;  %v1944_v27 = vpop.f32.mrf.mxu1 }
 0x1e7   :  { %14369 = vst [vmem:[#allocation97_spill] sm:$0xff] %v11099_v45  ;;  %v11107_v28 = vadd.f32 %v1944_v27, %v1023_v0 }
 0x1e8   :  { %v1035_v62 = vpop.f32.mrf.mxu0  ;;  %v1946_v33 = vpop.f32.mrf.mxu1 }
 0x1e9   :  { %14370 = vst [vmem:[#allocation98_spill] sm:$0xff] %v11107_v28  ;;  %v11109_v14 = vadd.f32 %v1946_v33, %v1025_v59  ;;  %v9799_v59 = vld [vmem:[%s14261_s0 + $0x90] sm:$0xff]  }
 0x1ea   :  { %v1039_v6 = vpop.f32.mrf.mxu0  ;;  %v1950_v1 = vpop.f32.mrf.mxu1  ;;  %8835 = vmatmul.mubr.msk.bf16.gmra.mxu0 %vm493_vm1, %v9797_v12  ;;  %9034 = vmatmul.mubr.msk.bf16.gmra.mxu1 %vm493_vm1, %v9798_v49  ;;  %v9800_v12 = vld [vmem:[%s14261_s0 + $0x90] sm:$0xff]  }
 0x1eb   :  { %14371 = vst [vmem:[#allocation99_spill] sm:$0xff] %v11109_v14  ;;  %v11113_v4 = vadd.f32 %v1950_v1, %v1029_v3  ;;  %2761 = vmatprep.mubr.bf16.mxu0 %v14281_v8  ;;  %3956 = vmatprep.mubr.bf16.mxu1 %v14281_v8 }
 0x1ec   :  { %v1041_v58 = vpop.f32.mrf.mxu0  ;;  %v1952_v45 = vpop.f32.mrf.mxu1 }
 0x1ed   :  { %14372 = vst [vmem:[#allocation100_spill] sm:$0xff] %v11113_v4  ;;  %v11117_v0 = vadd.f32 %v1952_v45, %v1031_v21 }
 0x1ee   :  { %v1043_v27 = vpop.f32.mrf.mxu0  ;;  %v1954_v28 = vpop.f32.mrf.mxu1 }
 0x1ef   :  { %14373 = vst [vmem:[#allocation101_spill] sm:$0xff] %v11117_v0  ;;  %v11125_v3 = vadd.f32 %v1954_v28, %v1033_v20 }
 0x1f0   :  { %v1045_v1 = vpop.f32.mrf.mxu0  ;;  %v1956_v49 = vpop.f32.mrf.mxu1 }
 0x1f1   :  { %14374 = vst [vmem:[#allocation102_spill] sm:$0xff] %v11125_v3  ;;  %v11127_v33 = vadd.f32 %v1956_v49, %v1035_v62  ;;  %v9801_v62 = vld [vmem:[%s14261_s0 + $0x98] sm:$0xff]  }
 0x1f2   :  { %v1049_v4 = vpop.f32.mrf.mxu0  ;;  %v1960_v14 = vpop.f32.mrf.mxu1  ;;  %8836 = vmatmul.mubr.msk.bf16.gmra.mxu0 %vm493_vm1, %v9799_v59  ;;  %9035 = vmatmul.mubr.msk.bf16.gmra.mxu1 %vm493_vm1, %v9800_v12  ;;  %v9802_v59 = vld [vmem:[%s14261_s0 + $0x98] sm:$0xff]  }
 0x1f3   :  { %14375 = vst [vmem:[#allocation103_spill] sm:$0xff] %v11127_v33  ;;  %v11131_v21 = vadd.f32 %v1960_v14, %v1039_v6  ;;  %2771 = vmatprep.mubr.bf16.mxu0 %v14281_v8  ;;  %3966 = vmatprep.mubr.bf16.mxu1 %v14281_v8 }
 0x1f4   :  { %v1051_v45 = vpop.f32.mrf.mxu0  ;;  %v1962_v0 = vpop.f32.mrf.mxu1 }
 0x1f5   :  { %14376 = vst [vmem:[#allocation104_spill] sm:$0xff] %v11131_v21  ;;  %v11135_v20 = vadd.f32 %v1962_v0, %v1041_v58 }
 0x1f6   :  { %v1053_v28 = vpop.f32.mrf.mxu0  ;;  %v1964_v3 = vpop.f32.mrf.mxu1 }
 0x1f7   :  { %14377 = vst [vmem:[#allocation105_spill] sm:$0xff] %v11135_v20  ;;  %v11143_v6 = vadd.f32 %v1964_v3, %v1043_v27 }
 0x1f8   :  { %v1055_v14 = vpop.f32.mrf.mxu0  ;;  %v1966_v12 = vpop.f32.mrf.mxu1 }
 0x1f9   :  { %14378 = vst [vmem:[#allocation106_spill] sm:$0xff] %v11143_v6  ;;  %v11145_v49 = vadd.f32 %v1966_v12, %v1045_v1  ;;  %v9803_v1 = vld [vmem:[%s14261_s0 + $0xa0] sm:$0xff]  }
 0x1fa   :  { %v1059_v21 = vpop.f32.mrf.mxu0  ;;  %v1970_v33 = vpop.f32.mrf.mxu1  ;;  %8837 = vmatmul.mubr.msk.bf16.gmra.mxu0 %vm493_vm1, %v9801_v62  ;;  %9036 = vmatmul.mubr.msk.bf16.gmra.mxu1 %vm493_vm1, %v9802_v59  ;;  %v9804_v62 = vld [vmem:[%s14261_s0 + $0xa0] sm:$0xff]  }
 0x1fb   :  { %14379 = vst [vmem:[#allocation107_spill] sm:$0xff] %v11145_v49  ;;  %v11149_v58 = vadd.f32 %v1970_v33, %v1049_v4  ;;  %2781 = vmatprep.mubr.bf16.mxu0 %v14281_v8  ;;  %3976 = vmatprep.mubr.bf16.mxu1 %v14281_v8 }
 0x1fc   :  { %v1061_v0 = vpop.f32.mrf.mxu0  ;;  %v1972_v20 = vpop.f32.mrf.mxu1 }
 0x1fd   :  { %14380 = vst [vmem:[#allocation108_spill] sm:$0xff] %v11149_v58  ;;  %v11153_v27 = vadd.f32 %v1972_v20, %v1051_v45 }
 0x1fe   :  { %v1063_v3 = vpop.f32.mrf.mxu0  ;;  %v1974_v6 = vpop.f32.mrf.mxu1 }
 0x1ff   :  { %14381 = vst [vmem:[#allocation109_spill] sm:$0xff] %v11153_v27  ;;  %v11161_v4 = vadd.f32 %v1974_v6, %v1053_v28 }
 0x200   :  { %v1065_v33 = vpop.f32.mrf.mxu0  ;;  %v1976_v59 = vpop.f32.mrf.mxu1 }
 0x201   :  { %14382 = vst [vmem:[#allocation110_spill] sm:$0xff] %v11161_v4  ;;  %v11163_v12 = vadd.f32 %v1976_v59, %v1055_v14  ;;  %v9805_v14 = vld [vmem:[%s14261_s0 + $0xa8] sm:$0xff]  }
 0x202   :  { %v1069_v58 = vpop.f32.mrf.mxu0  ;;  %v1980_v49 = vpop.f32.mrf.mxu1  ;;  %8838 = vmatmul.mubr.msk.bf16.gmra.mxu0 %vm493_vm1, %v9803_v1  ;;  %9037 = vmatmul.mubr.msk.bf16.gmra.mxu1 %vm493_vm1, %v9804_v62  ;;  %v9806_v1 = vld [vmem:[%s14261_s0 + $0xa8] sm:$0xff]  }
 0x203   :  { %14383 = vst [vmem:[#allocation111_spill] sm:$0xff] %v11163_v12  ;;  %v11167_v45 = vadd.f32 %v1980_v49, %v1059_v21  ;;  %2791 = vmatprep.mubr.bf16.mxu0 %v14281_v8  ;;  %3986 = vmatprep.mubr.bf16.mxu1 %v14281_v8 }
 0x204   :  { %v1071_v20 = vpop.f32.mrf.mxu0  ;;  %v1982_v27 = vpop.f32.mrf.mxu1 }
 0x205   :  { %14384 = vst [vmem:[#allocation112_spill] sm:$0xff] %v11167_v45  ;;  %v11171_v28 = vadd.f32 %v1982_v27, %v1061_v0 }
 0x206   :  { %v1073_v6 = vpop.f32.mrf.mxu0  ;;  %v1984_v4 = vpop.f32.mrf.mxu1 }
 0x207   :  { %14385 = vst [vmem:[#allocation113_spill] sm:$0xff] %v11171_v28  ;;  %v11179_v21 = vadd.f32 %v1984_v4, %v1063_v3 }
 0x208   :  { %v1075_v49 = vpop.f32.mrf.mxu0  ;;  %v1986_v62 = vpop.f32.mrf.mxu1 }
 0x209   :  { %14386 = vst [vmem:[#allocation114_spill] sm:$0xff] %v11179_v21  ;;  %v11181_v59 = vadd.f32 %v1986_v62, %v1065_v33  ;;  %v9807_v33 = vld [vmem:[%s14261_s0 + $0xb0] sm:$0xff]  }
 0x20a   :  { %v1079_v45 = vpop.f32.mrf.mxu0  ;;  %v1990_v12 = vpop.f32.mrf.mxu1  ;;  %8839 = vmatmul.mubr.msk.bf16.gmra.mxu0 %vm493_vm1, %v9805_v14  ;;  %9038 = vmatmul.mubr.msk.bf16.gmra.mxu1 %vm493_vm1, %v9806_v1  ;;  %v9808_v14 = vld [vmem:[%s14261_s0 + $0xb0] sm:$0xff]  }
 0x20b   :  { %14387 = vst [vmem:[#allocation115_spill] sm:$0xff] %v11181_v59  ;;  %v11185_v0 = vadd.f32 %v1990_v12, %v1069_v58  ;;  %2801 = vmatprep.mubr.bf16.mxu0 %v14281_v8  ;;  %3996 = vmatprep.mubr.bf16.mxu1 %v14281_v8 }
 0x20c   :  { %v1081_v27 = vpop.f32.mrf.mxu0  ;;  %v1992_v28 = vpop.f32.mrf.mxu1 }
 0x20d   :  { %14388 = vst [vmem:[#allocation116_spill] sm:$0xff] %v11185_v0  ;;  %v11189_v3 = vadd.f32 %v1992_v28, %v1071_v20 }
 0x20e   :  { %v1083_v4 = vpop.f32.mrf.mxu0  ;;  %v1994_v21 = vpop.f32.mrf.mxu1 }
 0x20f   :  { %14389 = vst [vmem:[#allocation117_spill] sm:$0xff] %v11189_v3  ;;  %v11197_v58 = vadd.f32 %v1994_v21, %v1073_v6 }
 0x210   :  { %v1085_v12 = vpop.f32.mrf.mxu0  ;;  %v1996_v1 = vpop.f32.mrf.mxu1 }
 0x211   :  { %14390 = vst [vmem:[#allocation118_spill] sm:$0xff] %v11197_v58  ;;  %v11199_v62 = vadd.f32 %v1996_v1, %v1075_v49  ;;  %v9809_v49 = vld [vmem:[%s14261_s0 + $0xb8] sm:$0xff]  }
 0x212   :  { %v1089_v0 = vpop.f32.mrf.mxu0  ;;  %v2000_v59 = vpop.f32.mrf.mxu1  ;;  %8840 = vmatmul.mubr.msk.bf16.gmra.mxu0 %vm493_vm1, %v9807_v33  ;;  %9039 = vmatmul.mubr.msk.bf16.gmra.mxu1 %vm493_vm1, %v9808_v14  ;;  %v9810_v33 = vld [vmem:[%s14261_s0 + $0xb8] sm:$0xff]  }
 0x213   :  { %14391 = vst [vmem:[#allocation119_spill] sm:$0xff] %v11199_v62  ;;  %v11203_v20 = vadd.f32 %v2000_v59, %v1079_v45  ;;  %2811 = vmatprep.mubr.bf16.mxu0 %v14281_v8  ;;  %4006 = vmatprep.mubr.bf16.mxu1 %v14281_v8 }
 0x214   :  { %v1091_v28 = vpop.f32.mrf.mxu0  ;;  %v2002_v3 = vpop.f32.mrf.mxu1 }
 0x215   :  { %14392 = vst [vmem:[#allocation120_spill] sm:$0xff] %v11203_v20  ;;  %v11207_v6 = vadd.f32 %v2002_v3, %v1081_v27 }
 0x216   :  { %v1093_v21 = vpop.f32.mrf.mxu0  ;;  %v2004_v58 = vpop.f32.mrf.mxu1 }
 0x217   :  { %14393 = vst [vmem:[#allocation121_spill] sm:$0xff] %v11207_v6  ;;  %v11215_v45 = vadd.f32 %v2004_v58, %v1083_v4 }
 0x218   :  { %v1095_v59 = vpop.f32.mrf.mxu0  ;;  %v2006_v14 = vpop.f32.mrf.mxu1 }
 0x219   :  { %14394 = vst [vmem:[#allocation122_spill] sm:$0xff] %v11215_v45  ;;  %v11217_v1 = vadd.f32 %v2006_v14, %v1085_v12  ;;  %v9811_v12 = vld [vmem:[%s14261_s0 + $0xc0] sm:$0xff]  }
 0x21a   :  { %v1099_v20 = vpop.f32.mrf.mxu0  ;;  %v2010_v62 = vpop.f32.mrf.mxu1  ;;  %8841 = vmatmul.mubr.msk.bf16.gmra.mxu0 %vm493_vm1, %v9809_v49  ;;  %9040 = vmatmul.mubr.msk.bf16.gmra.mxu1 %vm493_vm1, %v9810_v33  ;;  %v9812_v49 = vld [vmem:[%s14261_s0 + $0xc0] sm:$0xff]  }
 0x21b   :  { %14395 = vst [vmem:[#allocation123_spill] sm:$0xff] %v11217_v1  ;;  %v11221_v27 = vadd.f32 %v2010_v62, %v1089_v0  ;;  %2821 = vmatprep.mubr.bf16.mxu0 %v14281_v8  ;;  %4016 = vmatprep.mubr.bf16.mxu1 %v14281_v8 }
 0x21c   :  { %v1101_v3 = vpop.f32.mrf.mxu0  ;;  %v2012_v6 = vpop.f32.mrf.mxu1 }
 0x21d   :  { %14396 = vst [vmem:[#allocation124_spill] sm:$0xff] %v11221_v27  ;;  %v11225_v4 = vadd.f32 %v2012_v6, %v1091_v28 }
 0x21e   :  { %v1103_v58 = vpop.f32.mrf.mxu0  ;;  %v2014_v45 = vpop.f32.mrf.mxu1 }
 0x21f   :  { %14397 = vst [vmem:[#allocation125_spill] sm:$0xff] %v11225_v4  ;;  %v11233_v0 = vadd.f32 %v2014_v45, %v1093_v21 }
 0x220   :  { %v1105_v62 = vpop.f32.mrf.mxu0  ;;  %v2016_v33 = vpop.f32.mrf.mxu1 }
 0x221   :  { %14398 = vst [vmem:[#allocation126_spill] sm:$0xff] %v11233_v0  ;;  %v11235_v14 = vadd.f32 %v2016_v33, %v1095_v59  ;;  %v9813_v59 = vld [vmem:[%s14261_s0 + $0xc8] sm:$0xff]  }
 0x222   :  { %v1109_v27 = vpop.f32.mrf.mxu0  ;;  %v2020_v1 = vpop.f32.mrf.mxu1  ;;  %8842 = vmatmul.mubr.msk.bf16.gmra.mxu0 %vm493_vm1, %v9811_v12  ;;  %9041 = vmatmul.mubr.msk.bf16.gmra.mxu1 %vm493_vm1, %v9812_v49  ;;  %v9814_v12 = vld [vmem:[%s14261_s0 + $0xc8] sm:$0xff]  }
 0x223   :  { %14399 = vst [vmem:[#allocation127_spill] sm:$0xff] %v11235_v14  ;;  %v11239_v28 = vadd.f32 %v2020_v1, %v1099_v20  ;;  %2831 = vmatprep.mubr.bf16.mxu0 %v14281_v8  ;;  %4026 = vmatprep.mubr.bf16.mxu1 %v14281_v8 }
 0x224   :  { %v1111_v6 = vpop.f32.mrf.mxu0  ;;  %v2022_v4 = vpop.f32.mrf.mxu1 }
 0x225   :  { %14400 = vst [vmem:[#allocation128_spill] sm:$0xff] %v11239_v28  ;;  %v11243_v21 = vadd.f32 %v2022_v4, %v1101_v3 }
 0x226   :  { %v1113_v45 = vpop.f32.mrf.mxu0  ;;  %v2024_v0 = vpop.f32.mrf.mxu1 }
 0x227   :  { %14401 = vst [vmem:[#allocation129_spill] sm:$0xff] %v11243_v21  ;;  %v11251_v20 = vadd.f32 %v2024_v0, %v1103_v58 }
 0x228   :  { %v1115_v1 = vpop.f32.mrf.mxu0  ;;  %v2026_v49 = vpop.f32.mrf.mxu1 }
 0x229   :  { %14402 = vst [vmem:[#allocation130_spill] sm:$0xff] %v11251_v20  ;;  %v11253_v33 = vadd.f32 %v2026_v49, %v1105_v62  ;;  %v9815_v62 = vld [vmem:[%s14261_s0 + $0xd0] sm:$0xff]  }
 0x22a   :  { %v1119_v28 = vpop.f32.mrf.mxu0  ;;  %v2030_v14 = vpop.f32.mrf.mxu1  ;;  %8843 = vmatmul.mubr.msk.bf16.gmra.mxu0 %vm493_vm1, %v9813_v59  ;;  %9042 = vmatmul.mubr.msk.bf16.gmra.mxu1 %vm493_vm1, %v9814_v12  ;;  %v9816_v59 = vld [vmem:[%s14261_s0 + $0xd0] sm:$0xff]  }
 0x22b   :  { %14403 = vst [vmem:[#allocation131_spill] sm:$0xff] %v11253_v33  ;;  %v11257_v3 = vadd.f32 %v2030_v14, %v1109_v27  ;;  %2841 = vmatprep.mubr.bf16.mxu0 %v14281_v8  ;;  %4036 = vmatprep.mubr.bf16.mxu1 %v14281_v8 }
 0x22c   :  { %v1121_v4 = vpop.f32.mrf.mxu0  ;;  %v2032_v21 = vpop.f32.mrf.mxu1 }
 0x22d   :  { %14404 = vst [vmem:[#allocation132_spill] sm:$0xff] %v11257_v3  ;;  %v11261_v58 = vadd.f32 %v2032_v21, %v1111_v6 }
 0x22e   :  { %v1123_v0 = vpop.f32.mrf.mxu0  ;;  %v2034_v20 = vpop.f32.mrf.mxu1 }
 0x22f   :  { %14405 = vst [vmem:[#allocation133_spill] sm:$0xff] %v11261_v58  ;;  %v11269_v27 = vadd.f32 %v2034_v20, %v1113_v45 }
 0x230   :  { %v1125_v14 = vpop.f32.mrf.mxu0  ;;  %v2036_v12 = vpop.f32.mrf.mxu1 }
 0x231   :  { %14406 = vst [vmem:[#allocation134_spill] sm:$0xff] %v11269_v27  ;;  %v11271_v49 = vadd.f32 %v2036_v12, %v1115_v1  ;;  %v9817_v1 = vld [vmem:[%s14261_s0 + $0xd8] sm:$0xff]  }
 0x232   :  { %v1129_v3 = vpop.f32.mrf.mxu0  ;;  %v2040_v33 = vpop.f32.mrf.mxu1  ;;  %8844 = vmatmul.mubr.msk.bf16.gmra.mxu0 %vm493_vm1, %v9815_v62  ;;  %9043 = vmatmul.mubr.msk.bf16.gmra.mxu1 %vm493_vm1, %v9816_v59  ;;  %v9818_v62 = vld [vmem:[%s14261_s0 + $0xd8] sm:$0xff]  }
 0x233   :  { %14407 = vst [vmem:[#allocation135_spill] sm:$0xff] %v11271_v49  ;;  %v11275_v6 = vadd.f32 %v2040_v33, %v1119_v28  ;;  %2851 = vmatprep.mubr.bf16.mxu0 %v14281_v8  ;;  %4046 = vmatprep.mubr.bf16.mxu1 %v14281_v8 }
 0x234   :  { %v1131_v21 = vpop.f32.mrf.mxu0  ;;  %v2042_v58 = vpop.f32.mrf.mxu1 }
 0x235   :  { %14408 = vst [vmem:[#allocation136_spill] sm:$0xff] %v11275_v6  ;;  %v11279_v45 = vadd.f32 %v2042_v58, %v1121_v4 }
 0x236   :  { %v1133_v20 = vpop.f32.mrf.mxu0  ;;  %v2044_v27 = vpop.f32.mrf.mxu1 }
 0x237   :  { %14409 = vst [vmem:[#allocation137_spill] sm:$0xff] %v11279_v45  ;;  %v11287_v28 = vadd.f32 %v2044_v27, %v1123_v0 }
 0x238   :  { %v1135_v33 = vpop.f32.mrf.mxu0  ;;  %v2046_v59 = vpop.f32.mrf.mxu1 }
 0x239   :  { %14410 = vst [vmem:[#allocation138_spill] sm:$0xff] %v11287_v28  ;;  %v11289_v12 = vadd.f32 %v2046_v59, %v1125_v14  ;;  %v9819_v14 = vld [vmem:[%s14261_s0 + $0xe0] sm:$0xff]  }
 0x23a   :  { %v1139_v6 = vpop.f32.mrf.mxu0  ;;  %v2050_v49 = vpop.f32.mrf.mxu1  ;;  %8845 = vmatmul.mubr.msk.bf16.gmra.mxu0 %vm493_vm1, %v9817_v1  ;;  %9044 = vmatmul.mubr.msk.bf16.gmra.mxu1 %vm493_vm1, %v9818_v62  ;;  %v9820_v1 = vld [vmem:[%s14261_s0 + $0xe0] sm:$0xff]  }
 0x23b   :  { %14411 = vst [vmem:[#allocation139_spill] sm:$0xff] %v11289_v12  ;;  %v11293_v4 = vadd.f32 %v2050_v49, %v1129_v3  ;;  %2861 = vmatprep.mubr.bf16.mxu0 %v14281_v8  ;;  %4056 = vmatprep.mubr.bf16.mxu1 %v14281_v8 }
 0x23c   :  { %v1141_v58 = vpop.f32.mrf.mxu0  ;;  %v2052_v45 = vpop.f32.mrf.mxu1 }
 0x23d   :  { %14412 = vst [vmem:[#allocation140_spill] sm:$0xff] %v11293_v4  ;;  %v11297_v0 = vadd.f32 %v2052_v45, %v1131_v21 }
 0x23e   :  { %v1143_v27 = vpop.f32.mrf.mxu0  ;;  %v2054_v28 = vpop.f32.mrf.mxu1 }
 0x23f   :  { %v11305_v3 = vadd.f32 %v2054_v28, %v1133_v20 }
 0x240   :  { %v1145_v49 = vpop.f32.mrf.mxu0  ;;  %v2056_v62 = vpop.f32.mrf.mxu1 }
 0x241   :  { %14413 = vst [vmem:[#allocation141_spill] sm:$0xff] %v11305_v3  ;;  %v11307_v59 = vadd.f32 %v2056_v62, %v1135_v33 }
 0x242   :  { %v2060_v4 = vpop.f32.mrf.mxu1  ;;  %v2623_v12 = vpop.f32.mrf.mxu0  ;;  %8846 = vmatmul.mubr.msk.bf16.gmra.mxu0 %vm493_vm1, %v9819_v14  ;;  %9045 = vmatmul.mubr.msk.bf16.gmra.mxu1 %vm493_vm1, %v9820_v1  ;;  %v9824_v14 = vld [vmem:[%s14261_s0 + $0xe8] sm:$0xff]  }
 0x243   :  { %14414 = vst [vmem:[#allocation142_spill] sm:$0xff] %v11307_v59  ;;  %v11311_v21 = vadd.f32 %v2060_v4, %v1139_v6  ;;  %v3102_v45 = vadd.f32 %v2623_v12, %v10455_v15  ;;  %2871 = vmatprep.mubr.bf16.mxu0 %v14281_v8  ;;  %4066 = vmatprep.mubr.bf16.mxu1 %v14281_v8  ;;  %v9825_v15 = vld [vmem:[%s14261_s0 + $0xe8] sm:$0xff]  }
 0x244   :  { %v2062_v20 = vpop.f32.mrf.mxu1  ;;  %v2625_v28 = vpop.f32.mrf.mxu0 }
 0x245   :  { %v11316_v3 = vadd.f32 %v2062_v20, %v1141_v58  ;;  %v3103_v33 = vadd.f32 %v2625_v28, %v10459_v18 }
 0x246   :  { %v2064_v62 = vpop.f32.mrf.mxu1  ;;  %v2627_v59 = vpop.f32.mrf.mxu0 }
 0x247   :  { %14415 = vst [vmem:[#allocation143_spill] sm:$0xff] %v11316_v3  ;;  %v11325_v6 = vadd.f32 %v2064_v62, %v1143_v27  ;;  %v3104_v12 = vadd.f32 %v2627_v59, %v10467_v23  ;;  %v9826_v62 = vld [vmem:[%s14261_s0 + $0xf0] sm:$0xff]  }
 0x248   :  { %v2066_v4 = vpop.f32.mrf.mxu1  ;;  %v2629_v1 = vpop.f32.mrf.mxu0 }
 0x249   :  { %v11328_v58 = vadd.f32 %v2066_v4, %v1145_v49  ;;  %v3105_v18 = vadd.f32 %v2629_v1, %v10469_v26 }
 0x24a   :  { %v11331_v20 = vpop.f32.mrf.mxu1  ;;  %v2633_v28 = vpop.f32.mrf.mxu0  ;;  %8847 = vmatmul.mubr.msk.bf16.gmra.mxu0 %vm493_vm1, %v9824_v14  ;;  %9046 = vmatmul.mubr.msk.bf16.gmra.mxu1 %vm493_vm1, %v9825_v15 }
 0x24b   :  { %v3106_v3 = vadd.f32 %v2633_v28, %v10473_v29  ;;  %2881 = vmatprep.mubr.bf16.mxu0 %v14281_v8  ;;  %4076 = vmatprep.mubr.bf16.mxu1 %v14281_v8  ;;  %v9827_v29 = vld [vmem:[%s14261_s0 + $0xf0] sm:$0xff]  }
 0x24c   :  { %v11338_v23 = vpop.f32.mrf.mxu1  ;;  %v2635_v27 = vpop.f32.mrf.mxu0 }
 0x24d   :  { %14416 = vst [vmem:[#allocation144_spill] sm:$0xff] %v11338_v23  ;;  %v3107_v49 = vadd.f32 %v2635_v27, %v10477_v32 }
 0x24e   :  { %v11341_v59 = vpop.f32.mrf.mxu1  ;;  %v2637_v26 = vpop.f32.mrf.mxu0 }
 0x24f   :  { %14417 = vst [vmem:[#allocation145_spill] sm:$0xff] %v11341_v59  ;;  %v3108_v14 = vadd.f32 %v2637_v26, %v10485_v37 }
 0x250   :  { %v11350_v15 = vpop.f32.mrf.mxu1  ;;  %v2639_v4 = vpop.f32.mrf.mxu0 }
 0x251   :  { %14418 = vst [vmem:[#allocation146_spill] sm:$0xff] %v11350_v15  ;;  %v3109_v1 = vadd.f32 %v2639_v4, %v10487_v40 }
 0x252   :  { %v2643_v28 = vpop.f32.mrf.mxu0  ;;  %8848 = vmatmul.mubr.msk.bf16.gmra.mxu0 %vm493_vm1, %v9826_v62  ;;  %v3838_v32 = vpop.f32.mrf.mxu1  ;;  %9047 = vmatmul.mubr.msk.bf16.gmra.mxu1 %vm493_vm1, %v9827_v29  ;;  %v9828_v62 = vld [vmem:[%s14261_s0 + $0xf8] sm:$0xff]  }
 0x253   :  { %v3110_v27 = vadd.f32 %v2643_v28, %v10491_v43  ;;  %v11356_v59 = vadd.f32 %v3838_v32, %v3102_v45  ;;  %2891 = vmatprep.mubr.bf16.mxu0 %v14281_v8  ;;  %4086 = vmatprep.mubr.bf16.mxu1 %v14281_v8  ;;  %v9829_v43 = vld [vmem:[%s14261_s0 + $0xf8] sm:$0xff]  }
 0x254   :  { %v2645_v37 = vpop.f32.mrf.mxu0  ;;  %v3840_v26 = vpop.f32.mrf.mxu1 }
 0x255   :  { %14419 = vst [vmem:[#allocation147_spill] sm:$0xff] %v11356_v59  ;;  %v3111_v15 = vadd.f32 %v2645_v37, %v10495_v46  ;;  %v11361_v23 = vadd.f32 %v3840_v26, %v3103_v33 }
 0x256   :  { %v2647_v40 = vpop.f32.mrf.mxu0  ;;  %v3842_v4 = vpop.f32.mrf.mxu1 }
 0x257   :  { %14420 = vst [vmem:[#allocation148_spill] sm:$0xff] %v11361_v23  ;;  %v3112_v45 = vadd.f32 %v2647_v40, %v10503_v51  ;;  %v11370_v29 = vadd.f32 %v3842_v4, %v3104_v12 }
 0x258   :  { %v2649_v28 = vpop.f32.mrf.mxu0  ;;  %v3844_v32 = vpop.f32.mrf.mxu1 }
 0x259   :  { %v3113_v46 = vadd.f32 %v2649_v28, %v10505_v54  ;;  %v11373_v33 = vadd.f32 %v3844_v32, %v3105_v18 }
 0x25a   :  { %v2653_v37 = vpop.f32.mrf.mxu0  ;;  %8849 = vmatmul.mubr.msk.bf16.gmra.mxu0 %vm493_vm1, %v9828_v62  ;;  %v3848_v26 = vpop.f32.mrf.mxu1  ;;  %9048 = vmatmul.mubr.msk.bf16.gmra.mxu1 %vm493_vm1, %v9829_v43  ;;  %v9830_v62 = vld [vmem:[%s14261_s0 + $0x100] sm:$0xff]  }
 0x25b   :  { %v3114_v23 = vadd.f32 %v2653_v37, %v10509_v57  ;;  %v11378_v59 = vadd.f32 %v3848_v26, %v3106_v3  ;;  %2901 = vmatprep.mubr.bf16.mxu0 %v14281_v8  ;;  %4096 = vmatprep.mubr.bf16.mxu1 %v14281_v8  ;;  %v9831_v57 = vld [vmem:[%s14261_s0 + $0x100] sm:$0xff]  }
 0x25c   :  { %v2655_v51 = vpop.f32.mrf.mxu0  ;;  %v3850_v12 = vpop.f32.mrf.mxu1 }
 0x25d   :  { %v3115_v54 = vadd.f32 %v2655_v51, %v10513_v60  ;;  %v11383_v18 = vadd.f32 %v3850_v12, %v3107_v49 }
 0x25e   :  { %v2657_v40 = vpop.f32.mrf.mxu0  ;;  %v3852_v4 = vpop.f32.mrf.mxu1 }
 0x25f   :  { %v3116_v3 = vadd.f32 %v2657_v40, %v10521_v2  ;;  %v11392_v43 = vadd.f32 %v3852_v4, %v3108_v14 }
 0x260   :  { %v2659_v28 = vpop.f32.mrf.mxu0  ;;  %v3854_v32 = vpop.f32.mrf.mxu1 }
 0x261   :  { %v3117_v60 = vadd.f32 %v2659_v28, %v10523_v7  ;;  %v11395_v49 = vadd.f32 %v3854_v32, %v3109_v1 }
 0x262   :  { %v2663_v37 = vpop.f32.mrf.mxu0  ;;  %8850 = vmatmul.mubr.msk.bf16.gmra.mxu0 %vm493_vm1, %v9830_v62  ;;  %v3858_v26 = vpop.f32.mrf.mxu1  ;;  %9049 = vmatmul.mubr.msk.bf16.gmra.mxu1 %vm493_vm1, %v9831_v57  ;;  %v9832_v62 = vld [vmem:[%s14261_s0 + $0x108] sm:$0xff]  }
 0x263   :  { %v3118_v51 = vadd.f32 %v2663_v37, %v10527_v11  ;;  %v11400_v12 = vadd.f32 %v3858_v26, %v3110_v27  ;;  %2911 = vmatprep.mubr.bf16.mxu0 %v14281_v8  ;;  %4106 = vmatprep.mubr.bf16.mxu1 %v14281_v8  ;;  %v9833_v11 = vld [vmem:[%s14261_s0 + $0x108] sm:$0xff]  }
 0x264   :  { %v2665_v2 = vpop.f32.mrf.mxu0  ;;  %v3860_v14 = vpop.f32.mrf.mxu1 }
 0x265   :  { %v3119_v7 = vadd.f32 %v2665_v2, %v10531_v16  ;;  %v11405_v1 = vadd.f32 %v3860_v14, %v3111_v15 }
 0x266   :  { %v2667_v40 = vpop.f32.mrf.mxu0  ;;  %v3862_v4 = vpop.f32.mrf.mxu1 }
 0x267   :  { %v3120_v27 = vadd.f32 %v2667_v40, %v10542_v24  ;;  %v11414_v57 = vadd.f32 %v3862_v4, %v3112_v45 }
 0x268   :  { %v2669_v28 = vpop.f32.mrf.mxu0  ;;  %v3864_v32 = vpop.f32.mrf.mxu1 }
 0x269   :  { %v3121_v16 = vadd.f32 %v2669_v28, %v10548_v30  ;;  %v11417_v15 = vadd.f32 %v3864_v32, %v3113_v46 }
 0x26a   :  { %v2673_v37 = vpop.f32.mrf.mxu0  ;;  %8851 = vmatmul.mubr.msk.bf16.gmra.mxu0 %vm493_vm1, %v9832_v62  ;;  %v3868_v26 = vpop.f32.mrf.mxu1  ;;  %9050 = vmatmul.mubr.msk.bf16.gmra.mxu1 %vm493_vm1, %v9833_v11  ;;  %v9834_v62 = vld [vmem:[%s14261_s0 + $0x110] sm:$0xff]  }
 0x26b   :  { %v3122_v2 = vadd.f32 %v2673_v37, %v10553_v35  ;;  %v11422_v14 = vadd.f32 %v3868_v26, %v3114_v23  ;;  %2921 = vmatprep.mubr.bf16.mxu0 %v14281_v8  ;;  %4116 = vmatprep.mubr.bf16.mxu1 %v14281_v8  ;;  %v9835_v35 = vld [vmem:[%s14261_s0 + $0x110] sm:$0xff]  }
 0x26c   :  { %v2675_v24 = vpop.f32.mrf.mxu0  ;;  %v3870_v45 = vpop.f32.mrf.mxu1 }
 0x26d   :  { %v3123_v30 = vadd.f32 %v2675_v24, %v10557_v39  ;;  %v11427_v46 = vadd.f32 %v3870_v45, %v3115_v54 }
 0x26e   :  { %v2677_v40 = vpop.f32.mrf.mxu0  ;;  %v3872_v4 = vpop.f32.mrf.mxu1 }
 0x26f   :  { %v3124_v23 = vadd.f32 %v2677_v40, %v10565_v47  ;;  %v11436_v11 = vadd.f32 %v3872_v4, %v3116_v3  ;;  %v9836_v40 = vld [vmem:[%s14261_s0 + $0x118] sm:$0xff]  }
 0x270   :  { %v2679_v28 = vpop.f32.mrf.mxu0  ;;  %v3874_v32 = vpop.f32.mrf.mxu1 }
 0x271   :  { %v3125_v39 = vadd.f32 %v2679_v28, %v10567_v50  ;;  %v11439_v54 = vadd.f32 %v3874_v32, %v3117_v60  ;;  %v9868_v32 = vld [vmem:[%s14262_s3 + $0xf0] ss:$8 sps:$4 sm:$0xff]  }
 0x272   :  { %v2683_v37 = vpop.f32.mrf.mxu0  ;;  %8852 = vmatmul.mubr.msk.bf16.gmra.mxu0 %vm493_vm1, %v9834_v62  ;;  %v3878_v26 = vpop.f32.mrf.mxu1  ;;  %9051 = vmatmul.mubr.msk.bf16.gmra.mxu1 %vm493_vm1, %v9835_v35 }
 0x273   :  { %v3126_v24 = vadd.f32 %v2683_v37, %v10571_v55  ;;  %v11444_v45 = vadd.f32 %v3878_v26, %v3118_v51  ;;  %2931 = vmatprep.mubr.bf16.mxu0 %v14281_v8  ;;  %4126 = vmatprep.mubr.bf16.mxu1 %v14281_v8  ;;  %v9837_v55 = vld [vmem:[%s14261_s0 + $0x118] sm:$0xff]  }
 0x274   :  { %v2685_v47 = vpop.f32.mrf.mxu0  ;;  %v3880_v3 = vpop.f32.mrf.mxu1 }
 0x275   :  { %v3127_v50 = vadd.f32 %v2685_v47, %v10578_v61  ;;  %v11449_v60 = vadd.f32 %v3880_v3, %v3119_v7  ;;  %v9870_v61 = vld [vmem:[%s14262_s3 + $0xf4] ss:$8 sps:$4 sm:$0xff]  }
 0x276   :  { %v2687_v4 = vpop.f32.mrf.mxu0  ;;  %v3882_v62 = vpop.f32.mrf.mxu1  ;;  %6108 = vmatprep.subr.bf16.mxu1 %v9870_v61 }
 0x277   :  { %v3128_v51 = vadd.f32 %v2687_v4, %v10587_v5  ;;  %v11458_v35 = vadd.f32 %v3882_v62, %v3120_v27  ;;  %6109 = vmatpush1.bf16.msra.mxu1 %v9868_v32 }
 0x278   :  { %v2689_v7 = vpop.f32.mrf.mxu0  ;;  %v3884_v28 = vpop.f32.mrf.mxu1 }
 0x279   :  { %v3129_v37 = vadd.f32 %v2689_v7, %v10589_v13  ;;  %v11467_v26 = vadd.f32 %v3884_v28, %v3121_v16  ;;  %v9838_v13 = vld [vmem:[%s14261_s0 + $0x120] sm:$0xff]  }
 0x27a   :  { %v2693_v47 = vpop.f32.mrf.mxu0  ;;  %8853 = vmatmul.mubr.msk.bf16.gmra.mxu0 %vm493_vm1, %v9836_v40  ;;  %v3888_v5 = vpop.f32.mrf.mxu1  ;;  %9052 = vmatmul.mubr.msk.bf16.gmra.mxu1 %vm493_vm1, %v9837_v55  ;;  %v9839_v16 = vld [vmem:[%s14261_s0 + $0x120] sm:$0xff]  }
 0x27b   :  { %14421 = vst [vmem:[#allocation149_spill] sm:$0xff] %v11467_v26  ;;  %v3130_v27 = vadd.f32 %v2693_v47, %v10593_v19  ;;  %v11472_v3 = vadd.f32 %v3888_v5, %v3122_v2  ;;  %2941 = vmatprep.mubr.bf16.mxu0 %v14281_v8  ;;  %4136 = vmatprep.mubr.bf16.mxu1 %v14281_v8 }
 0x27c   :  { %v2695_v4 = vpop.f32.mrf.mxu0  ;;  %v3890_v62 = vpop.f32.mrf.mxu1 }
 0x27d   :  { %14422 = vst [vmem:[#allocation150_spill] sm:$0xff] %v11472_v3  ;;  %v3131_v40 = vadd.f32 %v2695_v4, %v10600_v25  ;;  %v11483_v19 = vadd.f32 %v3890_v62, %v3123_v30 }
 0x27e   :  { %v2697_v2 = vpop.f32.mrf.mxu0  ;;  %v3892_v55 = vpop.f32.mrf.mxu1 }
 0x27f   :  { %v3132_v61 = vadd.f32 %v2697_v2, %v10611_v36  ;;  %v11486_v7 = vadd.f32 %v3892_v55, %v3124_v23 }
 0x280   :  { %v2699_v28 = vpop.f32.mrf.mxu0  ;;  %v3894_v47 = vpop.f32.mrf.mxu1 }
 0x281   :  { %v3133_v5 = vadd.f32 %v2699_v28, %v10613_v42  ;;  %v11489_v3 = vadd.f32 %v3894_v47, %v3125_v39  ;;  %v9840_v42 = vld [vmem:[%s14261_s0 + $0x128] sm:$0xff]  }
 0x282   :  { %v2703_v26 = vpop.f32.mrf.mxu0  ;;  %8854 = vmatmul.mubr.msk.bf16.gmra.mxu0 %vm493_vm1, %v9838_v13  ;;  %v3898_v32 = vpop.f32.mrf.mxu1  ;;  %9053 = vmatmul.mubr.msk.bf16.gmra.mxu1 %vm493_vm1, %v9839_v16  ;;  %v9841_v39 = vld [vmem:[%s14261_s0 + $0x128] sm:$0xff]  }
 0x283   :  { %v3134_v25 = vadd.f32 %v2703_v26, %v10617_v48  ;;  %v11494_v30 = vadd.f32 %v3898_v32, %v3126_v24  ;;  %2951 = vmatprep.mubr.bf16.mxu0 %v14281_v8  ;;  %4146 = vmatprep.mubr.bf16.mxu1 %v14281_v8 }
 0x284   :  { %v2705_v36 = vpop.f32.mrf.mxu0  ;;  %v3900_v23 = vpop.f32.mrf.mxu1 }
 0x285   :  { %v3135_v4 = vadd.f32 %v2705_v36, %v10621_v53  ;;  %v11505_v62 = vadd.f32 %v3900_v23, %v3127_v50 }
 0x286   :  { %v2707_v48 = vpop.f32.mrf.mxu0  ;;  %v3902_v24 = vpop.f32.mrf.mxu1 }
 0x287   :  { %v3136_v26 = vadd.f32 %v2707_v48, %v10629_v63  ;;  %v11508_v13 = vadd.f32 %v3902_v24, %v3128_v51 }
 0x288   :  { %v2709_v16 = vpop.f32.mrf.mxu0  ;;  %v3904_v2 = vpop.f32.mrf.mxu1 }
 0x289   :  { %v3137_v55 = vadd.f32 %v2709_v16, %v10631_v9  ;;  %v11511_v28 = vadd.f32 %v3904_v2, %v3129_v37  ;;  %v9842_v9 = vld [vmem:[%s14261_s0 + $0x130] sm:$0xff]  }
 0x28a   :  { %v2713_v47 = vpop.f32.mrf.mxu0  ;;  %8855 = vmatmul.mubr.msk.bf16.gmra.mxu0 %vm493_vm1, %v9840_v42  ;;  %v3908_v32 = vpop.f32.mrf.mxu1  ;;  %9054 = vmatmul.mubr.msk.bf16.gmra.mxu1 %vm493_vm1, %v9841_v39  ;;  %v9843_v37 = vld [vmem:[%s14261_s0 + $0x130] sm:$0xff]  }
 0x28b   :  { %v3138_v53 = vadd.f32 %v2713_v47, %v10635_v17  ;;  %v11516_v50 = vadd.f32 %v3908_v32, %v3130_v27  ;;  %2961 = vmatprep.mubr.bf16.mxu0 %v14281_v8  ;;  %4156 = vmatprep.mubr.bf16.mxu1 %v14281_v8 }
 0x28c   :  { %v2715_v63 = vpop.f32.mrf.mxu0  ;;  %v3910_v51 = vpop.f32.mrf.mxu1 }
 0x28d   :  { %v3139_v36 = vadd.f32 %v2715_v63, %v10639_v22  ;;  %v11527_v23 = vadd.f32 %v3910_v51, %v3131_v40 }
 0x28e   :  { %v2717_v17 = vpop.f32.mrf.mxu0  ;;  %v3912_v27 = vpop.f32.mrf.mxu1 }
 0x28f   :  { %v3140_v42 = vadd.f32 %v2717_v17, %v10647_v34  ;;  %v11530_v39 = vadd.f32 %v3912_v27, %v3132_v61 }
 0x290   :  { %v2719_v48 = vpop.f32.mrf.mxu0  ;;  %v3914_v24 = vpop.f32.mrf.mxu1 }
 0x291   :  { %v3141_v16 = vadd.f32 %v2719_v48, %v10649_v44  ;;  %v11533_v2 = vadd.f32 %v3914_v24, %v3133_v5 }
 0x292   :  { %v2723_v47 = vpop.f32.mrf.mxu0  ;;  %8856 = vmatmul.mubr.msk.bf16.gmra.mxu0 %vm493_vm1, %v9842_v9  ;;  %v3918_v32 = vpop.f32.mrf.mxu1  ;;  %9055 = vmatmul.mubr.msk.bf16.gmra.mxu1 %vm493_vm1, %v9843_v37  ;;  %v9844_v9 = vld [vmem:[%s14261_s0 + $0x138] sm:$0xff]  }
 0x293   :  { %v3142_v22 = vadd.f32 %v2723_v47, %v10653_v52  ;;  %v11538_v40 = vadd.f32 %v3918_v32, %v3134_v25  ;;  %2971 = vmatprep.mubr.bf16.mxu0 %v14281_v8  ;;  %4166 = vmatprep.mubr.bf16.mxu1 %v14281_v8  ;;  %v9845_v52 = vld [vmem:[%s14261_s0 + $0x138] sm:$0xff]  }
 0x294   :  { %v2725_v34 = vpop.f32.mrf.mxu0  ;;  %v3920_v61 = vpop.f32.mrf.mxu1 }
 0x295   :  { %v3143_v44 = vadd.f32 %v2725_v34, %v10657_v56  ;;  %v11543_v5 = vadd.f32 %v3920_v61, %v3135_v4  ;;  %v14427_v34 = vld [vmem:[#allocation6_spill] sm:$0xff] }
 0x296   :  { %v2727_v63 = vpop.f32.mrf.mxu0  ;;  %v3922_v51 = vpop.f32.mrf.mxu1 }
 0x297   :  { %14423 = vst [vmem:[#allocation151_spill] sm:$0xff] %v11543_v5  ;;  %v3144_v25 = vadd.f32 %v2727_v63, %v10665_v10  ;;  %v11552_v37 = vadd.f32 %v3922_v51, %v3136_v26  ;;  %v9846_v51 = vld [vmem:[%s14261_s0 + $0x140] sm:$0xff]  }
 0x298   :  { %v2729_v17 = vpop.f32.mrf.mxu0  ;;  %v3924_v27 = vpop.f32.mrf.mxu1 }
 0x299   :  { %14424 = vst [vmem:[#allocation152_spill] sm:$0xff] %v11552_v37  ;;  %v3145_v56 = vadd.f32 %v2729_v17, %v10667_v31  ;;  %v11555_v4 = vadd.f32 %v3924_v27, %v3137_v55  ;;  %v14440_v37 = vld [vmem:[#allocation13_spill] sm:$0xff] }
 0x29a   :  { %v2733_v48 = vpop.f32.mrf.mxu0  ;;  %8857 = vmatmul.mubr.msk.bf16.gmra.mxu0 %vm493_vm1, %v9844_v9  ;;  %v3928_v24 = vpop.f32.mrf.mxu1  ;;  %9056 = vmatmul.mubr.msk.bf16.gmra.mxu1 %vm493_vm1, %v9845_v52 }
 0x29b   :  { %14425 = vst [vmem:[#allocation153_spill] sm:$0xff] %v11555_v4  ;;  %v3146_v47 = vadd.f32 %v2733_v48, %v10671_v41  ;;  %v11560_v32 = vadd.f32 %v3928_v24, %v3138_v53  ;;  %2981 = vmatprep.mubr.bf16.mxu0 %v14281_v8  ;;  %4176 = vmatprep.mubr.bf16.mxu1 %v14281_v8  ;;  %v9847_v41 = vld [vmem:[%s14261_s0 + $0x140] sm:$0xff]   ;;  %v14429_v53 = vld [vmem:[#allocation7_spill] sm:$0xff]  ;;  %v14431_v48 = vld [vmem:[#allocation8_spill] sm:$0xff] }
 0x29c   :  { %v2735_v10 = vpop.f32.mrf.mxu0  ;;  %v3930_v26 = vpop.f32.mrf.mxu1 }
 0x29d   :  { %14426 = vst [vmem:[#allocation154_spill] sm:$0xff] %v11560_v32  ;;  %v3147_v31 = vadd.f32 %v2735_v10, %v14427_v34  ;;  %v11565_v55 = vadd.f32 %v3930_v26, %v3139_v36  ;;  %v14433_v34 = vld [vmem:[#allocation9_spill] sm:$0xff] }
 0x29e   :  { %v2737_v61 = vpop.f32.mrf.mxu0  ;;  %v3932_v63 = vpop.f32.mrf.mxu1 }
 0x29f   :  { %14428 = vst [vmem:[#allocation6_spill] sm:$0xff] %v11565_v55  ;;  %v3148_v9 = vadd.f32 %v2737_v61, %v14429_v53  ;;  %v11574_v52 = vadd.f32 %v3932_v63, %v3140_v42  ;;  %v14434_v63 = vld [vmem:[#allocation10_spill] sm:$0xff] }
 0x2a0   :  { %v2739_v17 = vpop.f32.mrf.mxu0  ;;  %v3934_v27 = vpop.f32.mrf.mxu1 }
 0x2a1   :  { %14430 = vst [vmem:[#allocation7_spill] sm:$0xff] %v11574_v52  ;;  %v3149_v24 = vadd.f32 %v2739_v17, %v14431_v48  ;;  %v11577_v36 = vadd.f32 %v3934_v27, %v3141_v16  ;;  %v9848_v27 = vld [vmem:[%s14261_s0 + $0x148] sm:$0xff]  }
 0x2a2   :  { %v2743_v10 = vpop.f32.mrf.mxu0  ;;  %8858 = vmatmul.mubr.msk.bf16.gmra.mxu0 %vm493_vm1, %v9846_v51  ;;  %v3938_v26 = vpop.f32.mrf.mxu1  ;;  %9057 = vmatmul.mubr.msk.bf16.gmra.mxu1 %vm493_vm1, %v9847_v41  ;;  %v9880_v51 = vld [vmem:[%s14262_s3 + $0xe0] ss:$8 sps:$4 sm:$0xff]   ;;  %v9882_v41 = vld [vmem:[%s14262_s3 + $0xe4] ss:$8 sps:$4 sm:$0xff]  }
 0x2a3   :  { %14432 = vst [vmem:[#allocation8_spill] sm:$0xff] %v11577_v36  ;;  %v3150_v55 = vadd.f32 %v2743_v10, %v14433_v34  ;;  %v11582_v32 = vadd.f32 %v3938_v26, %v3142_v22  ;;  %2991 = vmatprep.mubr.bf16.mxu0 %v14281_v8  ;;  %4186 = vmatprep.mubr.bf16.mxu1 %v14281_v8  ;;  %v9849_v48 = vld [vmem:[%s14261_s0 + $0x148] sm:$0xff]  }
 0x2a4   :  { %v2745_v42 = vpop.f32.mrf.mxu0  ;;  %v3940_v61 = vpop.f32.mrf.mxu1  ;;  %6110 = vmatprep.subr.bf16.mxu1 %v9882_v41  ;;  %v14442_v41 = vld [vmem:[#allocation14_spill] sm:$0xff] }
 0x2a5   :  { %v3151_v53 = vadd.f32 %v2745_v42, %v14434_v63  ;;  %v11587_v16 = vadd.f32 %v3940_v61, %v3143_v44  ;;  %v14436_v44 = vld [vmem:[#allocation11_spill] sm:$0xff]  ;;  %6111 = vmatpush1.bf16.msra.mxu1 %v9880_v51  ;;  %v14438_v61 = vld [vmem:[#allocation12_spill] sm:$0xff] }
 0x2a6   :  { %v2747_v22 = vpop.f32.mrf.mxu0  ;;  %v3942_v17 = vpop.f32.mrf.mxu1 }
 0x2a7   :  { %14435 = vst [vmem:[#allocation9_spill] sm:$0xff] %v11587_v16  ;;  %v3152_v10 = vadd.f32 %v2747_v22, %v14436_v44  ;;  %v11602_v26 = vadd.f32 %v3942_v17, %v3144_v25 }
 0x2a8   :  { %v2749_v34 = vpop.f32.mrf.mxu0  ;;  %v3944_v42 = vpop.f32.mrf.mxu1 }
 0x2a9   :  { %14437 = vst [vmem:[#allocation10_spill] sm:$0xff] %v11602_v26  ;;  %v3153_v63 = vadd.f32 %v2749_v34, %v14438_v61  ;;  %v11605_v36 = vadd.f32 %v3944_v42, %v3145_v56  ;;  %v14446_v42 = vld [vmem:[#allocation16_spill] sm:$0xff] }
 0x2aa   :  { %v2753_v52 = vpop.f32.mrf.mxu0  ;;  %8859 = vmatmul.mubr.msk.bf16.gmra.mxu0 %vm493_vm1, %v9848_v27  ;;  %v3948_v4 = vpop.f32.mrf.mxu1  ;;  %9058 = vmatmul.mubr.msk.bf16.gmra.mxu1 %vm493_vm1, %v9849_v48  ;;  %v9850_v27 = vld [vmem:[%s14261_s0 + $0x150] sm:$0xff]  }
 0x2ab   :  { %14439 = vst [vmem:[#allocation11_spill] sm:$0xff] %v11605_v36  ;;  %v3154_v16 = vadd.f32 %v2753_v52, %v14440_v37  ;;  %v11610_v5 = vadd.f32 %v3948_v4, %v3146_v47  ;;  %3001 = vmatprep.mubr.bf16.mxu0 %v14281_v8  ;;  %4196 = vmatprep.mubr.bf16.mxu1 %v14281_v8  ;;  %v9851_v37 = vld [vmem:[%s14261_s0 + $0x150] sm:$0xff]  }
 0x2ac   :  { %v2755_v25 = vpop.f32.mrf.mxu0  ;;  %v3950_v51 = vpop.f32.mrf.mxu1  ;;  %v14444_v4 = vld [vmem:[#allocation15_spill] sm:$0xff] }
 0x2ad   :  { %14441 = vst [vmem:[#allocation12_spill] sm:$0xff] %v11610_v5  ;;  %v3155_v22 = vadd.f32 %v2755_v25, %v14442_v41  ;;  %v11615_v56 = vadd.f32 %v3950_v51, %v3147_v31  ;;  %v14448_v41 = vld [vmem:[#allocation17_spill] sm:$0xff] }
 0x2ae   :  { %v2757_v17 = vpop.f32.mrf.mxu0  ;;  %v3952_v44 = vpop.f32.mrf.mxu1 }
 0x2af   :  { %14443 = vst [vmem:[#allocation13_spill] sm:$0xff] %v11615_v56  ;;  %v3156_v47 = vadd.f32 %v2757_v17, %v14444_v4  ;;  %v11624_v52 = vadd.f32 %v3952_v44, %v3148_v9  ;;  %v14450_v44 = vld [vmem:[#allocation18_spill] sm:$0xff] }
 0x2b0   :  { %v2759_v48 = vpop.f32.mrf.mxu0  ;;  %v3954_v34 = vpop.f32.mrf.mxu1 }
 0x2b1   :  { %14445 = vst [vmem:[#allocation14_spill] sm:$0xff] %v11624_v52  ;;  %v3157_v61 = vadd.f32 %v2759_v48, %v14446_v42  ;;  %v11627_v31 = vadd.f32 %v3954_v34, %v3149_v24 }
 0x2b2   :  { %v2763_v25 = vpop.f32.mrf.mxu0  ;;  %8860 = vmatmul.mubr.msk.bf16.gmra.mxu0 %vm493_vm1, %v9850_v27  ;;  %v3958_v51 = vpop.f32.mrf.mxu1  ;;  %9059 = vmatmul.mubr.msk.bf16.gmra.mxu1 %vm493_vm1, %v9851_v37  ;;  %v9852_v27 = vld [vmem:[%s14261_s0 + $0x158] sm:$0xff]   ;;  %v14452_v37 = vld [vmem:[#allocation19_spill] sm:$0xff] }
 0x2b3   :  { %14447 = vst [vmem:[#allocation15_spill] sm:$0xff] %v11627_v31  ;;  %v3158_v56 = vadd.f32 %v2763_v25, %v14448_v41  ;;  %v11632_v5 = vadd.f32 %v3958_v51, %v3150_v55  ;;  %3011 = vmatprep.mubr.bf16.mxu0 %v14281_v8  ;;  %4206 = vmatprep.mubr.bf16.mxu1 %v14281_v8  ;;  %v9853_v55 = vld [vmem:[%s14261_s0 + $0x158] sm:$0xff]  }
 0x2b4   :  { %v2765_v9 = vpop.f32.mrf.mxu0  ;;  %v3960_v17 = vpop.f32.mrf.mxu1 }
 0x2b5   :  { %14449 = vst [vmem:[#allocation16_spill] sm:$0xff] %v11632_v5  ;;  %v3159_v4 = vadd.f32 %v2765_v9, %v14450_v44  ;;  %v11637_v24 = vadd.f32 %v3960_v17, %v3151_v53  ;;  %v14454_v5 = vld [vmem:[#allocation20_spill] sm:$0xff] }
 0x2b6   :  { %v2767_v48 = vpop.f32.mrf.mxu0  ;;  %v3962_v34 = vpop.f32.mrf.mxu1 }
 0x2b7   :  { %14451 = vst [vmem:[#allocation17_spill] sm:$0xff] %v11637_v24  ;;  %v3160_v42 = vadd.f32 %v2767_v48, %v14452_v37  ;;  %v11646_v25 = vadd.f32 %v3962_v34, %v3152_v10  ;;  %v14456_v24 = vld [vmem:[#allocation21_spill] sm:$0xff]  ;;  %v14458_v34 = vld [vmem:[#allocation22_spill] sm:$0xff] }
 0x2b8   :  { %v2769_v51 = vpop.f32.mrf.mxu0  ;;  %v3964_v41 = vpop.f32.mrf.mxu1 }
 0x2b9   :  { %14453 = vst [vmem:[#allocation18_spill] sm:$0xff] %v11646_v25  ;;  %v3161_v9 = vadd.f32 %v2769_v51, %v14454_v5  ;;  %v11649_v53 = vadd.f32 %v3964_v41, %v3153_v63 }
 0x2ba   :  { %v2773_v17 = vpop.f32.mrf.mxu0  ;;  %8861 = vmatmul.mubr.msk.bf16.gmra.mxu0 %vm493_vm1, %v9852_v27  ;;  %v3968_v44 = vpop.f32.mrf.mxu1  ;;  %9060 = vmatmul.mubr.msk.bf16.gmra.mxu1 %vm493_vm1, %v9853_v55  ;;  %v9854_v27 = vld [vmem:[%s14261_s0 + $0x160] sm:$0xff]  }
 0x2bb   :  { %14455 = vst [vmem:[#allocation19_spill] sm:$0xff] %v11649_v53  ;;  %v3162_v31 = vadd.f32 %v2773_v17, %v14456_v24  ;;  %v11654_v52 = vadd.f32 %v3968_v44, %v3154_v16  ;;  %3021 = vmatprep.mubr.bf16.mxu0 %v14281_v8  ;;  %4216 = vmatprep.mubr.bf16.mxu1 %v14281_v8  ;;  %v9855_v16 = vld [vmem:[%s14261_s0 + $0x160] sm:$0xff]   ;;  %v14460_v24 = vld [vmem:[#allocation23_spill] sm:$0xff] }
 0x2bc   :  { %v2775_v10 = vpop.f32.mrf.mxu0  ;;  %v3970_v48 = vpop.f32.mrf.mxu1 }
 0x2bd   :  { %14457 = vst [vmem:[#allocation20_spill] sm:$0xff] %v11654_v52  ;;  %v3163_v5 = vadd.f32 %v2775_v10, %v14458_v34  ;;  %v11659_v63 = vadd.f32 %v3970_v48, %v3155_v22  ;;  %v14462_v52 = vld [vmem:[#allocation24_spill] sm:$0xff] }
 0x2be   :  { %v2777_v37 = vpop.f32.mrf.mxu0  ;;  %v3972_v51 = vpop.f32.mrf.mxu1 }
 0x2bf   :  { %14459 = vst [vmem:[#allocation21_spill] sm:$0xff] %v11659_v63  ;;  %v3164_v55 = vadd.f32 %v2777_v37, %v14460_v24  ;;  %v11668_v41 = vadd.f32 %v3972_v51, %v3156_v47  ;;  %v14464_v63 = vld [vmem:[#allocation25_spill] sm:$0xff]  ;;  %v14466_v51 = vld [vmem:[#allocation26_spill] sm:$0xff] }
 0x2c0   :  { %v2779_v17 = vpop.f32.mrf.mxu0  ;;  %v3974_v44 = vpop.f32.mrf.mxu1 }
 0x2c1   :  { %14461 = vst [vmem:[#allocation22_spill] sm:$0xff] %v11668_v41  ;;  %v3165_v10 = vadd.f32 %v2779_v17, %v14462_v52  ;;  %v11671_v22 = vadd.f32 %v3974_v44, %v3157_v61  ;;  %v14472_v41 = vld [vmem:[#allocation29_spill] sm:$0xff] }
 0x2c2   :  { %v2783_v48 = vpop.f32.mrf.mxu0  ;;  %8862 = vmatmul.mubr.msk.bf16.gmra.mxu0 %vm493_vm1, %v9854_v27  ;;  %v3978_v34 = vpop.f32.mrf.mxu1  ;;  %9061 = vmatmul.mubr.msk.bf16.gmra.mxu1 %vm493_vm1, %v9855_v16  ;;  %v9856_v27 = vld [vmem:[%s14261_s0 + $0x168] sm:$0xff]  }
 0x2c3   :  { %14463 = vst [vmem:[#allocation23_spill] sm:$0xff] %v11671_v22  ;;  %v3166_v53 = vadd.f32 %v2783_v48, %v14464_v63  ;;  %v11676_v25 = vadd.f32 %v3978_v34, %v3158_v56  ;;  %3031 = vmatprep.mubr.bf16.mxu0 %v14281_v8  ;;  %4226 = vmatprep.mubr.bf16.mxu1 %v14281_v8  ;;  %v9857_v56 = vld [vmem:[%s14261_s0 + $0x168] sm:$0xff]   ;;  %v14468_v63 = vld [vmem:[#allocation27_spill] sm:$0xff]  ;;  %v14470_v22 = vld [vmem:[#allocation28_spill] sm:$0xff] }
 0x2c4   :  { %v2785_v47 = vpop.f32.mrf.mxu0  ;;  %v3980_v37 = vpop.f32.mrf.mxu1 }
 0x2c5   :  { %14465 = vst [vmem:[#allocation24_spill] sm:$0xff] %v11676_v25  ;;  %v3167_v52 = vadd.f32 %v2785_v47, %v14466_v51  ;;  %v11681_v61 = vadd.f32 %v3980_v37, %v3159_v4 }
 0x2c6   :  { %v2787_v24 = vpop.f32.mrf.mxu0  ;;  %v3982_v17 = vpop.f32.mrf.mxu1 }
 0x2c7   :  { %14467 = vst [vmem:[#allocation25_spill] sm:$0xff] %v11681_v61  ;;  %v3168_v16 = vadd.f32 %v2787_v24, %v14468_v63  ;;  %v11690_v44 = vadd.f32 %v3982_v17, %v3160_v42  ;;  %v14474_v17 = vld [vmem:[#allocation30_spill] sm:$0xff] }
 0x2c8   :  { %v2789_v48 = vpop.f32.mrf.mxu0  ;;  %v3984_v34 = vpop.f32.mrf.mxu1 }
 0x2c9   :  { %14469 = vst [vmem:[#allocation26_spill] sm:$0xff] %v11690_v44  ;;  %v3169_v47 = vadd.f32 %v2789_v48, %v14470_v22  ;;  %v11693_v4 = vadd.f32 %v3984_v34, %v3161_v9 }
 0x2ca   :  { %v2793_v37 = vpop.f32.mrf.mxu0  ;;  %8863 = vmatmul.mubr.msk.bf16.gmra.mxu0 %vm493_vm1, %v9856_v27  ;;  %v3988_v51 = vpop.f32.mrf.mxu1  ;;  %9062 = vmatmul.mubr.msk.bf16.gmra.mxu1 %vm493_vm1, %v9857_v56  ;;  %v9858_v27 = vld [vmem:[%s14261_s0 + $0x170] sm:$0xff]  }
 0x2cb   :  { %14471 = vst [vmem:[#allocation27_spill] sm:$0xff] %v11693_v4  ;;  %v3170_v61 = vadd.f32 %v2793_v37, %v14472_v41  ;;  %v11698_v25 = vadd.f32 %v3988_v51, %v3162_v31  ;;  %3041 = vmatprep.mubr.bf16.mxu0 %v14281_v8  ;;  %4236 = vmatprep.mubr.bf16.mxu1 %v14281_v8  ;;  %v9859_v31 = vld [vmem:[%s14261_s0 + $0x170] sm:$0xff]  }
 0x2cc   :  { %v2795_v42 = vpop.f32.mrf.mxu0  ;;  %v3990_v24 = vpop.f32.mrf.mxu1  ;;  %v14476_v41 = vld [vmem:[#allocation31_spill] sm:$0xff] }
 0x2cd   :  { %14473 = vst [vmem:[#allocation28_spill] sm:$0xff] %v11698_v25  ;;  %v3171_v22 = vadd.f32 %v2795_v42, %v14474_v17  ;;  %v11703_v9 = vadd.f32 %v3990_v24, %v3163_v5  ;;  %v14478_v25 = vld [vmem:[#allocation32_spill] sm:$0xff] }
 0x2ce   :  { %v2797_v63 = vpop.f32.mrf.mxu0  ;;  %v3992_v48 = vpop.f32.mrf.mxu1 }
 0x2cf   :  { %14475 = vst [vmem:[#allocation29_spill] sm:$0xff] %v11703_v9  ;;  %v3172_v56 = vadd.f32 %v2797_v63, %v14476_v41  ;;  %v11712_v34 = vadd.f32 %v3992_v48, %v3164_v55  ;;  %v14480_v9 = vld [vmem:[#allocation33_spill] sm:$0xff]  ;;  %v14482_v48 = vld [vmem:[#allocation34_spill] sm:$0xff]  ;;  %v9860_v41 = vld [vmem:[%s14261_s0 + $0x178] sm:$0xff]  }
 0x2d0   :  { %v2799_v37 = vpop.f32.mrf.mxu0  ;;  %v3994_v51 = vpop.f32.mrf.mxu1 }
 0x2d1   :  { %14477 = vst [vmem:[#allocation30_spill] sm:$0xff] %v11712_v34  ;;  %v3173_v42 = vadd.f32 %v2799_v37, %v14478_v25  ;;  %v11715_v5 = vadd.f32 %v3994_v51, %v3165_v10  ;;  %v9861_v37 = vld [vmem:[%s14261_s0 + $0x178] sm:$0xff]   ;;  %v14488_v34 = vld [vmem:[#allocation37_spill] sm:$0xff] }
 0x2d2   :  { %v2803_v24 = vpop.f32.mrf.mxu0  ;;  %8864 = vmatmul.mubr.msk.bf16.gmra.mxu0 %vm493_vm1, %v9858_v27  ;;  %v3998_v17 = vpop.f32.mrf.mxu1  ;;  %9063 = vmatmul.mubr.msk.bf16.gmra.mxu1 %vm493_vm1, %v9859_v31  ;;  %v9889_v27 = vld [vmem:[%s14262_s3 + $0xd0] ss:$8 sps:$4 sm:$0xff]  }
 0x2d3   :  { %14479 = vst [vmem:[#allocation31_spill] sm:$0xff] %v11715_v5  ;;  %v3174_v4 = vadd.f32 %v2803_v24, %v14480_v9  ;;  %v11720_v44 = vadd.f32 %v3998_v17, %v3166_v53  ;;  %3051 = vmatprep.mubr.bf16.mxu0 %v14281_v8  ;;  %4246 = vmatprep.mubr.bf16.mxu1 %v14281_v8  ;;  %v9891_v9 = vld [vmem:[%s14262_s3 + $0xd4] ss:$8 sps:$4 sm:$0xff]  }
 0x2d4   :  { %v2805_v55 = vpop.f32.mrf.mxu0  ;;  %v4000_v63 = vpop.f32.mrf.mxu1  ;;  %6112 = vmatprep.subr.bf16.mxu1 %v9891_v9  ;;  %v14490_v9 = vld [vmem:[#allocation38_spill] sm:$0xff] }
 0x2d5   :  { %14481 = vst [vmem:[#allocation32_spill] sm:$0xff] %v11720_v44  ;;  %v3175_v25 = vadd.f32 %v2805_v55, %v14482_v48  ;;  %v11725_v10 = vadd.f32 %v4000_v63, %v3167_v52  ;;  %v14484_v52 = vld [vmem:[#allocation35_spill] sm:$0xff]  ;;  %6113 = vmatpush1.bf16.msra.mxu1 %v9889_v27  ;;  %v14486_v63 = vld [vmem:[#allocation36_spill] sm:$0xff] }
 0x2d6   :  { %v2807_v53 = vpop.f32.mrf.mxu0  ;;  %v4002_v31 = vpop.f32.mrf.mxu1 }
 0x2d7   :  { %14483 = vst [vmem:[#allocation33_spill] sm:$0xff] %v11725_v10  ;;  %v3176_v51 = vadd.f32 %v2807_v53, %v14484_v52  ;;  %v11740_v24 = vadd.f32 %v4002_v31, %v3168_v16 }
 0x2d8   :  { %v2809_v17 = vpop.f32.mrf.mxu0  ;;  %v4004_v55 = vpop.f32.mrf.mxu1 }
 0x2d9   :  { %14485 = vst [vmem:[#allocation34_spill] sm:$0xff] %v11740_v24  ;;  %v3177_v48 = vadd.f32 %v2809_v17, %v14486_v63  ;;  %v11743_v10 = vadd.f32 %v4004_v55, %v3169_v47  ;;  %v14494_v55 = vld [vmem:[#allocation40_spill] sm:$0xff] }
 0x2da   :  { %v2813_v44 = vpop.f32.mrf.mxu0  ;;  %8865 = vmatmul.mubr.msk.bf16.gmra.mxu0 %vm493_vm1, %v9860_v41  ;;  %v4008_v5 = vpop.f32.mrf.mxu1  ;;  %9064 = vmatmul.mubr.msk.bf16.gmra.mxu1 %vm493_vm1, %v9861_v37  ;;  %v9862_v41 = vld [vmem:[%s14261_s0 + $0x180] sm:$0xff]  }
 0x2db   :  { %14487 = vst [vmem:[#allocation35_spill] sm:$0xff] %v11743_v10  ;;  %v3178_v36 = vadd.f32 %v2813_v44, %v14488_v34  ;;  %v11748_v26 = vadd.f32 %v4008_v5, %v3170_v61  ;;  %3061 = vmatprep.mubr.bf16.mxu0 %v14281_v8  ;;  %4256 = vmatprep.mubr.bf16.mxu1 %v14281_v8  ;;  %v9863_v61 = vld [vmem:[%s14261_s0 + $0x180] sm:$0xff]   ;;  %v14492_v44 = vld [vmem:[#allocation39_spill] sm:$0xff] }
 0x2dc   :  { %v2815_v16 = vpop.f32.mrf.mxu0  ;;  %v4010_v27 = vpop.f32.mrf.mxu1 }
 0x2dd   :  { %14489 = vst [vmem:[#allocation36_spill] sm:$0xff] %v11748_v26  ;;  %v3179_v53 = vadd.f32 %v2815_v16, %v14490_v9  ;;  %v11753_v47 = vadd.f32 %v4010_v27, %v3171_v22  ;;  %v14496_v9 = vld [vmem:[#allocation41_spill] sm:$0xff] }
 0x2de   :  { %v2817_v31 = vpop.f32.mrf.mxu0  ;;  %v4012_v52 = vpop.f32.mrf.mxu1 }
 0x2df   :  { %14491 = vst [vmem:[#allocation37_spill] sm:$0xff] %v11753_v47  ;;  %v3180_v34 = vadd.f32 %v2817_v31, %v14492_v44  ;;  %v11762_v5 = vadd.f32 %v4012_v52, %v3172_v56  ;;  %v14497_v52 = vld [vmem:[#allocation42_spill] sm:$0xff] }
 0x2e0   :  { %v2819_v37 = vpop.f32.mrf.mxu0  ;;  %v4014_v17 = vpop.f32.mrf.mxu1 }
 0x2e1   :  { %14493 = vst [vmem:[#allocation38_spill] sm:$0xff] %v11762_v5  ;;  %v3181_v63 = vadd.f32 %v2819_v37, %v14494_v55  ;;  %v11765_v22 = vadd.f32 %v4014_v17, %v3173_v42  ;;  %v14501_v5 = vld [vmem:[#allocation45_spill] sm:$0xff] }
 0x2e2   :  { %v2823_v16 = vpop.f32.mrf.mxu0  ;;  %8866 = vmatmul.mubr.msk.bf16.gmra.mxu0 %vm493_vm1, %v9862_v41  ;;  %v4018_v27 = vpop.f32.mrf.mxu1  ;;  %9065 = vmatmul.mubr.msk.bf16.gmra.mxu1 %vm493_vm1, %v9863_v61  ;;  %v9864_v41 = vld [vmem:[%s14261_s0 + $0x188] sm:$0xff]   ;;  %v14498_v61 = vld [vmem:[#allocation43_spill] sm:$0xff] }
 0x2e3   :  { %14495 = vst [vmem:[#allocation39_spill] sm:$0xff] %v11765_v22  ;;  %v3182_v47 = vadd.f32 %v2823_v16, %v14496_v9  ;;  %v11770_v26 = vadd.f32 %v4018_v27, %v3174_v4  ;;  %3071 = vmatprep.mubr.bf16.mxu0 %v14281_v8  ;;  %4266 = vmatprep.mubr.bf16.mxu1 %v14281_v8  ;;  %v9865_v4 = vld [vmem:[%s14261_s0 + $0x188] sm:$0xff]   ;;  %v14499_v22 = vld [vmem:[#allocation44_spill] sm:$0xff] }
 0x2e4   :  { %v2825_v56 = vpop.f32.mrf.mxu0  ;;  %v4020_v31 = vpop.f32.mrf.mxu1 }
 0x2e5   :  { %v3183_v44 = vadd.f32 %v2825_v56, %v14497_v52  ;;  %v11775_v42 = vadd.f32 %v4020_v31, %v3175_v25 }
 0x2e6   :  { %v2827_v37 = vpop.f32.mrf.mxu0  ;;  %v4022_v17 = vpop.f32.mrf.mxu1 }
 0x2e7   :  { %v3184_v55 = vadd.f32 %v2827_v37, %v14498_v61  ;;  %v11784_v16 = vadd.f32 %v4022_v17, %v3176_v51 }
 0x2e8   :  { %v2829_v27 = vpop.f32.mrf.mxu0  ;;  %v4024_v9 = vpop.f32.mrf.mxu1 }
 0x2e9   :  { %v11787_v56 = vadd.f32 %v2829_v27, %v14499_v22  ;;  %v11789_v25 = vadd.f32 %v4024_v9, %v3177_v48  ;;  %v14503_v22 = vld [vmem:[#allocation46_spill] sm:$0xff] }
 0x2ea   :  { %v2833_v31 = vpop.f32.mrf.mxu0  ;;  %8867 = vmatmul.mubr.msk.bf16.gmra.mxu0 %vm493_vm1, %v9864_v41  ;;  %v4028_v52 = vpop.f32.mrf.mxu1  ;;  %9066 = vmatmul.mubr.msk.bf16.gmra.mxu1 %vm493_vm1, %v9865_v4  ;;  %v9866_v41 = vld [vmem:[%s14261_s0 + $0x190] sm:$0xff]  }
 0x2eb   :  { %14500 = vst [vmem:[#allocation40_spill] sm:$0xff] %v11787_v56  ;;  %v3186_v10 = vadd.f32 %v2833_v31, %v14501_v5  ;;  %v11794_v24 = vadd.f32 %v4028_v52, %v3178_v36  ;;  %3081 = vmatprep.mubr.bf16.mxu0 %v14281_v8  ;;  %4276 = vmatprep.mubr.bf16.mxu1 %v14281_v8  ;;  %v9867_v36 = vld [vmem:[%s14261_s0 + $0x190] sm:$0xff]   ;;  %v14509_v56 = vld [vmem:[#allocation48_spill] sm:$0xff] }
 0x2ec   :  { %v2835_v51 = vpop.f32.mrf.mxu0  ;;  %v4030_v37 = vpop.f32.mrf.mxu1  ;;  %v14506_v52 = vld [vmem:[#allocation47_spill] sm:$0xff] }
 0x2ed   :  { %14502 = vst [vmem:[#allocation41_spill] sm:$0xff] %v11794_v24  ;;  %v3187_v17 = vadd.f32 %v2835_v51, %v14503_v22  ;;  %v11799_v48 = vadd.f32 %v4030_v37, %v3179_v53 }
 0x2ee   :  { %v2837_v61 = vpop.f32.mrf.mxu0  ;;  %v4032_v27 = vpop.f32.mrf.mxu1 }
 0x2ef   :  { %14504 = vst [vmem:[#allocation42_spill] sm:$0xff] %v11799_v48  ;;  %v3188_v5 = vadd.f32 %v2837_v61, %v10866_v38  ;;  %v11808_v4 = vadd.f32 %v4032_v27, %v3180_v34  ;;  %v14511_v61 = vld [vmem:[#allocation49_spill] sm:$0xff] }
 0x2f0   :  { %v2839_v9 = vpop.f32.mrf.mxu0  ;;  %v4034_v31 = vpop.f32.mrf.mxu1 }
 0x2f1   :  { %14505 = vst [vmem:[#allocation43_spill] sm:$0xff] %v11808_v4  ;;  %v11811_v51 = vadd.f32 %v2839_v9, %v14506_v52  ;;  %v11813_v53 = vadd.f32 %v4034_v31, %v3181_v63 }
 0x2f2   :  { %v2843_v37 = vpop.f32.mrf.mxu0  ;;  %8868 = vmatmul.mubr.msk.bf16.gmra.mxu0 %vm493_vm1, %v9866_v41  ;;  %v4038_v22 = vpop.f32.mrf.mxu1  ;;  %9067 = vmatmul.mubr.msk.bf16.gmra.mxu1 %vm493_vm1, %v9867_v36  ;;  %v9871_v41 = vld [vmem:[%s14261_s0 + $0x198] sm:$0xff]  }
 0x2f3   :  { %14507 = vst [vmem:[#allocation44_spill] sm:$0xff] %v11811_v51  ;;  %14508 = vst [vmem:[#allocation45_spill] sm:$0xff] %v11813_v53  ;;  %v3190_v48 = vadd.f32 %v2843_v37, %v14509_v56  ;;  %v11818_v24 = vadd.f32 %v4038_v22, %v3182_v47  ;;  %3091 = vmatprep.mubr.bf16.mxu0 %v14281_v8  ;;  %4286 = vmatprep.mubr.bf16.mxu1 %v14281_v8  ;;  %v9872_v47 = vld [vmem:[%s14261_s0 + $0x198] sm:$0xff]   ;;  %v14513_v56 = vld [vmem:[#allocation50_spill] sm:$0xff] }
 0x2f4   :  { %v2845_v38 = vpop.f32.mrf.mxu0  ;;  %v4040_v34 = vpop.f32.mrf.mxu1  ;;  %v14518_v51 = vld [vmem:[#allocation52_spill] sm:$0xff] }
 0x2f5   :  { %14510 = vst [vmem:[#allocation46_spill] sm:$0xff] %v11818_v24  ;;  %v3191_v27 = vadd.f32 %v2845_v38, %v14511_v61  ;;  %v11823_v63 = vadd.f32 %v4040_v34, %v3183_v44  ;;  %v14516_v38 = vld [vmem:[#allocation51_spill] sm:$0xff] }
 0x2f6   :  { %v2847_v9 = vpop.f32.mrf.mxu0  ;;  %v4042_v31 = vpop.f32.mrf.mxu1 }
 0x2f7   :  { %14512 = vst [vmem:[#allocation47_spill] sm:$0xff] %v11823_v63  ;;  %v3192_v36 = vadd.f32 %v2847_v9, %v14513_v56  ;;  %v11832_v52 = vadd.f32 %v4042_v31, %v3184_v55  ;;  %v14520_v31 = vld [vmem:[#allocation53_spill] sm:$0xff] }
 0x2f8   :  { %v2849_v37 = vpop.f32.mrf.mxu0  ;;  %v11834_v22 = vpop.f32.mrf.mxu1 }
 0x2f9   :  { %14514 = vst [vmem:[#allocation48_spill] sm:$0xff] %v11832_v52  ;;  %14515 = vst [vmem:[#allocation49_spill] sm:$0xff] %v11834_v22  ;;  %v11837_v44 = vadd.f32 %v2849_v37, %v14516_v38 }
 0x2fa   :  { %v2853_v34 = vpop.f32.mrf.mxu0  ;;  %8869 = vmatmul.mubr.msk.bf16.gmra.mxu0 %vm493_vm1, %v9871_v41  ;;  %v4048_v61 = vpop.f32.mrf.mxu1  ;;  %9068 = vmatmul.mubr.msk.bf16.gmra.mxu1 %vm493_vm1, %v9872_v47  ;;  %v9873_v41 = vld [vmem:[%s14261_s0 + $0x1a0] sm:$0xff]  }
 0x2fb   :  { %14517 = vst [vmem:[#allocation50_spill] sm:$0xff] %v11837_v44  ;;  %v3194_v63 = vadd.f32 %v2853_v34, %v14518_v51  ;;  %v11842_v24 = vadd.f32 %v4048_v61, %v3186_v10  ;;  %4296 = vmatprep.mubr.bf16.mxu1 %v14281_v8  ;;  %5051 = vmatprep.mubr.bf16.mxu0 %v14281_v8  ;;  %v9874_v10 = vld [vmem:[%s14261_s0 + $0x40] sm:$0xff]   ;;  %v14522_v51 = vld [vmem:[#allocation54_spill] sm:$0xff] }
 0x2fc   :  { %v2855_v55 = vpop.f32.mrf.mxu0  ;;  %v4050_v9 = vpop.f32.mrf.mxu1 }
 0x2fd   :  { %14519 = vst [vmem:[#allocation51_spill] sm:$0xff] %v11842_v24  ;;  %v3195_v56 = vadd.f32 %v2855_v55, %v14520_v31  ;;  %v11847_v37 = vadd.f32 %v4050_v9, %v3187_v17  ;;  %v14525_v55 = vld [vmem:[#allocation55_spill] sm:$0xff] }
 0x2fe   :  { %v2857_v38 = vpop.f32.mrf.mxu0  ;;  %v4052_v52 = vpop.f32.mrf.mxu1 }
 0x2ff   :  { %14521 = vst [vmem:[#allocation52_spill] sm:$0xff] %v11847_v37  ;;  %v3196_v47 = vadd.f32 %v2857_v38, %v14522_v51  ;;  %v11856_v34 = vadd.f32 %v4052_v52, %v3188_v5  ;;  %v14527_v37 = vld [vmem:[#allocation56_spill] sm:$0xff]  ;;  %v14529_v38 = vld [vmem:[#allocation57_spill] sm:$0xff] }
 0x300   :  { %v2859_v61 = vpop.f32.mrf.mxu0  ;;  %v11858_v24 = vpop.f32.mrf.mxu1 }
 0x301   :  { %14523 = vst [vmem:[#allocation53_spill] sm:$0xff] %v11856_v34  ;;  %14524 = vst [vmem:[#allocation54_spill] sm:$0xff] %v11858_v24  ;;  %v11861_v17 = vadd.f32 %v2859_v61, %v14525_v55  ;;  %v9875_v55 = vld [vmem:[%s14261_s0 + $0x1a8] sm:$0xff]   ;;  %v14532_v34 = vld [vmem:[#allocation59_spill] sm:$0xff] }
 0x302   :  { %v2863_v9 = vpop.f32.mrf.mxu0  ;;  %v4058_v31 = vpop.f32.mrf.mxu1  ;;  %9069 = vmatmul.mubr.msk.bf16.gmra.mxu1 %vm493_vm1, %v9873_v41  ;;  %9224 = vmatmul.mubr.msk.bf16.vlgmr.msra.gmra.mxu0 %vm493_vm1, %v9874_v10  ;;  %v9898_v41 = vld [vmem:[%s14262_s3 + $0xc0] ss:$8 sps:$4 sm:$0xff]  }
 0x303   :  { %14526 = vst [vmem:[#allocation55_spill] sm:$0xff] %v11861_v17  ;;  %v3198_v44 = vadd.f32 %v2863_v9, %v14527_v37  ;;  %v11866_v22 = vadd.f32 %v4058_v31, %v3190_v48  ;;  %4306 = vmatprep.mubr.bf16.mxu1 %v14281_v8  ;;  %5061 = vmatprep.mubr.bf16.mxu0 %v14281_v8  ;;  %v9900_v37 = vld [vmem:[%s14262_s3 + $0xc4] ss:$8 sps:$4 sm:$0xff]  }
 0x304   :  { %v2865_v5 = vpop.f32.mrf.mxu0  ;;  %v4060_v52 = vpop.f32.mrf.mxu1  ;;  %v9876_v9 = vld [vmem:[%s14261_s0 + $0x48] sm:$0xff]   ;;  %6114 = vmatprep.subr.bf16.mxu1 %v9900_v37 }
 0x305   :  { %14528 = vst [vmem:[#allocation56_spill] sm:$0xff] %v11866_v22  ;;  %v3199_v51 = vadd.f32 %v2865_v5, %v14529_v38  ;;  %v11871_v61 = vadd.f32 %v4060_v52, %v3191_v27  ;;  %v14531_v27 = vld [vmem:[#allocation58_spill] sm:$0xff]  ;;  %6115 = vmatpush1.bf16.msra.mxu1 %v9898_v41  ;;  %v14534_v22 = vld [vmem:[#allocation60_spill] sm:$0xff]  ;;  %v14536_v41 = vld [vmem:[#allocation61_spill] sm:$0xff] }
 0x306   :  { %v2867_v48 = vpop.f32.mrf.mxu0  ;;  %v4062_v10 = vpop.f32.mrf.mxu1 }
 0x307   :  { %14530 = vst [vmem:[#allocation57_spill] sm:$0xff] %v11871_v61  ;;  %v3200_v31 = vadd.f32 %v2867_v48, %v14531_v27  ;;  %v11886_v5 = vadd.f32 %v4062_v10, %v3192_v36 }
 0x308   :  { %v2869_v52 = vpop.f32.mrf.mxu0  ;;  %v11888_v38 = vpop.f32.mrf.mxu1 }
 0x309   :  { %v11891_v17 = vadd.f32 %v2869_v52, %v14532_v34  ;;  %v14539_v52 = vld [vmem:[#allocation63_spill] sm:$0xff] }
 0x30a   :  { %v2873_v24 = vpop.f32.mrf.mxu0  ;;  %v4068_v61 = vpop.f32.mrf.mxu1  ;;  %9070 = vmatmul.mubr.msk.bf16.gmra.mxu1 %vm493_vm1, %v9875_v55  ;;  %9225 = vmatmul.mubr.msk.bf16.gmra.mxu0 %vm493_vm1, %v9876_v9  ;;  %v9877_v55 = vld [vmem:[%s14261_s0 + $0x50] sm:$0xff]   ;;  %v14537_v9 = vld [vmem:[#allocation62_spill] sm:$0xff] }
 0x30b   :  { %14533 = vst [vmem:[#allocation58_spill] sm:$0xff] %v11891_v17  ;;  %v3202_v53 = vadd.f32 %v2873_v24, %v14534_v22  ;;  %v11896_v4 = vadd.f32 %v4068_v61, %v3194_v63  ;;  %5071 = vmatprep.mubr.bf16.mxu0 %v14281_v8  ;;  %6140 = vmatprep.mubr.bf16.mxu1 %v14281_v8 }
 0x30c   :  { %v2875_v36 = vpop.f32.mrf.mxu0  ;;  %v4070_v37 = vpop.f32.mrf.mxu1 }
 0x30d   :  { %14535 = vst [vmem:[#allocation59_spill] sm:$0xff] %v11896_v4  ;;  %v3203_v48 = vadd.f32 %v2875_v36, %v14536_v41  ;;  %v11901_v34 = vadd.f32 %v4070_v37, %v3195_v56  ;;  %v14541_v56 = vld [vmem:[#allocation64_spill] sm:$0xff] }
 0x30e   :  { %v2877_v10 = vpop.f32.mrf.mxu0  ;;  %v4072_v27 = vpop.f32.mrf.mxu1 }
 0x30f   :  { %v3204_v24 = vadd.f32 %v2877_v10, %v14537_v9  ;;  %v11907_v63 = vadd.f32 %v4072_v27, %v3196_v47  ;;  %v14544_v27 = vld [vmem:[#allocation65_spill] sm:$0xff] }
 0x310   :  { %v2879_v22 = vpop.f32.mrf.mxu0  ;;  %v11909_v61 = vpop.f32.mrf.mxu1 }
 0x311   :  { %14538 = vst [vmem:[#allocation60_spill] sm:$0xff] %v11907_v63  ;;  %v11912_v17 = vadd.f32 %v2879_v22, %v14539_v52 }
 0x312   :  { %v2883_v4 = vpop.f32.mrf.mxu0  ;;  %v4078_v36 = vpop.f32.mrf.mxu1  ;;  %9226 = vmatmul.mubr.msk.bf16.gmra.mxu0 %vm493_vm1, %v9877_v55  ;;  %v9878_v55 = vld [vmem:[%s14261_s0 + $0x58] sm:$0xff]  }
 0x313   :  { %14540 = vst [vmem:[#allocation61_spill] sm:$0xff] %v11912_v17  ;;  %v11916_v37 = vadd.f32 %v2883_v4, %v14541_v56  ;;  %v11918_v41 = vadd.f32 %v4078_v36, %v3198_v44  ;;  %5081 = vmatprep.mubr.bf16.mxu0 %v14281_v8  ;;  %v14547_v17 = vld [vmem:[#allocation66_spill] sm:$0xff] }
 0x314   :  { %v2885_v10 = vpop.f32.mrf.mxu0  ;;  %v4080_v47 = vpop.f32.mrf.mxu1 }
 0x315   :  { %14542 = vst [vmem:[#allocation62_spill] sm:$0xff] %v11916_v37  ;;  %14543 = vst [vmem:[#allocation63_spill] sm:$0xff] %v11918_v41  ;;  %v11922_v9 = vadd.f32 %v2885_v10, %v14544_v27  ;;  %v11924_v63 = vadd.f32 %v4080_v47, %v3199_v51  ;;  %v14551_v41 = vld [vmem:[#allocation67_spill] sm:$0xff]  ;;  %v14553_v47 = vld [vmem:[#allocation68_spill] sm:$0xff] }
 0x316   :  { %v2887_v22 = vpop.f32.mrf.mxu0  ;;  %v4082_v52 = vpop.f32.mrf.mxu1 }
 0x317   :  { %14545 = vst [vmem:[#allocation64_spill] sm:$0xff] %v11922_v9  ;;  %14546 = vst [vmem:[#allocation65_spill] sm:$0xff] %v11924_v63  ;;  %v11930_v4 = vadd.f32 %v2887_v22, %v14547_v17  ;;  %v11932_v44 = vadd.f32 %v4082_v52, %v3200_v31  ;;  %v14556_v22 = vld [vmem:[#allocation69_spill] sm:$0xff]  ;;  %v14775_v9 = vld [vmem:[#allocation143_spill] sm:$0xff] }
 0x318   :  { %v2889_v36 = vpop.f32.mrf.mxu0  ;;  %v11934_v56 = vpop.f32.mrf.mxu1 }
 0x319   :  { %14548 = vst [vmem:[#allocation66_spill] sm:$0xff] %v11930_v4  ;;  %14549 = vst [vmem:[#allocation155_spill] sm:$0xff] %v11932_v44  ;;  %v11937_v37 = vadd.f32 %v2889_v36, %v14551_v41 }
 0x31a   :  { %14550 = vst [vmem:[#allocation156_spill] sm:$0xff] %v11934_v56  ;;  %v2893_v10 = vpop.f32.mrf.mxu0  ;;  %v4088_v51 = vpop.f32.mrf.mxu1  ;;  %9227 = vmatmul.mubr.msk.bf16.gmra.mxu0 %vm493_vm1, %v9878_v55  ;;  %v9879_v55 = vld [vmem:[%s14261_s0 + $0x60] sm:$0xff]  }
 0x31b   :  { %14552 = vst [vmem:[#allocation67_spill] sm:$0xff] %v11937_v37  ;;  %v11941_v27 = vadd.f32 %v2893_v10, %v14553_v47  ;;  %v11943_v63 = vadd.f32 %v4088_v51, %v3202_v53  ;;  %5091 = vmatprep.mubr.bf16.mxu0 %v14281_v8  ;;  %v14559_v37 = vld [vmem:[#allocation70_spill] sm:$0xff] }
 0x31c   :  { %v2895_v17 = vpop.f32.mrf.mxu0  ;;  %v4090_v31 = vpop.f32.mrf.mxu1 }
 0x31d   :  { %14554 = vst [vmem:[#allocation68_spill] sm:$0xff] %v11941_v27  ;;  %14555 = vst [vmem:[#allocation157_spill] sm:$0xff] %v11943_v63  ;;  %v11947_v52 = vadd.f32 %v2895_v17, %v14556_v22  ;;  %v11949_v44 = vadd.f32 %v4090_v31, %v3203_v48  ;;  %v14563_v63 = vld [vmem:[#allocation71_spill] sm:$0xff]  ;;  %v14566_v31 = vld [vmem:[#allocation72_spill] sm:$0xff] }
 0x31e   :  { %v2897_v41 = vpop.f32.mrf.mxu0  ;;  %v4092_v36 = vpop.f32.mrf.mxu1 }
 0x31f   :  { %14557 = vst [vmem:[#allocation69_spill] sm:$0xff] %v11947_v52  ;;  %14558 = vst [vmem:[#allocation158_spill] sm:$0xff] %v11949_v44  ;;  %v11955_v10 = vadd.f32 %v2897_v41, %v14559_v37  ;;  %v11957_v53 = vadd.f32 %v4092_v36, %v3204_v24  ;;  %v14569_v24 = vld [vmem:[#allocation73_spill] sm:$0xff] }
 0x320   :  { %v2899_v51 = vpop.f32.mrf.mxu0  ;;  %v11959_v47 = vpop.f32.mrf.mxu1 }
 0x321   :  { %14560 = vst [vmem:[#allocation70_spill] sm:$0xff] %v11955_v10  ;;  %14561 = vst [vmem:[#allocation159_spill] sm:$0xff] %v11957_v53  ;;  %v11962_v27 = vadd.f32 %v2899_v51, %v14563_v63  ;;  %v9883_v63 = vld [vmem:[%s14261_s0 + $0x68] sm:$0xff]  }
 0x322   :  { %14562 = vst [vmem:[#allocation160_spill] sm:$0xff] %v11959_v47  ;;  %v2903_v17 = vpop.f32.mrf.mxu0  ;;  %v11964_v48 = vpop.f32.mrf.mxu1  ;;  %9228 = vmatmul.mubr.msk.bf16.gmra.mxu0 %vm493_vm1, %v9879_v55  ;;  %v14572_v51 = vld [vmem:[#allocation74_spill] sm:$0xff] }
 0x323   :  { %14564 = vst [vmem:[#allocation71_spill] sm:$0xff] %v11962_v27  ;;  %14565 = vst [vmem:[#allocation161_spill] sm:$0xff] %v11964_v48  ;;  %v11968_v22 = vadd.f32 %v2903_v17, %v14566_v31  ;;  %5101 = vmatprep.mubr.bf16.mxu0 %v14281_v8 }
 0x324   :  { %v2905_v37 = vpop.f32.mrf.mxu0  ;;  %v11971_v41 = vpop.f32.mrf.mxu1 }
 0x325   :  { %14567 = vst [vmem:[#allocation72_spill] sm:$0xff] %v11968_v22  ;;  %14568 = vst [vmem:[#allocation162_spill] sm:$0xff] %v11971_v41  ;;  %v11974_v36 = vadd.f32 %v2905_v37, %v14569_v24  ;;  %v14575_v22 = vld [vmem:[#allocation75_spill] sm:$0xff]  ;;  %v14578_v37 = vld [vmem:[#allocation76_spill] sm:$0xff] }
 0x326   :  { %v2907_v53 = vpop.f32.mrf.mxu0  ;;  %v11976_v47 = vpop.f32.mrf.mxu1 }
 0x327   :  { %14570 = vst [vmem:[#allocation73_spill] sm:$0xff] %v11974_v36  ;;  %14571 = vst [vmem:[#allocation163_spill] sm:$0xff] %v11976_v47  ;;  %v11982_v55 = vadd.f32 %v2907_v53, %v14572_v51  ;;  %v14581_v53 = vld [vmem:[#allocation77_spill] sm:$0xff] }
 0x328   :  { %v2909_v17 = vpop.f32.mrf.mxu0  ;;  %v11984_v31 = vpop.f32.mrf.mxu1 }
 0x329   :  { %14573 = vst [vmem:[#allocation74_spill] sm:$0xff] %v11982_v55  ;;  %14574 = vst [vmem:[#allocation164_spill] sm:$0xff] %v11984_v31  ;;  %v11987_v27 = vadd.f32 %v2909_v17, %v14575_v22  ;;  %v9884_v22 = vld [vmem:[%s14261_s0 + $0x70] sm:$0xff]   ;;  %v14584_v17 = vld [vmem:[#allocation78_spill] sm:$0xff] }
 0x32a   :  { %v2913_v44 = vpop.f32.mrf.mxu0  ;;  %v11989_v10 = vpop.f32.mrf.mxu1  ;;  %9229 = vmatmul.mubr.msk.bf16.gmra.mxu0 %vm493_vm1, %v9883_v63 }
 0x32b   :  { %14576 = vst [vmem:[#allocation75_spill] sm:$0xff] %v11987_v27  ;;  %14577 = vst [vmem:[#allocation165_spill] sm:$0xff] %v11989_v10  ;;  %v11993_v24 = vadd.f32 %v2913_v44, %v14578_v37  ;;  %5111 = vmatprep.mubr.bf16.mxu0 %v14281_v8 }
 0x32c   :  { %v2915_v36 = vpop.f32.mrf.mxu0  ;;  %v11996_v52 = vpop.f32.mrf.mxu1 }
 0x32d   :  { %14579 = vst [vmem:[#allocation76_spill] sm:$0xff] %v11993_v24  ;;  %14580 = vst [vmem:[#allocation166_spill] sm:$0xff] %v11996_v52  ;;  %v11999_v51 = vadd.f32 %v2915_v36, %v14581_v53  ;;  %v14587_v24 = vld [vmem:[#allocation79_spill] sm:$0xff]  ;;  %v14590_v36 = vld [vmem:[#allocation80_spill] sm:$0xff] }
 0x32e   :  { %v2917_v55 = vpop.f32.mrf.mxu0  ;;  %v12001_v31 = vpop.f32.mrf.mxu1 }
 0x32f   :  { %14582 = vst [vmem:[#allocation77_spill] sm:$0xff] %v11999_v51  ;;  %14583 = vst [vmem:[#allocation167_spill] sm:$0xff] %v12001_v31  ;;  %v12007_v63 = vadd.f32 %v2917_v55, %v14584_v17  ;;  %v14593_v55 = vld [vmem:[#allocation81_spill] sm:$0xff] }
 0x330   :  { %v2919_v44 = vpop.f32.mrf.mxu0  ;;  %v12009_v37 = vpop.f32.mrf.mxu1 }
 0x331   :  { %14585 = vst [vmem:[#allocation78_spill] sm:$0xff] %v12007_v63  ;;  %14586 = vst [vmem:[#allocation168_spill] sm:$0xff] %v12009_v37  ;;  %v12012_v27 = vadd.f32 %v2919_v44, %v14587_v24  ;;  %v9907_v24 = vld [vmem:[%s14262_s3 + $0xb0] ss:$8 sps:$4 sm:$0xff]   ;;  %v9909_v44 = vld [vmem:[%s14262_s3 + $0xb4] ss:$8 sps:$4 sm:$0xff]  }
 0x332   :  { %v2923_v52 = vpop.f32.mrf.mxu0  ;;  %v12014_v10 = vpop.f32.mrf.mxu1  ;;  %9230 = vmatmul.mubr.msk.bf16.gmra.mxu0 %vm493_vm1, %v9884_v22  ;;  %6116 = vmatprep.subr.bf16.mxu1 %v9909_v44  ;;  %v14605_v44 = vld [vmem:[#allocation85_spill] sm:$0xff] }
 0x333   :  { %14588 = vst [vmem:[#allocation79_spill] sm:$0xff] %v12012_v27  ;;  %14589 = vst [vmem:[#allocation169_spill] sm:$0xff] %v12014_v10  ;;  %v12018_v53 = vadd.f32 %v2923_v52, %v14590_v36  ;;  %5121 = vmatprep.mubr.bf16.mxu0 %v14281_v8  ;;  %v9885_v52 = vld [vmem:[%s14261_s0 + $0x78] sm:$0xff]   ;;  %v14596_v36 = vld [vmem:[#allocation82_spill] sm:$0xff]  ;;  %6117 = vmatpush1.bf16.msra.mxu1 %v9907_v24 }
 0x334   :  { %v2925_v51 = vpop.f32.mrf.mxu0  ;;  %v12021_v31 = vpop.f32.mrf.mxu1 }
 0x335   :  { %14591 = vst [vmem:[#allocation80_spill] sm:$0xff] %v12018_v53  ;;  %14592 = vst [vmem:[#allocation170_spill] sm:$0xff] %v12021_v31  ;;  %v12024_v17 = vadd.f32 %v2925_v51, %v14593_v55 }
 0x336   :  { %v2927_v22 = vpop.f32.mrf.mxu0  ;;  %v12032_v27 = vpop.f32.mrf.mxu1 }
 0x337   :  { %14594 = vst [vmem:[#allocation81_spill] sm:$0xff] %v12024_v17  ;;  %14595 = vst [vmem:[#allocation171_spill] sm:$0xff] %v12032_v27  ;;  %v12038_v63 = vadd.f32 %v2927_v22, %v14596_v36  ;;  %v14599_v17 = vld [vmem:[#allocation83_spill] sm:$0xff]  ;;  %v14602_v27 = vld [vmem:[#allocation84_spill] sm:$0xff] }
 0x338   :  { %v2929_v51 = vpop.f32.mrf.mxu0  ;;  %v12040_v55 = vpop.f32.mrf.mxu1 }
 0x339   :  { %14597 = vst [vmem:[#allocation82_spill] sm:$0xff] %v12038_v63  ;;  %14598 = vst [vmem:[#allocation172_spill] sm:$0xff] %v12040_v55  ;;  %v12043_v31 = vadd.f32 %v2929_v51, %v14599_v17  ;;  %v9886_v17 = vld [vmem:[%s14261_s0 + $0x80] sm:$0xff]   ;;  %v14608_v51 = vld [vmem:[#allocation86_spill] sm:$0xff] }
 0x33a   :  { %v2933_v53 = vpop.f32.mrf.mxu0  ;;  %v12045_v10 = vpop.f32.mrf.mxu1  ;;  %9231 = vmatmul.mubr.msk.bf16.gmra.mxu0 %vm493_vm1, %v9885_v52 }
 0x33b   :  { %14600 = vst [vmem:[#allocation83_spill] sm:$0xff] %v12043_v31  ;;  %14601 = vst [vmem:[#allocation173_spill] sm:$0xff] %v12045_v10  ;;  %v12049_v37 = vadd.f32 %v2933_v53, %v14602_v27  ;;  %5131 = vmatprep.mubr.bf16.mxu0 %v14281_v8 }
 0x33c   :  { %v2935_v22 = vpop.f32.mrf.mxu0  ;;  %v12052_v36 = vpop.f32.mrf.mxu1 }
 0x33d   :  { %14603 = vst [vmem:[#allocation84_spill] sm:$0xff] %v12049_v37  ;;  %14604 = vst [vmem:[#allocation174_spill] sm:$0xff] %v12052_v36  ;;  %v12055_v63 = vadd.f32 %v2935_v22, %v14605_v44  ;;  %v14611_v37 = vld [vmem:[#allocation87_spill] sm:$0xff]  ;;  %v14614_v22 = vld [vmem:[#allocation88_spill] sm:$0xff] }
 0x33e   :  { %v2937_v24 = vpop.f32.mrf.mxu0  ;;  %v12057_v55 = vpop.f32.mrf.mxu1 }
 0x33f   :  { %14606 = vst [vmem:[#allocation85_spill] sm:$0xff] %v12055_v63  ;;  %14607 = vst [vmem:[#allocation175_spill] sm:$0xff] %v12057_v55  ;;  %v12063_v52 = vadd.f32 %v2937_v24, %v14608_v51  ;;  %v14617_v24 = vld [vmem:[#allocation89_spill] sm:$0xff] }
 0x340   :  { %v2939_v27 = vpop.f32.mrf.mxu0  ;;  %v12065_v53 = vpop.f32.mrf.mxu1 }
 0x341   :  { %14609 = vst [vmem:[#allocation86_spill] sm:$0xff] %v12063_v52  ;;  %14610 = vst [vmem:[#allocation176_spill] sm:$0xff] %v12065_v53  ;;  %v12068_v10 = vadd.f32 %v2939_v27, %v14611_v37  ;;  %v9887_v37 = vld [vmem:[%s14261_s0 + $0x88] sm:$0xff]  }
 0x342   :  { %v2943_v36 = vpop.f32.mrf.mxu0  ;;  %v12070_v31 = vpop.f32.mrf.mxu1  ;;  %9232 = vmatmul.mubr.msk.bf16.gmra.mxu0 %vm493_vm1, %v9886_v17  ;;  %v14620_v27 = vld [vmem:[#allocation90_spill] sm:$0xff] }
 0x343   :  { %14612 = vst [vmem:[#allocation87_spill] sm:$0xff] %v12068_v10  ;;  %14613 = vst [vmem:[#allocation177_spill] sm:$0xff] %v12070_v31  ;;  %v12074_v44 = vadd.f32 %v2943_v36, %v14614_v22  ;;  %5141 = vmatprep.mubr.bf16.mxu0 %v14281_v8 }
 0x344   :  { %v2945_v55 = vpop.f32.mrf.mxu0  ;;  %v12077_v63 = vpop.f32.mrf.mxu1 }
 0x345   :  { %14615 = vst [vmem:[#allocation88_spill] sm:$0xff] %v12074_v44  ;;  %14616 = vst [vmem:[#allocation178_spill] sm:$0xff] %v12077_v63  ;;  %v12080_v51 = vadd.f32 %v2945_v55, %v14617_v24  ;;  %v14623_v44 = vld [vmem:[#allocation91_spill] sm:$0xff]  ;;  %v14626_v55 = vld [vmem:[#allocation92_spill] sm:$0xff] }
 0x346   :  { %v2947_v53 = vpop.f32.mrf.mxu0  ;;  %v12082_v52 = vpop.f32.mrf.mxu1 }
 0x347   :  { %14618 = vst [vmem:[#allocation89_spill] sm:$0xff] %v12080_v51  ;;  %14619 = vst [vmem:[#allocation179_spill] sm:$0xff] %v12082_v52  ;;  %v12088_v17 = vadd.f32 %v2947_v53, %v14620_v27  ;;  %v14629_v53 = vld [vmem:[#allocation93_spill] sm:$0xff] }
 0x348   :  { %v2949_v36 = vpop.f32.mrf.mxu0  ;;  %v12090_v22 = vpop.f32.mrf.mxu1 }
 0x349   :  { %14621 = vst [vmem:[#allocation90_spill] sm:$0xff] %v12088_v17  ;;  %14622 = vst [vmem:[#allocation180_spill] sm:$0xff] %v12090_v22  ;;  %v12093_v10 = vadd.f32 %v2949_v36, %v14623_v44  ;;  %v9888_v44 = vld [vmem:[%s14261_s0 + $0x90] sm:$0xff]   ;;  %v14632_v36 = vld [vmem:[#allocation94_spill] sm:$0xff] }
 0x34a   :  { %v2953_v63 = vpop.f32.mrf.mxu0  ;;  %v12095_v31 = vpop.f32.mrf.mxu1  ;;  %9233 = vmatmul.mubr.msk.bf16.gmra.mxu0 %vm493_vm1, %v9887_v37 }
 0x34b   :  { %14624 = vst [vmem:[#allocation91_spill] sm:$0xff] %v12093_v10  ;;  %14625 = vst [vmem:[#allocation181_spill] sm:$0xff] %v12095_v31  ;;  %v12099_v24 = vadd.f32 %v2953_v63, %v14626_v55  ;;  %5151 = vmatprep.mubr.bf16.mxu0 %v14281_v8 }
 0x34c   :  { %v2955_v51 = vpop.f32.mrf.mxu0  ;;  %v12102_v52 = vpop.f32.mrf.mxu1 }
 0x34d   :  { %14627 = vst [vmem:[#allocation92_spill] sm:$0xff] %v12099_v24  ;;  %14628 = vst [vmem:[#allocation182_spill] sm:$0xff] %v12102_v52  ;;  %v12105_v27 = vadd.f32 %v2955_v51, %v14629_v53  ;;  %v14635_v24 = vld [vmem:[#allocation95_spill] sm:$0xff]  ;;  %v14638_v51 = vld [vmem:[#allocation96_spill] sm:$0xff] }
 0x34e   :  { %v2957_v17 = vpop.f32.mrf.mxu0  ;;  %v12107_v22 = vpop.f32.mrf.mxu1 }
 0x34f   :  { %14630 = vst [vmem:[#allocation93_spill] sm:$0xff] %v12105_v27  ;;  %14631 = vst [vmem:[#allocation183_spill] sm:$0xff] %v12107_v22  ;;  %v12113_v37 = vadd.f32 %v2957_v17, %v14632_v36  ;;  %v14641_v17 = vld [vmem:[#allocation97_spill] sm:$0xff] }
 0x350   :  { %v2959_v63 = vpop.f32.mrf.mxu0  ;;  %v12115_v55 = vpop.f32.mrf.mxu1 }
 0x351   :  { %14633 = vst [vmem:[#allocation94_spill] sm:$0xff] %v12113_v37  ;;  %14634 = vst [vmem:[#allocation184_spill] sm:$0xff] %v12115_v55  ;;  %v12118_v10 = vadd.f32 %v2959_v63, %v14635_v24  ;;  %v9892_v24 = vld [vmem:[%s14261_s0 + $0x98] sm:$0xff]   ;;  %v14644_v63 = vld [vmem:[#allocation98_spill] sm:$0xff] }
 0x352   :  { %v2963_v52 = vpop.f32.mrf.mxu0  ;;  %v12120_v31 = vpop.f32.mrf.mxu1  ;;  %9234 = vmatmul.mubr.msk.bf16.gmra.mxu0 %vm493_vm1, %v9888_v44 }
 0x353   :  { %14636 = vst [vmem:[#allocation95_spill] sm:$0xff] %v12118_v10  ;;  %14637 = vst [vmem:[#allocation185_spill] sm:$0xff] %v12120_v31  ;;  %v12124_v53 = vadd.f32 %v2963_v52, %v14638_v51  ;;  %5161 = vmatprep.mubr.bf16.mxu0 %v14281_v8  ;;  %v14647_v10 = vld [vmem:[#allocation99_spill] sm:$0xff] }
 0x354   :  { %v2965_v27 = vpop.f32.mrf.mxu0  ;;  %v12127_v22 = vpop.f32.mrf.mxu1 }
 0x355   :  { %14639 = vst [vmem:[#allocation96_spill] sm:$0xff] %v12124_v53  ;;  %14640 = vst [vmem:[#allocation186_spill] sm:$0xff] %v12127_v22  ;;  %v12130_v36 = vadd.f32 %v2965_v27, %v14641_v17  ;;  %v14650_v27 = vld [vmem:[#allocation100_spill] sm:$0xff] }
 0x356   :  { %v2967_v37 = vpop.f32.mrf.mxu0  ;;  %v12132_v55 = vpop.f32.mrf.mxu1 }
 0x357   :  { %14642 = vst [vmem:[#allocation97_spill] sm:$0xff] %v12130_v36  ;;  %14643 = vst [vmem:[#allocation187_spill] sm:$0xff] %v12132_v55  ;;  %v12138_v44 = vadd.f32 %v2967_v37, %v14644_v63  ;;  %v14653_v37 = vld [vmem:[#allocation101_spill] sm:$0xff] }
 0x358   :  { %v2969_v52 = vpop.f32.mrf.mxu0  ;;  %v12140_v51 = vpop.f32.mrf.mxu1 }
 0x359   :  { %14645 = vst [vmem:[#allocation98_spill] sm:$0xff] %v12138_v44  ;;  %14646 = vst [vmem:[#allocation188_spill] sm:$0xff] %v12140_v51  ;;  %v12143_v53 = vadd.f32 %v2969_v52, %v14647_v10  ;;  %v9893_v10 = vld [vmem:[%s14261_s0 + $0xa0] sm:$0xff]   ;;  %v14656_v52 = vld [vmem:[#allocation102_spill] sm:$0xff] }
 0x35a   :  { %v2973_v22 = vpop.f32.mrf.mxu0  ;;  %v12145_v31 = vpop.f32.mrf.mxu1  ;;  %9235 = vmatmul.mubr.msk.bf16.gmra.mxu0 %vm493_vm1, %v9892_v24 }
 0x35b   :  { %14648 = vst [vmem:[#allocation99_spill] sm:$0xff] %v12143_v53  ;;  %14649 = vst [vmem:[#allocation189_spill] sm:$0xff] %v12145_v31  ;;  %v12149_v17 = vadd.f32 %v2973_v22, %v14650_v27  ;;  %5171 = vmatprep.mubr.bf16.mxu0 %v14281_v8 }
 0x35c   :  { %v2975_v55 = vpop.f32.mrf.mxu0  ;;  %v12152_v36 = vpop.f32.mrf.mxu1 }
 0x35d   :  { %14651 = vst [vmem:[#allocation100_spill] sm:$0xff] %v12149_v17  ;;  %14652 = vst [vmem:[#allocation190_spill] sm:$0xff] %v12152_v36  ;;  %v12155_v63 = vadd.f32 %v2975_v55, %v14653_v37  ;;  %v14659_v17 = vld [vmem:[#allocation103_spill] sm:$0xff]  ;;  %v14662_v55 = vld [vmem:[#allocation104_spill] sm:$0xff] }
 0x35e   :  { %v2977_v51 = vpop.f32.mrf.mxu0  ;;  %v12157_v44 = vpop.f32.mrf.mxu1 }
 0x35f   :  { %14654 = vst [vmem:[#allocation101_spill] sm:$0xff] %v12155_v63  ;;  %14655 = vst [vmem:[#allocation191_spill] sm:$0xff] %v12157_v44  ;;  %v12163_v24 = vadd.f32 %v2977_v51, %v14656_v52  ;;  %v14665_v51 = vld [vmem:[#allocation105_spill] sm:$0xff] }
 0x360   :  { %v2979_v22 = vpop.f32.mrf.mxu0  ;;  %v12165_v27 = vpop.f32.mrf.mxu1 }
 0x361   :  { %14657 = vst [vmem:[#allocation102_spill] sm:$0xff] %v12163_v24  ;;  %14658 = vst [vmem:[#allocation192_spill] sm:$0xff] %v12165_v27  ;;  %v12168_v31 = vadd.f32 %v2979_v22, %v14659_v17  ;;  %v9894_v17 = vld [vmem:[%s14261_s0 + $0xa8] sm:$0xff]  }
 0x362   :  { %v2983_v36 = vpop.f32.mrf.mxu0  ;;  %v12170_v53 = vpop.f32.mrf.mxu1  ;;  %9236 = vmatmul.mubr.msk.bf16.gmra.mxu0 %vm493_vm1, %v9893_v10  ;;  %v14668_v22 = vld [vmem:[#allocation106_spill] sm:$0xff] }
 0x363   :  { %14660 = vst [vmem:[#allocation103_spill] sm:$0xff] %v12168_v31  ;;  %14661 = vst [vmem:[#allocation193_spill] sm:$0xff] %v12170_v53  ;;  %v12174_v37 = vadd.f32 %v2983_v36, %v14662_v55  ;;  %5181 = vmatprep.mubr.bf16.mxu0 %v14281_v8 }
 0x364   :  { %v2985_v44 = vpop.f32.mrf.mxu0  ;;  %v12177_v63 = vpop.f32.mrf.mxu1 }
 0x365   :  { %14663 = vst [vmem:[#allocation104_spill] sm:$0xff] %v12174_v37  ;;  %14664 = vst [vmem:[#allocation194_spill] sm:$0xff] %v12177_v63  ;;  %v12180_v52 = vadd.f32 %v2985_v44, %v14665_v51  ;;  %v14671_v37 = vld [vmem:[#allocation107_spill] sm:$0xff]  ;;  %v9916_v44 = vld [vmem:[%s14262_s3 + $0xa0] ss:$8 sps:$4 sm:$0xff]  }
 0x366   :  { %v2987_v27 = vpop.f32.mrf.mxu0  ;;  %v12182_v24 = vpop.f32.mrf.mxu1  ;;  %v9918_v51 = vld [vmem:[%s14262_s3 + $0xa4] ss:$8 sps:$4 sm:$0xff]  }
 0x367   :  { %14666 = vst [vmem:[#allocation105_spill] sm:$0xff] %v12180_v52  ;;  %14667 = vst [vmem:[#allocation195_spill] sm:$0xff] %v12182_v24  ;;  %v12188_v10 = vadd.f32 %v2987_v27, %v14668_v22  ;;  %v14674_v27 = vld [vmem:[#allocation108_spill] sm:$0xff]  ;;  %6118 = vmatprep.subr.bf16.mxu1 %v9918_v51  ;;  %v14683_v51 = vld [vmem:[#allocation111_spill] sm:$0xff] }
 0x368   :  { %v2989_v36 = vpop.f32.mrf.mxu0  ;;  %v12190_v55 = vpop.f32.mrf.mxu1  ;;  %6119 = vmatpush1.bf16.msra.mxu1 %v9916_v44 }
 0x369   :  { %14669 = vst [vmem:[#allocation106_spill] sm:$0xff] %v12188_v10  ;;  %14670 = vst [vmem:[#allocation196_spill] sm:$0xff] %v12190_v55  ;;  %v12193_v31 = vadd.f32 %v2989_v36, %v14671_v37 }
 0x36a   :  { %v2993_v52 = vpop.f32.mrf.mxu0  ;;  %v12201_v24 = vpop.f32.mrf.mxu1  ;;  %9237 = vmatmul.mubr.msk.bf16.gmra.mxu0 %vm493_vm1, %v9894_v17  ;;  %v9895_v17 = vld [vmem:[%s14261_s0 + $0xb0] sm:$0xff]  }
 0x36b   :  { %14672 = vst [vmem:[#allocation107_spill] sm:$0xff] %v12193_v31  ;;  %14673 = vst [vmem:[#allocation197_spill] sm:$0xff] %v12201_v24  ;;  %v12205_v22 = vadd.f32 %v2993_v52, %v14674_v27  ;;  %5191 = vmatprep.mubr.bf16.mxu0 %v14281_v8  ;;  %v14677_v31 = vld [vmem:[#allocation109_spill] sm:$0xff]  ;;  %v14680_v24 = vld [vmem:[#allocation110_spill] sm:$0xff] }
 0x36c   :  { %v2995_v37 = vpop.f32.mrf.mxu0  ;;  %v12208_v36 = vpop.f32.mrf.mxu1 }
 0x36d   :  { %14675 = vst [vmem:[#allocation108_spill] sm:$0xff] %v12205_v22  ;;  %14676 = vst [vmem:[#allocation198_spill] sm:$0xff] %v12208_v36  ;;  %v12211_v10 = vadd.f32 %v2995_v37, %v14677_v31  ;;  %v14686_v31 = vld [vmem:[#allocation112_spill] sm:$0xff] }
 0x36e   :  { %v2997_v55 = vpop.f32.mrf.mxu0  ;;  %v12213_v63 = vpop.f32.mrf.mxu1 }
 0x36f   :  { %14678 = vst [vmem:[#allocation109_spill] sm:$0xff] %v12211_v10  ;;  %14679 = vst [vmem:[#allocation199_spill] sm:$0xff] %v12213_v63  ;;  %v12219_v52 = vadd.f32 %v2997_v55, %v14680_v24  ;;  %v14689_v24 = vld [vmem:[#allocation113_spill] sm:$0xff] }
 0x370   :  { %v2999_v27 = vpop.f32.mrf.mxu0  ;;  %v12221_v22 = vpop.f32.mrf.mxu1 }
 0x371   :  { %14681 = vst [vmem:[#allocation110_spill] sm:$0xff] %v12219_v52  ;;  %14682 = vst [vmem:[#allocation200_spill] sm:$0xff] %v12221_v22  ;;  %v12224_v53 = vadd.f32 %v2999_v27, %v14683_v51  ;;  %v9896_v27 = vld [vmem:[%s14261_s0 + $0xb8] sm:$0xff]   ;;  %v14692_v51 = vld [vmem:[#allocation114_spill] sm:$0xff] }
 0x372   :  { %v3003_v44 = vpop.f32.mrf.mxu0  ;;  %v12226_v36 = vpop.f32.mrf.mxu1  ;;  %9238 = vmatmul.mubr.msk.bf16.gmra.mxu0 %vm493_vm1, %v9895_v17 }
 0x373   :  { %14684 = vst [vmem:[#allocation111_spill] sm:$0xff] %v12224_v53  ;;  %14685 = vst [vmem:[#allocation201_spill] sm:$0xff] %v12226_v36  ;;  %v12230_v37 = vadd.f32 %v3003_v44, %v14686_v31  ;;  %5201 = vmatprep.mubr.bf16.mxu0 %v14281_v8  ;;  %v14695_v53 = vld [vmem:[#allocation115_spill] sm:$0xff] }
 0x374   :  { %v3005_v10 = vpop.f32.mrf.mxu0  ;;  %v12233_v63 = vpop.f32.mrf.mxu1 }
 0x375   :  { %14687 = vst [vmem:[#allocation112_spill] sm:$0xff] %v12230_v37  ;;  %14688 = vst [vmem:[#allocation202_spill] sm:$0xff] %v12233_v63  ;;  %v12236_v55 = vadd.f32 %v3005_v10, %v14689_v24  ;;  %v14698_v10 = vld [vmem:[#allocation116_spill] sm:$0xff] }
 0x376   :  { %v3007_v52 = vpop.f32.mrf.mxu0  ;;  %v12238_v22 = vpop.f32.mrf.mxu1 }
 0x377   :  { %14690 = vst [vmem:[#allocation113_spill] sm:$0xff] %v12236_v55  ;;  %14691 = vst [vmem:[#allocation203_spill] sm:$0xff] %v12238_v22  ;;  %v12244_v17 = vadd.f32 %v3007_v52, %v14692_v51  ;;  %v9924_v52 = vld [vmem:[%s14262_s3 + $0x94] ss:$8 sps:$4 sm:$0xff]  }
 0x378   :  { %v3009_v44 = vpop.f32.mrf.mxu0  ;;  %v12246_v31 = vpop.f32.mrf.mxu1  ;;  %6120 = vmatprep.subr.bf16.mxu1 %v9924_v52  ;;  %v9925_v52 = vld [vmem:[%s14262_s3 + $0x80] ss:$8 sps:$4 sm:$0xff]  }
 0x379   :  { %14693 = vst [vmem:[#allocation114_spill] sm:$0xff] %v12244_v17  ;;  %14694 = vst [vmem:[#allocation204_spill] sm:$0xff] %v12246_v31  ;;  %v12249_v37 = vadd.f32 %v3009_v44, %v14695_v53  ;;  %v9922_v53 = vld [vmem:[%s14262_s3 + $0x90] ss:$8 sps:$4 sm:$0xff]   ;;  %v14701_v44 = vld [vmem:[#allocation117_spill] sm:$0xff] }
 0x37a   :  { %v3013_v63 = vpop.f32.mrf.mxu0  ;;  %v12251_v36 = vpop.f32.mrf.mxu1  ;;  %9239 = vmatmul.mubr.msk.bf16.gmra.mxu0 %vm493_vm1, %v9896_v27  ;;  %6121 = vmatpush1.bf16.msra.mxu1 %v9922_v53 }
 0x37b   :  { %14696 = vst [vmem:[#allocation115_spill] sm:$0xff] %v12249_v37  ;;  %14697 = vst [vmem:[#allocation205_spill] sm:$0xff] %v12251_v36  ;;  %v12255_v24 = vadd.f32 %v3013_v63, %v14698_v10  ;;  %5211 = vmatprep.mubr.bf16.mxu0 %v14281_v8  ;;  %v9897_v10 = vld [vmem:[%s14261_s0 + $0xc0] sm:$0xff]  }
 0x37c   :  { %v3015_v51 = vpop.f32.mrf.mxu0  ;;  %v12261_v17 = vpop.f32.mrf.mxu1 }
 0x37d   :  { %14699 = vst [vmem:[#allocation116_spill] sm:$0xff] %v12255_v24  ;;  %14700 = vst [vmem:[#allocation206_spill] sm:$0xff] %v12261_v17  ;;  %v12267_v36 = vadd.f32 %v3015_v51, %v14701_v44  ;;  %v14704_v24 = vld [vmem:[#allocation118_spill] sm:$0xff]  ;;  %v14707_v51 = vld [vmem:[#allocation119_spill] sm:$0xff] }
 0x37e   :  { %v3017_v27 = vpop.f32.mrf.mxu0  ;;  %v12269_v63 = vpop.f32.mrf.mxu1  ;;  %v9927_v17 = vld [vmem:[%s14262_s3 + $0x84] ss:$8 sps:$4 sm:$0xff]  }
 0x37f   :  { %14702 = vst [vmem:[#allocation117_spill] sm:$0xff] %v12267_v36  ;;  %14703 = vst [vmem:[#allocation207_spill] sm:$0xff] %v12269_v63  ;;  %v12275_v37 = vadd.f32 %v3017_v27, %v14704_v24  ;;  %6122 = vmatprep.subr.bf16.mxu1 %v9927_v17  ;;  %v14710_v24 = vld [vmem:[#allocation120_spill] sm:$0xff]  ;;  %v14713_v36 = vld [vmem:[#allocation121_spill] sm:$0xff] }
 0x380   :  { %v3019_v31 = vpop.f32.mrf.mxu0  ;;  %v12280_v22 = vpop.f32.mrf.mxu1  ;;  %6123 = vmatpush1.bf16.msra.mxu1 %v9925_v52  ;;  %v9901_v17 = vld [vmem:[%s14261_s0 + $0xc8] sm:$0xff]  }
 0x381   :  { %14705 = vst [vmem:[#allocation118_spill] sm:$0xff] %v12275_v37  ;;  %14706 = vst [vmem:[#allocation208_spill] sm:$0xff] %v12280_v22  ;;  %v12286_v44 = vadd.f32 %v3019_v31, %v14707_v51 }
 0x382   :  { %v3023_v63 = vpop.f32.mrf.mxu0  ;;  %v12288_v53 = vpop.f32.mrf.mxu1  ;;  %9240 = vmatmul.mubr.msk.bf16.gmra.mxu0 %vm493_vm1, %v9897_v10  ;;  %v14716_v10 = vld [vmem:[#allocation122_spill] sm:$0xff] }
 0x383   :  { %14708 = vst [vmem:[#allocation119_spill] sm:$0xff] %v12286_v44  ;;  %14709 = vst [vmem:[#allocation209_spill] sm:$0xff] %v12288_v53  ;;  %v12292_v27 = vadd.f32 %v3023_v63, %v14710_v24  ;;  %5221 = vmatprep.mubr.bf16.mxu0 %v14281_v8 }
 0x384   :  { %v3025_v22 = vpop.f32.mrf.mxu0  ;;  %v12295_v37 = vpop.f32.mrf.mxu1 }
 0x385   :  { %14711 = vst [vmem:[#allocation120_spill] sm:$0xff] %v12292_v27  ;;  %14712 = vst [vmem:[#allocation210_spill] sm:$0xff] %v12295_v37  ;;  %v12298_v55 = vadd.f32 %v3025_v22, %v14713_v36  ;;  %v14719_v27 = vld [vmem:[#allocation123_spill] sm:$0xff]  ;;  %v14722_v22 = vld [vmem:[#allocation124_spill] sm:$0xff] }
 0x386   :  { %v3027_v31 = vpop.f32.mrf.mxu0  ;;  %v12300_v51 = vpop.f32.mrf.mxu1 }
 0x387   :  { %14714 = vst [vmem:[#allocation121_spill] sm:$0xff] %v12298_v55  ;;  %14715 = vst [vmem:[#allocation211_spill] sm:$0xff] %v12300_v51  ;;  %v12306_v52 = vadd.f32 %v3027_v31, %v14716_v10  ;;  %v14725_v31 = vld [vmem:[#allocation125_spill] sm:$0xff] }
 0x388   :  { %v3029_v63 = vpop.f32.mrf.mxu0  ;;  %v12308_v24 = vpop.f32.mrf.mxu1 }
 0x389   :  { %14717 = vst [vmem:[#allocation122_spill] sm:$0xff] %v12306_v52  ;;  %14718 = vst [vmem:[#allocation212_spill] sm:$0xff] %v12308_v24  ;;  %v12311_v44 = vadd.f32 %v3029_v63, %v14719_v27  ;;  %v9902_v27 = vld [vmem:[%s14261_s0 + $0xd0] sm:$0xff]   ;;  %v14728_v63 = vld [vmem:[#allocation126_spill] sm:$0xff] }
 0x38a   :  { %v3033_v37 = vpop.f32.mrf.mxu0  ;;  %v12313_v53 = vpop.f32.mrf.mxu1  ;;  %9241 = vmatmul.mubr.msk.bf16.gmra.mxu0 %vm493_vm1, %v9901_v17 }
 0x38b   :  { %14720 = vst [vmem:[#allocation123_spill] sm:$0xff] %v12311_v44  ;;  %14721 = vst [vmem:[#allocation213_spill] sm:$0xff] %v12313_v53  ;;  %v12317_v36 = vadd.f32 %v3033_v37, %v14722_v22  ;;  %5231 = vmatprep.mubr.bf16.mxu0 %v14281_v8 }
 0x38c   :  { %v3035_v55 = vpop.f32.mrf.mxu0  ;;  %v12320_v51 = vpop.f32.mrf.mxu1 }
 0x38d   :  { %14723 = vst [vmem:[#allocation124_spill] sm:$0xff] %v12317_v36  ;;  %14724 = vst [vmem:[#allocation214_spill] sm:$0xff] %v12320_v51  ;;  %v12323_v10 = vadd.f32 %v3035_v55, %v14725_v31  ;;  %v14731_v36 = vld [vmem:[#allocation127_spill] sm:$0xff]  ;;  %v14734_v55 = vld [vmem:[#allocation128_spill] sm:$0xff] }
 0x38e   :  { %v3037_v52 = vpop.f32.mrf.mxu0  ;;  %v12325_v24 = vpop.f32.mrf.mxu1 }
 0x38f   :  { %14726 = vst [vmem:[#allocation125_spill] sm:$0xff] %v12323_v10  ;;  %14727 = vst [vmem:[#allocation215_spill] sm:$0xff] %v12325_v24  ;;  %v12331_v17 = vadd.f32 %v3037_v52, %v14728_v63  ;;  %v14737_v52 = vld [vmem:[#allocation129_spill] sm:$0xff] }
 0x390   :  { %v3039_v37 = vpop.f32.mrf.mxu0  ;;  %v12333_v22 = vpop.f32.mrf.mxu1 }
 0x391   :  { %14729 = vst [vmem:[#allocation126_spill] sm:$0xff] %v12331_v17  ;;  %14730 = vst [vmem:[#allocation216_spill] sm:$0xff] %v12333_v22  ;;  %v12336_v44 = vadd.f32 %v3039_v37, %v14731_v36  ;;  %v9903_v36 = vld [vmem:[%s14261_s0 + $0xd8] sm:$0xff]   ;;  %v14740_v37 = vld [vmem:[#allocation130_spill] sm:$0xff] }
 0x392   :  { %v3043_v51 = vpop.f32.mrf.mxu0  ;;  %v12338_v53 = vpop.f32.mrf.mxu1  ;;  %9242 = vmatmul.mubr.msk.bf16.gmra.mxu0 %vm493_vm1, %v9902_v27 }
 0x393   :  { %14732 = vst [vmem:[#allocation127_spill] sm:$0xff] %v12336_v44  ;;  %14733 = vst [vmem:[#allocation217_spill] sm:$0xff] %v12338_v53  ;;  %v12342_v31 = vadd.f32 %v3043_v51, %v14734_v55  ;;  %5241 = vmatprep.mubr.bf16.mxu0 %v14281_v8  ;;  %v14743_v44 = vld [vmem:[#allocation131_spill] sm:$0xff] }
 0x394   :  { %v3045_v10 = vpop.f32.mrf.mxu0  ;;  %v12345_v24 = vpop.f32.mrf.mxu1 }
 0x395   :  { %14735 = vst [vmem:[#allocation128_spill] sm:$0xff] %v12342_v31  ;;  %14736 = vst [vmem:[#allocation218_spill] sm:$0xff] %v12345_v24  ;;  %v12348_v63 = vadd.f32 %v3045_v10, %v14737_v52  ;;  %v14746_v10 = vld [vmem:[#allocation132_spill] sm:$0xff] }
 0x396   :  { %v3047_v17 = vpop.f32.mrf.mxu0  ;;  %v12350_v22 = vpop.f32.mrf.mxu1 }
 0x397   :  { %14738 = vst [vmem:[#allocation129_spill] sm:$0xff] %v12348_v63  ;;  %14739 = vst [vmem:[#allocation219_spill] sm:$0xff] %v12350_v22  ;;  %v12356_v27 = vadd.f32 %v3047_v17, %v14740_v37  ;;  %v14749_v17 = vld [vmem:[#allocation133_spill] sm:$0xff] }
 0x398   :  { %v3049_v51 = vpop.f32.mrf.mxu0  ;;  %v12358_v55 = vpop.f32.mrf.mxu1 }
 0x399   :  { %14741 = vst [vmem:[#allocation130_spill] sm:$0xff] %v12356_v27  ;;  %14742 = vst [vmem:[#allocation220_spill] sm:$0xff] %v12358_v55  ;;  %v12361_v31 = vadd.f32 %v3049_v51, %v14743_v44  ;;  %v9904_v44 = vld [vmem:[%s14261_s0 + $0xe0] sm:$0xff]   ;;  %v14752_v51 = vld [vmem:[#allocation134_spill] sm:$0xff] }
 0x39a   :  { %v3053_v24 = vpop.f32.mrf.mxu0  ;;  %v12363_v53 = vpop.f32.mrf.mxu1  ;;  %9243 = vmatmul.mubr.msk.bf16.gmra.mxu0 %vm493_vm1, %v9903_v36 }
 0x39b   :  { %14744 = vst [vmem:[#allocation131_spill] sm:$0xff] %v12361_v31  ;;  %14745 = vst [vmem:[#allocation221_spill] sm:$0xff] %v12363_v53  ;;  %v12367_v52 = vadd.f32 %v3053_v24, %v14746_v10  ;;  %5251 = vmatprep.mubr.bf16.mxu0 %v14281_v8 }
 0x39c   :  { %v3055_v22 = vpop.f32.mrf.mxu0  ;;  %v12370_v63 = vpop.f32.mrf.mxu1 }
 0x39d   :  { %14747 = vst [vmem:[#allocation132_spill] sm:$0xff] %v12367_v52  ;;  %14748 = vst [vmem:[#allocation222_spill] sm:$0xff] %v12370_v63  ;;  %v12373_v37 = vadd.f32 %v3055_v22, %v14749_v17  ;;  %v14755_v52 = vld [vmem:[#allocation135_spill] sm:$0xff]  ;;  %v14758_v22 = vld [vmem:[#allocation136_spill] sm:$0xff] }
 0x39e   :  { %v3057_v55 = vpop.f32.mrf.mxu0  ;;  %v12375_v27 = vpop.f32.mrf.mxu1 }
 0x39f   :  { %14750 = vst [vmem:[#allocation133_spill] sm:$0xff] %v12373_v37  ;;  %14751 = vst [vmem:[#allocation223_spill] sm:$0xff] %v12375_v27  ;;  %v12381_v36 = vadd.f32 %v3057_v55, %v14752_v51  ;;  %v14760_v55 = vld [vmem:[#allocation137_spill] sm:$0xff] }
 0x3a0   :  { %v3059_v24 = vpop.f32.mrf.mxu0  ;;  %v12383_v10 = vpop.f32.mrf.mxu1 }
 0x3a1   :  { %14753 = vst [vmem:[#allocation134_spill] sm:$0xff] %v12381_v36  ;;  %14754 = vst [vmem:[#allocation224_spill] sm:$0xff] %v12383_v10  ;;  %v12386_v53 = vadd.f32 %v3059_v24, %v14755_v52  ;;  %v9905_v52 = vld [vmem:[%s14261_s0 + $0xe8] sm:$0xff]  }
 0x3a2   :  { %v3063_v63 = vpop.f32.mrf.mxu0  ;;  %v12388_v31 = vpop.f32.mrf.mxu1  ;;  %9244 = vmatmul.mubr.msk.bf16.gmra.mxu0 %vm493_vm1, %v9904_v44  ;;  %v14762_v24 = vld [vmem:[#allocation138_spill] sm:$0xff] }
 0x3a3   :  { %14756 = vst [vmem:[#allocation135_spill] sm:$0xff] %v12386_v53  ;;  %14757 = vst [vmem:[#allocation225_spill] sm:$0xff] %v12388_v31  ;;  %v3278_v17 = vadd.f32 %v3063_v63, %v14758_v22  ;;  %5261 = vmatprep.mubr.bf16.mxu0 %v14281_v8  ;;  %v14764_v63 = vld [vmem:[#allocation139_spill] sm:$0xff] }
 0x3a4   :  { %v3065_v27 = vpop.f32.mrf.mxu0  ;;  %v12393_v37 = vpop.f32.mrf.mxu1 }
 0x3a5   :  { %14759 = vst [vmem:[#allocation136_spill] sm:$0xff] %v12393_v37  ;;  %v3279_v51 = vadd.f32 %v3065_v27, %v14760_v55  ;;  %v14767_v27 = vld [vmem:[#allocation140_spill] sm:$0xff] }
 0x3a6   :  { %v3067_v36 = vpop.f32.mrf.mxu0  ;;  %v12396_v56 = vpop.f32.mrf.mxu1 }
 0x3a7   :  { %14761 = vst [vmem:[#allocation137_spill] sm:$0xff] %v12396_v56  ;;  %v3280_v53 = vadd.f32 %v3067_v36, %v14762_v24 }
 0x3a8   :  { %v3069_v10 = vpop.f32.mrf.mxu0  ;;  %v12402_v44 = vpop.f32.mrf.mxu1 }
 0x3a9   :  { %14763 = vst [vmem:[#allocation138_spill] sm:$0xff] %v12402_v44  ;;  %v12405_v22 = vadd.f32 %v3069_v10, %v14764_v63  ;;  %v9906_v10 = vld [vmem:[%s14261_s0 + $0xf0] sm:$0xff]   ;;  %v14770_v63 = vld [vmem:[#allocation141_spill] sm:$0xff] }
 0x3aa   :  { %v3073_v31 = vpop.f32.mrf.mxu0  ;;  %v12407_v47 = vpop.f32.mrf.mxu1  ;;  %9245 = vmatmul.mubr.msk.bf16.gmra.mxu0 %vm493_vm1, %v9905_v52 }
 0x3ab   :  { %14765 = vst [vmem:[#allocation139_spill] sm:$0xff] %v12405_v22  ;;  %14766 = vst [vmem:[#allocation226_spill] sm:$0xff] %v12407_v47  ;;  %v3282_v55 = vadd.f32 %v3073_v31, %v14767_v27  ;;  %5271 = vmatprep.mubr.bf16.mxu0 %v14281_v8  ;;  %v14772_v31 = vld [vmem:[#allocation142_spill] sm:$0xff] }
 0x3ac   :  { %v3075_v56 = vpop.f32.mrf.mxu0  ;;  %v12412_v37 = vpop.f32.mrf.mxu1 }
 0x3ad   :  { %14768 = vst [vmem:[#allocation140_spill] sm:$0xff] %v12412_v37  ;;  %v3283_v36 = vadd.f32 %v3075_v56, %v11297_v0 }
 0x3ae   :  { %v3077_v24 = vpop.f32.mrf.mxu0  ;;  %v12415_v4 = vpop.f32.mrf.mxu1 }
 0x3af   :  { %14769 = vst [vmem:[#allocation227_spill] sm:$0xff] %v12415_v4  ;;  %v3284_v22 = vadd.f32 %v3077_v24, %v14770_v63 }
 0x3b0   :  { %v3079_v47 = vpop.f32.mrf.mxu0  ;;  %v12421_v52 = vpop.f32.mrf.mxu1 }
 0x3b1   :  { %14771 = vst [vmem:[#allocation141_spill] sm:$0xff] %v12421_v52  ;;  %v12424_v27 = vadd.f32 %v3079_v47, %v14772_v31  ;;  %v9910_v47 = vld [vmem:[%s14261_s0 + $0xf8] sm:$0xff]  }
 0x3b2   :  { %v3083_v44 = vpop.f32.mrf.mxu0  ;;  %v4278_v41 = vpop.f32.mrf.mxu1  ;;  %9246 = vmatmul.mubr.msk.bf16.gmra.mxu0 %vm493_vm1, %v9906_v10 }
 0x3b3   :  { %14773 = vst [vmem:[#allocation142_spill] sm:$0xff] %v12424_v27  ;;  %v3286_v0 = vadd.f32 %v3083_v44, %v11311_v21  ;;  %v12428_v56 = vadd.f32 %v4278_v41, %v3278_v17  ;;  %5281 = vmatprep.mubr.bf16.mxu0 %v14281_v8  ;;  %v14779_v17 = vld [vmem:[#allocation2_spill] sm:$0xff]  ;;  %v14782_v27 = vld [vmem:[#allocation144_spill] sm:$0xff] }
 0x3b4   :  { %v3085_v4 = vpop.f32.mrf.mxu0  ;;  %v4280_v37 = vpop.f32.mrf.mxu1  ;;  %v2071_v44 = vadd.f32 %v11331_v20, %v14779_v17 }
 0x3b5   :  { %14774 = vst [vmem:[#allocation228_spill] sm:$0xff] %v12428_v56  ;;  %v3287_v24 = vadd.f32 %v3085_v4, %v14775_v9  ;;  %v12432_v63 = vadd.f32 %v4280_v37, %v3279_v51  ;;  %v14781_v51 = vld [vmem:[#allocation3_spill] sm:$0xff] }
 0x3b6   :  { %v3087_v52 = vpop.f32.mrf.mxu0  ;;  %v4282_v48 = vpop.f32.mrf.mxu1 }
 0x3b7   :  { %14776 = vst [vmem:[#allocation143_spill] sm:$0xff] %v12432_v63  ;;  %v3288_v10 = vadd.f32 %v3087_v52, %v11325_v6  ;;  %v12438_v31 = vadd.f32 %v4282_v48, %v3280_v53  ;;  %v2073_v63 = vadd.f32 %v14782_v27, %v14781_v51  ;;  %v14784_v52 = vld [vmem:[#allocation4_spill] sm:$0xff]  ;;  %v14786_v27 = vld [vmem:[#allocation5_spill] sm:$0xff] }
 0x3b8   :  { %v3089_v21 = vpop.f32.mrf.mxu0  ;;  %v12440_v41 = vpop.f32.mrf.mxu1 }
 0x3b9   :  { %14777 = vst [vmem:[#allocation229_spill] sm:$0xff] %v12438_v31  ;;  %14778 = vst [vmem:[#allocation230_spill] sm:$0xff] %v12440_v41  ;;  %v12445_v9 = vadd.f32 %v3089_v21, %v11328_v58  ;;  %v14785_v31 = vld [vmem:[#allocation145_spill] sm:$0xff] }
 0x3ba   :  { %v3093_v4 = vpop.f32.mrf.mxu0  ;;  %v4288_v37 = vpop.f32.mrf.mxu1  ;;  %9247 = vmatmul.mubr.msk.bf16.gmra.mxu0 %vm493_vm1, %v9910_v47  ;;  %v2075_v20 = vadd.f32 %v14785_v31, %v14784_v52  ;;  %v9911_v47 = vld [vmem:[%s14261_s0 + $0x100] sm:$0xff]  }
 0x3bb   :  { %14780 = vst [vmem:[#allocation2_spill] sm:$0xff] %v12445_v9  ;;  %v3290_v56 = vadd.f32 %v3093_v4, %v2071_v44  ;;  %v12450_v6 = vadd.f32 %v4288_v37, %v3282_v55  ;;  %5291 = vmatprep.mubr.bf16.mxu0 %v14281_v8  ;;  %v14787_v44 = vld [vmem:[#allocation146_spill] sm:$0xff] }
 0x3bc   :  { %v3095_v48 = vpop.f32.mrf.mxu0  ;;  %v4290_v53 = vpop.f32.mrf.mxu1  ;;  %v2077_v55 = vadd.f32 %v14787_v44, %v14786_v27 }
 0x3bd   :  { %14783 = vst [vmem:[#allocation3_spill] sm:$0xff] %v12450_v6  ;;  %v3291_v17 = vadd.f32 %v3095_v48, %v2073_v63  ;;  %v12455_v58 = vadd.f32 %v4290_v53, %v3283_v36  ;;  %v14789_v48 = vld [vmem:[#allocation147_spill] sm:$0xff] }
 0x3be   :  { %v3097_v21 = vpop.f32.mrf.mxu0  ;;  %v4292_v9 = vpop.f32.mrf.mxu1 }
 0x3bf   :  { %v3292_v4 = vadd.f32 %v3097_v21, %v2075_v20  ;;  %v12462_v37 = vadd.f32 %v4292_v9, %v3284_v22  ;;  %v14790_v22 = vld [vmem:[#allocation148_spill] sm:$0xff] }
 0x3c0   :  { %v3099_v51 = vpop.f32.mrf.mxu0  ;;  %v12464_v6 = vpop.f32.mrf.mxu1 }
 0x3c1   :  { %14788 = vst [vmem:[#allocation144_spill] sm:$0xff] %v12462_v37  ;;  %v12466_v41 = vadd.f32 %v3099_v51, %v2077_v55  ;;  %v9912_v55 = vld [vmem:[%s14261_s0 + $0x108] sm:$0xff]  }
 0x3c2   :  { %v4298_v63 = vpop.f32.mrf.mxu1  ;;  %v5053_v36 = vpop.f32.mrf.mxu0  ;;  %9248 = vmatmul.mubr.msk.bf16.gmra.mxu0 %vm493_vm1, %v9911_v47 }
 0x3c3   :  { %v12469_v31 = vadd.f32 %v4298_v63, %v3286_v0  ;;  %v5532_v53 = vadd.f32 %v5053_v36, %v14789_v48  ;;  %5301 = vmatprep.mubr.bf16.mxu0 %v14281_v8 }
 0x3c4   :  { %v4300_v52 = vpop.f32.mrf.mxu1  ;;  %v5055_v27 = vpop.f32.mrf.mxu0 }
 0x3c5   :  { %v12473_v20 = vadd.f32 %v4300_v52, %v3287_v24  ;;  %v5533_v9 = vadd.f32 %v5055_v27, %v14790_v22 }
 0x3c6   :  { %v4302_v21 = vpop.f32.mrf.mxu1  ;;  %v5057_v44 = vpop.f32.mrf.mxu0 }
 0x3c7   :  { %v12479_v51 = vadd.f32 %v4302_v21, %v3288_v10  ;;  %v5534_v0 = vadd.f32 %v5057_v44, %v11370_v29 }
 0x3c8   :  { %v12482_v47 = vpop.f32.mrf.mxu1  ;;  %v5059_v63 = vpop.f32.mrf.mxu0 }
 0x3c9   :  { %v5535_v36 = vadd.f32 %v5059_v63, %v11373_v33  ;;  %v9913_v33 = vld [vmem:[%s14261_s0 + $0x110] sm:$0xff]  }
 0x3ca   :  { %v4308_v48 = vpop.f32.mrf.mxu1  ;;  %v5063_v24 = vpop.f32.mrf.mxu0  ;;  %9249 = vmatmul.mubr.msk.bf16.gmra.mxu0 %vm493_vm1, %v9912_v55 }
 0x3cb   :  { %v12486_v52 = vadd.f32 %v4308_v48, %v3290_v56  ;;  %v5536_v27 = vadd.f32 %v5063_v24, %v11378_v59  ;;  %5311 = vmatprep.mubr.bf16.mxu0 %v14281_v8 }
 0x3cc   :  { %v4310_v22 = vpop.f32.mrf.mxu1  ;;  %v5065_v10 = vpop.f32.mrf.mxu0 }
 0x3cd   :  { %v12490_v21 = vadd.f32 %v4310_v22, %v3291_v17  ;;  %v5537_v29 = vadd.f32 %v5065_v10, %v11383_v18 }
 0x3ce   :  { %v4312_v44 = vpop.f32.mrf.mxu1  ;;  %v5067_v37 = vpop.f32.mrf.mxu0 }
 0x3cf   :  { %v12496_v63 = vadd.f32 %v4312_v44, %v3292_v4  ;;  %v5538_v56 = vadd.f32 %v5067_v37, %v11392_v43  ;;  %v9914_v4 = vld [vmem:[%s14261_s0 + $0x118] sm:$0xff]  }
 0x3d0   :  { %v5069_v55 = vpop.f32.mrf.mxu0 }
 0x3d1   :  { %v5539_v59 = vadd.f32 %v5069_v55, %v11395_v49 }
 0x3d2   :  { %v5073_v48 = vpop.f32.mrf.mxu0  ;;  %9250 = vmatmul.mubr.msk.bf16.gmra.mxu0 %vm493_vm1, %v9913_v33 }
 0x3d3   :  { %v5540_v17 = vadd.f32 %v5073_v48, %v11400_v12  ;;  %5321 = vmatprep.mubr.bf16.mxu0 %v14281_v8  ;;  %v12511_v12 = vld [vmem:[%s14263_s2] ss:$0 sm:$0xff] }
 0x3d4   :  { %v5075_v18 = vpop.f32.mrf.mxu0 }
 0x3d5   :  { %v5724_v24 = vmax.f32 %v5532_v53, %v5540_v17  ;;  %v5541_v22 = vadd.f32 %v5075_v18, %v11405_v1 }
 0x3d6   :  { %v5077_v10 = vpop.f32.mrf.mxu0 }
 0x3d7   :  { %v5725_v43 = vmax.f32 %v5533_v9, %v5541_v22  ;;  %v5542_v37 = vadd.f32 %v5077_v10, %v11414_v57 }
 0x3d8   :  { %v5079_v49 = vpop.f32.mrf.mxu0 }
 0x3d9   :  { %v5820_v44 = vmax.f32 %v5724_v24, %v5725_v43  ;;  %v5726_v33 = vmax.f32 %v5534_v0, %v5542_v37  ;;  %v5543_v53 = vadd.f32 %v5079_v49, %v11417_v15  ;;  %v9915_v15 = vld [vmem:[%s14261_s0 + $0x120] sm:$0xff]   ;;  %v9943_v43 = vld [vmem:[%s14262_s3 + $0x1f4] ss:$8 sps:$4 sm:$0xff]  }
 0x3da   :  { %v5083_v55 = vpop.f32.mrf.mxu0  ;;  %9251 = vmatmul.mubr.msk.bf16.gmra.mxu0 %vm493_vm1, %v9914_v4  ;;  %7025 = vmatprep.subr.bf16.mxu0 %v9943_v43  ;;  %v9920_v43 = vld [vmem:[%s14261_s0 + $0x130] sm:$0xff]  }
 0x3db   :  { %v5727_v1 = vmax.f32 %v5535_v36, %v5543_v53  ;;  %v5544_v48 = vadd.f32 %v5083_v55, %v11422_v14  ;;  %5331 = vmatprep.mubr.bf16.mxu0 %v14281_v8  ;;  %v5875_v57 = vadd.f32 %v12511_v12, %v5820_v44  ;;  %v9941_v44 = vld [vmem:[%s14262_s3 + $0x1f0] ss:$8 sps:$4 sm:$0xff]  }
 0x3dc   :  { %v5085_v9 = vpop.f32.mrf.mxu0  ;;  %7026 = vmatpush1.bf16.msra.mxu0 %v9941_v44 }
 0x3dd   :  { %v5821_v17 = vmax.f32 %v5726_v33, %v5727_v1  ;;  %v5728_v18 = vmax.f32 %v5536_v27, %v5544_v48  ;;  %v5545_v24 = vadd.f32 %v5085_v9, %v11427_v46  ;;  %v5923_v14 = vmax.f32 %v5875_v57, 0.0  ;;  %v9944_v1 = vld [vmem:[%s14262_s3 + $0x1e0] ss:$8 sps:$4 sm:$0xff]  }
 0x3de   :  { %v5087_v22 = vpop.f32.mrf.mxu0 }
 0x3df   :  { %v5876_v0 = vadd.f32 %v12511_v12, %v5821_v17  ;;  %v5729_v10 = vmax.f32 %v5537_v29, %v5545_v24  ;;  %v5546_v36 = vadd.f32 %v5087_v22, %v11436_v11  ;;  %v9950_v17 = vld [vmem:[%s14262_s3 + $0x1d4] ss:$8 sps:$4 sm:$0xff]   ;;  %v9948_v22 = vld [vmem:[%s14262_s3 + $0x1d0] ss:$8 sps:$4 sm:$0xff]  }
 0x3e0   :  { %v5089_v4 = vpop.f32.mrf.mxu0 }
 0x3e1   :  { %v5924_v37 = vmax.f32 %v5876_v0, 0.0  ;;  %v5822_v27 = vmax.f32 %v5728_v18, %v5729_v10  ;;  %v5730_v49 = vmax.f32 %v5538_v56, %v5546_v36  ;;  %v5547_v46 = vadd.f32 %v5089_v4, %v11439_v54  ;;  %v9946_v56 = vld [vmem:[%s14262_s3 + $0x1e4] ss:$8 sps:$4 sm:$0xff]  }
 0x3e2   :  { %v5093_v33 = vpop.f32.mrf.mxu0  ;;  %9252 = vmatmul.mubr.msk.bf16.gmra.mxu0 %vm493_vm1, %v9915_v15  ;;  %7027 = vmatprep.subr.bf16.mxu0 %v9946_v56  ;;  %v9953_v36 = vld [vmem:[%s14262_s3 + $0x1c4] ss:$8 sps:$4 sm:$0xff]  }
 0x3e3   :  { %v12532_v11 = vpack.c.bf16 %v5924_v37, %v5923_v14  ;;  %v5731_v29 = vmax.f32 %v5539_v59, %v5547_v46  ;;  %5341 = vmatprep.mubr.bf16.mxu0 %v14281_v8  ;;  %v5877_v54 = vadd.f32 %v12511_v12, %v5822_v27  ;;  %v9919_v59 = vld [vmem:[%s14261_s0 + $0x128] sm:$0xff]   ;;  %7028 = vmatpush1.bf16.msra.mxu0 %v9944_v1  ;;  %v9957_v27 = vld [vmem:[%s14262_s3 + $0x1b4] ss:$8 sps:$4 sm:$0xff]  }
 0x3e4   :  { %v5095_v53 = vpop.f32.mrf.mxu0  ;;  %7029 = vmatprep.subr.bf16.mxu0 %v9950_v17  ;;  %v9951_v14 = vld [vmem:[%s14262_s3 + $0x1c0] ss:$8 sps:$4 sm:$0xff]   ;;  %v5548_v44 = vadd.f32 %v5093_v33, %v11444_v45 }
 0x3e5   :  { %v5823_v55 = vmax.f32 %v5730_v49, %v5731_v29  ;;  %v5925_v18 = vmax.f32 %v5877_v54, 0.0  ;;  %v9955_v49 = vld [vmem:[%s14262_s3 + $0x1b0] ss:$8 sps:$4 sm:$0xff]   ;;  %v9963_v54 = vld [vmem:[%s14262_s3 + $0x1a4] ss:$8 sps:$4 sm:$0xff]  }
 0x3e6   :  { %v5097_v48 = vpop.f32.mrf.mxu0 }
 0x3e7   :  { %v5878_v57 = vadd.f32 %v12511_v12, %v5823_v55  ;;  %7030 = vmatpush1.bf16.msra.mxu0 %v9948_v22  ;;  %v5549_v55 = vadd.f32 %v5095_v53, %v11449_v60  ;;  %v5550_v33 = vadd.f32 %v5097_v48, %v11458_v35  ;;  %v9967_v60 = vld [vmem:[%s14262_s3 + $0x194] ss:$8 sps:$4 sm:$0xff]  }
 0x3e8   :  { %v5099_v9 = vpop.f32.mrf.mxu0  ;;  %7031 = vmatprep.subr.bf16.mxu0 %v9953_v36 }
 0x3e9   :  { %v5926_v24 = vmax.f32 %v5878_v57, 0.0  ;;  %v9961_v57 = vld [vmem:[%s14262_s3 + $0x1a0] ss:$8 sps:$4 sm:$0xff]  }
 0x3ea   :  { %v5103_v15 = vpop.f32.mrf.mxu0  ;;  %9253 = vmatmul.mubr.msk.bf16.gmra.mxu0 %vm493_vm1, %v9919_v59 }
 0x3eb   :  { %5351 = vmatprep.mubr.bf16.mxu0 %v14281_v8  ;;  %v12554_v0 = vpack.c.bf16 %v5926_v24, %v5925_v18  ;;  %7032 = vmatpush1.bf16.msra.mxu0 %v9951_v14 }
 0x3ec   :  { %v5105_v10 = vpop.f32.mrf.mxu0  ;;  %7033 = vmatprep.subr.bf16.mxu0 %v9957_v27 }
 0x3ee   :  { %v5107_v4 = vpop.f32.mrf.mxu0 }
 0x3ef   :  { %7034 = vmatpush1.bf16.msra.mxu0 %v9955_v49 }
 0x3f0   :  { %v5109_v37 = vpop.f32.mrf.mxu0  ;;  %7035 = vmatprep.subr.bf16.mxu0 %v9963_v54 }
 0x3f2   :  { %v5113_v46 = vpop.f32.mrf.mxu0  ;;  %9254 = vmatmul.mubr.msk.bf16.gmra.mxu0 %vm493_vm1, %v9920_v43  ;;  %v9965_v43 = vld [vmem:[%s14262_s3 + $0x190] ss:$8 sps:$4 sm:$0xff]  }
 0x3f3   :  { %v5556_v29 = vadd.f32 %v5113_v46, %v11494_v30  ;;  %5361 = vmatprep.mubr.bf16.mxu0 %v14281_v8  ;;  %v9921_v30 = vld [vmem:[%s14261_s0 + $0x138] sm:$0xff]   ;;  %7036 = vmatpush1.bf16.msra.mxu0 %v9961_v57  ;;  %v5555_v57 = vadd.f32 %v5109_v37, %v11489_v3 }
 0x3f4   :  { %v5115_v56 = vpop.f32.mrf.mxu0  ;;  %7037 = vmatprep.subr.bf16.mxu0 %v9967_v60 }
 0x3f5   :  { %v5732_v1 = vmax.f32 %v5548_v44, %v5556_v29  ;;  %v5557_v59 = vadd.f32 %v5115_v56, %v11505_v62  ;;  %v14791_v62 = vld [vmem:[#allocation149_spill] sm:$0xff]  ;;  %v5553_v44 = vadd.f32 %v5105_v10, %v11483_v19  ;;  %v5554_v19 = vadd.f32 %v5107_v4, %v11486_v7  ;;  %v9958_v7 = vld [vmem:[%s14262_s3 + $0x70] ss:$8 sps:$4 sm:$0xff]  }
 0x3f6   :  { %v5117_v45 = vpop.f32.mrf.mxu0  ;;  %v5551_v53 = vadd.f32 %v5099_v9, %v14791_v62 }
 0x3f7   :  { %v5733_v17 = vmax.f32 %v5549_v55, %v5557_v59  ;;  %v5558_v18 = vadd.f32 %v5117_v45, %v11508_v13  ;;  %v14792_v13 = vld [vmem:[#allocation150_spill] sm:$0xff]  ;;  %7038 = vmatpush1.bf16.msra.mxu0 %v9965_v43  ;;  %v9928_v55 = vld [vmem:[%s14261_s0 + $0x140] sm:$0xff]  }
 0x3f8   :  { %v5119_v24 = vpop.f32.mrf.mxu0  ;;  %v5552_v48 = vadd.f32 %v5103_v15, %v14792_v13 }
 0x3f9   :  { %v5824_v22 = vmax.f32 %v5732_v1, %v5733_v17  ;;  %v5734_v36 = vmax.f32 %v5550_v33, %v5558_v18  ;;  %v5559_v14 = vadd.f32 %v5119_v24, %v11511_v28  ;;  %v9970_v28 = vld [vmem:[%s14262_s3 + $0x184] ss:$8 sps:$4 sm:$0xff]   ;;  %v9968_v1 = vld [vmem:[%s14262_s3 + $0x180] ss:$8 sps:$4 sm:$0xff]  }
 0x3fa   :  { %v5123_v35 = vpop.f32.mrf.mxu0  ;;  %9255 = vmatmul.mubr.msk.bf16.gmra.mxu0 %vm493_vm1, %v9921_v30  ;;  %7039 = vmatprep.subr.bf16.mxu0 %v9970_v28 }
 0x3fb   :  { %v5735_v27 = vmax.f32 %v5551_v53, %v5559_v14  ;;  %v5560_v49 = vadd.f32 %v5123_v35, %v11516_v50  ;;  %5371 = vmatprep.mubr.bf16.mxu0 %v14281_v8  ;;  %v5879_v9 = vadd.f32 %v12511_v12, %v5824_v22  ;;  %v9960_v50 = vld [vmem:[%s14262_s3 + $0x74] ss:$8 sps:$4 sm:$0xff]   ;;  %7040 = vmatpush1.bf16.msra.mxu0 %v9968_v1  ;;  %v14794_v1 = vld [vmem:[#allocation9_spill] sm:$0xff] }
 0x3fc   :  { %v5125_v46 = vpop.f32.mrf.mxu0  ;;  %6381 = vmatprep.subr.bf16.mxu1 %v9960_v50  ;;  %v14793_v50 = vld [vmem:[#allocation151_spill] sm:$0xff] }
 0x3fd   :  { %v5825_v29 = vmax.f32 %v5734_v36, %v5735_v27  ;;  %v5736_v56 = vmax.f32 %v5552_v48, %v5560_v49  ;;  %v5561_v54 = vadd.f32 %v5125_v46, %v11527_v23  ;;  %v5927_v45 = vmax.f32 %v5879_v9, 0.0  ;;  %v9971_v48 = vld [vmem:[%s14262_s3 + $0x60] ss:$8 sps:$4 sm:$0xff]   ;;  %v9973_v27 = vld [vmem:[%s14262_s3 + $0x64] ss:$8 sps:$4 sm:$0xff]   ;;  %v9930_v46 = vld [vmem:[%s14261_s0 + $0x150] sm:$0xff]  }
 0x3fe   :  { %v5127_v15 = vpop.f32.mrf.mxu0 }
 0x3ff   :  { %v5880_v10 = vadd.f32 %v12511_v12, %v5825_v29  ;;  %v5737_v59 = vmax.f32 %v5553_v44, %v5561_v54  ;;  %v5562_v23 = vadd.f32 %v5127_v15, %v11530_v39 }
 0x400   :  { %v5129_v30 = vpop.f32.mrf.mxu0 }
 0x401   :  { %v5928_v33 = vmax.f32 %v5880_v10, 0.0  ;;  %v5826_v17 = vmax.f32 %v5736_v56, %v5737_v59  ;;  %v5738_v18 = vmax.f32 %v5554_v19, %v5562_v23  ;;  %v5563_v24 = vadd.f32 %v5129_v30, %v11533_v2  ;;  %v9929_v2 = vld [vmem:[%s14261_s0 + $0x148] sm:$0xff]   ;;  %v9931_v59 = vld [vmem:[%s14261_s0 + $0x158] sm:$0xff]  }
 0x402   :  { %v5133_v60 = vpop.f32.mrf.mxu0  ;;  %9256 = vmatmul.mubr.msk.bf16.gmra.mxu0 %vm493_vm1, %v9928_v55  ;;  %v14795_v23 = vld [vmem:[#allocation152_spill] sm:$0xff]  ;;  %v14796_v30 = vld [vmem:[#allocation10_spill] sm:$0xff] }
 0x403   :  { %v12624_v4 = vpack.c.bf16 %v5928_v33, %v5927_v45  ;;  %v5739_v39 = vmax.f32 %v5555_v57, %v5563_v24  ;;  %5381 = vmatprep.mubr.bf16.mxu0 %v14281_v8  ;;  %v5881_v37 = vadd.f32 %v12511_v12, %v5826_v17  ;;  %v5564_v29 = vadd.f32 %v5133_v60, %v11538_v40  ;;  %v14798_v60 = vld [vmem:[#allocation11_spill] sm:$0xff] }
 0x404   :  { %v5135_v3 = vpop.f32.mrf.mxu0 }
 0x405   :  { %v5827_v62 = vmax.f32 %v5738_v18, %v5739_v39  ;;  %6141 = vmatmul.mubr.bf16.vlgmr.msra.gmra.mxu1 %v12624_v4  ;;  %v5929_v14 = vmax.f32 %v5881_v37, 0.0  ;;  %v5565_v15 = vadd.f32 %v5135_v3, %v14793_v50  ;;  %v14799_v3 = vld [vmem:[#allocation154_spill] sm:$0xff]  ;;  %v14803_v50 = vld [vmem:[#allocation7_spill] sm:$0xff] }
 0x406   :  { %v5137_v53 = vpop.f32.mrf.mxu0  ;;  %6150 = vmatprep.mubr.bf16.mxu1 %v14281_v8  ;;  %6382 = vmatpush1.bf16.msra.mxu1 %v9958_v7 }
 0x407   :  { %v5882_v22 = vadd.f32 %v12511_v12, %v5827_v62  ;;  %6383 = vmatprep.subr.bf16.mxu1 %v9973_v27  ;;  %v5566_v57 = vadd.f32 %v5137_v53, %v14795_v23 }
 0x408   :  { %v5139_v36 = vpop.f32.mrf.mxu0 }
 0x409   :  { %v5930_v43 = vmax.f32 %v5882_v22, 0.0 }
 0x40a   :  { %v5143_v35 = vpop.f32.mrf.mxu0  ;;  %9257 = vmatmul.mubr.msk.bf16.gmra.mxu0 %vm493_vm1, %v9929_v2  ;;  %6384 = vmatpush1.bf16.msra.mxu1 %v9971_v48  ;;  %v14800_v2 = vld [vmem:[#allocation12_spill] sm:$0xff] }
 0x40b   :  { %v12635_v13 = vpack.c.bf16 %v5930_v43, %v5929_v14  ;;  %5391 = vmatprep.mubr.bf16.mxu0 %v14281_v8  ;;  %v5568_v37 = vadd.f32 %v5143_v35, %v14799_v3  ;;  %v14801_v43 = vld [vmem:[#allocation6_spill] sm:$0xff]  ;;  %v9976_v35 = vld [vmem:[%s14262_s3 + $0x54] ss:$8 sps:$4 sm:$0xff]  }
 0x40c   :  { %v5145_v49 = vpop.f32.mrf.mxu0  ;;  %6385 = vmatprep.subr.bf16.mxu1 %v9976_v35 }
 0x40d   :  { %6151 = vmatmul.mubr.bf16.gmra.mxu1 %v12635_v13  ;;  %v5569_v48 = vadd.f32 %v5145_v49, %v14801_v43  ;;  %v9979_v43 = vld [vmem:[%s14262_s3 + $0x44] ss:$8 sps:$4 sm:$0xff]  }
 0x40e   :  { %v5147_v9 = vpop.f32.mrf.mxu0  ;;  %6160 = vmatprep.mubr.bf16.mxu1 %v14281_v8 }
 0x410   :  { %v5149_v28 = vpop.f32.mrf.mxu0 }
 0x412   :  { %v5153_v44 = vpop.f32.mrf.mxu0  ;;  %9258 = vmatmul.mubr.msk.bf16.gmra.mxu0 %vm493_vm1, %v9930_v46  ;;  %v14802_v46 = vld [vmem:[#allocation13_spill] sm:$0xff] }
 0x413   :  { %v5572_v56 = vadd.f32 %v5153_v44, %v11582_v32  ;;  %5401 = vmatprep.mubr.bf16.mxu0 %v14281_v8  ;;  %v14797_v32 = vld [vmem:[#allocation153_spill] sm:$0xff] }
 0x414   :  { %v5155_v54 = vpop.f32.mrf.mxu0  ;;  %v5567_v17 = vadd.f32 %v5139_v36, %v14797_v32 }
 0x415   :  { %v5740_v55 = vmax.f32 %v5564_v29, %v5572_v56  ;;  %v5573_v19 = vadd.f32 %v5155_v54, %v14794_v1  ;;  %v9974_v29 = vld [vmem:[%s14262_s3 + $0x50] ss:$8 sps:$4 sm:$0xff]   ;;  %v9932_v54 = vld [vmem:[%s14261_s0 + $0x160] sm:$0xff]   ;;  %v14804_v1 = vld [vmem:[#allocation14_spill] sm:$0xff] }
 0x416   :  { %v5157_v10 = vpop.f32.mrf.mxu0  ;;  %6386 = vmatpush1.bf16.msra.mxu1 %v9974_v29  ;;  %v14807_v29 = vld [vmem:[#allocation16_spill] sm:$0xff] }
 0x417   :  { %v5741_v45 = vmax.f32 %v5565_v15, %v5573_v19  ;;  %v5574_v40 = vadd.f32 %v5157_v10, %v14796_v30  ;;  %v5570_v15 = vadd.f32 %v5147_v9, %v14803_v50  ;;  %v14805_v10 = vld [vmem:[#allocation8_spill] sm:$0xff]  ;;  %6387 = vmatprep.subr.bf16.mxu1 %v9979_v43 }
 0x418   :  { %v5159_v33 = vpop.f32.mrf.mxu0 }
 0x419   :  { %v5828_v18 = vmax.f32 %v5740_v55, %v5741_v45  ;;  %v5742_v24 = vmax.f32 %v5566_v57, %v5574_v40  ;;  %v5575_v7 = vadd.f32 %v5159_v33, %v14798_v60  ;;  %v14806_v33 = vld [vmem:[#allocation15_spill] sm:$0xff] }
 0x41a   :  { %v5163_v39 = vpop.f32.mrf.mxu0  ;;  %9259 = vmatmul.mubr.msk.bf16.gmra.mxu0 %vm493_vm1, %v9931_v59  ;;  %v5571_v59 = vadd.f32 %v5149_v28, %v14805_v10 }
 0x41b   :  { %v5743_v62 = vmax.f32 %v5567_v17, %v5575_v7  ;;  %v5576_v22 = vadd.f32 %v5163_v39, %v14800_v2  ;;  %5411 = vmatprep.mubr.bf16.mxu0 %v14281_v8  ;;  %v5883_v53 = vadd.f32 %v12511_v12, %v5828_v18  ;;  %v9933_v39 = vld [vmem:[%s14261_s0 + $0x168] sm:$0xff]  }
 0x41c   :  { %v5165_v14 = vpop.f32.mrf.mxu0 }
 0x41d   :  { %v5829_v36 = vmax.f32 %v5742_v24, %v5743_v62  ;;  %v5744_v27 = vmax.f32 %v5568_v37, %v5576_v22  ;;  %v5577_v44 = vadd.f32 %v5165_v14, %v14802_v46  ;;  %v5931_v23 = vmax.f32 %v5883_v53, 0.0  ;;  %v9977_v14 = vld [vmem:[%s14262_s3 + $0x40] ss:$8 sps:$4 sm:$0xff]  }
 0x41e   :  { %v5167_v56 = vpop.f32.mrf.mxu0  ;;  %6388 = vmatpush1.bf16.msra.mxu1 %v9977_v14  ;;  %v14816_v14 = vld [vmem:[#allocation28_spill] sm:$0xff] }
 0x41f   :  { %v5884_v49 = vadd.f32 %v12511_v12, %v5829_v36  ;;  %v5745_v55 = vmax.f32 %v5569_v48, %v5577_v44  ;;  %v5578_v19 = vadd.f32 %v5167_v56, %v14804_v1  ;;  %v14808_v56 = vld [vmem:[#allocation24_spill] sm:$0xff]  ;;  %v14810_v1 = vld [vmem:[#allocation25_spill] sm:$0xff] }
 0x420   :  { %v5169_v57 = vpop.f32.mrf.mxu0 }
 0x421   :  { %v5932_v45 = vmax.f32 %v5884_v49, 0.0  ;;  %v5830_v30 = vmax.f32 %v5744_v27, %v5745_v55  ;;  %v5746_v40 = vmax.f32 %v5570_v15, %v5578_v19  ;;  %v5579_v32 = vadd.f32 %v5169_v57, %v14806_v33  ;;  %v9934_v27 = vld [vmem:[%s14261_s0 + $0x170] sm:$0xff]   ;;  %v14809_v15 = vld [vmem:[#allocation17_spill] sm:$0xff] }
 0x422   :  { %v5173_v17 = vpop.f32.mrf.mxu0  ;;  %9260 = vmatmul.mubr.msk.bf16.gmra.mxu0 %vm493_vm1, %v9932_v54 }
 0x423   :  { %v5747_v9 = vmax.f32 %v5571_v59, %v5579_v32  ;;  %v12684_v18 = vpack.c.bf16 %v5932_v45, %v5931_v23  ;;  %5421 = vmatprep.mubr.bf16.mxu0 %v14281_v8  ;;  %v5885_v60 = vadd.f32 %v12511_v12, %v5830_v30  ;;  %v5580_v35 = vadd.f32 %v5173_v17, %v14807_v29  ;;  %v9935_v59 = vld [vmem:[%s14261_s0 + $0x178] sm:$0xff]   ;;  %v14811_v23 = vld [vmem:[#allocation18_spill] sm:$0xff]  ;;  %v14813_v32 = vld [vmem:[#allocation19_spill] sm:$0xff] }
 0x424   :  { %v5175_v24 = vpop.f32.mrf.mxu0  ;;  %v14812_v30 = vld [vmem:[#allocation26_spill] sm:$0xff] }
 0x425   :  { %v5831_v28 = vmax.f32 %v5746_v40, %v5747_v9  ;;  %6161 = vmatmul.mubr.bf16.gmra.mxu1 %v12684_v18  ;;  %v5933_v62 = vmax.f32 %v5885_v60, 0.0  ;;  %v5581_v49 = vadd.f32 %v5175_v24, %v14809_v15 }
 0x426   :  { %v5177_v7 = vpop.f32.mrf.mxu0  ;;  %6170 = vmatprep.mubr.bf16.mxu1 %v14281_v8 }
 0x427   :  { %v5886_v3 = vadd.f32 %v12511_v12, %v5831_v28  ;;  %v5582_v57 = vadd.f32 %v5177_v7, %v14811_v23  ;;  %v14814_v28 = vld [vmem:[#allocation27_spill] sm:$0xff] }
 0x428   :  { %v5179_v37 = vpop.f32.mrf.mxu0  ;;  %v14821_v23 = vld [vmem:[#allocation23_spill] sm:$0xff] }
 0x429   :  { %v5934_v2 = vmax.f32 %v5886_v3, 0.0  ;;  %v5583_v17 = vadd.f32 %v5179_v37, %v14813_v32  ;;  %v14815_v3 = vld [vmem:[#allocation20_spill] sm:$0xff] }
 0x42a   :  { %v5183_v22 = vpop.f32.mrf.mxu0  ;;  %9261 = vmatmul.mubr.msk.bf16.gmra.mxu0 %vm493_vm1, %v9933_v39 }
 0x42b   :  { %v12695_v53 = vpack.c.bf16 %v5934_v2, %v5933_v62  ;;  %5431 = vmatprep.mubr.bf16.mxu0 %v14281_v8  ;;  %v5584_v62 = vadd.f32 %v5183_v22, %v14815_v3  ;;  %v9982_v22 = vld [vmem:[%s14262_s3 + $0x34] ss:$8 sps:$4 sm:$0xff]  }
 0x42c   :  { %v5185_v48 = vpop.f32.mrf.mxu0  ;;  %6389 = vmatprep.subr.bf16.mxu1 %v9982_v22 }
 0x42d   :  { %6171 = vmatmul.mubr.bf16.gmra.mxu1 %v12695_v53 }
 0x42e   :  { %v5187_v36 = vpop.f32.mrf.mxu0  ;;  %6180 = vmatprep.mubr.bf16.mxu1 %v14281_v8 }
 0x430   :  { %v5189_v46 = vpop.f32.mrf.mxu0 }
 0x432   :  { %v5193_v44 = vpop.f32.mrf.mxu0  ;;  %9262 = vmatmul.mubr.msk.bf16.gmra.mxu0 %vm493_vm1, %v9934_v27 }
 0x433   :  { %v5588_v54 = vadd.f32 %v5193_v44, %v14808_v56  ;;  %5441 = vmatprep.mubr.bf16.mxu0 %v14281_v8  ;;  %v14817_v44 = vld [vmem:[#allocation21_spill] sm:$0xff] }
 0x434   :  { %v5195_v50 = vpop.f32.mrf.mxu0  ;;  %v5585_v29 = vadd.f32 %v5185_v48, %v14817_v44  ;;  %v14818_v56 = vld [vmem:[#allocation29_spill] sm:$0xff] }
 0x435   :  { %v5748_v55 = vmax.f32 %v5580_v35, %v5588_v54  ;;  %v5589_v19 = vadd.f32 %v5195_v50, %v14810_v1  ;;  %v9980_v50 = vld [vmem:[%s14262_s3 + $0x30] ss:$8 sps:$4 sm:$0xff]  }
 0x436   :  { %v5197_v10 = vpop.f32.mrf.mxu0  ;;  %6390 = vmatpush1.bf16.msra.mxu1 %v9980_v50 }
 0x437   :  { %v5749_v45 = vmax.f32 %v5581_v49, %v5589_v19  ;;  %v5590_v40 = vadd.f32 %v5197_v10, %v14812_v30  ;;  %v9936_v49 = vld [vmem:[%s14261_s0 + $0x180] sm:$0xff]   ;;  %v14820_v10 = vld [vmem:[#allocation30_spill] sm:$0xff] }
 0x438   :  { %v5199_v33 = vpop.f32.mrf.mxu0 }
 0x439   :  { %v5832_v9 = vmax.f32 %v5748_v55, %v5749_v45  ;;  %v5750_v60 = vmax.f32 %v5582_v57, %v5590_v40  ;;  %v5591_v24 = vadd.f32 %v5199_v33, %v14814_v28  ;;  %v14819_v55 = vld [vmem:[#allocation22_spill] sm:$0xff]  ;;  %v5587_v57 = vadd.f32 %v5189_v46, %v14821_v23 }
 0x43a   :  { %v5203_v39 = vpop.f32.mrf.mxu0  ;;  %9263 = vmatmul.mubr.msk.bf16.gmra.mxu0 %vm493_vm1, %v9935_v59  ;;  %v5586_v1 = vadd.f32 %v5187_v36, %v14819_v55 }
 0x43b   :  { %v5751_v2 = vmax.f32 %v5583_v17, %v5591_v24  ;;  %v5592_v43 = vadd.f32 %v5203_v39, %v14816_v14  ;;  %5451 = vmatprep.mubr.bf16.mxu0 %v14281_v8  ;;  %v5887_v7 = vadd.f32 %v12511_v12, %v5832_v9  ;;  %v14822_v17 = vld [vmem:[#allocation31_spill] sm:$0xff] }
 0x43c   :  { %v5205_v27 = vpop.f32.mrf.mxu0 }
 0x43d   :  { %v5833_v37 = vmax.f32 %v5750_v60, %v5751_v2  ;;  %v5752_v35 = vmax.f32 %v5584_v62, %v5592_v43  ;;  %v5593_v54 = vadd.f32 %v5205_v27, %v14818_v56  ;;  %v5935_v45 = vmax.f32 %v5887_v7, 0.0  ;;  %v9937_v62 = vld [vmem:[%s14261_s0 + $0x188] sm:$0xff]  }
 0x43e   :  { %v5207_v15 = vpop.f32.mrf.mxu0 }
 0x43f   :  { %v5888_v48 = vadd.f32 %v12511_v12, %v5833_v37  ;;  %v5753_v19 = vmax.f32 %v5585_v29, %v5593_v54  ;;  %v5594_v59 = vadd.f32 %v5207_v15, %v14820_v10  ;;  %v9983_v29 = vld [vmem:[%s14262_s3 + $0x20] ss:$8 sps:$4 sm:$0xff]   ;;  %v9985_v37 = vld [vmem:[%s14262_s3 + $0x24] ss:$8 sps:$4 sm:$0xff]   ;;  %v9938_v54 = vld [vmem:[%s14261_s0 + $0x190] sm:$0xff]  }
 0x440   :  { %v5209_v30 = vpop.f32.mrf.mxu0  ;;  %6391 = vmatprep.subr.bf16.mxu1 %v9985_v37  ;;  %v14823_v15 = vld [vmem:[#allocation32_spill] sm:$0xff]  ;;  %v14830_v37 = vld [vmem:[#allocation42_spill] sm:$0xff] }
 0x441   :  { %v5936_v40 = vmax.f32 %v5888_v48, 0.0  ;;  %v5834_v33 = vmax.f32 %v5752_v35, %v5753_v19  ;;  %v5754_v32 = vmax.f32 %v5586_v1, %v5594_v59  ;;  %v5595_v9 = vadd.f32 %v5209_v30, %v14822_v17  ;;  %6392 = vmatpush1.bf16.msra.mxu1 %v9983_v29  ;;  %v14824_v48 = vld [vmem:[#allocation33_spill] sm:$0xff] }
 0x442   :  { %v5213_v60 = vpop.f32.mrf.mxu0  ;;  %9264 = vmatmul.mubr.msk.bf16.gmra.mxu0 %vm493_vm1, %v9936_v49 }
 0x443   :  { %v5755_v36 = vmax.f32 %v5587_v57, %v5595_v9  ;;  %v12744_v28 = vpack.c.bf16 %v5936_v40, %v5935_v45  ;;  %5461 = vmatprep.mubr.bf16.mxu0 %v14281_v8  ;;  %v5889_v39 = vadd.f32 %v12511_v12, %v5834_v33  ;;  %v5596_v49 = vadd.f32 %v5213_v60, %v14823_v15  ;;  %v9939_v57 = vld [vmem:[%s14261_s0 + $0x198] sm:$0xff]   ;;  %v14825_v45 = vld [vmem:[#allocation34_spill] sm:$0xff]  ;;  %v9940_v15 = vld [vmem:[%s14261_s0 + $0x1a0] sm:$0xff]  }
 0x444   :  { %v5215_v24 = vpop.f32.mrf.mxu0 }
 0x445   :  { %v5835_v46 = vmax.f32 %v5754_v32, %v5755_v36  ;;  %6181 = vmatmul.mubr.bf16.gmra.mxu1 %v12744_v28  ;;  %v5937_v43 = vmax.f32 %v5889_v39, 0.0  ;;  %v5597_v19 = vadd.f32 %v5215_v24, %v14824_v48  ;;  %v14832_v48 = vld [vmem:[#allocation43_spill] sm:$0xff] }
 0x446   :  { %v5217_v3 = vpop.f32.mrf.mxu0  ;;  %6190 = vmatprep.mubr.bf16.mxu1 %v14281_v8 }
 0x447   :  { %v5890_v2 = vadd.f32 %v12511_v12, %v5835_v46  ;;  %v5598_v30 = vadd.f32 %v5217_v3, %v14825_v45 }
 0x448   :  { %v5219_v14 = vpop.f32.mrf.mxu0 }
 0x449   :  { %v5938_v7 = vmax.f32 %v5890_v2, 0.0 }
 0x44a   :  { %v5223_v27 = vpop.f32.mrf.mxu0  ;;  %9265 = vmatmul.mubr.msk.bf16.gmra.mxu0 %vm493_vm1, %v9937_v62  ;;  %v14828_v62 = vld [vmem:[#allocation41_spill] sm:$0xff] }
 0x44b   :  { %v12755_v44 = vpack.c.bf16 %v5938_v7, %v5937_v43  ;;  %5471 = vmatprep.mubr.bf16.mxu0 %v14281_v8  ;;  %v14829_v43 = vld [vmem:[#allocation37_spill] sm:$0xff] }
 0x44c   :  { %v5225_v35 = vpop.f32.mrf.mxu0 }
 0x44d   :  { %6191 = vmatmul.mubr.bf16.gmra.mxu1 %v12755_v44  ;;  %v5601_v7 = vadd.f32 %v5225_v35, %v14829_v43 }
 0x44e   :  { %v5227_v56 = vpop.f32.mrf.mxu0  ;;  %6200 = vmatprep.mubr.bf16.mxu1 %v14281_v8 }
 0x450   :  { %v5229_v50 = vpop.f32.mrf.mxu0 }
 0x452   :  { %v5233_v22 = vpop.f32.mrf.mxu0  ;;  %9266 = vmatmul.mubr.msk.bf16.gmra.mxu0 %vm493_vm1, %v9938_v54 }
 0x453   :  { %v5604_v55 = vadd.f32 %v5233_v22, %v11770_v26  ;;  %5481 = vmatprep.mubr.bf16.mxu0 %v14281_v8  ;;  %v14826_v26 = vld [vmem:[#allocation35_spill] sm:$0xff] }
 0x454   :  { %v5235_v1 = vpop.f32.mrf.mxu0  ;;  %v5599_v17 = vadd.f32 %v5219_v14, %v14826_v26 }
 0x455   :  { %v5756_v10 = vmax.f32 %v5596_v49, %v5604_v55  ;;  %v5605_v59 = vadd.f32 %v5235_v1, %v11775_v42  ;;  %v14827_v42 = vld [vmem:[#allocation36_spill] sm:$0xff]  ;;  %v14831_v49 = vld [vmem:[#allocation38_spill] sm:$0xff] }
 0x456   :  { %v5237_v23 = vpop.f32.mrf.mxu0  ;;  %v5600_v39 = vadd.f32 %v5223_v27, %v14827_v42  ;;  %v9988_v27 = vld [vmem:[%s14262_s3 + $0x14] ss:$8 sps:$4 sm:$0xff]   ;;  %v5602_v55 = vadd.f32 %v5227_v56, %v14831_v49 }
 0x457   :  { %v5757_v40 = vmax.f32 %v5597_v19, %v5605_v59  ;;  %v5606_v33 = vadd.f32 %v5237_v23, %v11784_v16  ;;  %6393 = vmatprep.subr.bf16.mxu1 %v9988_v27 }
 0x458   :  { %v5239_v32 = vpop.f32.mrf.mxu0 }
 0x459   :  { %v5836_v9 = vmax.f32 %v5756_v10, %v5757_v40  ;;  %v5758_v60 = vmax.f32 %v5598_v30, %v5606_v33  ;;  %v5607_v36 = vadd.f32 %v5239_v32, %v11789_v25  ;;  %v9986_v25 = vld [vmem:[%s14262_s3 + $0x10] ss:$8 sps:$4 sm:$0xff]   ;;  %v14834_v33 = vld [vmem:[#allocation45_spill] sm:$0xff] }
 0x45a   :  { %v5243_v24 = vpop.f32.mrf.mxu0  ;;  %9267 = vmatmul.mubr.msk.bf16.gmra.mxu0 %vm493_vm1, %v9939_v57  ;;  %v14833_v10 = vld [vmem:[#allocation39_spill] sm:$0xff]  ;;  %6394 = vmatpush1.bf16.msra.mxu1 %v9986_v25  ;;  %v14835_v25 = vld [vmem:[#allocation46_spill] sm:$0xff] }
 0x45b   :  { %v5759_v46 = vmax.f32 %v5599_v17, %v5607_v36  ;;  %v5608_v2 = vadd.f32 %v5243_v24, %v14828_v62  ;;  %5491 = vmatprep.mubr.bf16.mxu0 %v14281_v8  ;;  %v5891_v3 = vadd.f32 %v12511_v12, %v5836_v9  ;;  %v5603_v59 = vadd.f32 %v5229_v50, %v14833_v10  ;;  %v9947_v24 = vld [vmem:[%s14261_s0 + $0x1a8] sm:$0xff]   ;;  %v14839_v10 = vld [vmem:[#allocation40_spill] sm:$0xff] }
 0x45c   :  { %v5245_v16 = vpop.f32.mrf.mxu0 }
 0x45d   :  { %v5837_v14 = vmax.f32 %v5758_v60, %v5759_v46  ;;  %v5760_v29 = vmax.f32 %v5600_v39, %v5608_v2  ;;  %v5609_v54 = vadd.f32 %v5245_v16, %v14830_v37  ;;  %v5939_v23 = vmax.f32 %v5891_v3, 0.0  ;;  %v9989_v2 = vld [vmem:[%s14262_s3] ss:$8 sps:$4 sm:$0xff]   ;;  %v9991_v3 = vld [vmem:[%s14262_s3 + $0x4] ss:$8 sps:$4 sm:$0xff]  }
 0x45e   :  { %v5247_v22 = vpop.f32.mrf.mxu0  ;;  %6395 = vmatprep.subr.bf16.mxu1 %v9991_v3 }
 0x45f   :  { %v5892_v35 = vadd.f32 %v12511_v12, %v5837_v14  ;;  %v5761_v1 = vmax.f32 %v5601_v7, %v5609_v54  ;;  %v5610_v19 = vadd.f32 %v5247_v22, %v14832_v48  ;;  %6396 = vmatpush1.bf16.msra.mxu1 %v9989_v2  ;;  %v14836_v22 = vld [vmem:[#allocation56_spill] sm:$0xff]  ;;  %v14838_v48 = vld [vmem:[#allocation57_spill] sm:$0xff] }
 0x460   :  { %v5249_v57 = vpop.f32.mrf.mxu0 }
 0x461   :  { %v5940_v45 = vmax.f32 %v5892_v35, 0.0  ;;  %v5838_v30 = vmax.f32 %v5760_v29, %v5761_v1  ;;  %v5762_v40 = vmax.f32 %v5602_v55, %v5610_v19  ;;  %v5611_v32 = vadd.f32 %v5249_v57, %v14834_v33  ;;  %v9954_v29 = vld [vmem:[%s14261_s0 + $0x1b0] sm:$0xff]   ;;  %v14842_v33 = vld [vmem:[#allocation48_spill] sm:$0xff] }
 0x462   :  { %v5253_v26 = vpop.f32.mrf.mxu0  ;;  %9268 = vmatmul.mubr.msk.bf16.gmra.mxu0 %vm493_vm1, %v9940_v15  ;;  %v14837_v55 = vld [vmem:[#allocation47_spill] sm:$0xff] }
 0x463   :  { %v12804_v56 = vpack.c.bf16 %v5940_v45, %v5939_v23  ;;  %v5763_v17 = vmax.f32 %v5603_v59, %v5611_v32  ;;  %5501 = vmatprep.mubr.bf16.mxu0 %v14281_v8  ;;  %v5893_v60 = vadd.f32 %v12511_v12, %v5838_v30  ;;  %v5612_v27 = vadd.f32 %v5253_v26, %v14835_v25  ;;  %v14840_v59 = vld [vmem:[#allocation49_spill] sm:$0xff]  ;;  %v9964_v45 = vld [vmem:[%s14261_s0 + $0x1b8] sm:$0xff]   ;;  %v14841_v30 = vld [vmem:[#allocation50_spill] sm:$0xff] }
 0x464   :  { %v5255_v9 = vpop.f32.mrf.mxu0  ;;  %v4400_v23 = vadd.f32 %v14840_v59, %v14839_v10  ;;  %v14845_v25 = vld [vmem:[#allocation52_spill] sm:$0xff] }
 0x465   :  { %v5839_v50 = vmax.f32 %v5762_v40, %v5763_v17  ;;  %6201 = vmatmul.mubr.bf16.gmra.mxu1 %v12804_v56  ;;  %v5941_v46 = vmax.f32 %v5893_v60, 0.0  ;;  %v5613_v35 = vadd.f32 %v5255_v9, %v14837_v55  ;;  %v4408_v40 = vadd.f32 %v11888_v38, %v14841_v30 }
 0x466   :  { %v5257_v36 = vpop.f32.mrf.mxu0  ;;  %6210 = vmatprep.mubr.bf16.mxu1 %v14281_v8 }
 0x467   :  { %v5894_v42 = vadd.f32 %v12511_v12, %v5839_v50  ;;  %v5614_v32 = vadd.f32 %v5257_v36, %v14842_v33 }
 0x468   :  { %v5259_v39 = vpop.f32.mrf.mxu0 }
 0x469   :  { %v5942_v62 = vmax.f32 %v5894_v42, 0.0  ;;  %v5615_v60 = vadd.f32 %v5259_v39, %v4400_v23  ;;  %v14850_v23 = vld [vmem:[#allocation60_spill] sm:$0xff] }
 0x46a   :  { %v5263_v16 = vpop.f32.mrf.mxu0  ;;  %9269 = vmatmul.mubr.msk.bf16.gmra.mxu0 %vm493_vm1, %v9947_v24 }
 0x46b   :  { %v12821_v43 = vpack.c.bf16 %v5942_v62, %v5941_v46  ;;  %5511 = vmatprep.mubr.bf16.mxu0 %v14281_v8  ;;  %v14843_v62 = vld [vmem:[#allocation51_spill] sm:$0xff] }
 0x46c   :  { %v5265_v7 = vpop.f32.mrf.mxu0  ;;  %v5616_v2 = vadd.f32 %v5263_v16, %v14843_v62  ;;  %v14847_v16 = vld [vmem:[#allocation54_spill] sm:$0xff] }
 0x46d   :  { %6211 = vmatmul.mubr.bf16.gmra.mxu1 %v12821_v43 }
 0x46e   :  { %v5267_v14 = vpop.f32.mrf.mxu0  ;;  %6220 = vmatprep.mubr.bf16.mxu1 %v14281_v8 }
 0x470   :  { %v5269_v37 = vpop.f32.mrf.mxu0 }
 0x472   :  { %v5273_v54 = vpop.f32.mrf.mxu0  ;;  %9270 = vmatmul.mubr.msk.bf16.gmra.mxu0 %vm493_vm1, %v9954_v29  ;;  %v14844_v29 = vld [vmem:[#allocation59_spill] sm:$0xff] }
 0x473   :  { %v5620_v15 = vadd.f32 %v5273_v54, %v14836_v22  ;;  %5521 = vmatprep.mubr.bf16.mxu0 %v14281_v8 }
 0x474   :  { %v5275_v49 = vpop.f32.mrf.mxu0 }
 0x475   :  { %v5764_v1 = vmax.f32 %v5612_v27, %v5620_v15  ;;  %v5621_v19 = vadd.f32 %v5275_v49, %v14838_v48  ;;  %v9994_v15 = vld [vmem:[%s14262_s3 + $0x174] ss:$8 sps:$4 sm:$0xff]  }
 0x476   :  { %v5277_v57 = vpop.f32.mrf.mxu0  ;;  %v14846_v49 = vld [vmem:[#allocation44_spill] sm:$0xff]  ;;  %6671 = vmatprep.subr.bf16.mxu1 %v9994_v15 }
 0x477   :  { %v5765_v26 = vmax.f32 %v5613_v35, %v5621_v19  ;;  %v5622_v17 = vadd.f32 %v5277_v57, %v11886_v5  ;;  %v5617_v5 = vadd.f32 %v5265_v7, %v14845_v25  ;;  %v4404_v55 = vadd.f32 %v14847_v16, %v14846_v49  ;;  %v14848_v35 = vld [vmem:[#allocation55_spill] sm:$0xff]  ;;  %v14849_v19 = vld [vmem:[#allocation53_spill] sm:$0xff] }
 0x478   :  { %v5279_v9 = vpop.f32.mrf.mxu0  ;;  %v5618_v10 = vadd.f32 %v5267_v14, %v14849_v19  ;;  %v14852_v25 = vld [vmem:[#allocation161_spill] sm:$0xff]  ;;  %v14855_v49 = vld [vmem:[#allocation63_spill] sm:$0xff] }
 0x479   :  { %v5840_v50 = vmax.f32 %v5764_v1, %v5765_v26  ;;  %v5766_v24 = vmax.f32 %v5614_v32, %v5622_v17  ;;  %v5623_v42 = vadd.f32 %v5279_v9, %v4408_v40  ;;  %v4412_v1 = vadd.f32 %v11909_v61, %v14848_v35 }
 0x47a   :  { %v5283_v46 = vpop.f32.mrf.mxu0  ;;  %9271 = vmatmul.mubr.msk.bf16.gmra.mxu0 %vm493_vm1, %v9964_v45 }
 0x47b   :  { %v5767_v3 = vmax.f32 %v5615_v60, %v5623_v42  ;;  %v5624_v54 = vadd.f32 %v5283_v46, %v14844_v29  ;;  %7057 = vmatprep.mubr.bf16.mxu0 %v14281_v8  ;;  %v5895_v38 = vadd.f32 %v12511_v12, %v5840_v50 }
 0x47c   :  { %v5285_v36 = vpop.f32.mrf.mxu0 }
 0x47d   :  { %v5841_v27 = vmax.f32 %v5766_v24, %v5767_v3  ;;  %v5768_v39 = vmax.f32 %v5616_v2, %v5624_v54  ;;  %v5625_v22 = vadd.f32 %v5285_v36, %v11901_v34  ;;  %v5619_v34 = vadd.f32 %v5269_v37, %v4404_v55  ;;  %v14851_v36 = vld [vmem:[#allocation62_spill] sm:$0xff] }
 0x47e   :  { %v5287_v48 = vpop.f32.mrf.mxu0  ;;  %v5943_v45 = vmax.f32 %v5895_v38, 0.0 }
 0x47f   :  { %v5896_v59 = vadd.f32 %v12511_v12, %v5841_v27  ;;  %v5769_v7 = vmax.f32 %v5617_v5, %v5625_v22  ;;  %v5626_v57 = vadd.f32 %v5287_v48, %v14850_v23  ;;  %v4421_v5 = vadd.f32 %v14852_v25, %v14851_v36  ;;  %v14854_v22 = vld [vmem:[#allocation162_spill] sm:$0xff]  ;;  %v14857_v48 = vld [vmem:[#allocation163_spill] sm:$0xff] }
 0x480   :  { %v5289_v30 = vpop.f32.mrf.mxu0 }
 0x481   :  { %v5944_v40 = vmax.f32 %v5896_v59, 0.0  ;;  %v5842_v33 = vmax.f32 %v5768_v39, %v5769_v7  ;;  %v5770_v32 = vmax.f32 %v5618_v10, %v5626_v57  ;;  %v5627_v26 = vadd.f32 %v5289_v30, %v4412_v1  ;;  %v14853_v39 = vld [vmem:[#allocation64_spill] sm:$0xff]  ;;  %v14856_v1 = vld [vmem:[#allocation66_spill] sm:$0xff]  ;;  %v14858_v10 = vld [vmem:[#allocation65_spill] sm:$0xff] }
 0x482   :  { %v5293_v17 = vpop.f32.mrf.mxu0  ;;  %7058 = vmatmul.mubr.bf16.vlgmr.msra.gmra.mxu0 %v12744_v28  ;;  %v4422_v15 = vadd.f32 %v14854_v22, %v14853_v39  ;;  %v4423_v19 = vadd.f32 %v14857_v48, %v14856_v1  ;;  %v14859_v57 = vld [vmem:[#allocation58_spill] sm:$0xff]  ;;  %v14866_v39 = vld [vmem:[#allocation69_spill] sm:$0xff]  ;;  %v14870_v1 = vld [vmem:[#allocation167_spill] sm:$0xff] }
 0x483   :  { %v12862_v61 = vpack.c.bf16 %v5944_v40, %v5943_v45  ;;  %v5771_v9 = vmax.f32 %v5619_v34, %v5627_v26  ;;  %7067 = vmatprep.mubr.bf16.mxu0 %v14281_v8  ;;  %v5897_v60 = vadd.f32 %v12511_v12, %v5842_v33  ;;  %v5628_v16 = vadd.f32 %v5293_v17, %v14855_v49  ;;  %v14860_v34 = vld [vmem:[#allocation156_spill] sm:$0xff]  ;;  %v14861_v40 = vld [vmem:[#allocation67_spill] sm:$0xff]  ;;  %v14867_v22 = vld [vmem:[#allocation166_spill] sm:$0xff] }
 0x484   :  { %v5295_v14 = vpop.f32.mrf.mxu0  ;;  %v4416_v45 = vadd.f32 %v14860_v34, %v14859_v57  ;;  %v14862_v33 = vld [vmem:[#allocation164_spill] sm:$0xff]  ;;  %v14863_v26 = vld [vmem:[#allocation155_spill] sm:$0xff]  ;;  %v14868_v49 = vld [vmem:[#allocation157_spill] sm:$0xff] }
 0x485   :  { %v5843_v50 = vmax.f32 %v5770_v32, %v5771_v9  ;;  %6221 = vmatmul.mubr.bf16.gmra.mxu1 %v12862_v61  ;;  %v5945_v46 = vmax.f32 %v5897_v60, 0.0  ;;  %v5629_v59 = vadd.f32 %v5295_v14, %v14858_v10  ;;  %v4424_v32 = vadd.f32 %v14862_v33, %v14861_v40  ;;  %v14871_v10 = vld [vmem:[#allocation158_spill] sm:$0xff]  ;;  %v14872_v34 = vld [vmem:[#allocation61_spill] sm:$0xff]  ;;  %v14874_v40 = vld [vmem:[#allocation71_spill] sm:$0xff] }
 0x486   :  { %v5297_v37 = vpop.f32.mrf.mxu0  ;;  %6230 = vmatprep.mubr.bf16.mxu1 %v14281_v8 }
 0x487   :  { %v5898_v24 = vadd.f32 %v12511_v12, %v5843_v50  ;;  %v5630_v17 = vadd.f32 %v5297_v37, %v14863_v26  ;;  %v14864_v50 = vld [vmem:[#allocation68_spill] sm:$0xff]  ;;  %v14876_v26 = vld [vmem:[#allocation159_spill] sm:$0xff] }
 0x488   :  { %v5299_v42 = vpop.f32.mrf.mxu0 }
 0x489   :  { %v5946_v62 = vmax.f32 %v5898_v24, 0.0  ;;  %v14865_v24 = vld [vmem:[#allocation165_spill] sm:$0xff]  ;;  %v5631_v36 = vadd.f32 %v5299_v42, %v4416_v45  ;;  %v14873_v45 = vld [vmem:[#allocation160_spill] sm:$0xff] }
 0x48a   :  { %v5303_v2 = vpop.f32.mrf.mxu0  ;;  %7068 = vmatmul.mubr.bf16.gmra.mxu0 %v12755_v44 }
 0x48b   :  { %v12870_v3 = vpack.c.bf16 %v5946_v62, %v5945_v46  ;;  %7077 = vmatprep.mubr.bf16.mxu0 %v14281_v8  ;;  %v4425_v46 = vadd.f32 %v14865_v24, %v14864_v50 }
 0x48c   :  { %v5305_v29 = vpop.f32.mrf.mxu0 }
 0x48d   :  { %6231 = vmatmul.mubr.bf16.gmra.mxu1 %v12870_v3 }
 0x48e   :  { %v5307_v54 = vpop.f32.mrf.mxu0  ;;  %6240 = vmatprep.mubr.bf16.mxu1 %v14281_v8 }
 0x490   :  { %v5309_v38 = vpop.f32.mrf.mxu0 }
 0x492   :  { %v5313_v27 = vpop.f32.mrf.mxu0  ;;  %7078 = vmatmul.mubr.bf16.gmra.mxu0 %v12804_v56 }
 0x493   :  { %v5636_v55 = vadd.f32 %v5313_v27, %v4421_v5  ;;  %7087 = vmatprep.mubr.bf16.mxu0 %v14281_v8 }
 0x494   :  { %v5315_v35 = vpop.f32.mrf.mxu0 }
 0x495   :  { %v5772_v7 = vmax.f32 %v5628_v16, %v5636_v55  ;;  %v5637_v23 = vadd.f32 %v5315_v35, %v4422_v15  ;;  %v4426_v15 = vadd.f32 %v14867_v22, %v14866_v39  ;;  %v5632_v16 = vadd.f32 %v5303_v2, %v14868_v49  ;;  %v14869_v35 = vld [vmem:[#allocation70_spill] sm:$0xff]  ;;  %v14875_v2 = vld [vmem:[#allocation168_spill] sm:$0xff] }
 0x496   :  { %v5317_v30 = vpop.f32.mrf.mxu0  ;;  %v4427_v48 = vadd.f32 %v14870_v1, %v14869_v35  ;;  %v4428_v33 = vadd.f32 %v14875_v2, %v14874_v40  ;;  %v14882_v40 = vld [vmem:[#allocation170_spill] sm:$0xff] }
 0x497   :  { %v5773_v9 = vmax.f32 %v5629_v59, %v5637_v23  ;;  %v5638_v60 = vadd.f32 %v5317_v30, %v4423_v19  ;;  %v5633_v59 = vadd.f32 %v5305_v29, %v14871_v10  ;;  %v4420_v30 = vadd.f32 %v14873_v45, %v14872_v34  ;;  %v14877_v10 = vld [vmem:[#allocation72_spill] sm:$0xff] }
 0x498   :  { %v5319_v62 = vpop.f32.mrf.mxu0 }
 0x499   :  { %v5844_v25 = vmax.f32 %v5772_v7, %v5773_v9  ;;  %v5774_v14 = vmax.f32 %v5630_v17, %v5638_v60  ;;  %v5639_v5 = vadd.f32 %v5319_v62, %v4424_v32  ;;  %v5634_v17 = vadd.f32 %v5307_v54, %v14876_v26 }
 0x49a   :  { %v5323_v27 = vpop.f32.mrf.mxu0  ;;  %7088 = vmatmul.mubr.bf16.gmra.mxu0 %v12821_v43  ;;  %v5635_v24 = vadd.f32 %v5309_v38, %v4420_v30  ;;  %v14881_v30 = vld [vmem:[#allocation73_spill] sm:$0xff] }
 0x49b   :  { %v5775_v55 = vmax.f32 %v5631_v36, %v5639_v5  ;;  %v5640_v37 = vadd.f32 %v5323_v27, %v4425_v46  ;;  %7097 = vmatprep.mubr.bf16.mxu0 %v14281_v8  ;;  %v5899_v42 = vadd.f32 %v12511_v12, %v5844_v25  ;;  %v4430_v2 = vadd.f32 %v14882_v40, %v14881_v30  ;;  %v14895_v30 = vld [vmem:[#allocation84_spill] sm:$0xff]  ;;  %v14896_v40 = vld [vmem:[#allocation181_spill] sm:$0xff] }
 0x49c   :  { %v5325_v19 = vpop.f32.mrf.mxu0 }
 0x49d   :  { %v5845_v7 = vmax.f32 %v5774_v14, %v5775_v55  ;;  %v5776_v23 = vmax.f32 %v5632_v16, %v5640_v37  ;;  %v5641_v57 = vadd.f32 %v5325_v19, %v4426_v15  ;;  %v5947_v46 = vmax.f32 %v5899_v42, 0.0 }
 0x49e   :  { %v5327_v32 = vpop.f32.mrf.mxu0 }
 0x49f   :  { %v5900_v9 = vadd.f32 %v12511_v12, %v5845_v7  ;;  %v5777_v60 = vmax.f32 %v5633_v59, %v5641_v57  ;;  %v5642_v50 = vadd.f32 %v5327_v32, %v4427_v48  ;;  %v12914_v12 = vld [vmem:[%s14263_s2] ss:$0 sm:$0xff]  ;;  %v14884_v32 = vld [vmem:[#allocation178_spill] sm:$0xff] }
 0x4a0   :  { %v5329_v62 = vpop.f32.mrf.mxu0  ;;  %v14878_v59 = vld [vmem:[#allocation169_spill] sm:$0xff] }
 0x4a1   :  { %v5948_v29 = vmax.f32 %v5900_v9, 0.0  ;;  %v5846_v36 = vmax.f32 %v5776_v23, %v5777_v60  ;;  %v5778_v25 = vmax.f32 %v5634_v17, %v5642_v50  ;;  %v5643_v14 = vadd.f32 %v5329_v62, %v4428_v33  ;;  %v14879_v23 = vld [vmem:[#allocation80_spill] sm:$0xff]  ;;  %v14880_v57 = vld [vmem:[#allocation177_spill] sm:$0xff]  ;;  %v14885_v60 = vld [vmem:[#allocation74_spill] sm:$0xff] }
 0x4a2   :  { %v5333_v5 = vpop.f32.mrf.mxu0  ;;  %7098 = vmatmul.mubr.bf16.gmra.mxu0 %v12862_v61  ;;  %v4429_v7 = vadd.f32 %v14878_v59, %v14877_v10  ;;  %v4437_v34 = vadd.f32 %v14880_v57, %v14879_v23  ;;  %v14883_v33 = vld [vmem:[#allocation81_spill] sm:$0xff]  ;;  %v14886_v50 = vld [vmem:[#allocation171_spill] sm:$0xff]  ;;  %v14887_v62 = vld [vmem:[#allocation82_spill] sm:$0xff] }
 0x4a3   :  { %v12908_v27 = vpack.c.bf16 %v5948_v29, %v5947_v46  ;;  %v5779_v39 = vmax.f32 %v5635_v24, %v5643_v14  ;;  %7107 = vmatprep.mubr.bf16.mxu0 %v14281_v8  ;;  %v5901_v38 = vadd.f32 %v12914_v12, %v5846_v36  ;;  %v4438_v26 = vadd.f32 %v14884_v32, %v14883_v33  ;;  %v14888_v29 = vld [vmem:[#allocation179_spill] sm:$0xff]  ;;  %v14892_v10 = vld [vmem:[#allocation180_spill] sm:$0xff] }
 0x4a4   :  { %v5335_v54 = vpop.f32.mrf.mxu0  ;;  %v5644_v17 = vadd.f32 %v5333_v5, %v4429_v7  ;;  %v4431_v24 = vadd.f32 %v14886_v50, %v14885_v60  ;;  %v4439_v36 = vadd.f32 %v14888_v29, %v14887_v62  ;;  %v14893_v57 = vld [vmem:[#allocation76_spill] sm:$0xff]  ;;  %v4441_v33 = vadd.f32 %v14896_v40, %v14895_v30  ;;  %v14898_v60 = vld [vmem:[#allocation174_spill] sm:$0xff] }
 0x4a5   :  { %v5847_v22 = vmax.f32 %v5778_v25, %v5779_v39  ;;  %6241 = vmatmul.mubr.bf16.gmra.mxu1 %v12908_v27  ;;  %v5949_v55 = vmax.f32 %v5901_v38, 0.0  ;;  %v5645_v25 = vadd.f32 %v5335_v54, %v4430_v2  ;;  %v14889_v38 = vld [vmem:[#allocation75_spill] sm:$0xff] }
 0x4a6   :  { %v5337_v15 = vpop.f32.mrf.mxu0  ;;  %6250 = vmatprep.mubr.bf16.mxu1 %v14281_v8 }
 0x4a7   :  { %v5902_v49 = vadd.f32 %v12914_v12, %v5847_v22  ;;  %v14890_v22 = vld [vmem:[#allocation172_spill] sm:$0xff]  ;;  %v5646_v59 = vadd.f32 %v5337_v15, %v4431_v24  ;;  %v14899_v15 = vld [vmem:[#allocation85_spill] sm:$0xff]  ;;  %v14900_v24 = vld [vmem:[#allocation182_spill] sm:$0xff] }
 0x4a8   :  { %v5339_v16 = vpop.f32.mrf.mxu0  ;;  %v4442_v62 = vadd.f32 %v14900_v24, %v14899_v15 }
 0x4a9   :  { %v5950_v37 = vmax.f32 %v5902_v49, 0.0  ;;  %v4432_v49 = vadd.f32 %v14890_v22, %v14889_v38  ;;  %v14902_v38 = vld [vmem:[#allocation175_spill] sm:$0xff] }
 0x4aa   :  { %v5343_v35 = vpop.f32.mrf.mxu0  ;;  %7108 = vmatmul.mubr.bf16.gmra.mxu0 %v12870_v3  ;;  %v14904_v22 = vld [vmem:[#allocation183_spill] sm:$0xff] }
 0x4ab   :  { %v12921_v1 = vpack.c.bf16 %v5950_v37, %v5949_v55  ;;  %7117 = vmatprep.mubr.bf16.mxu0 %v14281_v8  ;;  %v14891_v37 = vld [vmem:[#allocation83_spill] sm:$0xff]  ;;  %v5647_v54 = vadd.f32 %v5339_v16, %v4432_v49 }
 0x4ac   :  { %v5345_v48 = vpop.f32.mrf.mxu0  ;;  %v4440_v5 = vadd.f32 %v14892_v10, %v14891_v37 }
 0x4ad   :  { %6251 = vmatmul.mubr.bf16.gmra.mxu1 %v12921_v1 }
 0x4ae   :  { %v5347_v42 = vpop.f32.mrf.mxu0  ;;  %6260 = vmatprep.mubr.bf16.mxu1 %v14281_v8 }
 0x4b0   :  { %v5349_v19 = vpop.f32.mrf.mxu0 }
 0x4b2   :  { %v5353_v45 = vpop.f32.mrf.mxu0  ;;  %7118 = vmatmul.mubr.bf16.gmra.mxu0 %v12908_v27 }
 0x4b3   :  { %v5652_v9 = vadd.f32 %v5353_v45, %v4437_v34  ;;  %7127 = vmatprep.mubr.bf16.mxu0 %v14281_v8  ;;  %v14894_v34 = vld [vmem:[#allocation173_spill] sm:$0xff] }
 0x4b4   :  { %v5355_v46 = vpop.f32.mrf.mxu0  ;;  %v4433_v45 = vadd.f32 %v14894_v34, %v14893_v57  ;;  %v14906_v57 = vld [vmem:[#allocation176_spill] sm:$0xff]  ;;  %v14907_v34 = vld [vmem:[#allocation87_spill] sm:$0xff] }
 0x4b5   :  { %v5780_v14 = vmax.f32 %v5644_v17, %v5652_v9  ;;  %v5653_v39 = vadd.f32 %v5355_v46, %v4438_v26  ;;  %v14897_v9 = vld [vmem:[#allocation77_spill] sm:$0xff] }
 0x4b6   :  { %v5357_v55 = vpop.f32.mrf.mxu0  ;;  %v4434_v50 = vadd.f32 %v14898_v60, %v14897_v9  ;;  %v5648_v29 = vadd.f32 %v5343_v35, %v4433_v45  ;;  %v14908_v45 = vld [vmem:[#allocation184_spill] sm:$0xff] }
 0x4b7   :  { %v5781_v7 = vmax.f32 %v5645_v25, %v5653_v39  ;;  %v5654_v23 = vadd.f32 %v5357_v55, %v4439_v36  ;;  %v14901_v39 = vld [vmem:[#allocation78_spill] sm:$0xff]  ;;  %v4444_v30 = vadd.f32 %v14908_v45, %v14907_v34  ;;  %v14913_v45 = vld [vmem:[#allocation89_spill] sm:$0xff] }
 0x4b8   :  { %v5359_v32 = vpop.f32.mrf.mxu0  ;;  %v4435_v16 = vadd.f32 %v14902_v38, %v14901_v39  ;;  %v5649_v10 = vadd.f32 %v5345_v48, %v4434_v50 }
 0x4b9   :  { %v5848_v2 = vmax.f32 %v5780_v14, %v5781_v7  ;;  %v5782_v26 = vmax.f32 %v5646_v59, %v5654_v23  ;;  %v5655_v17 = vadd.f32 %v5359_v32, %v4440_v5  ;;  %v14903_v14 = vld [vmem:[#allocation86_spill] sm:$0xff]  ;;  %v14905_v23 = vld [vmem:[#allocation79_spill] sm:$0xff] }
 0x4ba   :  { %v5363_v46 = vpop.f32.mrf.mxu0  ;;  %7128 = vmatmul.mubr.bf16.gmra.mxu0 %v12921_v1  ;;  %v4443_v49 = vadd.f32 %v14904_v22, %v14903_v14  ;;  %v4436_v35 = vadd.f32 %v14906_v57, %v14905_v23  ;;  %v14912_v23 = vld [vmem:[#allocation193_spill] sm:$0xff] }
 0x4bb   :  { %v5783_v36 = vmax.f32 %v5647_v54, %v5655_v17  ;;  %v5656_v25 = vadd.f32 %v5363_v46, %v4441_v33  ;;  %7137 = vmatprep.mubr.bf16.mxu0 %v14281_v8  ;;  %v5903_v55 = vadd.f32 %v12914_v12, %v5848_v2  ;;  %v5650_v33 = vadd.f32 %v5347_v42, %v4435_v16 }
 0x4bc   :  { %v5365_v37 = vpop.f32.mrf.mxu0  ;;  %v5651_v9 = vadd.f32 %v5349_v19, %v4436_v35  ;;  %v12982_v35 = vpop.f32.mrf.mxu1 }
 0x4bd   :  { %v5849_v5 = vmax.f32 %v5782_v26, %v5783_v36  ;;  %v5784_v59 = vmax.f32 %v5648_v29, %v5656_v25  ;;  %v5657_v7 = vadd.f32 %v5365_v37, %v4442_v62  ;;  %v5951_v60 = vmax.f32 %v5903_v55, 0.0 }
 0x4be   :  { %v5367_v40 = vpop.f32.mrf.mxu0 }
 0x4bf   :  { %v5904_v32 = vadd.f32 %v12914_v12, %v5849_v5  ;;  %v5785_v54 = vmax.f32 %v5649_v10, %v5657_v7  ;;  %v5658_v17 = vadd.f32 %v5367_v40, %v4443_v49  ;;  %v14909_v10 = vld [vmem:[#allocation88_spill] sm:$0xff]  ;;  %v14910_v5 = vld [vmem:[#allocation185_spill] sm:$0xff] }
 0x4c0   :  { %v5369_v2 = vpop.f32.mrf.mxu0  ;;  %v14911_v7 = vld [vmem:[#allocation96_spill] sm:$0xff] }
 0x4c1   :  { %v5952_v46 = vmax.f32 %v5904_v32, 0.0  ;;  %v5850_v48 = vmax.f32 %v5784_v59, %v5785_v54  ;;  %v5786_v26 = vmax.f32 %v5650_v33, %v5658_v17  ;;  %v5659_v50 = vadd.f32 %v5369_v2, %v4444_v30  ;;  %v14914_v30 = vld [vmem:[#allocation186_spill] sm:$0xff]  ;;  %v14915_v33 = vld [vmem:[#allocation97_spill] sm:$0xff] }
 0x4c2   :  { %v5373_v15 = vpop.f32.mrf.mxu0  ;;  %v4445_v59 = vadd.f32 %v14910_v5, %v14909_v10  ;;  %v4453_v57 = vadd.f32 %v14912_v23, %v14911_v7  ;;  %v4446_v40 = vadd.f32 %v14914_v30, %v14913_v45  ;;  %v14916_v32 = vld [vmem:[#allocation194_spill] sm:$0xff]  ;;  %v14922_v10 = vld [vmem:[#allocation188_spill] sm:$0xff]  ;;  %v14923_v23 = vld [vmem:[#allocation99_spill] sm:$0xff] }
 0x4c3   :  { %v12964_v24 = vpack.c.bf16 %v5952_v46, %v5951_v60  ;;  %v5787_v62 = vmax.f32 %v5651_v9, %v5659_v50  ;;  %v5905_v36 = vadd.f32 %v12914_v12, %v5850_v48  ;;  %v4454_v54 = vadd.f32 %v14916_v32, %v14915_v33  ;;  %v14917_v2 = vld [vmem:[#allocation90_spill] sm:$0xff]  ;;  %v14918_v46 = vld [vmem:[#allocation187_spill] sm:$0xff]  ;;  %v14924_v45 = vld [vmem:[#allocation196_spill] sm:$0xff] }
 0x4c4   :  { %v5375_v29 = vpop.f32.mrf.mxu0  ;;  %v5660_v17 = vadd.f32 %v5373_v15, %v4445_v59  ;;  %v4447_v48 = vadd.f32 %v14918_v46, %v14917_v2  ;;  %v14919_v50 = vld [vmem:[#allocation98_spill] sm:$0xff]  ;;  %v4456_v15 = vadd.f32 %v14924_v45, %v14923_v23  ;;  %v14926_v33 = vld [vmem:[#allocation92_spill] sm:$0xff]  ;;  %v14927_v32 = vld [vmem:[#allocation189_spill] sm:$0xff] }
 0x4c5   :  { %v5851_v25 = vmax.f32 %v5786_v26, %v5787_v62  ;;  %6261 = vmatmul.mubr.bf16.gmra.mxu1 %v12964_v24  ;;  %7138 = vmatmul.mubr.bf16.gmra.mxu0 %v12964_v24  ;;  %v5953_v38 = vmax.f32 %v5905_v36, 0.0  ;;  %v12988_v9 = vpop.f32.mrf.mxu1  ;;  %v14920_v62 = vld [vmem:[#allocation195_spill] sm:$0xff]  ;;  %v4449_v2 = vadd.f32 %v14927_v32, %v14926_v33  ;;  %v14928_v46 = vld [vmem:[#allocation100_spill] sm:$0xff]  ;;  %v14935_v33 = vld [vmem:[#allocation94_spill] sm:$0xff] }
 0x4c6   :  { %v5377_v42 = vpop.f32.mrf.mxu0  ;;  %6270 = vmatprep.mubr.bf16.mxu1 %v14281_v8  ;;  %7147 = vmatprep.mubr.bf16.mxu0 %v14281_v8  ;;  %v4455_v36 = vadd.f32 %v14920_v62, %v14919_v50  ;;  %v14929_v50 = vld [vmem:[#allocation197_spill] sm:$0xff]  ;;  %v14936_v32 = vld [vmem:[#allocation191_spill] sm:$0xff] }
 0x4c7   :  { %v5906_v19 = vadd.f32 %v12914_v12, %v5851_v25  ;;  %v5661_v25 = vadd.f32 %v5375_v29, %v4446_v40  ;;  %v5662_v59 = vadd.f32 %v5377_v42, %v4447_v48  ;;  %v12998_v30 = vpop.f32.mrf.mxu1  ;;  %v4457_v29 = vadd.f32 %v14929_v50, %v14928_v46  ;;  %v14930_v62 = vld [vmem:[#allocation93_spill] sm:$0xff]  ;;  %v14933_v48 = vld [vmem:[#allocation198_spill] sm:$0xff] }
 0x4c8   :  { %v5379_v39 = vpop.f32.mrf.mxu0  ;;  %14925 = vst [vmem:[#allocation4_spill] sm:$0xff] %v12998_v30  ;;  %v14932_v42 = vld [vmem:[#allocation101_spill] sm:$0xff]  ;;  %v4451_v46 = vadd.f32 %v14936_v32, %v14935_v33  ;;  %v14937_v50 = vld [vmem:[#allocation102_spill] sm:$0xff] }
 0x4c9   :  { %v5954_v16 = vmax.f32 %v5906_v19, 0.0  ;;  %v4458_v45 = vadd.f32 %v14933_v48, %v14932_v42  ;;  %v14941_v48 = vld [vmem:[#allocation103_spill] sm:$0xff] }
 0x4ca   :  { %v5383_v14 = vpop.f32.mrf.mxu0 }
 0x4cb   :  { %v12972_v22 = vpack.c.bf16 %v5954_v16, %v5953_v38  ;;  %v14921_v16 = vld [vmem:[#allocation91_spill] sm:$0xff] }
 0x4cc   :  { %v5385_v49 = vpop.f32.mrf.mxu0  ;;  %v4448_v5 = vadd.f32 %v14922_v10, %v14921_v16  ;;  %v14931_v16 = vld [vmem:[#allocation190_spill] sm:$0xff] }
 0x4cd   :  { %6271 = vmatmul.mubr.bf16.gmra.mxu1 %v12972_v22  ;;  %7148 = vmatmul.mubr.bf16.gmra.mxu0 %v12972_v22  ;;  %v4450_v10 = vadd.f32 %v14931_v16, %v14930_v62  ;;  %v14939_v62 = vld [vmem:[#allocation95_spill] sm:$0xff]  ;;  %v14940_v16 = vld [vmem:[#allocation192_spill] sm:$0xff] }
 0x4ce   :  { %v5387_v55 = vpop.f32.mrf.mxu0  ;;  %6280 = vmatprep.mubr.bf16.mxu1 %v14281_v8  ;;  %7157 = vmatprep.mubr.bf16.mxu0 %v14281_v8  ;;  %v4452_v42 = vadd.f32 %v14940_v16, %v14939_v62 }
 0x4d0   :  { %v5389_v37 = vpop.f32.mrf.mxu0 }
 0x4d2   :  { %v5393_v34 = vpop.f32.mrf.mxu0 }
 0x4d3   :  { %v5668_v60 = vadd.f32 %v5393_v34, %v4453_v57 }
 0x4d4   :  { %v5395_v26 = vpop.f32.mrf.mxu0 }
 0x4d5   :  { %v5788_v19 = vmax.f32 %v5660_v17, %v5668_v60  ;;  %v5669_v38 = vadd.f32 %v5395_v26, %v4454_v54  ;;  %v5663_v54 = vadd.f32 %v5379_v39, %v4448_v5  ;;  %v14938_v39 = vld [vmem:[#allocation199_spill] sm:$0xff] }
 0x4d6   :  { %v5397_v7 = vpop.f32.mrf.mxu0 }
 0x4d7   :  { %v5789_v57 = vmax.f32 %v5661_v25, %v5669_v38  ;;  %v5670_v34 = vadd.f32 %v5397_v7, %v4455_v36  ;;  %v13008_v25 = vpop.f32.mrf.mxu1  ;;  %v5664_v36 = vadd.f32 %v5383_v14, %v4449_v2  ;;  %v14942_v14 = vld [vmem:[#allocation200_spill] sm:$0xff] }
 0x4d8   :  { %v5399_v40 = vpop.f32.mrf.mxu0  ;;  %14934 = vst [vmem:[#allocation145_spill] sm:$0xff] %v13008_v25  ;;  %v4460_v2 = vadd.f32 %v14942_v14, %v14941_v48 }
 0x4d9   :  { %v5852_v17 = vmax.f32 %v5788_v19, %v5789_v57  ;;  %v5790_v60 = vmax.f32 %v5662_v59, %v5670_v34  ;;  %v5671_v26 = vadd.f32 %v5399_v40, %v4456_v15  ;;  %v4459_v19 = vadd.f32 %v14938_v39, %v14937_v50 }
 0x4da   :  { %v5403_v23 = vpop.f32.mrf.mxu0  ;;  %v5665_v59 = vadd.f32 %v5385_v49, %v4450_v10 }
 0x4db   :  { %v5791_v38 = vmax.f32 %v5663_v54, %v5671_v26  ;;  %v5672_v7 = vadd.f32 %v5403_v23, %v4457_v29  ;;  %v5907_v5 = vadd.f32 %v12914_v12, %v5852_v17  ;;  %v13019_v54 = vpop.f32.mrf.mxu1  ;;  %v5666_v26 = vadd.f32 %v5387_v55, %v4451_v46 }
 0x4dc   :  { %v5405_v15 = vpop.f32.mrf.mxu0  ;;  %14943 = vst [vmem:[#allocation5_spill] sm:$0xff] %v13019_v54  ;;  %v5667_v17 = vadd.f32 %v5389_v37, %v4452_v42 }
 0x4dd   :  { %v5853_v57 = vmax.f32 %v5790_v60, %v5791_v38  ;;  %v5792_v34 = vmax.f32 %v5664_v36, %v5672_v7  ;;  %v5673_v40 = vadd.f32 %v5405_v15, %v4458_v45  ;;  %v5955_v50 = vmax.f32 %v5907_v5, 0.0  ;;  %v13022_v7 = vpop.f32.mrf.mxu1 }
 0x4de   :  { %v5407_v29 = vpop.f32.mrf.mxu0  ;;  %14944 = vst [vmem:[#allocation146_spill] sm:$0xff] %v13022_v7 }
 0x4df   :  { %v5908_v23 = vadd.f32 %v12914_v12, %v5853_v57  ;;  %v5793_v33 = vmax.f32 %v5665_v59, %v5673_v40  ;;  %v5674_v32 = vadd.f32 %v5407_v29, %v4459_v19  ;;  %v13031_v19 = vpop.f32.mrf.mxu1 }
 0x4e0   :  { %v5409_v49 = vpop.f32.mrf.mxu0  ;;  %14945 = vst [vmem:[#allocation147_spill] sm:$0xff] %v13031_v19 }
 0x4e1   :  { %v5956_v60 = vmax.f32 %v5908_v23, 0.0  ;;  %v5854_v10 = vmax.f32 %v5792_v34, %v5793_v33  ;;  %v5794_v45 = vmax.f32 %v5666_v26, %v5674_v32  ;;  %v5675_v36 = vadd.f32 %v5409_v49, %v4460_v2  ;;  %v13034_v16 = vpop.f32.mrf.mxu1  ;;  %v14948_v26 = vld [vmem:[#allocation104_spill] sm:$0xff]  ;;  %v14949_v23 = vld [vmem:[#allocation201_spill] sm:$0xff] }
 0x4e2   :  { %v5413_v38 = vpop.f32.mrf.mxu0  ;;  %14946 = vst [vmem:[#allocation148_spill] sm:$0xff] %v13034_v16  ;;  %v4461_v33 = vadd.f32 %v14949_v23, %v14948_v26  ;;  %v14950_v32 = vld [vmem:[#allocation112_spill] sm:$0xff]  ;;  %v9997_v26 = vld [vmem:[%s14262_s3 + $0x164] ss:$8 sps:$4 sm:$0xff]   ;;  %v14960_v16 = vld [vmem:[#allocation211_spill] sm:$0xff] }
 0x4e3   :  { %v5795_v39 = vmax.f32 %v5667_v17, %v5675_v36  ;;  %v13024_v15 = vpack.c.bf16 %v5956_v60, %v5955_v50  ;;  %v5909_v55 = vadd.f32 %v12914_v12, %v5854_v10  ;;  %v13044_v2 = vpop.f32.mrf.mxu1  ;;  %v14951_v17 = vld [vmem:[#allocation209_spill] sm:$0xff]  ;;  %v9992_v10 = vld [vmem:[%s14262_s3 + $0x170] ss:$8 sps:$4 sm:$0xff]   ;;  %v14954_v36 = vld [vmem:[#allocation202_spill] sm:$0xff] }
 0x4e4   :  { %v5415_v62 = vpop.f32.mrf.mxu0  ;;  %14947 = vst [vmem:[#allocation149_spill] sm:$0xff] %v13044_v2  ;;  %v4469_v50 = vadd.f32 %v14951_v17, %v14950_v32  ;;  %v14957_v23 = vld [vmem:[#allocation106_spill] sm:$0xff]  ;;  %v14958_v32 = vld [vmem:[#allocation203_spill] sm:$0xff] }
 0x4e5   :  { %v5855_v46 = vmax.f32 %v5794_v45, %v5795_v39  ;;  %6281 = vmatmul.mubr.bf16.gmra.mxu1 %v13024_v15  ;;  %7158 = vmatmul.mubr.bf16.gmra.mxu0 %v13024_v15  ;;  %v5957_v57 = vmax.f32 %v5909_v55, 0.0  ;;  %v13052_v49 = vpop.f32.mrf.mxu1  ;;  %v14953_v45 = vld [vmem:[#allocation105_spill] sm:$0xff]  ;;  %v4463_v17 = vadd.f32 %v14958_v32, %v14957_v23  ;;  %v14959_v2 = vld [vmem:[#allocation114_spill] sm:$0xff] }
 0x4e6   :  { %v5417_v37 = vpop.f32.mrf.mxu0  ;;  %6290 = vmatprep.mubr.bf16.mxu1 %v14281_v8  ;;  %7167 = vmatprep.mubr.bf16.mxu0 %v14281_v8  ;;  %14952 = vst [vmem:[#allocation150_spill] sm:$0xff] %v13052_v49  ;;  %v4462_v39 = vadd.f32 %v14954_v36, %v14953_v45  ;;  %v14955_v55 = vld [vmem:[#allocation113_spill] sm:$0xff]  ;;  %v4471_v19 = vadd.f32 %v14960_v16, %v14959_v2  ;;  %v14965_v16 = vld [vmem:[#allocation212_spill] sm:$0xff] }
 0x4e7   :  { %v5910_v5 = vadd.f32 %v12914_v12, %v5855_v46  ;;  %v14956_v46 = vld [vmem:[#allocation210_spill] sm:$0xff]  ;;  %v13068_v54 = vpop.f32.mrf.mxu1  ;;  %v5678_v2 = vadd.f32 %v5417_v37, %v4463_v17  ;;  %v14969_v23 = vld [vmem:[#allocation213_spill] sm:$0xff] }
 0x4e8   :  { %v5419_v59 = vpop.f32.mrf.mxu0  ;;  %v5677_v7 = vadd.f32 %v5415_v62, %v4462_v39  ;;  %14961 = vst [vmem:[#allocation151_spill] sm:$0xff] %v13068_v54 }
 0x4e9   :  { %v5958_v34 = vmax.f32 %v5910_v5, 0.0  ;;  %v4470_v5 = vadd.f32 %v14956_v46, %v14955_v55  ;;  %v9995_v55 = vld [vmem:[%s14262_s3 + $0x160] ss:$8 sps:$4 sm:$0xff]   ;;  %v14964_v46 = vld [vmem:[#allocation115_spill] sm:$0xff]  ;;  %v13086_v54 = vpop.f32.mrf.mxu1 }
 0x4ea   :  { %v5423_v40 = vpop.f32.mrf.mxu0  ;;  %v4472_v62 = vadd.f32 %v14965_v16, %v14964_v46  ;;  %14970 = vst [vmem:[#allocation9_spill] sm:$0xff] %v13086_v54  ;;  %v14974_v16 = vld [vmem:[#allocation214_spill] sm:$0xff] }
 0x4eb   :  { %v13036_v42 = vpack.c.bf16 %v5958_v34, %v5957_v57  ;;  %v5676_v57 = vadd.f32 %v5413_v38, %v4461_v33  ;;  %v14962_v38 = vld [vmem:[#allocation107_spill] sm:$0xff]  ;;  %v14963_v33 = vld [vmem:[#allocation204_spill] sm:$0xff]  ;;  %v15011_v54 = vld [vmem:[#allocation222_spill] sm:$0xff] }
 0x4ec   :  { %v5425_v48 = vpop.f32.mrf.mxu0 }
 0x4ed   :  { %6291 = vmatmul.mubr.bf16.gmra.mxu1 %v13036_v42  ;;  %7168 = vmatmul.mubr.bf16.gmra.mxu0 %v13036_v42 }
 0x4ee   :  { %v13040_v14 = vpop.f32.mrf.mxu0  ;;  %6413 = vmatprep.mubr.bf16.mxu1 %v14281_v8  ;;  %7177 = vmatprep.mubr.bf16.mxu0 %v14281_v8 }
 0x4f0   :  { %v13046_v29 = vpop.f32.mrf.mxu0 }
 0x4f2   :  { %v5433_v60 = vpop.f32.mrf.mxu0 }
 0x4f3   :  { %v5684_v34 = vadd.f32 %v5433_v60, %v4469_v50  ;;  %v4464_v50 = vadd.f32 %v14963_v33, %v14962_v38 }
 0x4f4   :  { %v5435_v49 = vpop.f32.mrf.mxu0 }
 0x4f5   :  { %v5796_v45 = vmax.f32 %v5676_v57, %v5684_v34  ;;  %v5685_v36 = vadd.f32 %v5435_v49, %v4470_v5  ;;  %6414 = vmatmul.mubr.bf16.vlgmr.msra.gmra.mxu1 %v12532_v11  ;;  %v10000_v11 = vld [vmem:[%s14262_s3 + $0x154] ss:$8 sps:$4 sm:$0xff]   ;;  %v14967_v5 = vld [vmem:[#allocation205_spill] sm:$0xff]  ;;  %v5679_v33 = vadd.f32 %v5419_v59, %v4464_v50  ;;  %v14975_v50 = vld [vmem:[#allocation110_spill] sm:$0xff] }
 0x4f6   :  { %v5437_v60 = vpop.f32.mrf.mxu0  ;;  %6672 = vmatpush1.bf16.msra.mxu1 %v9992_v10  ;;  %6423 = vmatprep.mubr.bf16.mxu1 %v14281_v8  ;;  %v14966_v49 = vld [vmem:[#allocation108_spill] sm:$0xff] }
 0x4f7   :  { %v5797_v39 = vmax.f32 %v5677_v7, %v5685_v36  ;;  %v5686_v57 = vadd.f32 %v5437_v60, %v4471_v19  ;;  %6673 = vmatprep.subr.bf16.mxu1 %v9997_v26  ;;  %v4465_v10 = vadd.f32 %v14967_v5, %v14966_v49  ;;  %v14968_v34 = vld [vmem:[#allocation116_spill] sm:$0xff]  ;;  %v14971_v7 = vld [vmem:[#allocation109_spill] sm:$0xff]  ;;  %v14972_v19 = vld [vmem:[#allocation206_spill] sm:$0xff] }
 0x4f8   :  { %v4473_v32 = vadd.f32 %v14969_v23, %v14968_v34  ;;  %v5439_v38 = vpop.f32.mrf.mxu0  ;;  %v4466_v26 = vadd.f32 %v14972_v19, %v14971_v7  ;;  %v9998_v36 = vld [vmem:[%s14262_s3 + $0x150] ss:$8 sps:$4 sm:$0xff]   ;;  %v14973_v60 = vld [vmem:[#allocation117_spill] sm:$0xff]  ;;  %v13103_v7 = vpop.f32.mrf.mxu1 }
 0x4f9   :  { %v5856_v25 = vmax.f32 %v5796_v45, %v5797_v39  ;;  %v5798_v46 = vmax.f32 %v5678_v2, %v5686_v57  ;;  %v5687_v37 = vadd.f32 %v5439_v38, %v4472_v62  ;;  %v4474_v49 = vadd.f32 %v14974_v16, %v14973_v60  ;;  %v10003_v45 = vld [vmem:[%s14262_s3 + $0x144] ss:$8 sps:$4 sm:$0xff]   ;;  %v14976_v62 = vld [vmem:[#allocation207_spill] sm:$0xff]  ;;  %14979 = vst [vmem:[#allocation152_spill] sm:$0xff] %v13103_v7  ;;  %v14983_v60 = vld [vmem:[#allocation216_spill] sm:$0xff] }
 0x4fa   :  { %v5443_v17 = vpop.f32.mrf.mxu0  ;;  %6674 = vmatpush1.bf16.msra.mxu1 %v9995_v55  ;;  %v5680_v5 = vadd.f32 %v5423_v40, %v4465_v10  ;;  %v4467_v2 = vadd.f32 %v14976_v62, %v14975_v50  ;;  %v14977_v39 = vld [vmem:[#allocation118_spill] sm:$0xff]  ;;  %v14978_v55 = vld [vmem:[#allocation215_spill] sm:$0xff]  ;;  %v5681_v19 = vadd.f32 %v5425_v48, %v4466_v26 }
 0x4fb   :  { %v5799_v34 = vmax.f32 %v5679_v33, %v5687_v37  ;;  %v5688_v59 = vadd.f32 %v5443_v17, %v4473_v32  ;;  %6675 = vmatprep.subr.bf16.mxu1 %v10000_v11  ;;  %v4475_v57 = vadd.f32 %v14978_v55, %v14977_v39  ;;  %v5911_v23 = vadd.f32 %v12914_v12, %v5856_v25  ;;  %v14980_v11 = vld [vmem:[#allocation111_spill] sm:$0xff]  ;;  %v14981_v33 = vld [vmem:[#allocation208_spill] sm:$0xff]  ;;  %v10001_v25 = vld [vmem:[%s14262_s3 + $0x140] ss:$8 sps:$4 sm:$0xff]  }
 0x4fc   :  { %v5445_v38 = vpop.f32.mrf.mxu0  ;;  %v4468_v37 = vadd.f32 %v14981_v33, %v14980_v11  ;;  %v14982_v17 = vld [vmem:[#allocation119_spill] sm:$0xff]  ;;  %v5682_v48 = vadd.f32 %v13040_v14, %v4467_v2  ;;  %v10007_v33 = vld [vmem:[%s14262_s3 + $0x120] ss:$8 sps:$4 sm:$0xff]  }
 0x4fd   :  { %v5857_v40 = vmax.f32 %v5798_v46, %v5799_v34  ;;  %v5800_v10 = vmax.f32 %v5680_v5, %v5688_v59  ;;  %v5689_v32 = vadd.f32 %v5445_v38, %v4474_v49  ;;  %6424 = vmatmul.mubr.bf16.gmra.mxu1 %v12554_v0  ;;  %v4476_v16 = vadd.f32 %v14983_v60, %v14982_v17  ;;  %v10006_v49 = vld [vmem:[%s14262_s3 + $0x134] ss:$8 sps:$4 sm:$0xff]  }
 0x4fe   :  { %v5447_v50 = vpop.f32.mrf.mxu0  ;;  %6433 = vmatprep.mubr.bf16.mxu1 %v14281_v8  ;;  %6676 = vmatpush1.bf16.msra.mxu1 %v9998_v36  ;;  %v5683_v5 = vadd.f32 %v13046_v29, %v4468_v37  ;;  %v5959_v34 = vmax.f32 %v5911_v23, 0.0  ;;  %v13120_v36 = vpop.f32.mrf.mxu1  ;;  %v10009_v29 = vld [vmem:[%s14262_s3 + $0x124] ss:$8 sps:$4 sm:$0xff]  }
 0x4ff   :  { %v5912_v46 = vadd.f32 %v12914_v12, %v5857_v40  ;;  %v5801_v26 = vmax.f32 %v5681_v19, %v5689_v32  ;;  %v5690_v0 = vadd.f32 %v5447_v50, %v4475_v57  ;;  %6677 = vmatprep.subr.bf16.mxu1 %v10003_v45  ;;  %14984 = vst [vmem:[#allocation10_spill] sm:$0xff] %v13120_v36  ;;  %v10004_v45 = vld [vmem:[%s14262_s3 + $0x130] ss:$8 sps:$4 sm:$0xff]  }
 0x500   :  { %v5449_v59 = vpop.f32.mrf.mxu0  ;;  %v13130_v23 = vpop.f32.mrf.mxu1 }
 0x501   :  { %v5960_v62 = vmax.f32 %v5912_v46, 0.0  ;;  %v5858_v39 = vmax.f32 %v5800_v10, %v5801_v26  ;;  %v5802_v55 = vmax.f32 %v5682_v48, %v5690_v0  ;;  %v5691_v38 = vadd.f32 %v5449_v59, %v4476_v16  ;;  %14985 = vst [vmem:[#allocation153_spill] sm:$0xff] %v13130_v23  ;;  %v10010_v48 = vld [vmem:[%s14262_s3 + $0x110] ss:$8 sps:$4 sm:$0xff]   ;;  %v10015_v26 = vld [vmem:[%s14262_s3 + $0x104] ss:$8 sps:$4 sm:$0xff]  }
 0x502   :  { %v5453_v14 = vpop.f32.mrf.mxu0  ;;  %6678 = vmatpush1.bf16.msra.mxu1 %v10001_v25  ;;  %v13144_v17 = vpop.f32.mrf.mxu1 }
 0x503   :  { %v5803_v2 = vmax.f32 %v5683_v5, %v5691_v38  ;;  %v13122_v19 = vpack.c.bf16 %v5960_v62, %v5959_v34  ;;  %6679 = vmatprep.subr.bf16.mxu1 %v10006_v49  ;;  %v5913_v40 = vadd.f32 %v12914_v12, %v5858_v39  ;;  %14986 = vst [vmem:[#allocation11_spill] sm:$0xff] %v13144_v17  ;;  %v10013_v34 = vld [vmem:[%s14262_s3 + $0x100] ss:$8 sps:$4 sm:$0xff]   ;;  %v14989_v62 = vld [vmem:[#allocation120_spill] sm:$0xff] }
 0x504   :  { %v5455_v57 = vpop.f32.mrf.mxu0  ;;  %v13154_v0 = vpop.f32.mrf.mxu1  ;;  %v14990_v39 = vld [vmem:[#allocation217_spill] sm:$0xff]  ;;  %v14991_v38 = vld [vmem:[#allocation128_spill] sm:$0xff] }
 0x505   :  { %v5859_v10 = vmax.f32 %v5802_v55, %v5803_v2  ;;  %6434 = vmatmul.mubr.bf16.gmra.mxu1 %v12624_v4  ;;  %7178 = vmatmul.mubr.bf16.gmra.mxu0 %v13122_v19  ;;  %v10012_v4 = vld [vmem:[%s14262_s3 + $0x114] ss:$8 sps:$4 sm:$0xff]   ;;  %v5961_v60 = vmax.f32 %v5913_v40, 0.0  ;;  %14987 = vst [vmem:[#allocation154_spill] sm:$0xff] %v13154_v0  ;;  %v4477_v55 = vadd.f32 %v14990_v39, %v14989_v62  ;;  %v14992_v2 = vld [vmem:[#allocation225_spill] sm:$0xff]  ;;  %v15000_v62 = vld [vmem:[#allocation130_spill] sm:$0xff] }
 0x506   :  { %v5457_v32 = vpop.f32.mrf.mxu0  ;;  %6443 = vmatprep.mubr.bf16.mxu1 %v14281_v8  ;;  %7187 = vmatprep.mubr.bf16.mxu0 %v14281_v8  ;;  %v13160_v5 = vpop.f32.mrf.mxu1  ;;  %v14993_v40 = vld [vmem:[#allocation121_spill] sm:$0xff]  ;;  %v14999_v0 = vld [vmem:[#allocation219_spill] sm:$0xff] }
 0x507   :  { %v5914_v11 = vadd.f32 %v12914_v12, %v5859_v10  ;;  %6680 = vmatpush1.bf16.msra.mxu1 %v10004_v45  ;;  %14988 = vst [vmem:[#allocation12_spill] sm:$0xff] %v13160_v5  ;;  %v4485_v45 = vadd.f32 %v14992_v2, %v14991_v38  ;;  %v14994_v10 = vld [vmem:[#allocation218_spill] sm:$0xff]  ;;  %v15001_v39 = vld [vmem:[#allocation137_spill] sm:$0xff] }
 0x508   :  { %v5459_v37 = vpop.f32.mrf.mxu0  ;;  %6681 = vmatprep.subr.bf16.mxu1 %v10009_v29  ;;  %v14998_v5 = vld [vmem:[#allocation122_spill] sm:$0xff]  ;;  %v4487_v38 = vadd.f32 %v15001_v39, %v15000_v62 }
 0x509   :  { %v5962_v16 = vmax.f32 %v5914_v11, 0.0  ;;  %v4478_v11 = vadd.f32 %v14994_v10, %v14993_v40  ;;  %v4479_v17 = vadd.f32 %v14999_v0, %v14998_v5  ;;  %v15002_v40 = vld [vmem:[#allocation123_spill] sm:$0xff]  ;;  %v15003_v10 = vld [vmem:[#allocation220_spill] sm:$0xff] }
 0x50a   :  { %v5463_v50 = vpop.f32.mrf.mxu0 }
 0x50b   :  { %v13146_v25 = vpack.c.bf16 %v5962_v16, %v5961_v60  ;;  %6682 = vmatpush1.bf16.msra.mxu1 %v10007_v33  ;;  %v14995_v33 = vld [vmem:[#allocation129_spill] sm:$0xff]  ;;  %v5692_v16 = vadd.f32 %v5453_v14, %v4477_v55  ;;  %v5693_v2 = vadd.f32 %v5455_v57, %v4478_v11  ;;  %v4480_v14 = vadd.f32 %v15003_v10, %v15002_v40 }
 0x50c   :  { %v5465_v46 = vpop.f32.mrf.mxu0  ;;  %6683 = vmatprep.subr.bf16.mxu1 %v10012_v4  ;;  %v14996_v4 = vld [vmem:[#allocation136_spill] sm:$0xff]  ;;  %v5694_v0 = vadd.f32 %v5457_v32, %v4479_v17  ;;  %v15007_v57 = vld [vmem:[#allocation221_spill] sm:$0xff] }
 0x50d   :  { %6444 = vmatmul.mubr.bf16.gmra.mxu1 %v12635_v13  ;;  %7188 = vmatmul.mubr.bf16.gmra.mxu0 %v13146_v25  ;;  %v10018_v13 = vld [vmem:[%s14262_s3 + $0x274] ss:$8 sps:$4 sm:$0xff]   ;;  %v4486_v60 = vadd.f32 %v14996_v4, %v14995_v33  ;;  %v5695_v62 = vadd.f32 %v5459_v37, %v4480_v14  ;;  %v15012_v32 = vld [vmem:[#allocation133_spill] sm:$0xff] }
 0x50e   :  { %v5467_v49 = vpop.f32.mrf.mxu0  ;;  %6453 = vmatprep.mubr.bf16.mxu1 %v14281_v8  ;;  %7197 = vmatprep.mubr.bf16.mxu0 %v14281_v8  ;;  %v15006_v4 = vld [vmem:[#allocation124_spill] sm:$0xff]  ;;  %v15018_v37 = vld [vmem:[#allocation227_spill] sm:$0xff] }
 0x50f   :  { %6684 = vmatpush1.bf16.msra.mxu1 %v10010_v48  ;;  %v13176_v48 = vpop.f32.mrf.mxu1  ;;  %v4481_v11 = vadd.f32 %v15007_v57, %v15006_v4  ;;  %v15013_v17 = vld [vmem:[#allocation140_spill] sm:$0xff]  ;;  %v15015_v4 = vld [vmem:[#allocation126_spill] sm:$0xff]  ;;  %v15016_v57 = vld [vmem:[#allocation223_spill] sm:$0xff] }
 0x510   :  { %v5469_v59 = vpop.f32.mrf.mxu0  ;;  %6685 = vmatprep.subr.bf16.mxu1 %v10015_v26  ;;  %14997 = vst [vmem:[#allocation6_spill] sm:$0xff] %v13176_v48  ;;  %v15010_v48 = vld [vmem:[#allocation125_spill] sm:$0xff] }
 0x511   :  { %v13188_v5 = vpop.f32.mrf.mxu1  ;;  %v4482_v30 = vadd.f32 %v15011_v54, %v15010_v48 }
 0x512   :  { %v5473_v29 = vpop.f32.mrf.mxu0 }
 0x513   :  { %v5700_v26 = vadd.f32 %v5473_v29, %v4485_v45  ;;  %6686 = vmatpush1.bf16.msra.mxu1 %v10013_v34  ;;  %v15004_v34 = vld [vmem:[#allocation131_spill] sm:$0xff]  ;;  %v15005_v45 = vld [vmem:[#allocation138_spill] sm:$0xff] }
 0x514   :  { %v5475_v23 = vpop.f32.mrf.mxu0  ;;  %7379 = vmatprep.subr.bf16.mxu1 %v10018_v13  ;;  %v4488_v29 = vadd.f32 %v15005_v45, %v15004_v34  ;;  %v4490_v45 = vadd.f32 %v15013_v17, %v15012_v32 }
 0x515   :  { %v5804_v36 = vmax.f32 %v5692_v16, %v5700_v26  ;;  %v5701_v7 = vadd.f32 %v5475_v23, %v4486_v60  ;;  %6454 = vmatmul.mubr.bf16.gmra.mxu1 %v12684_v18  ;;  %v15008_v23 = vld [vmem:[#allocation132_spill] sm:$0xff]  ;;  %v15009_v60 = vld [vmem:[#allocation226_spill] sm:$0xff] }
 0x516   :  { %v5477_v55 = vpop.f32.mrf.mxu0  ;;  %6463 = vmatprep.mubr.bf16.mxu1 %v14281_v8  ;;  %v4489_v16 = vadd.f32 %v15009_v60, %v15008_v23  ;;  %v4483_v23 = vadd.f32 %v15016_v57, %v15015_v4  ;;  %v15017_v60 = vld [vmem:[#allocation134_spill] sm:$0xff] }
 0x517   :  { %v5805_v13 = vmax.f32 %v5693_v2, %v5701_v7  ;;  %v5702_v33 = vadd.f32 %v5477_v55, %v4487_v38  ;;  %v5696_v7 = vadd.f32 %v5463_v50, %v4481_v11  ;;  %v13198_v38 = vpop.f32.mrf.mxu1  ;;  %v15019_v50 = vld [vmem:[#allocation127_spill] sm:$0xff] }
 0x518   :  { %v5479_v26 = vpop.f32.mrf.mxu0  ;;  %15014 = vst [vmem:[#allocation13_spill] sm:$0xff] %v13198_v38  ;;  %v5698_v32 = vadd.f32 %v5467_v49, %v4483_v23 }
 0x519   :  { %v5860_v39 = vmax.f32 %v5804_v36, %v5805_v13  ;;  %v5806_v40 = vmax.f32 %v5694_v0, %v5702_v33  ;;  %v5703_v10 = vadd.f32 %v5479_v26, %v4488_v29  ;;  %v4491_v36 = vadd.f32 %v15018_v37, %v15017_v60  ;;  %v15020_v33 = vld [vmem:[#allocation224_spill] sm:$0xff]  ;;  %v15021_v26 = vld [vmem:[#allocation135_spill] sm:$0xff] }
 0x51a   :  { %v5483_v34 = vpop.f32.mrf.mxu0  ;;  %v5697_v0 = vadd.f32 %v5465_v46, %v4482_v30  ;;  %v4484_v11 = vadd.f32 %v15020_v33, %v15019_v50 }
 0x51b   :  { %v5807_v2 = vmax.f32 %v5695_v62, %v5703_v10  ;;  %v5704_v55 = vadd.f32 %v5483_v34, %v4489_v16  ;;  %v5915_v14 = vadd.f32 %v12914_v12, %v5860_v39  ;;  %v15022_v16 = vld [vmem:[#allocation141_spill] sm:$0xff]  ;;  %v13211_v34 = vpop.f32.mrf.mxu1 }
 0x51c   :  { %v5485_v29 = vpop.f32.mrf.mxu0  ;;  %v4492_v62 = vadd.f32 %v15022_v16, %v15021_v26 }
 0x51d   :  { %v5861_v54 = vmax.f32 %v5806_v40, %v5807_v2  ;;  %v5808_v48 = vmax.f32 %v5696_v7, %v5704_v55  ;;  %v5705_v13 = vadd.f32 %v5485_v29, %v4490_v45  ;;  %6464 = vmatmul.mubr.bf16.gmra.mxu1 %v12695_v53  ;;  %v5699_v40 = vadd.f32 %v5469_v59, %v4484_v11  ;;  %v13214_v60 = vpop.f32.mrf.mxu1 }
 0x51e   :  { %v5487_v10 = vpop.f32.mrf.mxu0  ;;  %6473 = vmatprep.mubr.bf16.mxu1 %v14281_v8  ;;  %v5963_v17 = vmax.f32 %v5915_v14, 0.0 }
 0x51f   :  { %v5916_v39 = vadd.f32 %v12914_v12, %v5861_v54  ;;  %v5809_v30 = vmax.f32 %v5697_v0, %v5705_v13  ;;  %v5706_v46 = vadd.f32 %v5487_v10, %v4491_v36  ;;  %v13223_v36 = vpop.f32.mrf.mxu1 }
 0x520   :  { %v5489_v45 = vpop.f32.mrf.mxu0 }
 0x521   :  { %v5964_v7 = vmax.f32 %v5916_v39, 0.0  ;;  %v5862_v2 = vmax.f32 %v5808_v48, %v5809_v30  ;;  %v5810_v55 = vmax.f32 %v5698_v32, %v5706_v46  ;;  %v5707_v4 = vadd.f32 %v5489_v45, %v4492_v62  ;;  %v13226_v33 = vpop.f32.mrf.mxu1  ;;  %v15024_v30 = vld [vmem:[#allocation228_spill] sm:$0xff]  ;;  %v15025_v45 = vld [vmem:[#allocation143_spill] sm:$0xff] }
 0x522   :  { %v5493_v57 = vpop.f32.mrf.mxu0  ;;  %15023 = vst [vmem:[#allocation7_spill] sm:$0xff] %v13226_v33 }
 0x523   :  { %v5811_v37 = vmax.f32 %v5699_v40, %v5707_v4  ;;  %v13216_v29 = vpack.c.bf16 %v5964_v7, %v5963_v17  ;;  %v5917_v49 = vadd.f32 %v12914_v12, %v5862_v2  ;;  %v5708_v46 = vadd.f32 %v5493_v57, %v15024_v30 }
 0x524   :  { %v5495_v50 = vpop.f32.mrf.mxu0 }
 0x525   :  { %v5863_v23 = vmax.f32 %v5810_v55, %v5811_v37  ;;  %6474 = vmatmul.mubr.bf16.gmra.mxu1 %v12744_v28  ;;  %7198 = vmatmul.mubr.bf16.gmra.mxu0 %v13216_v29  ;;  %v5965_v54 = vmax.f32 %v5917_v49, 0.0  ;;  %v13230_v16 = vpop.f32.mrf.mxu1  ;;  %v5709_v7 = vadd.f32 %v5495_v50, %v15025_v45  ;;  %v15027_v37 = vld [vmem:[#allocation139_spill] sm:$0xff]  ;;  %v15028_v49 = vld [vmem:[#allocation230_spill] sm:$0xff] }
 0x526   :  { %v5497_v59 = vpop.f32.mrf.mxu0  ;;  %6483 = vmatprep.mubr.bf16.mxu1 %v14281_v8  ;;  %7207 = vmatprep.mubr.bf16.mxu0 %v14281_v8 }
 0x527   :  { %v5918_v14 = vadd.f32 %v12914_v12, %v5863_v23  ;;  %v13235_v32 = vpop.f32.mrf.mxu1  ;;  %v4496_v23 = vadd.f32 %v15028_v49, %v15027_v37  ;;  %v15031_v37 = vld [vmem:[#allocation3_spill] sm:$0xff] }
 0x528   :  { %v5499_v0 = vpop.f32.mrf.mxu0 }
 0x529   :  { %v5966_v48 = vmax.f32 %v5918_v14, 0.0  ;;  %v13240_v2 = vpop.f32.mrf.mxu1 }
 0x52a   :  { %v5503_v13 = vpop.f32.mrf.mxu0  ;;  %15026 = vst [vmem:[#allocation14_spill] sm:$0xff] %v13240_v2 }
 0x52b   :  { %v13228_v11 = vpack.c.bf16 %v5966_v48, %v5965_v54  ;;  %v15029_v54 = vld [vmem:[#allocation2_spill] sm:$0xff]  ;;  %v5712_v49 = vadd.f32 %v5503_v13, %v15031_v37  ;;  %v4508_v13 = vadd.f32 %v12982_v35, %v12466_v41 }
 0x52c   :  { %v5505_v26 = vpop.f32.mrf.mxu0  ;;  %v4504_v57 = vadd.f32 %v12482_v47, %v15029_v54 }
 0x52d   :  { %6484 = vmatmul.mubr.bf16.gmra.mxu1 %v12755_v44  ;;  %7208 = vmatmul.mubr.bf16.gmra.mxu0 %v13228_v11 }
 0x52e   :  { %v5507_v62 = vpop.f32.mrf.mxu0  ;;  %6493 = vmatprep.mubr.bf16.mxu1 %v14281_v8 }
 0x530   :  { %v5509_v10 = vpop.f32.mrf.mxu0 }
 0x532   :  { %v5513_v39 = vpop.f32.mrf.mxu0 }
 0x533   :  { %v5716_v40 = vadd.f32 %v5513_v39, %v12469_v31  ;;  %v15030_v31 = vld [vmem:[#allocation229_spill] sm:$0xff] }
 0x534   :  { %v5515_v17 = vpop.f32.mrf.mxu0  ;;  %v5710_v48 = vadd.f32 %v5497_v59, %v15030_v31  ;;  %v5713_v59 = vadd.f32 %v5505_v26, %v12455_v58 }
 0x535   :  { %v5812_v55 = vmax.f32 %v5708_v46, %v5716_v40  ;;  %v5717_v4 = vadd.f32 %v5515_v17, %v12473_v20  ;;  %6494 = vmatmul.mubr.bf16.gmra.mxu1 %v12804_v56  ;;  %v5711_v46 = vadd.f32 %v5499_v0, %v4496_v23  ;;  %v13251_v40 = vpop.f32.mrf.mxu1 }
 0x536   :  { %v5517_v14 = vpop.f32.mrf.mxu0  ;;  %6503 = vmatprep.mubr.bf16.mxu1 %v14281_v8 }
 0x537   :  { %v5813_v39 = vmax.f32 %v5709_v7, %v5717_v4  ;;  %v5718_v50 = vadd.f32 %v5517_v14, %v12479_v51  ;;  %v13257_v7 = vpop.f32.mrf.mxu1 }
 0x538   :  { %v5519_v30 = vpop.f32.mrf.mxu0 }
 0x539   :  { %v5864_v20 = vmax.f32 %v5812_v55, %v5813_v39  ;;  %v5814_v17 = vmax.f32 %v5710_v48, %v5718_v50  ;;  %v5719_v45 = vadd.f32 %v5519_v30, %v4504_v57  ;;  %v15032_v55 = vld [vmem:[#allocation142_spill] sm:$0xff]  ;;  %v13269_v31 = vpop.f32.mrf.mxu1 }
 0x53a   :  { %v5523_v33 = vpop.f32.mrf.mxu0  ;;  %v4500_v23 = vadd.f32 %v12464_v6, %v15032_v55 }
 0x53b   :  { %v5815_v38 = vmax.f32 %v5711_v46, %v5719_v45  ;;  %v5720_v2 = vadd.f32 %v5523_v33, %v12486_v52  ;;  %v5919_v47 = vadd.f32 %v12914_v12, %v5864_v20  ;;  %v15033_v33 = vld [vmem:[#allocation144_spill] sm:$0xff]  ;;  %v13273_v30 = vpop.f32.mrf.mxu1 }
 0x53c   :  { %v5525_v54 = vpop.f32.mrf.mxu0  ;;  %v5714_v14 = vadd.f32 %v5507_v62, %v15033_v33 }
 0x53d   :  { %v5865_v51 = vmax.f32 %v5814_v17, %v5815_v38  ;;  %v5816_v0 = vmax.f32 %v5712_v49, %v5720_v2  ;;  %v5721_v4 = vadd.f32 %v5525_v54, %v12490_v21  ;;  %6504 = vmatmul.mubr.bf16.gmra.mxu1 %v12821_v43  ;;  %v5715_v2 = vadd.f32 %v5509_v10, %v4500_v23  ;;  %v13279_v10 = vpop.f32.mrf.mxu1 }
 0x53e   :  { %v5527_v52 = vpop.f32.mrf.mxu0  ;;  %6513 = vmatprep.mubr.bf16.mxu1 %v14281_v8  ;;  %v5967_v21 = vmax.f32 %v5919_v47, 0.0  ;;  %15034 = vst [vmem:[#allocation8_spill] sm:$0xff] %v13279_v10 }
 0x53f   :  { %v5920_v58 = vadd.f32 %v12914_v12, %v5865_v51  ;;  %v5817_v26 = vmax.f32 %v5713_v59, %v5721_v4  ;;  %v5722_v38 = vadd.f32 %v5527_v52, %v12496_v63  ;;  %v10021_v52 = vld [vmem:[%s14262_s3 + $0x264] ss:$8 sps:$4 sm:$0xff]  }
 0x540   :  { %v5529_v57 = vpop.f32.mrf.mxu0 }
 0x541   :  { %v5968_v48 = vmax.f32 %v5920_v58, 0.0  ;;  %v5866_v6 = vmax.f32 %v5816_v0, %v5817_v26  ;;  %v5818_v39 = vmax.f32 %v5714_v14, %v5722_v38  ;;  %v5723_v50 = vadd.f32 %v5529_v57, %v4508_v13  ;;  %v10016_v13 = vld [vmem:[%s14262_s3 + $0x270] ss:$8 sps:$4 sm:$0xff]   ;;  %v10019_v14 = vld [vmem:[%s14262_s3 + $0x260] ss:$8 sps:$4 sm:$0xff]  }
 0x542   :  { %v10024_v58 = vld [vmem:[%s14262_s3 + $0x254] ss:$8 sps:$4 sm:$0xff]   ;;  %v10022_v38 = vld [vmem:[%s14262_s3 + $0x250] ss:$8 sps:$4 sm:$0xff]  }
 0x543   :  { %v5819_v41 = vmax.f32 %v5715_v2, %v5723_v50  ;;  %v13271_v35 = vpack.c.bf16 %v5968_v48, %v5967_v21  ;;  %v5921_v62 = vadd.f32 %v12914_v12, %v5866_v6  ;;  %v10025_v21 = vld [vmem:[%s14262_s3 + $0x240] ss:$8 sps:$4 sm:$0xff]   ;;  %v10030_v57 = vld [vmem:[%s14262_s3 + $0x234] ss:$8 sps:$4 sm:$0xff]   ;;  %v10028_v6 = vld [vmem:[%s14262_s3 + $0x230] ss:$8 sps:$4 sm:$0xff]  }
 0x544   :  { %v10031_v50 = vld [vmem:[%s14262_s3 + $0x220] ss:$8 sps:$4 sm:$0xff]  }
 0x545   :  { %v5867_v46 = vmax.f32 %v5818_v39, %v5819_v41  ;;  %6514 = vmatmul.mubr.bf16.gmra.mxu1 %v12862_v61  ;;  %v5969_v20 = vmax.f32 %v5921_v62, 0.0  ;;  %v13281_v45 = vpop.f32.mrf.mxu1  ;;  %v10036_v62 = vld [vmem:[%s14262_s3 + $0x214] ss:$8 sps:$4 sm:$0xff]  }
 0x546   :  { %6523 = vmatprep.mubr.bf16.mxu1 %v14281_v8  ;;  %15035 = vst [vmem:[#allocation15_spill] sm:$0xff] %v13281_v45 }
 0x547   :  { %v5922_v63 = vadd.f32 %v12914_v12, %v5867_v46  ;;  %v13287_v49 = vpop.f32.mrf.mxu1  ;;  %v10034_v46 = vld [vmem:[%s14262_s3 + $0x210] ss:$8 sps:$4 sm:$0xff]  }
 0x548   :  { %15036 = vst [vmem:[#allocation16_spill] sm:$0xff] %v13287_v49 }
 0x549   :  { %v5970_v17 = vmax.f32 %v5922_v63, 0.0  ;;  %v13289_v47 = vpop.f32.mrf.mxu1  ;;  %v10039_v63 = vld [vmem:[%s14262_s3 + $0x204] ss:$8 sps:$4 sm:$0xff]  }
 0x54a   :  { %15037 = vst [vmem:[#allocation24_spill] sm:$0xff] %v13289_v47 }
 0x54b   :  { %v13283_v37 = vpack.c.bf16 %v5970_v17, %v5969_v20  ;;  %v13293_v12 = vpop.f32.mrf.mxu1  ;;  %v10037_v20 = vld [vmem:[%s14262_s3 + $0x200] ss:$8 sps:$4 sm:$0xff]  }
 0x54c   :  { %15038 = vst [vmem:[#allocation17_spill] sm:$0xff] %v13293_v12 }
 0x54d   :  { %6524 = vmatmul.mubr.bf16.gmra.mxu1 %v12870_v3  ;;  %v13295_v54 = vpop.f32.mrf.mxu1 }
 0x54e   :  { %6533 = vmatprep.mubr.bf16.mxu1 %v14281_v8  ;;  %15039 = vst [vmem:[#allocation25_spill] sm:$0xff] %v13295_v54 }
 0x54f   :  { %v13299_v59 = vpop.f32.mrf.mxu1 }
 0x550   :  { %15040 = vst [vmem:[#allocation18_spill] sm:$0xff] %v13299_v59 }
 0x551   :  { %v13301_v51 = vpop.f32.mrf.mxu1 }
 0x552   :  { %15041 = vst [vmem:[#allocation26_spill] sm:$0xff] %v13301_v51 }
 0x553   :  { %v13305_v0 = vpop.f32.mrf.mxu1 }
 0x554   :  { %15042 = vst [vmem:[#allocation19_spill] sm:$0xff] %v13305_v0 }
 0x555   :  { %6534 = vmatmul.mubr.bf16.gmra.mxu1 %v12908_v27 }
 0x556   :  { %6543 = vmatprep.mubr.bf16.mxu1 %v14281_v8 }
 0x55d   :  { %6544 = vmatmul.mubr.bf16.gmra.mxu1 %v12921_v1 }
 0x55e   :  { %6553 = vmatprep.mubr.bf16.mxu1 %v14281_v8 }
 0x565   :  { %6554 = vmatmul.mubr.bf16.gmra.mxu1 %v12964_v24  ;;  %v13307_v4 = vpop.f32.mrf.mxu1 }
 0x566   :  { %6563 = vmatprep.mubr.bf16.mxu1 %v14281_v8  ;;  %15043 = vst [vmem:[#allocation27_spill] sm:$0xff] %v13307_v4 }
 0x567   :  { %v13309_v55 = vpop.f32.mrf.mxu1 }
 0x568   :  { %15044 = vst [vmem:[#allocation20_spill] sm:$0xff] %v13309_v55 }
 0x569   :  { %v13313_v23 = vpop.f32.mrf.mxu1 }
 0x56a   :  { %15045 = vst [vmem:[#allocation28_spill] sm:$0xff] %v13313_v23 }
 0x56b   :  { %v13321_v33 = vpop.f32.mrf.mxu1 }
 0x56c   :  { %15046 = vst [vmem:[#allocation21_spill] sm:$0xff] %v13321_v33 }
 0x56d   :  { %6564 = vmatmul.mubr.bf16.gmra.mxu1 %v12972_v22  ;;  %v13331_v26 = vpop.f32.mrf.mxu1 }
 0x56e   :  { %6703 = vmatprep.mubr.bf16.mxu1 %v14281_v8  ;;  %15047 = vst [vmem:[#allocation29_spill] sm:$0xff] %v13331_v26 }
 0x56f   :  { %v13339_v2 = vpop.f32.mrf.mxu1 }
 0x570   :  { %15048 = vst [vmem:[#allocation22_spill] sm:$0xff] %v13339_v2 }
 0x571   :  { %v13349_v48 = vpop.f32.mrf.mxu1 }
 0x572   :  { %15049 = vst [vmem:[#allocation30_spill] sm:$0xff] %v13349_v48 }
 0x573   :  { %v13357_v39 = vpop.f32.mrf.mxu1 }
 0x574   :  { %15050 = vst [vmem:[#allocation23_spill] sm:$0xff] %v13357_v39 }
 0x575   :  { %6704 = vmatmul.mubr.bf16.vlgmr.msra.gmra.mxu1 %v12684_v18  ;;  %v10027_v18 = vld [vmem:[%s14262_s3 + $0x244] ss:$8 sps:$4 sm:$0xff]  }
 0x576   :  { %7380 = vmatpush1.bf16.msra.mxu1 %v10016_v13  ;;  %6713 = vmatprep.mubr.bf16.mxu1 %v14281_v8 }
 0x577   :  { %7381 = vmatprep.subr.bf16.mxu1 %v10021_v52 }
 0x57a   :  { %7382 = vmatpush1.bf16.msra.mxu1 %v10019_v14 }
 0x57b   :  { %7383 = vmatprep.subr.bf16.mxu1 %v10024_v58 }
 0x57d   :  { %6714 = vmatmul.mubr.bf16.gmra.mxu1 %v12695_v53  ;;  %v10033_v53 = vld [vmem:[%s14262_s3 + $0x224] ss:$8 sps:$4 sm:$0xff]  }
 0x57e   :  { %6723 = vmatprep.mubr.bf16.mxu1 %v14281_v8  ;;  %7384 = vmatpush1.bf16.msra.mxu1 %v10022_v38 }
 0x57f   :  { %7385 = vmatprep.subr.bf16.mxu1 %v10027_v18 }
 0x582   :  { %7386 = vmatpush1.bf16.msra.mxu1 %v10025_v21 }
 0x583   :  { %7387 = vmatprep.subr.bf16.mxu1 %v10030_v57 }
 0x585   :  { %6724 = vmatmul.mubr.bf16.gmra.mxu1 %v12744_v28  ;;  %v13364_v41 = vpop.f32.mrf.mxu1 }
 0x586   :  { %6733 = vmatprep.mubr.bf16.mxu1 %v14281_v8  ;;  %7388 = vmatpush1.bf16.msra.mxu1 %v10028_v6  ;;  %15051 = vst [vmem:[#allocation31_spill] sm:$0xff] %v13364_v41 }
 0x587   :  { %7389 = vmatprep.subr.bf16.mxu1 %v10033_v53  ;;  %v13372_v28 = vpop.f32.mrf.mxu1 }
 0x588   :  { %15052 = vst [vmem:[#allocation32_spill] sm:$0xff] %v13372_v28 }
 0x589   :  { %v13382_v17 = vpop.f32.mrf.mxu1 }
 0x58a   :  { %7390 = vmatpush1.bf16.msra.mxu1 %v10031_v50  ;;  %15053 = vst [vmem:[#allocation33_spill] sm:$0xff] %v13382_v17 }
 0x58b   :  { %7391 = vmatprep.subr.bf16.mxu1 %v10036_v62  ;;  %v13384_v13 = vpop.f32.mrf.mxu1 }
 0x58c   :  { %15054 = vst [vmem:[#allocation34_spill] sm:$0xff] %v13384_v13 }
 0x58d   :  { %6734 = vmatmul.mubr.bf16.gmra.mxu1 %v12755_v44  ;;  %v13388_v52 = vpop.f32.mrf.mxu1 }
 0x58e   :  { %6743 = vmatprep.mubr.bf16.mxu1 %v14281_v8  ;;  %7392 = vmatpush1.bf16.msra.mxu1 %v10034_v46  ;;  %15055 = vst [vmem:[#allocation35_spill] sm:$0xff] %v13388_v52 }
 0x58f   :  { %7393 = vmatprep.subr.bf16.mxu1 %v10039_v63  ;;  %v13390_v44 = vpop.f32.mrf.mxu1 }
 0x590   :  { %15056 = vst [vmem:[#allocation36_spill] sm:$0xff] %v13390_v44 }
 0x591   :  { %v13394_v14 = vpop.f32.mrf.mxu1 }
 0x592   :  { %7394 = vmatpush1.bf16.msra.mxu1 %v10037_v20  ;;  %15057 = vst [vmem:[#allocation41_spill] sm:$0xff] %v13394_v14 }
 0x593   :  { %v13396_v58 = vpop.f32.mrf.mxu1 }
 0x594   :  { %15058 = vst [vmem:[#allocation37_spill] sm:$0xff] %v13396_v58 }
 0x595   :  { %6744 = vmatmul.mubr.bf16.gmra.mxu1 %v12804_v56 }
 0x596   :  { %6753 = vmatprep.mubr.bf16.mxu1 %v14281_v8 }
 0x59d   :  { %6754 = vmatmul.mubr.bf16.gmra.mxu1 %v12821_v43 }
 0x59e   :  { %6763 = vmatprep.mubr.bf16.mxu1 %v14281_v8 }
 0x5a5   :  { %v13398_v38 = vpop.f32.mrf.mxu1  ;;  %6764 = vmatmul.mubr.bf16.gmra.mxu1 %v12862_v61 }
 0x5a6   :  { %15059 = vst [vmem:[#allocation42_spill] sm:$0xff] %v13398_v38  ;;  %6773 = vmatprep.mubr.bf16.mxu1 %v14281_v8 }
 0x5a7   :  { %v13402_v18 = vpop.f32.mrf.mxu1 }
 0x5a8   :  { %15060 = vst [vmem:[#allocation38_spill] sm:$0xff] %v13402_v18 }
 0x5a9   :  { %v13404_v21 = vpop.f32.mrf.mxu1 }
 0x5aa   :  { %15061 = vst [vmem:[#allocation43_spill] sm:$0xff] %v13404_v21 }
 0x5ab   :  { %v13406_v57 = vpop.f32.mrf.mxu1 }
 0x5ac   :  { %15062 = vst [vmem:[#allocation39_spill] sm:$0xff] %v13406_v57 }
 0x5ad   :  { %v13408_v6 = vpop.f32.mrf.mxu1  ;;  %6774 = vmatmul.mubr.bf16.gmra.mxu1 %v12870_v3 }
 0x5ae   :  { %15063 = vst [vmem:[#allocation45_spill] sm:$0xff] %v13408_v6  ;;  %6783 = vmatprep.mubr.bf16.mxu1 %v14281_v8 }
 0x5af   :  { %v13412_v53 = vpop.f32.mrf.mxu1 }
 0x5b0   :  { %15064 = vst [vmem:[#allocation46_spill] sm:$0xff] %v13412_v53 }
 0x5b1   :  { %v13414_v50 = vpop.f32.mrf.mxu1 }
 0x5b2   :  { %15065 = vst [vmem:[#allocation56_spill] sm:$0xff] %v13414_v50 }
 0x5b3   :  { %v13416_v62 = vpop.f32.mrf.mxu1 }
 0x5b4   :  { %15066 = vst [vmem:[#allocation47_spill] sm:$0xff] %v13416_v62 }
 0x5b5   :  { %v13418_v46 = vpop.f32.mrf.mxu1  ;;  %6784 = vmatmul.mubr.bf16.gmra.mxu1 %v12908_v27 }
 0x5b6   :  { %6793 = vmatprep.mubr.bf16.mxu1 %v14281_v8 }
 0x5b7   :  { %v13422_v63 = vpop.f32.mrf.mxu1 }
 0x5b9   :  { %v13424_v20 = vpop.f32.mrf.mxu1 }
 0x5bb   :  { %v13426_v6 = vpop.f32.mrf.mxu1 }
 0x5bd   :  { %v13428_v57 = vpop.f32.mrf.mxu1  ;;  %6794 = vmatmul.mubr.bf16.gmra.mxu1 %v12921_v1 }
 0x5be   :  { %6803 = vmatprep.mubr.bf16.mxu1 %v14281_v8 }
 0x5bf   :  { %v13432_v50 = vpop.f32.mrf.mxu1 }
 0x5c1   :  { %v13434_v62 = vpop.f32.mrf.mxu1 }
 0x5c3   :  { %v13436_v53 = vpop.f32.mrf.mxu1 }
 0x5c5   :  { %v13438_v21 = vpop.f32.mrf.mxu1  ;;  %6804 = vmatmul.mubr.bf16.gmra.mxu1 %v12964_v24 }
 0x5c6   :  { %6813 = vmatprep.mubr.bf16.mxu1 %v14281_v8 }
 0x5c7   :  { %v13442_v18 = vpop.f32.mrf.mxu1 }
 0x5c9   :  { %v13444_v38 = vpop.f32.mrf.mxu1 }
 0x5cb   :  { %v13446_v58 = vpop.f32.mrf.mxu1 }
 0x5cd   :  { %v13448_v14 = vpop.f32.mrf.mxu1  ;;  %6814 = vmatmul.mubr.bf16.gmra.mxu1 %v12972_v22 }
 0x5ce   :  { %6823 = vmatprep.mubr.bf16.mxu1 %v14281_v8 }
 0x5cf   :  { %v13452_v44 = vpop.f32.mrf.mxu1 }
 0x5d1   :  { %v13454_v52 = vpop.f32.mrf.mxu1 }
 0x5d3   :  { %v13456_v13 = vpop.f32.mrf.mxu1 }
 0x5d5   :  { %v13458_v17 = vpop.f32.mrf.mxu1  ;;  %6824 = vmatmul.mubr.bf16.gmra.mxu1 %v13024_v15 }
 0x5d6   :  { %6833 = vmatprep.mubr.bf16.mxu1 %v14281_v8 }
 0x5d7   :  { %v13462_v28 = vpop.f32.mrf.mxu1 }
 0x5d9   :  { %v13464_v41 = vpop.f32.mrf.mxu1 }
 0x5db   :  { %v13466_v39 = vpop.f32.mrf.mxu1 }
 0x5dc   :  { %15067 = vst [vmem:[#allocation57_spill] sm:$0xff] %v13466_v39 }
 0x5dd   :  { %v13468_v48 = vpop.f32.mrf.mxu1  ;;  %6834 = vmatmul.mubr.bf16.gmra.mxu1 %v13036_v42 }
 0x5de   :  { %6843 = vmatprep.mubr.bf16.mxu1 %v14281_v8 }
 0x5df   :  { %v13472_v2 = vpop.f32.mrf.mxu1 }
 0x5e1   :  { %v13474_v26 = vpop.f32.mrf.mxu1 }
 0x5e3   :  { %v13476_v33 = vpop.f32.mrf.mxu1 }
 0x5e4   :  { %15068 = vst [vmem:[#allocation40_spill] sm:$0xff] %v13476_v33 }
 0x5e5   :  { %v13478_v23 = vpop.f32.mrf.mxu1  ;;  %6844 = vmatmul.mubr.bf16.gmra.mxu1 %v13122_v19 }
 0x5e6   :  { %6853 = vmatprep.mubr.bf16.mxu1 %v14281_v8 }
 0x5e7   :  { %v13482_v55 = vpop.f32.mrf.mxu1 }
 0x5e9   :  { %v13484_v39 = vpop.f32.mrf.mxu1 }
 0x5eb   :  { %v13486_v4 = vpop.f32.mrf.mxu1 }
 0x5ed   :  { %v13488_v0 = vpop.f32.mrf.mxu1  ;;  %6854 = vmatmul.mubr.bf16.gmra.mxu1 %v13146_v25 }
 0x5ee   :  { %7411 = vmatprep.mubr.bf16.mxu1 %v14281_v8 }
 0x5ef   :  { %v13492_v51 = vpop.f32.mrf.mxu1 }
 0x5f1   :  { %v13494_v33 = vpop.f32.mrf.mxu1 }
 0x5f3   :  { %v13496_v59 = vpop.f32.mrf.mxu1 }
 0x5f4   :  { %15069 = vst [vmem:[#allocation49_spill] sm:$0xff] %v13496_v59 }
 0x5f5   :  { %v13498_v54 = vpop.f32.mrf.mxu1  ;;  %7412 = vmatmul.mubr.bf16.vlgmr.msra.gmra.mxu1 %v12804_v56 }
 0x5f6   :  { %15070 = vst [vmem:[#allocation50_spill] sm:$0xff] %v13498_v54  ;;  %7421 = vmatprep.mubr.bf16.mxu1 %v14281_v8 }
 0x5f7   :  { %v13502_v12 = vpop.f32.mrf.mxu1 }
 0x5f9   :  { %v13504_v47 = vpop.f32.mrf.mxu1 }
 0x5fa   :  { %15071 = vst [vmem:[#allocation48_spill] sm:$0xff] %v13504_v47 }
 0x5fb   :  { %v13506_v49 = vpop.f32.mrf.mxu1 }
 0x5fc   :  { %15072 = vst [vmem:[#allocation51_spill] sm:$0xff] %v13506_v49 }
 0x5fd   :  { %v13508_v45 = vpop.f32.mrf.mxu1  ;;  %7422 = vmatmul.mubr.bf16.gmra.mxu1 %v12821_v43 }
 0x5fe   :  { %15073 = vst [vmem:[#allocation59_spill] sm:$0xff] %v13508_v45  ;;  %7431 = vmatprep.mubr.bf16.mxu1 %v14281_v8 }
 0x5ff   :  { %v13512_v10 = vpop.f32.mrf.mxu1 }
 0x601   :  { %v13514_v59 = vpop.f32.mrf.mxu1 }
 0x602   :  { %15074 = vst [vmem:[#allocation52_spill] sm:$0xff] %v13514_v59 }
 0x603   :  { %v13516_v54 = vpop.f32.mrf.mxu1 }
 0x604   :  { %15075 = vst [vmem:[#allocation44_spill] sm:$0xff] %v13516_v54 }
 0x605   :  { %v13518_v56 = vpop.f32.mrf.mxu1  ;;  %7432 = vmatmul.mubr.bf16.gmra.mxu1 %v12862_v61 }
 0x606   :  { %15076 = vst [vmem:[#allocation54_spill] sm:$0xff] %v13518_v56  ;;  %7441 = vmatprep.mubr.bf16.mxu1 %v14281_v8 }
 0x607   :  { %v13522_v47 = vpop.f32.mrf.mxu1 }
 0x608   :  { %15077 = vst [vmem:[#allocation55_spill] sm:$0xff] %v13522_v47  ;;  %v13606_v47 = vpop.f32.mrf.mxu0 }
 0x609   :  { %v13524_v49 = vpop.f32.mrf.mxu1 }
 0x60a   :  { %15078 = vst [vmem:[#allocation53_spill] sm:$0xff] %v13524_v49 }
 0x60b   :  { %v13526_v45 = vpop.f32.mrf.mxu1 }
 0x60c   :  { %15079 = vst [vmem:[#allocation60_spill] sm:$0xff] %v13526_v45 }
 0x60d   :  { %v13528_v43 = vpop.f32.mrf.mxu1  ;;  %7442 = vmatmul.mubr.bf16.gmra.mxu1 %v12870_v3 }
 0x60e   :  { %15080 = vst [vmem:[#allocation62_spill] sm:$0xff] %v13528_v43  ;;  %7451 = vmatprep.mubr.bf16.mxu1 %v14281_v8 }
 0x60f   :  { %v13532_v59 = vpop.f32.mrf.mxu1 }
 0x610   :  { %15081 = vst [vmem:[#allocation161_spill] sm:$0xff] %v13532_v59 }
 0x611   :  { %v13534_v54 = vpop.f32.mrf.mxu1 }
 0x612   :  { %15082 = vst [vmem:[#allocation64_spill] sm:$0xff] %v13534_v54 }
 0x613   :  { %v13536_v56 = vpop.f32.mrf.mxu1 }
 0x614   :  { %15083 = vst [vmem:[#allocation162_spill] sm:$0xff] %v13536_v56 }
 0x615   :  { %v13538_v61 = vpop.f32.mrf.mxu1  ;;  %7452 = vmatmul.mubr.bf16.gmra.mxu1 %v12908_v27  ;;  %v10040_v27 = vld [vmem:[%s14264_s5 + $0x38] sm:$0xff]  }
 0x616   :  { %15084 = vst [vmem:[#allocation63_spill] sm:$0xff] %v13538_v61  ;;  %7461 = vmatprep.mubr.bf16.mxu1 %v14281_v8  ;;  %9552 = vmatprep.subr.bf16.mxu0 %v10040_v27 }
 0x617   :  { %v13542_v49 = vpop.f32.mrf.mxu1  ;;  %9553 = vmatpush3.bf16.msra.mxu0 %v10040_v27 }
 0x618   :  { %15085 = vst [vmem:[#allocation66_spill] sm:$0xff] %v13542_v49 }
 0x619   :  { %v13544_v45 = vpop.f32.mrf.mxu1 }
 0x61a   :  { %15086 = vst [vmem:[#allocation163_spill] sm:$0xff] %v13544_v45  ;;  %v10041_v45 = vld [vmem:[%s14264_s5 + $0x78] sm:$0xff]  }
 0x61b   :  { %v13546_v43 = vpop.f32.mrf.mxu1  ;;  %9572 = vmatprep.subr.bf16.mxu1 %v10041_v45 }
 0x61c   :  { %15087 = vst [vmem:[#allocation65_spill] sm:$0xff] %v13546_v43  ;;  %9573 = vmatpush3.bf16.msra.mxu1 %v10041_v45  ;;  %v10043_v45 = vld [vmem:[%s14264_s5 + $0x70] sm:$0xff]  }
 0x61d   :  { %v13548_v3 = vpop.f32.mrf.mxu1  ;;  %7462 = vmatmul.mubr.bf16.gmra.mxu1 %v12921_v1  ;;  %9574 = vmatprep.subr.bf16.mxu1 %v10043_v45 }
 0x61e   :  { %15088 = vst [vmem:[#allocation58_spill] sm:$0xff] %v13548_v3  ;;  %7471 = vmatprep.mubr.bf16.mxu1 %v14281_v8 }
 0x61f   :  { %v13552_v54 = vpop.f32.mrf.mxu1 }
 0x620   :  { %15089 = vst [vmem:[#allocation156_spill] sm:$0xff] %v13552_v54  ;;  %9575 = vmatpush3.bf16.msra.mxu1 %v10043_v45 }
 0x621   :  { %v13554_v56 = vpop.f32.mrf.mxu1 }
 0x622   :  { %15090 = vst [vmem:[#allocation67_spill] sm:$0xff] %v13554_v56 }
 0x623   :  { %v13562_v49 = vpop.f32.mrf.mxu1 }
 0x624   :  { %15091 = vst [vmem:[#allocation164_spill] sm:$0xff] %v13562_v49  ;;  %v15101_v49 = vld [vmem:[#allocation145_spill] sm:$0xff] }
 0x625   :  { %v13564_v1 = vpop.f32.mrf.mxu1  ;;  %7472 = vmatmul.mubr.bf16.gmra.mxu1 %v12964_v24  ;;  %v10042_v24 = vld [vmem:[%s14264_s5 + $0x30] sm:$0xff]  }
 0x626   :  { %15092 = vst [vmem:[#allocation155_spill] sm:$0xff] %v13564_v1  ;;  %7481 = vmatprep.mubr.bf16.mxu1 %v14281_v8  ;;  %9554 = vmatprep.subr.bf16.mxu0 %v10042_v24 }
 0x627   :  { %v13568_v56 = vpop.f32.mrf.mxu1  ;;  %9555 = vmatpush3.bf16.msra.mxu0 %v10042_v24 }
 0x628   :  { %15093 = vst [vmem:[#allocation68_spill] sm:$0xff] %v13568_v56 }
 0x629   :  { %v13570_v54 = vpop.f32.mrf.mxu1 }
 0x62a   :  { %15094 = vst [vmem:[#allocation165_spill] sm:$0xff] %v13570_v54 }
 0x62b   :  { %v13572_v3 = vpop.f32.mrf.mxu1 }
 0x62c   :  { %15095 = vst [vmem:[#allocation69_spill] sm:$0xff] %v13572_v3 }
 0x62d   :  { %v13574_v43 = vpop.f32.mrf.mxu1  ;;  %7482 = vmatmul.mubr.bf16.gmra.mxu1 %v12972_v22  ;;  %v6416_v22 = vadd.f32 %v13418_v46, %v12988_v9  ;;  %v15102_v9 = vld [vmem:[#allocation5_spill] sm:$0xff] }
 0x62e   :  { %15096 = vst [vmem:[#allocation166_spill] sm:$0xff] %v13574_v43  ;;  %7491 = vmatprep.mubr.bf16.mxu1 %v14281_v8  ;;  %v6422_v46 = vadd.f32 %v13426_v6, %v15102_v9  ;;  %v15106_v9 = vld [vmem:[#allocation149_spill] sm:$0xff] }
 0x62f   :  { %v13578_v27 = vpop.f32.mrf.mxu1 }
 0x630   :  { %15097 = vst [vmem:[#allocation157_spill] sm:$0xff] %v13578_v27  ;;  %v15100_v27 = vld [vmem:[#allocation4_spill] sm:$0xff] }
 0x631   :  { %v13583_v1 = vpop.f32.mrf.mxu1  ;;  %v6418_v54 = vadd.f32 %v13422_v63, %v15100_v27  ;;  %v15103_v63 = vld [vmem:[#allocation146_spill] sm:$0xff] }
 0x632   :  { %15098 = vst [vmem:[#allocation70_spill] sm:$0xff] %v13583_v1 }
 0x633   :  { %v13588_v3 = vpop.f32.mrf.mxu1 }
 0x634   :  { %15099 = vst [vmem:[#allocation167_spill] sm:$0xff] %v13588_v3  ;;  %v6420_v3 = vadd.f32 %v13424_v20, %v15101_v49  ;;  %v15104_v49 = vld [vmem:[#allocation147_spill] sm:$0xff] }
 0x635   :  { %v6705_v43 = vpop.f32.mrf.mxu1  ;;  %7492 = vmatmul.mubr.bf16.gmra.mxu1 %v13024_v15 }
 0x636   :  { %v13595_v56 = vadd.f32 %v6705_v43, %v6416_v22  ;;  %7501 = vmatprep.mubr.bf16.mxu1 %v14281_v8  ;;  %v6426_v43 = vadd.f32 %v13428_v57, %v15103_v63  ;;  %v10044_v57 = vld [vmem:[%s14264_s5 + $0x28] sm:$0xff]  }
 0x637   :  { %v6707_v1 = vpop.f32.mrf.mxu1  ;;  %9556 = vmatprep.subr.bf16.mxu0 %v10044_v57 }
 0x638   :  { %v13600_v24 = vadd.f32 %v6707_v1, %v6418_v54  ;;  %v6428_v54 = vadd.f32 %v13432_v50, %v15104_v49  ;;  %v6432_v50 = vadd.f32 %v13436_v53, %v15106_v9  ;;  %9557 = vmatpush3.bf16.msra.mxu0 %v10044_v57  ;;  %v15109_v53 = vld [vmem:[#allocation151_spill] sm:$0xff] }
 0x639   :  { %v6709_v61 = vpop.f32.mrf.mxu1 }
 0x63a   :  { %v13604_v59 = vadd.f32 %v6709_v61, %v6420_v3  ;;  %v13618_v61 = vpop.f32.mrf.mxu0  ;;  %v15105_v3 = vld [vmem:[#allocation148_spill] sm:$0xff] }
 0x63b   :  { %v6711_v15 = vpop.f32.mrf.mxu1  ;;  %v6430_v1 = vadd.f32 %v13434_v62, %v15105_v3 }
 0x63c   :  { %v13610_v27 = vadd.f32 %v6711_v15, %v6422_v46  ;;  %v10045_v15 = vld [vmem:[%s14264_s5 + $0x68] sm:$0xff]   ;;  %v13634_v62 = vpop.f32.mrf.mxu0 }
 0x63d   :  { %v6715_v45 = vpop.f32.mrf.mxu1  ;;  %7502 = vmatmul.mubr.bf16.gmra.mxu1 %v13036_v42  ;;  %9576 = vmatprep.subr.bf16.mxu1 %v10045_v15 }
 0x63e   :  { %v13615_v20 = vadd.f32 %v6715_v45, %v6426_v43  ;;  %7511 = vmatprep.mubr.bf16.mxu1 %v14281_v8  ;;  %v15107_v43 = vld [vmem:[#allocation150_spill] sm:$0xff]  ;;  %9577 = vmatpush3.bf16.msra.mxu1 %v10045_v15  ;;  %v13646_v57 = vpop.f32.mrf.mxu0 }
 0x63f   :  { %v6717_v6 = vpop.f32.mrf.mxu1  ;;  %v6436_v45 = vadd.f32 %v13438_v21, %v15107_v43 }
 0x640   :  { %v13622_v22 = vadd.f32 %v6717_v6, %v6428_v54  ;;  %v6438_v6 = vadd.f32 %v13442_v18, %v15109_v53  ;;  %v10046_v18 = vld [vmem:[%s14264_s5 + $0x20] sm:$0xff]   ;;  %v13659_v15 = vpop.f32.mrf.mxu0 }
 0x641   :  { %v6719_v42 = vpop.f32.mrf.mxu1  ;;  %9558 = vmatprep.subr.bf16.mxu0 %v10046_v18 }
 0x642   :  { %v13629_v46 = vadd.f32 %v6719_v42, %v6430_v1  ;;  %v15110_v42 = vld [vmem:[#allocation9_spill] sm:$0xff]  ;;  %9559 = vmatpush3.bf16.msra.mxu0 %v10046_v18 }
 0x643   :  { %v6721_v63 = vpop.f32.mrf.mxu1  ;;  %v6440_v21 = vadd.f32 %v13444_v38, %v15110_v42  ;;  %v10047_v42 = vld [vmem:[%s14264_s5 + $0x18] sm:$0xff]  }
 0x644   :  { %v13638_v49 = vadd.f32 %v6721_v63, %v6432_v50  ;;  %v15111_v63 = vld [vmem:[#allocation152_spill] sm:$0xff]  ;;  %9560 = vmatprep.subr.bf16.mxu0 %v10047_v42 }
 0x645   :  { %v6725_v54 = vpop.f32.mrf.mxu1  ;;  %7512 = vmatmul.mubr.bf16.gmra.mxu1 %v13122_v19  ;;  %v6442_v19 = vadd.f32 %v13446_v58, %v15111_v63  ;;  %v15113_v58 = vld [vmem:[#allocation153_spill] sm:$0xff] }
 0x646   :  { %15108 = vst [vmem:[#allocation158_spill] sm:$0xff] %v13638_v49  ;;  %v13643_v3 = vadd.f32 %v6725_v54, %v6436_v45  ;;  %7521 = vmatprep.mubr.bf16.mxu1 %v14281_v8  ;;  %v15112_v54 = vld [vmem:[#allocation10_spill] sm:$0xff]  ;;  %9561 = vmatpush3.bf16.msra.mxu0 %v10047_v42 }
 0x647   :  { %v6727_v1 = vpop.f32.mrf.mxu1  ;;  %v6446_v53 = vadd.f32 %v13448_v14, %v15112_v54  ;;  %v13674_v14 = vpop.f32.mrf.mxu0  ;;  %v10049_v54 = vld [vmem:[%s14264_s5 + $0x10] sm:$0xff]  }
 0x648   :  { %v13650_v9 = vadd.f32 %v6727_v1, %v6438_v6  ;;  %v6448_v6 = vadd.f32 %v13452_v44, %v15113_v58  ;;  %v15115_v44 = vld [vmem:[#allocation154_spill] sm:$0xff]  ;;  %v15116_v58 = vld [vmem:[#allocation12_spill] sm:$0xff]  ;;  %9562 = vmatprep.subr.bf16.mxu0 %v10049_v54 }
 0x649   :  { %v6729_v50 = vpop.f32.mrf.mxu1  ;;  %v6452_v18 = vadd.f32 %v13456_v13, %v15115_v44  ;;  %v15117_v13 = vld [vmem:[#allocation6_spill] sm:$0xff]  ;;  %v6460_v44 = vadd.f32 %v13464_v41, %v13188_v5  ;;  %v6466_v41 = vadd.f32 %v13468_v48, %v13211_v34 }
 0x64a   :  { %v13654_v43 = vadd.f32 %v6729_v50, %v6440_v21  ;;  %v15114_v50 = vld [vmem:[#allocation11_spill] sm:$0xff]  ;;  %9563 = vmatpush3.bf16.msra.mxu0 %v10049_v54  ;;  %v6458_v42 = vadd.f32 %v13462_v28, %v15117_v13 }
 0x64b   :  { %v6731_v45 = vpop.f32.mrf.mxu1  ;;  %v6450_v63 = vadd.f32 %v13454_v52, %v15114_v50  ;;  %v6456_v52 = vadd.f32 %v13458_v17, %v15116_v58 }
 0x64c   :  { %v13663_v49 = vadd.f32 %v6731_v45, %v6442_v19 }
 0x64d   :  { %v6735_v38 = vpop.f32.mrf.mxu1  ;;  %7522 = vmatmul.mubr.bf16.gmra.mxu1 %v13146_v25 }
 0x64e   :  { %v13668_v1 = vadd.f32 %v6735_v38, %v6446_v53  ;;  %7531 = vmatprep.mubr.bf16.mxu1 %v14281_v8  ;;  %v13687_v38 = vpop.f32.mrf.mxu0 }
 0x64f   :  { %v6737_v21 = vpop.f32.mrf.mxu1 }
 0x650   :  { %v13678_v19 = vadd.f32 %v6737_v21, %v6448_v6  ;;  %v13702_v17 = vpop.f32.mrf.mxu0 }
 0x651   :  { %v6739_v25 = vpop.f32.mrf.mxu1 }
 0x652   :  { %v13682_v45 = vadd.f32 %v6739_v25, %v6450_v63  ;;  %v10050_v63 = vld [vmem:[%s14264_s5 + $0x8] sm:$0xff]   ;;  %v13718_v5 = vpop.f32.mrf.mxu0 }
 0x653   :  { %v6741_v53 = vpop.f32.mrf.mxu1  ;;  %9564 = vmatprep.subr.bf16.mxu0 %v10050_v63 }
 0x654   :  { %v13691_v6 = vadd.f32 %v6741_v53, %v6452_v18  ;;  %9565 = vmatpush3.bf16.msra.mxu0 %v10050_v63  ;;  %v10051_v53 = vld [vmem:[%s14264_s5] sm:$0xff]   ;;  %v13728_v63 = vpop.f32.mrf.mxu0 }
 0x655   :  { %v6745_v21 = vpop.f32.mrf.mxu1  ;;  %7532 = vmatmul.mubr.bf16.gmra.mxu1 %v13216_v29  ;;  %v10048_v29 = vld [vmem:[%s14264_s5 + $0x60] sm:$0xff]   ;;  %9566 = vmatprep.subr.bf16.mxu0 %v10051_v53 }
 0x656   :  { %v13696_v50 = vadd.f32 %v6745_v21, %v6456_v52  ;;  %7541 = vmatprep.mubr.bf16.mxu1 %v14281_v8  ;;  %9578 = vmatprep.subr.bf16.mxu1 %v10048_v29  ;;  %v6468_v21 = vadd.f32 %v13472_v2, %v13214_v60  ;;  %v13741_v2 = vpop.f32.mrf.mxu0 }
 0x657   :  { %v6747_v25 = vpop.f32.mrf.mxu1  ;;  %9579 = vmatpush3.bf16.msra.mxu1 %v10048_v29  ;;  %v6476_v29 = vadd.f32 %v13478_v23, %v13230_v16 }
 0x658   :  { %v13706_v18 = vadd.f32 %v6747_v25, %v6458_v42  ;;  %9567 = vmatpush3.bf16.msra.mxu0 %v10051_v53  ;;  %v6470_v25 = vadd.f32 %v13474_v26, %v13223_v36  ;;  %v6478_v36 = vadd.f32 %v13482_v55, %v13235_v32 }
 0x659   :  { %v6749_v28 = vpop.f32.mrf.mxu1 }
 0x65a   :  { %v13711_v54 = vadd.f32 %v6749_v28, %v6460_v44 }
 0x65b   :  { %v13716_v58 = vpop.f32.mrf.mxu1 }
 0x65d   :  { %v6755_v52 = vpop.f32.mrf.mxu1  ;;  %7542 = vmatmul.mubr.bf16.gmra.mxu1 %v13228_v11  ;;  %v10052_v11 = vld [vmem:[%s14264_s5 + $0x58] sm:$0xff]  }
 0x65e   :  { %v13725_v13 = vadd.f32 %v6755_v52, %v6466_v41  ;;  %7551 = vmatprep.mubr.bf16.mxu1 %v14281_v8  ;;  %9580 = vmatprep.subr.bf16.mxu1 %v10052_v11  ;;  %v13751_v41 = vpop.f32.mrf.mxu0  ;;  %v15122_v52 = vld [vmem:[#allocation14_spill] sm:$0xff] }
 0x65f   :  { %v6757_v42 = vpop.f32.mrf.mxu1  ;;  %9581 = vmatpush3.bf16.msra.mxu1 %v10052_v11 }
 0x660   :  { %15118 = vst [vmem:[#allocation61_spill] sm:$0xff] %v13725_v13  ;;  %v13732_v44 = vadd.f32 %v6757_v42, %v6468_v21  ;;  %v6480_v21 = vadd.f32 %v13484_v39, %v15122_v52  ;;  %v13761_v55 = vpop.f32.mrf.mxu0  ;;  %v6488_v39 = vadd.f32 %v13492_v51, %v13269_v31  ;;  %v10053_v31 = vld [vmem:[%s14264_s5 + $0x50] sm:$0xff]   ;;  %v15169_v13 = vld [vmem:[#allocation161_spill] sm:$0xff] }
 0x661   :  { %v6759_v34 = vpop.f32.mrf.mxu1  ;;  %9582 = vmatprep.subr.bf16.mxu1 %v10053_v31 }
 0x662   :  { %15119 = vst [vmem:[#allocation160_spill] sm:$0xff] %v13732_v44  ;;  %v13734_v48 = vadd.f32 %v6759_v34, %v6470_v25 }
 0x663   :  { %v13739_v60 = vpop.f32.mrf.mxu1  ;;  %9583 = vmatpush3.bf16.msra.mxu1 %v10053_v31  ;;  %v15137_v31 = vld [vmem:[#allocation17_spill] sm:$0xff] }
 0x664   :  { %15120 = vst [vmem:[#allocation71_spill] sm:$0xff] %v13734_v48  ;;  %15121 = vst [vmem:[#allocation168_spill] sm:$0xff] %v13739_v60  ;;  %v15161_v60 = vld [vmem:[#allocation21_spill] sm:$0xff] }
 0x665   :  { %v6765_v28 = vpop.f32.mrf.mxu1  ;;  %7552 = vmatmul.mubr.bf16.gmra.mxu1 %v13271_v35  ;;  %v6482_v35 = vadd.f32 %v13486_v4, %v13251_v40  ;;  %v13772_v40 = vpop.f32.mrf.mxu0  ;;  %v6490_v4 = vadd.f32 %v13494_v33, %v13273_v30  ;;  %v15132_v33 = vld [vmem:[#allocation16_spill] sm:$0xff] }
 0x666   :  { %v13748_v26 = vadd.f32 %v6765_v28, %v6476_v29  ;;  %7561 = vmatprep.mubr.bf16.mxu1 %v14281_v8  ;;  %v6486_v8 = vadd.f32 %v13488_v0, %v13257_v7  ;;  %v15126_v7 = vld [vmem:[#allocation8_spill] sm:$0xff]  ;;  %v15127_v0 = vld [vmem:[#allocation49_spill] sm:$0xff] }
 0x667   :  { %v6767_v53 = vpop.f32.mrf.mxu1  ;;  %v13785_v51 = vpop.f32.mrf.mxu0 }
 0x668   :  { %v13755_v42 = vadd.f32 %v6767_v53, %v6478_v36  ;;  %v6492_v53 = vadd.f32 %v15127_v0, %v15126_v7  ;;  %v15135_v7 = vld [vmem:[#allocation48_spill] sm:$0xff] }
 0x669   :  { %v6769_v16 = vpop.f32.mrf.mxu1 }
 0x66a   :  { %v13759_v23 = vadd.f32 %v6769_v16, %v6480_v21  ;;  %v15129_v21 = vld [vmem:[#allocation15_spill] sm:$0xff]  ;;  %v15130_v16 = vld [vmem:[#allocation50_spill] sm:$0xff] }
 0x66b   :  { %v6771_v32 = vpop.f32.mrf.mxu1 }
 0x66c   :  { %v13765_v25 = vadd.f32 %v6771_v32, %v6482_v35  ;;  %v6496_v35 = vadd.f32 %v15130_v16, %v15129_v21  ;;  %v15138_v21 = vld [vmem:[#allocation51_spill] sm:$0xff] }
 0x66d   :  { %v6775_v34 = vpop.f32.mrf.mxu1  ;;  %7562 = vmatmul.mubr.bf16.gmra.mxu1 %v13283_v37 }
 0x66e   :  { %15123 = vst [vmem:[#allocation159_spill] sm:$0xff] %v13765_v25  ;;  %v13770_v11 = vadd.f32 %v6775_v34, %v6486_v8  ;;  %v6498_v8 = vadd.f32 %v13502_v12, %v15132_v33  ;;  %v6502_v12 = vadd.f32 %v15138_v21, %v15137_v31 }
 0x66f   :  { %v6777_v29 = vpop.f32.mrf.mxu1 }
 0x670   :  { %15124 = vst [vmem:[#allocation72_spill] sm:$0xff] %v13770_v11  ;;  %v13776_v28 = vadd.f32 %v6777_v29, %v6488_v39  ;;  %v10054_v39 = vld [vmem:[%s14264_s5 + $0x48] sm:$0xff]   ;;  %v15162_v11 = vld [vmem:[#allocation60_spill] sm:$0xff] }
 0x671   :  { %v6779_v36 = vpop.f32.mrf.mxu1  ;;  %9584 = vmatprep.subr.bf16.mxu1 %v10054_v39 }
 0x672   :  { %15125 = vst [vmem:[#allocation169_spill] sm:$0xff] %v13776_v28  ;;  %v13780_v52 = vadd.f32 %v6779_v36, %v6490_v4  ;;  %v13798_v4 = vpop.f32.mrf.mxu0  ;;  %v15134_v36 = vld [vmem:[#allocation24_spill] sm:$0xff]  ;;  %9585 = vmatpush3.bf16.msra.mxu1 %v10054_v39  ;;  %v15143_v39 = vld [vmem:[#allocation18_spill] sm:$0xff] }
 0x673   :  { %v6781_v37 = vpop.f32.mrf.mxu1  ;;  %v6500_v0 = vadd.f32 %v15135_v7, %v15134_v36  ;;  %v6508_v7 = vadd.f32 %v13512_v10, %v15143_v39  ;;  %v15149_v10 = vld [vmem:[#allocation44_spill] sm:$0xff] }
 0x674   :  { %15128 = vst [vmem:[#allocation80_spill] sm:$0xff] %v13780_v52  ;;  %v13789_v32 = vadd.f32 %v6781_v37, %v6492_v53  ;;  %v13811_v33 = vpop.f32.mrf.mxu0 }
 0x675   :  { %v6785_v30 = vpop.f32.mrf.mxu1 }
 0x676   :  { %15131 = vst [vmem:[#allocation177_spill] sm:$0xff] %v13789_v32  ;;  %v13793_v34 = vadd.f32 %v6785_v30, %v6496_v35  ;;  %v10055_v35 = vld [vmem:[%s14264_s5 + $0x40] sm:$0xff]   ;;  %v15141_v32 = vld [vmem:[#allocation59_spill] sm:$0xff]  ;;  %v13826_v21 = vpop.f32.mrf.mxu0 }
 0x677   :  { %v6787_v29 = vpop.f32.mrf.mxu1  ;;  %9586 = vmatprep.subr.bf16.mxu1 %v10055_v35 }
 0x678   :  { %15133 = vst [vmem:[#allocation73_spill] sm:$0xff] %v13793_v34  ;;  %v13802_v53 = vadd.f32 %v6787_v29, %v6498_v8  ;;  %v15140_v34 = vld [vmem:[#allocation25_spill] sm:$0xff]  ;;  %9587 = vmatpush3.bf16.msra.mxu1 %v10055_v35 }
 0x679   :  { %v6789_v37 = vpop.f32.mrf.mxu1  ;;  %v6506_v36 = vadd.f32 %v15141_v32, %v15140_v34  ;;  %v15146_v32 = vld [vmem:[#allocation52_spill] sm:$0xff] }
 0x67a   :  { %15136 = vst [vmem:[#allocation170_spill] sm:$0xff] %v13802_v53  ;;  %v13806_v16 = vadd.f32 %v6789_v37, %v6500_v0  ;;  %v13824_v37 = vld [vmem:[%s14264_s5 + $0xb8] sm:$0xff]   ;;  %v15152_v53 = vld [vmem:[#allocation54_spill] sm:$0xff] }
 0x67b   :  { %v6791_v30 = vpop.f32.mrf.mxu1  ;;  %9592 = vmatprep.subr.bf16.mxu0 %v13824_v37 }
 0x67c   :  { %15139 = vst [vmem:[#allocation81_spill] sm:$0xff] %v13806_v16  ;;  %v13815_v8 = vadd.f32 %v6791_v30, %v6502_v12  ;;  %v15145_v16 = vld [vmem:[#allocation26_spill] sm:$0xff]  ;;  %v15148_v30 = vld [vmem:[#allocation19_spill] sm:$0xff] }
 0x67d   :  { %v6795_v29 = vpop.f32.mrf.mxu1  ;;  %v6510_v34 = vadd.f32 %v15146_v32, %v15145_v16  ;;  %v15154_v16 = vld [vmem:[#allocation20_spill] sm:$0xff] }
 0x67e   :  { %15142 = vst [vmem:[#allocation178_spill] sm:$0xff] %v13815_v8  ;;  %v13819_v0 = vadd.f32 %v6795_v29, %v6506_v36  ;;  %v6512_v36 = vadd.f32 %v15149_v10, %v15148_v30  ;;  %v15151_v8 = vld [vmem:[#allocation27_spill] sm:$0xff]  ;;  %v15158_v30 = vld [vmem:[#allocation28_spill] sm:$0xff] }
 0x67f   :  { %v6797_v31 = vpop.f32.mrf.mxu1  ;;  %v6516_v52 = vadd.f32 %v15152_v53, %v15151_v8  ;;  %v6522_v53 = vadd.f32 %v15162_v11, %v15161_v60  ;;  %v15172_v60 = vld [vmem:[#allocation30_spill] sm:$0xff]  ;;  %v15173_v11 = vld [vmem:[#allocation64_spill] sm:$0xff] }
 0x680   :  { %15144 = vst [vmem:[#allocation74_spill] sm:$0xff] %v13819_v0  ;;  %v13830_v12 = vadd.f32 %v6797_v31, %v6508_v7  ;;  %v13837_v0 = vpop.f32.mrf.mxu0  ;;  %v15155_v7 = vld [vmem:[#allocation55_spill] sm:$0xff] }
 0x681   :  { %v6799_v35 = vpop.f32.mrf.mxu1  ;;  %v6518_v31 = vadd.f32 %v15155_v7, %v15154_v16  ;;  %v15165_v16 = vld [vmem:[#allocation29_spill] sm:$0xff] }
 0x682   :  { %15147 = vst [vmem:[#allocation171_spill] sm:$0xff] %v13830_v12  ;;  %v13835_v29 = vadd.f32 %v6799_v35, %v6510_v34  ;;  %v13847_v44 = vpop.f32.mrf.mxu0  ;;  %v15159_v34 = vld [vmem:[#allocation53_spill] sm:$0xff] }
 0x683   :  { %v6801_v39 = vpop.f32.mrf.mxu1  ;;  %15157 = vst [vmem:[#allocation172_spill] sm:$0xff] %v13847_v44  ;;  %v6520_v35 = vadd.f32 %v15159_v34, %v15158_v30  ;;  %v15216_v44 = vld [vmem:[#allocation39_spill] sm:$0xff] }
 0x684   :  { %15150 = vst [vmem:[#allocation82_spill] sm:$0xff] %v13835_v29  ;;  %v13841_v48 = vadd.f32 %v6801_v39, %v6512_v36  ;;  %v13857_v39 = vpop.f32.mrf.mxu0 }
 0x685   :  { %v6805_v28 = vpop.f32.mrf.mxu1  ;;  %15164 = vst [vmem:[#allocation76_spill] sm:$0xff] %v13857_v39  ;;  %v15176_v39 = vld [vmem:[#allocation162_spill] sm:$0xff] }
 0x686   :  { %15153 = vst [vmem:[#allocation179_spill] sm:$0xff] %v13841_v48  ;;  %v13845_v32 = vadd.f32 %v6805_v28, %v6516_v52  ;;  %v15166_v28 = vld [vmem:[#allocation62_spill] sm:$0xff]  ;;  %v13867_v34 = vpop.f32.mrf.mxu0 }
 0x687   :  { %v6807_v12 = vpop.f32.mrf.mxu1  ;;  %v6526_v52 = vadd.f32 %v15166_v28, %v15165_v16  ;;  %15171 = vst [vmem:[#allocation181_spill] sm:$0xff] %v13867_v34  ;;  %v15183_v34 = vld [vmem:[#allocation66_spill] sm:$0xff] }
 0x688   :  { %15156 = vst [vmem:[#allocation75_spill] sm:$0xff] %v13845_v32  ;;  %v13851_v10 = vadd.f32 %v6807_v12, %v6518_v31  ;;  %v15168_v32 = vld [vmem:[#allocation22_spill] sm:$0xff]  ;;  %v13877_v28 = vpop.f32.mrf.mxu0 }
 0x689   :  { %v6809_v29 = vpop.f32.mrf.mxu1  ;;  %v6528_v30 = vadd.f32 %v15169_v13, %v15168_v32  ;;  %15178 = vst [vmem:[#allocation85_spill] sm:$0xff] %v13877_v28  ;;  %v15179_v13 = vld [vmem:[#allocation31_spill] sm:$0xff]  ;;  %v15190_v28 = vld [vmem:[#allocation65_spill] sm:$0xff] }
 0x68a   :  { %15160 = vst [vmem:[#allocation83_spill] sm:$0xff] %v13851_v10  ;;  %v13855_v8 = vadd.f32 %v6809_v29, %v6520_v35  ;;  %v6530_v29 = vadd.f32 %v15173_v11, %v15172_v60  ;;  %v15175_v10 = vld [vmem:[#allocation23_spill] sm:$0xff]  ;;  %v13887_v11 = vpop.f32.mrf.mxu0 }
 0x68b   :  { %v6811_v36 = vpop.f32.mrf.mxu1  ;;  %v6532_v16 = vadd.f32 %v15176_v39, %v15175_v10  ;;  %15185 = vst [vmem:[#allocation175_spill] sm:$0xff] %v13887_v11  ;;  %v15186_v10 = vld [vmem:[#allocation33_spill] sm:$0xff]  ;;  %v15196_v11 = vld [vmem:[#allocation156_spill] sm:$0xff] }
 0x68c   :  { %15163 = vst [vmem:[#allocation180_spill] sm:$0xff] %v13855_v8  ;;  %v13861_v7 = vadd.f32 %v6811_v36, %v6522_v53 }
 0x68d   :  { %v6815_v48 = vpop.f32.mrf.mxu1 }
 0x68e   :  { %15167 = vst [vmem:[#allocation173_spill] sm:$0xff] %v13861_v7  ;;  %v13865_v12 = vadd.f32 %v6815_v48, %v6526_v52  ;;  %v15180_v48 = vld [vmem:[#allocation63_spill] sm:$0xff]  ;;  %v15182_v7 = vld [vmem:[#allocation32_spill] sm:$0xff] }
 0x68f   :  { %v6817_v31 = vpop.f32.mrf.mxu1  ;;  %v6536_v32 = vadd.f32 %v15180_v48, %v15179_v13  ;;  %v6538_v60 = vadd.f32 %v15183_v34, %v15182_v7  ;;  %v13897_v48 = vpop.f32.mrf.mxu0  ;;  %v15192_v7 = vld [vmem:[#allocation35_spill] sm:$0xff] }
 0x690   :  { %15170 = vst [vmem:[#allocation84_spill] sm:$0xff] %v13865_v12  ;;  %v13871_v35 = vadd.f32 %v6817_v31, %v6528_v30 }
 0x691   :  { %v6819_v8 = vpop.f32.mrf.mxu1 }
 0x692   :  { %15174 = vst [vmem:[#allocation77_spill] sm:$0xff] %v13871_v35  ;;  %v13875_v53 = vadd.f32 %v6819_v8, %v6530_v29  ;;  %v15187_v8 = vld [vmem:[#allocation163_spill] sm:$0xff]  ;;  %v15189_v35 = vld [vmem:[#allocation34_spill] sm:$0xff] }
 0x693   :  { %v6821_v36 = vpop.f32.mrf.mxu1  ;;  %v6540_v39 = vadd.f32 %v15187_v8, %v15186_v10  ;;  %v6542_v13 = vadd.f32 %v15190_v28, %v15189_v35  ;;  %v13910_v35 = vld [vmem:[%s14264_s5 + $0xf8] sm:$0xff]   ;;  %v13912_v28 = vpop.f32.mrf.mxu0  ;;  %v15200_v8 = vld [vmem:[#allocation67_spill] sm:$0xff] }
 0x694   :  { %15177 = vst [vmem:[#allocation174_spill] sm:$0xff] %v13875_v53  ;;  %v13881_v52 = vadd.f32 %v6821_v36, %v6532_v16  ;;  %15198 = vst [vmem:[#allocation87_spill] sm:$0xff] %v13910_v35  ;;  %9612 = vmatprep.subr.bf16.mxu1 %v13910_v35 }
 0x695   :  { %v6825_v12 = vpop.f32.mrf.mxu1 }
 0x696   :  { %15181 = vst [vmem:[#allocation182_spill] sm:$0xff] %v13881_v52  ;;  %v13885_v30 = vadd.f32 %v6825_v12, %v6536_v32  ;;  %v15193_v12 = vld [vmem:[#allocation58_spill] sm:$0xff]  ;;  %v15195_v52 = vld [vmem:[#allocation36_spill] sm:$0xff] }
 0x697   :  { %v6827_v31 = vpop.f32.mrf.mxu1  ;;  %v6546_v34 = vadd.f32 %v15193_v12, %v15192_v7  ;;  %v6548_v10 = vadd.f32 %v15196_v11, %v15195_v52  ;;  %v15203_v52 = vld [vmem:[#allocation164_spill] sm:$0xff] }
 0x698   :  { %15184 = vst [vmem:[#allocation78_spill] sm:$0xff] %v13885_v30  ;;  %v13891_v29 = vadd.f32 %v6827_v31, %v6538_v60  ;;  %v15199_v31 = vld [vmem:[#allocation41_spill] sm:$0xff] }
 0x699   :  { %v6829_v53 = vpop.f32.mrf.mxu1 }
 0x69a   :  { %15188 = vst [vmem:[#allocation86_spill] sm:$0xff] %v13891_v29  ;;  %v13895_v16 = vadd.f32 %v6829_v53, %v6540_v39  ;;  %v6550_v39 = vadd.f32 %v15200_v8, %v15199_v31  ;;  %v15209_v31 = vld [vmem:[#allocation38_spill] sm:$0xff] }
 0x69b   :  { %v6831_v36 = vpop.f32.mrf.mxu1 }
 0x69c   :  { %15191 = vst [vmem:[#allocation183_spill] sm:$0xff] %v13895_v16  ;;  %v13901_v32 = vadd.f32 %v6831_v36, %v6542_v13  ;;  %v15202_v36 = vld [vmem:[#allocation37_spill] sm:$0xff] }
 0x69d   :  { %v6835_v30 = vpop.f32.mrf.mxu1 }
 0x69e   :  { %15194 = vst [vmem:[#allocation79_spill] sm:$0xff] %v13901_v32  ;;  %v13905_v60 = vadd.f32 %v6835_v30, %v6546_v34  ;;  %v6552_v30 = vadd.f32 %v15203_v52, %v15202_v36  ;;  %v13923_v34 = vpop.f32.mrf.mxu0  ;;  %v15207_v32 = vld [vmem:[#allocation155_spill] sm:$0xff] }
 0x69f   :  { %v6837_v53 = vpop.f32.mrf.mxu1  ;;  %15205 = vst [vmem:[#allocation185_spill] sm:$0xff] %v13923_v34  ;;  %v15213_v36 = vld [vmem:[#allocation43_spill] sm:$0xff]  ;;  %v15217_v34 = vld [vmem:[#allocation69_spill] sm:$0xff] }
 0x6a0   :  { %15197 = vst [vmem:[#allocation176_spill] sm:$0xff] %v13905_v60  ;;  %v13916_v7 = vadd.f32 %v6837_v53, %v6548_v10  ;;  %v15206_v60 = vld [vmem:[#allocation42_spill] sm:$0xff]  ;;  %v15210_v10 = vld [vmem:[#allocation68_spill] sm:$0xff]  ;;  %v13933_v35 = vpop.f32.mrf.mxu0 }
 0x6a1   :  { %v6839_v13 = vpop.f32.mrf.mxu1  ;;  %v6556_v16 = vadd.f32 %v15207_v32, %v15206_v60  ;;  %v6558_v53 = vadd.f32 %v15210_v10, %v15209_v31  ;;  %15212 = vst [vmem:[#allocation89_spill] sm:$0xff] %v13933_v35  ;;  %v6562_v32 = vadd.f32 %v15217_v34, %v15216_v44  ;;  %v15220_v31 = vld [vmem:[#allocation45_spill] sm:$0xff]  ;;  %v15226_v44 = vld [vmem:[#allocation56_spill] sm:$0xff] }
 0x6a2   :  { %15201 = vst [vmem:[#allocation184_spill] sm:$0xff] %v13916_v7  ;;  %v13921_v11 = vadd.f32 %v6839_v13, %v6550_v39  ;;  %v15214_v39 = vld [vmem:[#allocation165_spill] sm:$0xff] }
 0x6a3   :  { %v6841_v12 = vpop.f32.mrf.mxu1  ;;  %v6560_v13 = vadd.f32 %v15214_v39, %v15213_v36  ;;  %v15224_v35 = vld [vmem:[#allocation157_spill] sm:$0xff] }
 0x6a4   :  { %15204 = vst [vmem:[#allocation88_spill] sm:$0xff] %v13921_v11  ;;  %v13927_v29 = vadd.f32 %v6841_v12, %v6552_v30  ;;  %v13943_v12 = vpop.f32.mrf.mxu0 }
 0x6a5   :  { %v6845_v25 = vpop.f32.mrf.mxu1  ;;  %15219 = vst [vmem:[#allocation194_spill] sm:$0xff] %v13943_v12  ;;  %v15230_v12 = vld [vmem:[#allocation167_spill] sm:$0xff] }
 0x6a6   :  { %15208 = vst [vmem:[#allocation96_spill] sm:$0xff] %v13927_v29  ;;  %v13931_v8 = vadd.f32 %v6845_v25, %v6556_v16  ;;  %v15221_v25 = vld [vmem:[#allocation166_spill] sm:$0xff]  ;;  %v13953_v39 = vpop.f32.mrf.mxu0 }
 0x6a7   :  { %v6847_v7 = vpop.f32.mrf.mxu1  ;;  %v6566_v16 = vadd.f32 %v15221_v25, %v15220_v31 }
 0x6a8   :  { %15211 = vst [vmem:[#allocation193_spill] sm:$0xff] %v13931_v8  ;;  %v13937_v52 = vadd.f32 %v6847_v7, %v6558_v53  ;;  %v15223_v8 = vld [vmem:[#allocation46_spill] sm:$0xff]  ;;  %v13963_v25 = vpop.f32.mrf.mxu0 }
 0x6a9   :  { %v6849_v11 = vpop.f32.mrf.mxu1  ;;  %v6568_v36 = vadd.f32 %v15224_v35, %v15223_v8  ;;  %15232 = vst [vmem:[#allocation91_spill] sm:$0xff] %v13963_v25 }
 0x6aa   :  { %15215 = vst [vmem:[#allocation186_spill] sm:$0xff] %v13937_v52  ;;  %v13941_v60 = vadd.f32 %v6849_v11, %v6560_v13  ;;  %v15227_v11 = vld [vmem:[#allocation70_spill] sm:$0xff]  ;;  %v15229_v52 = vld [vmem:[#allocation47_spill] sm:$0xff] }
 0x6ab   :  { %v6851_v30 = vpop.f32.mrf.mxu1  ;;  %v6570_v34 = vadd.f32 %v15227_v11, %v15226_v44  ;;  %v6572_v31 = vadd.f32 %v15230_v12, %v15229_v52 }
 0x6ac   :  { %15218 = vst [vmem:[#allocation97_spill] sm:$0xff] %v13941_v60  ;;  %v13947_v10 = vadd.f32 %v6851_v30, %v6562_v32 }
 0x6ad   :  { %v6855_v29 = vpop.f32.mrf.mxu1 }
 0x6ae   :  { %15222 = vst [vmem:[#allocation90_spill] sm:$0xff] %v13947_v10  ;;  %v13951_v7 = vadd.f32 %v6855_v29, %v6566_v16  ;;  %v13967_v16 = vpop.f32.mrf.mxu0 }
 0x6af   :  { %v6857_v53 = vpop.f32.mrf.mxu1  ;;  %15234 = vst [vmem:[#allocation99_spill] sm:$0xff] %v13967_v16 }
 0x6b0   :  { %15225 = vst [vmem:[#allocation187_spill] sm:$0xff] %v13951_v7  ;;  %v13957_v13 = vadd.f32 %v6857_v53, %v6568_v36  ;;  %v13969_v10 = vpop.f32.mrf.mxu0 }
 0x6b1   :  { %v6859_v60 = vpop.f32.mrf.mxu1  ;;  %15235 = vst [vmem:[#allocation196_spill] sm:$0xff] %v13969_v10 }
 0x6b2   :  { %15228 = vst [vmem:[#allocation98_spill] sm:$0xff] %v13957_v13  ;;  %v13961_v32 = vadd.f32 %v6859_v60, %v6570_v34  ;;  %v13971_v44 = vpop.f32.mrf.mxu0  ;;  %v7218_v34 = vadd.f32 %v13606_v47, %v13595_v56  ;;  %v7219_v13 = vadd.f32 %v13618_v61, %v13600_v24 }
 0x6b3   :  { %v6861_v30 = vpop.f32.mrf.mxu1  ;;  %15236 = vst [vmem:[#allocation92_spill] sm:$0xff] %v13971_v44  ;;  %v7227_v44 = vadd.f32 %v13728_v63, %v13650_v9  ;;  %v7229_v9 = vadd.f32 %v13751_v41, %v13663_v49  ;;  %v7230_v63 = vadd.f32 %v13761_v55, %v13668_v1  ;;  %v7231_v1 = vadd.f32 %v13772_v40, %v13678_v19 }
 0x6b4   :  { %15231 = vst [vmem:[#allocation195_spill] sm:$0xff] %v13961_v32  ;;  %v13965_v35 = vadd.f32 %v6861_v30, %v6572_v31  ;;  %v13973_v60 = vpop.f32.mrf.mxu0  ;;  %v7226_v31 = vadd.f32 %v13718_v5, %v13643_v3  ;;  %v7228_v3 = vadd.f32 %v13741_v2, %v13654_v43  ;;  %v7221_v5 = vadd.f32 %v13646_v57, %v13610_v27  ;;  %v14002_v57 = vld [vmem:[%s14265_s4] ss:$0 sm:$0xff] }
 0x6b5   :  { %v7413_v29 = vpop.f32.mrf.mxu1  ;;  %15237 = vst [vmem:[#allocation189_spill] sm:$0xff] %v13973_v60  ;;  %v7220_v60 = vadd.f32 %v13634_v62, %v13604_v59  ;;  %v7222_v59 = vadd.f32 %v13659_v15, %v13615_v20  ;;  %v7224_v55 = vadd.f32 %v13687_v38, %v13629_v46  ;;  %v7233_v19 = vadd.f32 %v13798_v4, %v13691_v6 }
 0x6b6   :  { %15233 = vst [vmem:[#allocation188_spill] sm:$0xff] %v13965_v35  ;;  %v13979_v35 = vpop.f32.mrf.mxu0  ;;  %v7572_v32 = vadd.f32 %v7413_v29, %v7218_v34 }
 0x6b7   :  { %v7415_v8 = vpop.f32.mrf.mxu1 }
 0x6b8   :  { %v7573_v25 = vadd.f32 %v7415_v8, %v7219_v13  ;;  %v13991_v34 = vpop.f32.mrf.mxu0 }
 0x6b9   :  { %v7417_v7 = vpop.f32.mrf.mxu1 }
 0x6ba   :  { %v7574_v24 = vadd.f32 %v7417_v7, %v7220_v60  ;;  %v7223_v7 = vadd.f32 %v13674_v14, %v13622_v22  ;;  %v14006_v41 = vpop.f32.mrf.mxu0 }
 0x6bb   :  { %v7419_v36 = vpop.f32.mrf.mxu1 }
 0x6bc   :  { %v7575_v43 = vadd.f32 %v7419_v36, %v7221_v5  ;;  %v14019_v40 = vpop.f32.mrf.mxu0 }
 0x6bd   :  { %v7423_v53 = vpop.f32.mrf.mxu1 }
 0x6be   :  { %v7576_v20 = vadd.f32 %v7423_v53, %v7222_v59 }
 0x6bf   :  { %v7425_v11 = vpop.f32.mrf.mxu1 }
 0x6c1   :  { %v7427_v52 = vpop.f32.mrf.mxu1 }
 0x6c2   :  { %v7578_v46 = vadd.f32 %v7427_v52, %v7224_v55  ;;  %v15240_v55 = vld [vmem:[#allocation57_spill] sm:$0xff] }
 0x6c3   :  { %v7429_v12 = vpop.f32.mrf.mxu1 }
 0x6c5   :  { %v7433_v30 = vpop.f32.mrf.mxu1 }
 0x6c6   :  { %v7580_v10 = vadd.f32 %v7433_v30, %v7226_v31 }
 0x6c7   :  { %v7435_v16 = vpop.f32.mrf.mxu1 }
 0x6c8   :  { %v7636_v47 = vmax.f32 %v7572_v32, %v7580_v10  ;;  %v7581_v56 = vadd.f32 %v7435_v16, %v7227_v44  ;;  %v7577_v16 = vadd.f32 %v7425_v11, %v7223_v7  ;;  %v15238_v44 = vld [vmem:[#allocation158_spill] sm:$0xff]  ;;  %v10057_v7 = vld [vmem:[%s14264_s5 + $0xb0] sm:$0xff]  }
 0x6c9   :  { %v7437_v29 = vpop.f32.mrf.mxu1  ;;  %v7225_v53 = vadd.f32 %v13702_v17, %v15238_v44  ;;  %v14022_v17 = vpop.f32.mrf.mxu0  ;;  %v7235_v44 = vadd.f32 %v13826_v21, %v13706_v18  ;;  %v15241_v18 = vld [vmem:[#allocation185_spill] sm:$0xff] }
 0x6ca   :  { %v7637_v61 = vmax.f32 %v7573_v25, %v7581_v56  ;;  %v7582_v31 = vadd.f32 %v7437_v29, %v7228_v3  ;;  %v7232_v25 = vadd.f32 %v13785_v51, %v13682_v45  ;;  %v7244_v21 = vadd.f32 %v15241_v18, %v13759_v23  ;;  %v15248_v23 = vld [vmem:[#allocation76_spill] sm:$0xff] }
 0x6cb   :  { %v7439_v62 = vpop.f32.mrf.mxu1  ;;  %v7579_v51 = vadd.f32 %v7429_v12, %v7225_v53  ;;  %v14024_v4 = vpop.f32.mrf.mxu0 }
 0x6cc   :  { %v7668_v2 = vmax.f32 %v7636_v47, %v7637_v61  ;;  %v7638_v10 = vmax.f32 %v7574_v24, %v7582_v31  ;;  %v7583_v27 = vadd.f32 %v7439_v62, %v7229_v9 }
 0x6cd   :  { %v7443_v49 = vpop.f32.mrf.mxu1 }
 0x6ce   :  { %v7639_v15 = vmax.f32 %v7575_v43, %v7583_v27  ;;  %v7584_v13 = vadd.f32 %v7443_v49, %v7230_v63  ;;  %v7691_v8 = vadd.f32 %v14002_v57, %v7668_v2  ;;  %v14028_v63 = vpop.f32.mrf.mxu0 }
 0x6cf   :  { %v7445_v32 = vpop.f32.mrf.mxu1 }
 0x6d0   :  { %v7669_v22 = vmax.f32 %v7638_v10, %v7639_v15  ;;  %v7640_v14 = vmax.f32 %v7576_v20, %v7584_v13  ;;  %v7585_v36 = vadd.f32 %v7445_v32, %v7231_v1  ;;  %v7707_v11 = vmax.f32 %v7691_v8, 0.0  ;;  %v14033_v20 = vpop.f32.mrf.mxu0  ;;  %v10058_v13 = vld [vmem:[%s14264_s5 + $0xa8] sm:$0xff]   ;;  %v15239_v1 = vld [vmem:[#allocation13_spill] sm:$0xff] }
 0x6d1   :  { %v7447_v60 = vpop.f32.mrf.mxu1  ;;  %v6462_v32 = vadd.f32 %v15240_v55, %v15239_v1  ;;  %v15253_v1 = vld [vmem:[#allocation181_spill] sm:$0xff] }
 0x6d2   :  { %v7641_v38 = vmax.f32 %v7577_v16, %v7585_v36  ;;  %v7586_v30 = vadd.f32 %v7447_v60, %v7232_v25  ;;  %v7692_v45 = vadd.f32 %v14002_v57, %v7669_v22  ;;  %v14045_v8 = vpop.f32.mrf.mxu0  ;;  %v7234_v16 = vadd.f32 %v13811_v33, %v13696_v50  ;;  %v10059_v50 = vld [vmem:[%s14264_s5 + $0xa0] sm:$0xff]  }
 0x6d3   :  { %v7449_v47 = vpop.f32.mrf.mxu1  ;;  %v7242_v22 = vadd.f32 %v13897_v48, %v13748_v26  ;;  %v7243_v60 = vadd.f32 %v13912_v28, %v13755_v42  ;;  %v7236_v26 = vadd.f32 %v13837_v0, %v13711_v54  ;;  %v10060_v54 = vld [vmem:[%s14264_s5 + $0x98] sm:$0xff]   ;;  %v15245_v0 = vld [vmem:[#allocation7_spill] sm:$0xff] }
 0x6d4   :  { %v7670_v56 = vmax.f32 %v7640_v14, %v7641_v38  ;;  %v7642_v3 = vmax.f32 %v7578_v46, %v7586_v30  ;;  %v7587_v5 = vadd.f32 %v7449_v47, %v7233_v19  ;;  %v7708_v29 = vmax.f32 %v7692_v45, 0.0  ;;  %v15242_v38 = vld [vmem:[#allocation172_spill] sm:$0xff]  ;;  %v15243_v47 = vld [vmem:[#allocation159_spill] sm:$0xff] }
 0x6d5   :  { %v7453_v24 = vpop.f32.mrf.mxu1 }
 0x6d6   :  { %v7643_v61 = vmax.f32 %v7579_v51, %v7587_v5  ;;  %v7723_v31 = vpack.c.bf16 %v7708_v29, %v7707_v11  ;;  %v7693_v52 = vadd.f32 %v14002_v57, %v7670_v56  ;;  %v7588_v36 = vadd.f32 %v7453_v24, %v7234_v16  ;;  %v15244_v11 = vld [vmem:[#allocation89_spill] sm:$0xff] }
 0x6d7   :  { %v7455_v6 = vpop.f32.mrf.mxu1  ;;  %v7245_v56 = vadd.f32 %v15244_v11, %v15243_v47  ;;  %v15247_v29 = vld [vmem:[#allocation61_spill] sm:$0xff] }
 0x6d8   :  { %v7671_v9 = vmax.f32 %v7642_v3, %v7643_v61  ;;  %9568 = vmatprep.mubr.bf16.mxu0 %v7723_v31  ;;  %v7709_v43 = vmax.f32 %v7693_v52, 0.0  ;;  %v7589_v48 = vadd.f32 %v7455_v6, %v7235_v44  ;;  %v15246_v3 = vld [vmem:[#allocation40_spill] sm:$0xff]  ;;  %v7238_v24 = vadd.f32 %v15248_v23, %v15247_v29  ;;  %v15250_v6 = vld [vmem:[#allocation194_spill] sm:$0xff]  ;;  %v15255_v44 = vld [vmem:[#allocation71_spill] sm:$0xff] }
 0x6d9   :  { %v7457_v59 = vpop.f32.mrf.mxu1  ;;  %v6472_v5 = vadd.f32 %v15246_v3, %v15245_v0  ;;  %v15249_v31 = vld [vmem:[#allocation72_spill] sm:$0xff] }
 0x6da   :  { %v7694_v12 = vadd.f32 %v14002_v57, %v7671_v9  ;;  %v7590_v28 = vadd.f32 %v7457_v59, %v7236_v26  ;;  %v7246_v52 = vadd.f32 %v15250_v6, %v15249_v31 }
 0x6db   :  { %v7459_v62 = vpop.f32.mrf.mxu1 }
 0x6dc   :  { %v7710_v2 = vmax.f32 %v7694_v12, 0.0 }
 0x6dd   :  { %v7463_v10 = vpop.f32.mrf.mxu1 }
 0x6de   :  { %v7724_v27 = vpack.c.bf16 %v7710_v2, %v7709_v43  ;;  %v7592_v16 = vadd.f32 %v7463_v10, %v7238_v24 }
 0x6df   :  { %v7465_v49 = vpop.f32.mrf.mxu1 }
 0x6e0   :  { %9569 = vmatmul.mubr.bf16.vlgmr.msra.gmra.mxu0 %v7724_v27  ;;  %v15251_v27 = vld [vmem:[#allocation168_spill] sm:$0xff] }
 0x6e1   :  { %v14035_v15 = vpop.f32.mrf.mxu1  ;;  %9593 = vmatpush3.bf16.msra.mxu0 %v13824_v37  ;;  %v6883_v37 = vadd.f32 %v13716_v58, %v6462_v32  ;;  %v14061_v58 = vpop.f32.mrf.mxu0 }
 0x6e2   :  { %9594 = vmatprep.subr.bf16.mxu0 %v10057_v7 }
 0x6e3   :  { %v14043_v25 = vpop.f32.mrf.mxu1  ;;  %v7237_v30 = vadd.f32 %v15242_v38, %v6883_v37  ;;  %v14077_v9 = vpop.f32.mrf.mxu0  ;;  %v15259_v38 = vld [vmem:[#allocation175_spill] sm:$0xff] }
 0x6e5   :  { %v7473_v14 = vpop.f32.mrf.mxu1  ;;  %9595 = vmatpush3.bf16.msra.mxu0 %v10057_v7  ;;  %v7591_v59 = vadd.f32 %v7459_v62, %v7237_v30  ;;  %v6887_v7 = vadd.f32 %v15251_v27, %v6472_v5  ;;  %v10061_v62 = vld [vmem:[%s14264_s5 + $0x90] sm:$0xff]   ;;  %v14092_v10 = vpop.f32.mrf.mxu0 }
 0x6e6   :  { %v7596_v53 = vadd.f32 %v7473_v14, %v7242_v22  ;;  %9596 = vmatprep.subr.bf16.mxu0 %v10058_v13  ;;  %v15254_v14 = vld [vmem:[#allocation169_spill] sm:$0xff] }
 0x6e7   :  { %v7475_v33 = vpop.f32.mrf.mxu1  ;;  %v7241_v30 = vadd.f32 %v15259_v38, %v6887_v7  ;;  %v14103_v23 = vpop.f32.mrf.mxu0  ;;  %v15266_v38 = vld [vmem:[#allocation170_spill] sm:$0xff] }
 0x6e8   :  { %v7644_v19 = vmax.f32 %v7588_v36, %v7596_v53  ;;  %v7597_v46 = vadd.f32 %v7475_v33, %v7243_v60  ;;  %v7247_v36 = vadd.f32 %v13953_v39, %v15254_v14  ;;  %v15256_v53 = vld [vmem:[#allocation85_spill] sm:$0xff]  ;;  %v15257_v33 = vld [vmem:[#allocation80_spill] sm:$0xff]  ;;  %v10065_v14 = vld [vmem:[%s14264_s5 + $0xf0] sm:$0xff]  }
 0x6e9   :  { %v7477_v42 = vpop.f32.mrf.mxu1  ;;  %9597 = vmatpush3.bf16.msra.mxu0 %v10058_v13  ;;  %v15252_v13 = vld [vmem:[#allocation160_spill] sm:$0xff]  ;;  %v7240_v60 = vadd.f32 %v15256_v53, %v15255_v44  ;;  %v7595_v3 = vadd.f32 %v14043_v25, %v7241_v30  ;;  %v14105_v6 = vpop.f32.mrf.mxu0  ;;  %v15262_v44 = vld [vmem:[#allocation87_spill] sm:$0xff] }
 0x6ea   :  { %v7645_v45 = vmax.f32 %v7589_v48, %v7597_v46  ;;  %v7598_v51 = vadd.f32 %v7477_v42, %v7244_v21  ;;  %9598 = vmatprep.subr.bf16.mxu0 %v10059_v50  ;;  %v7239_v55 = vadd.f32 %v15253_v1, %v15252_v13  ;;  %v15258_v48 = vld [vmem:[#allocation91_spill] sm:$0xff]  ;;  %v15267_v30 = vld [vmem:[#allocation92_spill] sm:$0xff] }
 0x6eb   :  { %v7479_v61 = vpop.f32.mrf.mxu1  ;;  %v7594_v47 = vadd.f32 %v14035_v15, %v7240_v60  ;;  %v14111_v7 = vpop.f32.mrf.mxu0  ;;  %v10066_v60 = vld [vmem:[%s14264_s5 + $0xe8] sm:$0xff]  }
 0x6ec   :  { %v7672_v12 = vmax.f32 %v7644_v19, %v7645_v45  ;;  %v7646_v43 = vmax.f32 %v7590_v28, %v7598_v51  ;;  %v7599_v2 = vadd.f32 %v7479_v61, %v7245_v56  ;;  %v7248_v19 = vadd.f32 %v15258_v48, %v15257_v33  ;;  %v15260_v28 = vld [vmem:[#allocation177_spill] sm:$0xff]  ;;  %v15261_v45 = vld [vmem:[#allocation99_spill] sm:$0xff]  ;;  %v15264_v48 = vld [vmem:[#allocation196_spill] sm:$0xff] }
 0x6ed   :  { %v7483_v32 = vpop.f32.mrf.mxu1  ;;  %9599 = vmatpush3.bf16.msra.mxu0 %v10059_v50  ;;  %v7593_v46 = vadd.f32 %v7465_v49, %v7239_v55  ;;  %v7249_v51 = vadd.f32 %v15261_v45, %v15260_v28  ;;  %v10062_v49 = vld [vmem:[%s14264_s5 + $0x88] sm:$0xff]   ;;  %v15263_v33 = vld [vmem:[#allocation73_spill] sm:$0xff]  ;;  %v15268_v45 = vld [vmem:[#allocation83_spill] sm:$0xff] }
 0x6ee   :  { %v7647_v22 = vmax.f32 %v7591_v59, %v7599_v2  ;;  %v7600_v37 = vadd.f32 %v7483_v32, %v7246_v52  ;;  %9600 = vmatprep.subr.bf16.mxu0 %v10060_v54  ;;  %v7695_v50 = vadd.f32 %v14002_v57, %v7672_v12  ;;  %v10063_v12 = vld [vmem:[%s14264_s5 + $0x80] sm:$0xff]  }
 0x6ef   :  { %v7485_v26 = vpop.f32.mrf.mxu1 }
 0x6f0   :  { %v7673_v18 = vmax.f32 %v7646_v43, %v7647_v22  ;;  %v7648_v21 = vmax.f32 %v7592_v16, %v7600_v37  ;;  %v7601_v39 = vadd.f32 %v7485_v26, %v7247_v36  ;;  %v7711_v29 = vmax.f32 %v7695_v50, 0.0  ;;  %v14114_v22 = vpop.f32.mrf.mxu0  ;;  %v15265_v50 = vld [vmem:[#allocation75_spill] sm:$0xff] }
 0x6f1   :  { %v7487_v42 = vpop.f32.mrf.mxu1  ;;  %9601 = vmatpush3.bf16.msra.mxu0 %v10060_v54 }
 0x6f2   :  { %v7649_v11 = vmax.f32 %v7593_v46, %v7601_v39  ;;  %v7602_v56 = vadd.f32 %v7487_v42, %v7248_v19  ;;  %v7696_v0 = vadd.f32 %v14002_v57, %v7673_v18  ;;  %9602 = vmatprep.subr.bf16.mxu0 %v10061_v62  ;;  %v14122_v53 = vpop.f32.mrf.mxu0  ;;  %v7250_v19 = vadd.f32 %v15264_v48, %v15263_v33 }
 0x6f3   :  { %v7489_v5 = vpop.f32.mrf.mxu1  ;;  %v7258_v46 = vadd.f32 %v14024_v4, %v15265_v50  ;;  %v7251_v42 = vadd.f32 %v15267_v30, %v15266_v38 }
 0x6f4   :  { %v7674_v24 = vmax.f32 %v7648_v21, %v7649_v11  ;;  %v7650_v61 = vmax.f32 %v7594_v47, %v7602_v56  ;;  %v7603_v54 = vadd.f32 %v7489_v5, %v7249_v51  ;;  %v7712_v31 = vmax.f32 %v7696_v0, 0.0  ;;  %v14133_v21 = vpop.f32.mrf.mxu0  ;;  %v10067_v47 = vld [vmem:[%s14264_s5 + $0xe0] sm:$0xff]  }
 0x6f5   :  { %v7493_v15 = vpop.f32.mrf.mxu1  ;;  %9603 = vmatpush3.bf16.msra.mxu0 %v10061_v62  ;;  %v7259_v51 = vadd.f32 %v14028_v63, %v15268_v45  ;;  %v15269_v11 = vld [vmem:[#allocation81_spill] sm:$0xff] }
 0x6f6   :  { %v7651_v52 = vmax.f32 %v7595_v3, %v7603_v54  ;;  %v7725_v59 = vpack.c.bf16 %v7712_v31, %v7711_v29  ;;  %9604 = vmatprep.subr.bf16.mxu0 %v10062_v49  ;;  %v7697_v43 = vadd.f32 %v14002_v57, %v7674_v24  ;;  %v7604_v39 = vadd.f32 %v7493_v15, %v7250_v19  ;;  %v15270_v56 = vld [vmem:[#allocation189_spill] sm:$0xff]  ;;  %v15271_v29 = vld [vmem:[#allocation180_spill] sm:$0xff]  ;;  %v14148_v63 = vpop.f32.mrf.mxu0 }
 0x6f7   :  { %v7495_v25 = vpop.f32.mrf.mxu1  ;;  %v7252_v4 = vadd.f32 %v15270_v56, %v15269_v11  ;;  %v7260_v24 = vadd.f32 %v14033_v20, %v15271_v29  ;;  %v15281_v11 = vld [vmem:[#allocation182_spill] sm:$0xff] }
 0x6f8   :  { %v7675_v2 = vmax.f32 %v7650_v61, %v7651_v52  ;;  %9588 = vmatprep.mubr.bf16.mxu1 %v7725_v59  ;;  %v7713_v55 = vmax.f32 %v7697_v43, 0.0  ;;  %v15272_v61 = vld [vmem:[#allocation178_spill] sm:$0xff]  ;;  %v14161_v33 = vpop.f32.mrf.mxu0  ;;  %v7265_v56 = vadd.f32 %v14103_v23, %v15281_v11  ;;  %v15288_v11 = vld [vmem:[#allocation79_spill] sm:$0xff] }
 0x6f9   :  { %v7497_v27 = vpop.f32.mrf.mxu1  ;;  %9605 = vmatpush3.bf16.msra.mxu0 %v10062_v49  ;;  %v7605_v49 = vadd.f32 %v7495_v25, %v7251_v42  ;;  %v7253_v54 = vadd.f32 %v13979_v35, %v15272_v61  ;;  %v10068_v25 = vld [vmem:[%s14264_s5 + $0xd8] sm:$0xff]  }
 0x6fa   :  { %v7698_v13 = vadd.f32 %v14002_v57, %v7675_v2  ;;  %9606 = vmatprep.subr.bf16.mxu0 %v10063_v12  ;;  %v7606_v15 = vadd.f32 %v7497_v27, %v7252_v4  ;;  %v15274_v2 = vld [vmem:[#allocation74_spill] sm:$0xff]  ;;  %v15275_v35 = vld [vmem:[#allocation84_spill] sm:$0xff]  ;;  %v14177_v4 = vpop.f32.mrf.mxu0 }
 0x6fb   :  { %v7499_v1 = vpop.f32.mrf.mxu1  ;;  %v7254_v20 = vadd.f32 %v13991_v34, %v15274_v2 }
 0x6fc   :  { %v7714_v32 = vmax.f32 %v7698_v13, 0.0  ;;  %v7199_v29 = vpop.f32.mrf.mxu0 }
 0x6fd   :  { %v7503_v16 = vpop.f32.mrf.mxu1  ;;  %9607 = vmatpush3.bf16.msra.mxu0 %v10063_v12  ;;  %v15273_v12 = vld [vmem:[#allocation173_spill] sm:$0xff] }
 0x6fe   :  { %v7726_v37 = vpack.c.bf16 %v7714_v32, %v7713_v55  ;;  %v7261_v43 = vadd.f32 %v14045_v8, %v15273_v12  ;;  %v7262_v55 = vadd.f32 %v14061_v58, %v15275_v35  ;;  %v7607_v32 = vadd.f32 %v7499_v1, %v7253_v54  ;;  %v10069_v58 = vld [vmem:[%s14264_s5 + $0xd0] sm:$0xff]   ;;  %v15278_v1 = vld [vmem:[#allocation82_spill] sm:$0xff]  ;;  %v7201_v12 = vpop.f32.mrf.mxu0 }
 0x6ff   :  { %v7505_v36 = vpop.f32.mrf.mxu1  ;;  %v7608_v48 = vadd.f32 %v7503_v16, %v7254_v20 }
 0x700   :  { %9589 = vmatmul.mubr.bf16.vlgmr.msra.gmra.mxu1 %v7726_v37 }
 0x701   :  { %v14119_v62 = vpop.f32.mrf.mxu1  ;;  %9613 = vmatpush3.bf16.msra.mxu1 %v15262_v44  ;;  %v15276_v44 = vld [vmem:[#allocation171_spill] sm:$0xff] }
 0x702   :  { %9614 = vmatprep.subr.bf16.mxu1 %v10065_v14 }
 0x703   :  { %v14127_v26 = vpop.f32.mrf.mxu1 }
 0x705   :  { %v7513_v18 = vpop.f32.mrf.mxu1  ;;  %9615 = vmatpush3.bf16.msra.mxu1 %v10065_v14 }
 0x706   :  { %v7612_v28 = vadd.f32 %v7513_v18, %v7258_v46  ;;  %9616 = vmatprep.subr.bf16.mxu1 %v10066_v60  ;;  %v15277_v46 = vld [vmem:[#allocation77_spill] sm:$0xff]  ;;  %v7256_v18 = vadd.f32 %v14019_v40, %v15278_v1  ;;  %v15284_v1 = vld [vmem:[#allocation86_spill] sm:$0xff] }
 0x707   :  { %v7515_v0 = vpop.f32.mrf.mxu1  ;;  %v7263_v34 = vadd.f32 %v14077_v9, %v15277_v46 }
 0x708   :  { %v7652_v3 = vmax.f32 %v7604_v39, %v7612_v28  ;;  %v7613_v5 = vadd.f32 %v7515_v0, %v7259_v51  ;;  %v15280_v51 = vld [vmem:[#allocation179_spill] sm:$0xff]  ;;  %v7610_v40 = vadd.f32 %v14119_v62, %v7256_v18  ;;  %v7267_v18 = vadd.f32 %v14111_v7, %v15284_v1 }
 0x709   :  { %v7517_v31 = vpop.f32.mrf.mxu1  ;;  %9617 = vmatpush3.bf16.msra.mxu1 %v10066_v60  ;;  %v7255_v60 = vadd.f32 %v14006_v41, %v15276_v44  ;;  %v15279_v41 = vld [vmem:[#allocation174_spill] sm:$0xff]  ;;  %v7257_v9 = vadd.f32 %v14022_v17, %v15280_v51 }
 0x70a   :  { %v7653_v52 = vmax.f32 %v7605_v49, %v7613_v5  ;;  %v7614_v59 = vadd.f32 %v7517_v31, %v7260_v24  ;;  %9618 = vmatprep.subr.bf16.mxu1 %v10067_v47  ;;  %v7264_v38 = vadd.f32 %v14092_v10, %v15279_v41  ;;  %v15285_v41 = vld [vmem:[#allocation186_spill] sm:$0xff] }
 0x70b   :  { %v7519_v13 = vpop.f32.mrf.mxu1  ;;  %v7609_v16 = vadd.f32 %v7505_v36, %v7255_v60  ;;  %v10070_v36 = vld [vmem:[%s14264_s5 + $0xc8] sm:$0xff]   ;;  %v7611_v17 = vadd.f32 %v14127_v26, %v7257_v9 }
 0x70c   :  { %v7676_v37 = vmax.f32 %v7652_v3, %v7653_v52  ;;  %v7654_v27 = vmax.f32 %v7606_v15, %v7614_v59  ;;  %v7615_v14 = vadd.f32 %v7519_v13, %v7261_v43  ;;  %v10071_v52 = vld [vmem:[%s14264_s5 + $0xc0] sm:$0xff]   ;;  %v7203_v13 = vpop.f32.mrf.mxu0 }
 0x70d   :  { %v7523_v8 = vpop.f32.mrf.mxu1  ;;  %9619 = vmatpush3.bf16.msra.mxu1 %v10067_v47 }
 0x70e   :  { %v7655_v19 = vmax.f32 %v7607_v32, %v7615_v14  ;;  %v7616_v50 = vadd.f32 %v7523_v8, %v7262_v55  ;;  %9620 = vmatprep.subr.bf16.mxu1 %v10068_v25  ;;  %v7699_v30 = vadd.f32 %v14002_v57, %v7676_v37  ;;  %v7205_v14 = vpop.f32.mrf.mxu0 }
 0x70f   :  { %v7525_v39 = vpop.f32.mrf.mxu1 }
 0x710   :  { %v7677_v42 = vmax.f32 %v7654_v27, %v7655_v19  ;;  %v7656_v28 = vmax.f32 %v7608_v48, %v7616_v50  ;;  %v7617_v45 = vadd.f32 %v7525_v39, %v7263_v34  ;;  %v7715_v5 = vmax.f32 %v7699_v30, 0.0  ;;  %v7209_v8 = vpop.f32.mrf.mxu0  ;;  %v15282_v48 = vld [vmem:[#allocation78_spill] sm:$0xff]  ;;  %v15283_v50 = vld [vmem:[#allocation193_spill] sm:$0xff]  ;;  %v15286_v30 = vld [vmem:[#allocation183_spill] sm:$0xff] }
 0x711   :  { %v7527_v47 = vpop.f32.mrf.mxu1  ;;  %9621 = vmatpush3.bf16.msra.mxu1 %v10068_v25  ;;  %v7266_v19 = vadd.f32 %v14105_v6, %v15282_v48  ;;  %v7274_v46 = vadd.f32 %v7199_v29, %v15283_v50  ;;  %v15297_v50 = vld [vmem:[#allocation188_spill] sm:$0xff] }
 0x712   :  { %v7657_v0 = vmax.f32 %v7609_v16, %v7617_v45  ;;  %v7618_v10 = vadd.f32 %v7527_v47, %v7264_v38  ;;  %v7700_v49 = vadd.f32 %v14002_v57, %v7677_v42  ;;  %9622 = vmatprep.subr.bf16.mxu1 %v10069_v58  ;;  %v7275_v38 = vadd.f32 %v7201_v12, %v15285_v41  ;;  %v15287_v47 = vld [vmem:[#allocation97_spill] sm:$0xff] }
 0x713   :  { %v7529_v3 = vpop.f32.mrf.mxu1  ;;  %v7268_v16 = vadd.f32 %v14114_v22, %v15286_v30  ;;  %v7276_v6 = vadd.f32 %v7203_v13, %v15287_v47  ;;  %v15295_v13 = vld [vmem:[#allocation195_spill] sm:$0xff] }
 0x714   :  { %v7678_v23 = vmax.f32 %v7656_v28, %v7657_v0  ;;  %v7658_v24 = vmax.f32 %v7610_v40, %v7618_v10  ;;  %v7619_v61 = vadd.f32 %v7529_v3, %v7265_v56  ;;  %v7716_v54 = vmax.f32 %v7700_v49, 0.0  ;;  %v7211_v28 = vpop.f32.mrf.mxu0  ;;  %v15289_v49 = vld [vmem:[#allocation90_spill] sm:$0xff] }
 0x715   :  { %v7533_v31 = vpop.f32.mrf.mxu1  ;;  %9623 = vmatpush3.bf16.msra.mxu1 %v10069_v58  ;;  %v7269_v56 = vadd.f32 %v14122_v53, %v15288_v11  ;;  %v10073_v11 = vld [vmem:[%s14266_s7 + $0x10] sm:$0xff]  }
 0x716   :  { %v7659_v62 = vmax.f32 %v7611_v17, %v7619_v61  ;;  %v7727_v15 = vpack.c.bf16 %v7716_v54, %v7715_v5  ;;  %9624 = vmatprep.subr.bf16.mxu1 %v10070_v36  ;;  %v7701_v26 = vadd.f32 %v14002_v57, %v7678_v23  ;;  %v7620_v58 = vadd.f32 %v7533_v31, %v7266_v19  ;;  %v15290_v17 = vld [vmem:[#allocation176_spill] sm:$0xff]  ;;  %v15291_v5 = vld [vmem:[#allocation187_spill] sm:$0xff]  ;;  %v7213_v23 = vpop.f32.mrf.mxu0 }
 0x717   :  { %v7535_v59 = vpop.f32.mrf.mxu1  ;;  %v7270_v3 = vadd.f32 %v14133_v21, %v15290_v17  ;;  %v7278_v29 = vadd.f32 %v7209_v8, %v15291_v5  ;;  %v9418_v5 = vld [vmem:[%s14267_s6] ss:$0 sm:$0xff] }
 0x718   :  { %v7679_v43 = vmax.f32 %v7658_v24, %v7659_v62  ;;  %9608 = vmatprep.mubr.bf16.mxu0 %v7727_v15  ;;  %v7717_v35 = vmax.f32 %v7701_v26, 0.0  ;;  %v7621_v45 = vadd.f32 %v7535_v59, %v7267_v18  ;;  %v15292_v62 = vld [vmem:[#allocation184_spill] sm:$0xff]  ;;  %v15293_v26 = vld [vmem:[#allocation98_spill] sm:$0xff] }
 0x719   :  { %v7537_v25 = vpop.f32.mrf.mxu1  ;;  %9625 = vmatpush3.bf16.msra.mxu1 %v10070_v36  ;;  %v7277_v36 = vadd.f32 %v7205_v14, %v15289_v49  ;;  %v7271_v53 = vadd.f32 %v14148_v63, %v15292_v62  ;;  %v15296_v63 = vld [vmem:[#allocation96_spill] sm:$0xff] }
 0x71a   :  { %v7702_v2 = vadd.f32 %v14002_v57, %v7679_v43  ;;  %9626 = vmatprep.subr.bf16.mxu1 %v10071_v52  ;;  %v7622_v0 = vadd.f32 %v7537_v25, %v7268_v16  ;;  %v7279_v43 = vadd.f32 %v7211_v28, %v15293_v26  ;;  %v15294_v25 = vld [vmem:[#allocation88_spill] sm:$0xff] }
 0x71b   :  { %v7539_v20 = vpop.f32.mrf.mxu1  ;;  %v7272_v21 = vadd.f32 %v14161_v33, %v15294_v25 }
 0x71c   :  { %v7718_v55 = vmax.f32 %v7702_v2, 0.0  ;;  %v7623_v24 = vadd.f32 %v7539_v20, %v7269_v56  ;;  %v10075_v56 = vld [vmem:[%s14266_s7] sm:$0xff]  }
 0x71d   :  { %v7543_v32 = vpop.f32.mrf.mxu1  ;;  %9627 = vmatpush3.bf16.msra.mxu1 %v10071_v52 }
 0x71e   :  { %v7728_v37 = vpack.c.bf16 %v7718_v55, %v7717_v35  ;;  %v7624_v52 = vadd.f32 %v7543_v32, %v7270_v3  ;;  %v7280_v35 = vadd.f32 %v7213_v23, %v15295_v13  ;;  %v7215_v55 = vpop.f32.mrf.mxu0  ;;  %v7273_v32 = vadd.f32 %v14177_v4, %v15296_v63 }
 0x71f   :  { %v7545_v27 = vpop.f32.mrf.mxu1 }
 0x720   :  { %9609 = vmatmul.mubr.bf16.vlgmr.msra.gmra.mxu0 %v7728_v37  ;;  %v7625_v37 = vadd.f32 %v7545_v27, %v7271_v53 }
 0x721   :  { %v7547_v44 = vpop.f32.mrf.mxu1 }
 0x723   :  { %v7549_v60 = vpop.f32.mrf.mxu1 }
 0x724   :  { %v7627_v18 = vadd.f32 %v7549_v60, %v7273_v32  ;;  %v10072_v60 = vld [vmem:[%s14266_s7 + $0x18] ss:$0 sps:$4 sm:$0x11]  }
 0x725   :  { %v7553_v34 = vpop.f32.mrf.mxu1  ;;  %9648 = vmatprep.subr.msk.bf16.mxu0 %vm8257_vm2, %v10072_v60 }
 0x726   :  { %v7628_v39 = vadd.f32 %v7553_v34, %v7274_v46  ;;  %v7281_v46 = vadd.f32 %v7215_v55, %v15297_v50  ;;  %v7626_v34 = vadd.f32 %v7547_v44, %v7272_v21 }
 0x727   :  { %v7555_v42 = vpop.f32.mrf.mxu1 }
 0x728   :  { %v7660_v51 = vmax.f32 %v7620_v58, %v7628_v39  ;;  %v7629_v9 = vadd.f32 %v7555_v42, %v7275_v38 }
 0x729   :  { %v7557_v40 = vpop.f32.mrf.mxu1 }
 0x72a   :  { %v7661_v10 = vmax.f32 %v7621_v45, %v7629_v9  ;;  %v7630_v7 = vadd.f32 %v7557_v40, %v7276_v6  ;;  %v8259_v6 = vsel %vm8257_vm2, %v10072_v60, 0 }
 0x72b   :  { %v7559_v22 = vpop.f32.mrf.mxu1  ;;  %9633 = vmatpush3.bf16.msra.mxu0 %v8259_v6 }
 0x72c   :  { %v7680_v61 = vmax.f32 %v7660_v51, %v7661_v10  ;;  %v7662_v54 = vmax.f32 %v7622_v0, %v7630_v7  ;;  %v7631_v31 = vadd.f32 %v7559_v22, %v7277_v36  ;;  %9634 = vmatprep.subr.bf16.mxu0 %v10073_v11 }
 0x72d   :  { %v7563_v15 = vpop.f32.mrf.mxu1 }
 0x72e   :  { %v7663_v59 = vmax.f32 %v7623_v24, %v7631_v31  ;;  %v7632_v12 = vadd.f32 %v7563_v15, %v7278_v29  ;;  %v7703_v20 = vadd.f32 %v14002_v57, %v7680_v61 }
 0x72f   :  { %v7565_v2 = vpop.f32.mrf.mxu1  ;;  %9635 = vmatpush3.bf16.msra.mxu0 %v10073_v11 }
 0x730   :  { %v7681_v14 = vmax.f32 %v7662_v54, %v7663_v59  ;;  %v7664_v8 = vmax.f32 %v7624_v52, %v7632_v12  ;;  %v7633_v48 = vadd.f32 %v7565_v2, %v7279_v43  ;;  %v7719_v41 = vmax.f32 %v7703_v20, 0.0 }
 0x731   :  { %v7567_v19 = vpop.f32.mrf.mxu1 }
 0x732   :  { %v7665_v58 = vmax.f32 %v7625_v37, %v7633_v48  ;;  %v7634_v1 = vadd.f32 %v7567_v19, %v7280_v35  ;;  %v7704_v33 = vadd.f32 %v14002_v57, %v7681_v14 }
 0x733   :  { %v7569_v39 = vpop.f32.mrf.mxu1 }
 0x734   :  { %v7682_v38 = vmax.f32 %v7664_v8, %v7665_v58  ;;  %v7666_v30 = vmax.f32 %v7626_v34, %v7634_v1  ;;  %v7635_v27 = vadd.f32 %v7569_v39, %v7281_v46  ;;  %v7720_v16 = vmax.f32 %v7704_v33, 0.0  ;;  %v9499_v46 = vld [vmem:[%s14268_s8] ss:$0 sm:$0xff] }
 0x736   :  { %v7667_v42 = vmax.f32 %v7627_v18, %v7635_v27  ;;  %v7729_v28 = vpack.c.bf16 %v7720_v16, %v7719_v41  ;;  %v7705_v45 = vadd.f32 %v14002_v57, %v7682_v38 }
 0x738   :  { %v7683_v4 = vmax.f32 %v7666_v30, %v7667_v42  ;;  %9628 = vmatprep.mubr.bf16.mxu1 %v7729_v28  ;;  %v7721_v44 = vmax.f32 %v7705_v45, 0.0 }
 0x73a   :  { %v7706_v51 = vadd.f32 %v14002_v57, %v7683_v4  ;;  %v10074_v57 = vld [vmem:[%s14266_s7 + $0x8] sm:$0xff]  }
 0x73b   :  { %9636 = vmatprep.subr.bf16.mxu0 %v10074_v57 }
 0x73c   :  { %v7722_v9 = vmax.f32 %v7706_v51, 0.0  ;;  %9637 = vmatpush3.bf16.msra.mxu0 %v10074_v57 }
 0x73d   :  { %9638 = vmatprep.subr.bf16.mxu0 %v10075_v56 }
 0x73e   :  { %v7730_v47 = vpack.c.bf16 %v7722_v9, %v7721_v44 }
 0x740   :  { %9629 = vmatmul.mubr.bf16.vlgmr.msra.gmra.mxu1 %v7730_v47  ;;  %9639 = vmatpush3.bf16.msra.mxu0 %v10075_v56 }
 0x7a0   :  { %v9570_v40 = vpop.f32.mrf.mxu0 }
 0x7a1   :  { %v7853_v54 = vadd.f32 %v9570_v40, %v9418_v5 }
 0x7a2   :  { %v7836_v0 = vpop.f32.mrf.mxu0 }
 0x7a3   :  { %v7851_v24 = vadd.f32 %v9418_v5, %v7836_v0 }
 0x7a4   :  { %v9571_v10 = vpop.f32.mrf.mxu0 }
 0x7a5   :  { %v7854_v61 = vadd.f32 %v9571_v10, %v9418_v5 }
 0x7a6   :  { %v7839_v49 = vpop.f32.mrf.mxu0 }
 0x7a7   :  { %v7852_v62 = vadd.f32 %v9418_v5, %v7839_v49 }
 0x7c0   :  { %v9590_v7 = vpop.f32.mrf.mxu1 }
 0x7c1   :  { %v7971_v52 = vadd.f32 %v9590_v7, %v7853_v54 }
 0x7c2   :  { %v7954_v36 = vpop.f32.mrf.mxu1 }
 0x7c3   :  { %v7969_v53 = vadd.f32 %v7954_v36, %v7851_v24 }
 0x7c4   :  { %v9591_v3 = vpop.f32.mrf.mxu1 }
 0x7c5   :  { %v7972_v15 = vadd.f32 %v9591_v3, %v7854_v61 }
 0x7c6   :  { %v7957_v29 = vpop.f32.mrf.mxu1 }
 0x7c7   :  { %v7970_v26 = vadd.f32 %v7957_v29, %v7852_v62 }
 0x7e0   :  { %v9610_v17 = vpop.f32.mrf.mxu0 }
 0x7e1   :  { %v8089_v21 = vadd.f32 %v9610_v17, %v7971_v52 }
 0x7e2   :  { %v8072_v22 = vpop.f32.mrf.mxu0 }
 0x7e3   :  { %v8087_v43 = vadd.f32 %v8072_v22, %v7969_v53 }
 0x7e4   :  { %v9611_v23 = vpop.f32.mrf.mxu0 }
 0x7e5   :  { %v8090_v25 = vadd.f32 %v9611_v23, %v7972_v15 }
 0x7e6   :  { %v8075_v59 = vpop.f32.mrf.mxu0 }
 0x7e7   :  { %v8088_v13 = vadd.f32 %v8075_v59, %v7970_v26 }
 0x800   :  { %v9630_v31 = vpop.f32.mrf.mxu1 }
 0x801   :  { %v8207_v55 = vadd.f32 %v9630_v31, %v8089_v21 }
 0x802   :  { %v8190_v12 = vpop.f32.mrf.mxu1 }
 0x803   :  { %v8205_v35 = vadd.f32 %v8190_v12, %v8087_v43  ;;  %v8211_v32 = vmax.f32 %v8207_v55, 0.0 }
 0x804   :  { %v9631_v2 = vpop.f32.mrf.mxu1 }
 0x805   :  { %v8208_v20 = vadd.f32 %v9631_v2, %v8090_v25  ;;  %v8209_v48 = vmax.f32 %v8205_v35, 0.0 }
 0x806   :  { %v8193_v37 = vpop.f32.mrf.mxu1 }
 0x807   :  { %v8206_v14 = vadd.f32 %v8193_v37, %v8088_v13  ;;  %v8212_v8 = vmax.f32 %v8208_v20, 0.0 }
 0x809   :  { %v8210_v63 = vmax.f32 %v8206_v14, 0.0  ;;  %v8214_v50 = vpack.c.bf16 %v8212_v8, %v8211_v32 }
 0x80b   :  { %v8213_v19 = vpack.c.bf16 %v8210_v63, %v8209_v48 }
 0x80d   :  { %9640 = vmatprep.mubr.msk.bf16.mxu0 %vm8250_vm3, %v8213_v19 }
 0x80e   :  { %9641 = vmatmul.mubr.msk.bf16.vlgmr.msra.gmra.mxu0 %vm8250_vm3, %v8214_v50 }
 0x8ce   :  { %v9642_v34 = vpop.f32.mrf.mxu0 }
 0x8cf   :  { %v8304_v58 = vadd.f32 %v9642_v34, %v9499_v46 }
 0x8d0   :  { %v8295_v1 = vpop.f32.mrf.mxu0 }
 0x8d1   :  { %v8296_v33 = vadd.f32 %v9499_v46, %v8295_v1  ;;  %v8317_v18 = vsel %vm8310_vm4, %v8304_v58, -inf }
 0x8d2   :  { %8318 = vmax.xlane.f32.xlu1 %v8317_v18  ;;  %v9643_v39 = vpop.f32.mrf.mxu0 }
 0x8d3   :  { %v8307_v41 = vadd.f32 %v9643_v39, %v9499_v46  ;;  %v8311_v38 = vsel %vm8310_vm4, %v8296_v33, -inf }
 0x8d4   :  { %v8298_v30 = vpop.f32.mrf.mxu0  ;;  %8312 = vmax.xlane.f32.xlu0 %v8311_v38 }
 0x8d5   :  { %v8299_v27 = vadd.f32 %v9499_v46, %v8298_v30  ;;  %v8320_v16 = vsel %vm8310_vm4, %v8307_v41, -inf }
 0x8d6   :  { %8321 = vmax.xlane.f32.xlu1 %v8320_v16 }
 0x8d7   :  { %v8314_v42 = vsel %vm8310_vm4, %v8299_v27, -inf }
 0x8d8   :  { %8315 = vmax.xlane.f32.xlu0 %v8314_v42 }
 0x95b   :  { %v8319_v28 = vpop.xlane.xlu1 %8318 }
 0x95c   :  { %v8325_v45 = vsub.f32 %v8304_v58, %v8319_v28 }
 0x95d   :  { %v8313_v4 = vpop.xlane.xlu0 %8312 }
 0x95e   :  { %v8323_v51 = vsub.f32 %v8296_v33, %v8313_v4  ;;  %v8331_v9 = vmul.f32 1.442695, %v8325_v45 }
 0x95f   :  { %v8322_v44 = vpop.xlane.xlu1 %8321 }
 0x960   :  { %v8327_v47 = vmul.f32 1.442695, %v8323_v51  ;;  %v8326_v60 = vsub.f32 %v8307_v41, %v8322_v44 }
 0x961   :  { %v8316_v6 = vpop.xlane.xlu0 %8315 }
 0x962   :  { %10076 = vpow2.f32 %v8327_v47  ;;  %v8324_v11 = vsub.f32 %v8299_v27, %v8316_v6  ;;  %v8333_v57 = vmul.f32 1.442695, %v8326_v60 }
 0x963   :  { %10078 = vpow2.f32 %v8331_v9 }
 0x964   :  { %v8329_v56 = vmul.f32 1.442695, %v8324_v11 }
 0x966   :  { %10080 = vpow2.f32 %v8329_v56 }
 0x967   :  { %10082 = vpow2.f32 %v8333_v57 }
 0x96f   :  { %v10077_v40 = vpop.eup %10076 }
 0x970   :  { %v8335_v0 = vsel %vm8310_vm4, %v10077_v40, 0.0  ;;  %v10079_v10 = vpop.eup %10078 }
 0x971   :  { %8336 = vadd.xlane.f32.xlu0 %v8335_v0  ;;  %v8341_v49 = vsel %vm8310_vm4, %v10079_v10, 0.0 }
 0x973   :  { %v10081_v7 = vpop.eup %10080 }
 0x974   :  { %v8338_v36 = vsel %vm8310_vm4, %v10081_v7, 0.0  ;;  %v10083_v17 = vpop.eup %10082 }
 0x975   :  { %8342 = vadd.xlane.f32.xlu0 %v8341_v49  ;;  %8339 = vadd.xlane.f32.xlu1 %v8338_v36  ;;  %v8344_v3 = vsel %vm8310_vm4, %v10083_v17, 0.0 }
 0x979   :  { %8345 = vadd.xlane.f32.xlu1 %v8344_v3 }
 0x9fa   :  { %v8337_v22 = vpop.xlane.xlu0 %8336 }
 0x9fb   :  { %10084 = vlog2.f32 %v8337_v22 }
 0x9fe   :  { %v8340_v5 = vpop.xlane.xlu1 %8339  ;;  %v8343_v29 = vpop.xlane.xlu0 %8342 }
 0x9ff   :  { %10086 = vlog2.f32 %v8340_v5 }
 0xa00   :  { %10088 = vlog2.f32 %v8343_v29 }
 0xa02   :  { %v8346_v23 = vpop.xlane.xlu1 %8345 }
 0xa03   :  { %10090 = vlog2.f32 %v8346_v23 }
 0xa08   :  { %v10085_v24 = vpop.eup %10084 }
 0xa09   :  { %v8348_v61 = vmul.f32 0.6931472, %v10085_v24 }
 0xa0b   :  { %v8355_v54 = vsub.f32 %v8323_v51, %v8348_v61 }
 0xa0c   :  { %v10087_v31 = vpop.eup %10086 }
 0xa0d   :  { %v10089_v62 = vpop.eup %10088  ;;  %8359 = vst.msk [vmem:[%s14269_s9] sm:$0xff] %vm8310_vm4, %v8355_v54  ;;  %v8350_v53 = vmul.f32 0.6931472, %v10087_v31 }
 0xa0e   :  { %v8352_v15 = vmul.f32 0.6931472, %v10089_v62 }
 0xa0f   :  { %v8356_v52 = vsub.f32 %v8324_v11, %v8350_v53 }
 0xa10   :  { %v10091_v59 = vpop.eup %10090  ;;  %v8357_v12 = vsub.f32 %v8325_v45, %v8352_v15 }
 0xa11   :  { %8360 = vst.msk [vmem:[%s14269_s9 + $0x8] sm:$0xff] %vm8310_vm4, %v8356_v52  ;;  %v8354_v26 = vmul.f32 0.6931472, %v10091_v59 }
 0xa12   :  { %8361 = vst.msk [vmem:[%s14269_s9 + $0x10] sm:$0xff] %vm8310_vm4, %v8357_v12 }
 0xa13   :  { %v8358_v43 = vsub.f32 %v8326_v60, %v8354_v26 }
 0xa15   :  { %8362 = vst.msk [vmem:[%s14269_s9 + $0x18] sm:$0xff] %vm8310_vm4, %v8358_v43 }

</bundles_post_ra>
